<compile_context>
chip_gen: v7x
topology: tpu7x:2x2x1
jax: 0.10.0
libtpu: 0.0.40
codegen_flags: <defaults>
</compile_context>

<pallas_src>
import functools
import math

import jax
import jax.numpy as jnp
from jax import lax
from jax.experimental import pallas as pl
from jax.experimental.pallas import tpu as pltpu


# ----------------------------- kernel helpers -----------------------------

def _layernorm(x, w, b, eps=1e-5):
    mean = jnp.mean(x, axis=-1, keepdims=True)
    var = jnp.mean(jnp.square(x - mean), axis=-1, keepdims=True)
    return (x - mean) * lax.rsqrt(var + eps) * w + b


def _mxu(x_f32, w_bf16):
    # f32 activations cast to bf16 right at the MXU dot, accumulate in f32.
    return jnp.dot(x_f32.astype(jnp.bfloat16), w_bf16,
                   preferred_element_type=jnp.float32)


def _time_shift(xt, prev_row):
    # xx[0] = prev_row, xx[t] = xt[t-1]: register-level sublane rotate (XLU) + row-0 select.
    rolled = pltpu.roll(xt, shift=1, axis=0)
    row = lax.broadcasted_iota(jnp.int32, xt.shape, 0)
    return jnp.where(row == 0, prev_row, rolled)


def make_block_kernel(apply_ln0: bool, seq_chunk: int):
    def kernel(
        # per-(batch, seq-chunk) inputs (leading batch dim squeezed by the BlockSpec)
        x_ref, att_shift_ref, wkv_ref, ffn_shift_ref,
        ln0_w_ref, ln0_b_ref, ln1_w_ref, ln1_b_ref, ln2_w_ref, ln2_b_ref,
        att_tmk_ref, att_tmv_ref, att_tmr_ref,
        time_decay_ref, time_first_ref,
        att_wk_ref, att_wv_ref, att_wr_ref, att_wo_ref,
        ffn_tmk_ref, ffn_tmr_ref,
        ffn_wk_ref, ffn_wr_ref, ffn_wv_ref,
        # outputs (state outputs are revisited across the seq-chunk axis -> used as carries)
        x_out_ref, att_shift_out_ref, wkv_out_ref, ffn_shift_out_ref,
        # scratch
        k_scr, v_scr,        # (TT, D) f32
        y_scr,               # (TT, D) bf16 (only ever consumed as an MXU input)
    ):
        TT, C = x_ref.shape
        CH = seq_chunk
        t_idx = pl.program_id(1)

        # First chunk of every sequence: seed the cross-chunk carries (resident output blocks)
        # from the incoming recurrent state.
        @pl.when(t_idx == 0)
        def _():
            att_shift_out_ref[...] = att_shift_ref[...]
            ffn_shift_out_ref[...] = ffn_shift_ref[...]
            wkv_out_ref[...] = wkv_ref[...]

        x = x_ref[...]                                   # (TT, C) f32
        if apply_ln0:                                    # layer_id == 0 only
            x = _layernorm(x, ln0_w_ref[...], ln0_b_ref[...])

        # ---------------- time-mix (attention) branch ----------------
        xa = _layernorm(x, ln1_w_ref[...], ln1_b_ref[...])
        xx = _time_shift(xa, att_shift_out_ref[...])     # carry = last xa row of prev chunk

        tmk = att_tmk_ref[...]
        tmv = att_tmv_ref[...]
        tmr = att_tmr_ref[...]
        xk = xa * tmk + xx * (1.0 - tmk)
        xv = xa * tmv + xx * (1.0 - tmv)
        xr = xa * tmr + xx * (1.0 - tmr)

        k_scr[...] = _mxu(xk, att_wk_ref[...])           # (TT, D) f32
        v_scr[...] = _mxu(xv, att_wv_ref[...])
        sr = jax.nn.sigmoid(_mxu(xr, att_wr_ref[...]))   # (TT, D) f32

        # WKV recurrence: (8, D)-chunked loads/stores, 8 unrolled steps per chunk,
        # approx reciprocal on the EUP, carry kept in (1, D) vregs.
        w_neg = -jnp.exp(time_decay_ref[...])            # (1, D)
        u = time_first_ref[...]                          # (1, D)
        aa0 = wkv_out_ref[0:1, :]                        # carry across chunks
        bb0 = wkv_out_ref[1:2, :]
        pp0 = wkv_out_ref[2:3, :]
        D = aa0.shape[1]
        row_ids = lax.broadcasted_iota(jnp.int32, (CH, D), 0)   # hoisted out of the loop

        def wkv_chunk(c, carry):
            aa, bb, pp = carry
            base = pl.multiple_of(c * CH, CH)
            kc = k_scr[pl.ds(base, CH), :]               # one (CH, D) load per CH steps
            vc = v_scr[pl.ds(base, CH), :]
            ychunk = jnp.zeros((CH, D), jnp.float32)
            for i in range(CH):                          # statically unrolled
                kk = kc[i:i + 1, :]
                vv = vc[i:i + 1, :]
                ww = u + kk
                p = jnp.maximum(pp, ww)
                e1 = jnp.exp(pp - p)
                e2 = jnp.exp(ww - p)
                yi = (e1 * aa + e2 * vv) * pl.reciprocal(e1 * bb + e2, approx=True)
                ychunk = jnp.where(row_ids == i, yi, ychunk)
                ww2 = w_neg + pp
                p2 = jnp.maximum(ww2, kk)
                e1b = jnp.exp(ww2 - p2)
                e2b = jnp.exp(kk - p2)
                aa = e1b * aa + e2b * vv
                bb = e1b * bb + e2b
                pp = p2
            y_scr[pl.ds(base, CH), :] = ychunk.astype(y_scr.dtype)
            return aa, bb, pp

        aa, bb, pp = lax.fori_loop(0, TT // CH, wkv_chunk, (aa0, bb0, pp0))
        wkv_out_ref[0:1, :] = aa
        wkv_out_ref[1:2, :] = bb
        wkv_out_ref[2:3, :] = pp

        x = x + _mxu(sr * y_scr[...], att_wo_ref[...])   # residual add, (TT, C)
        att_shift_out_ref[...] = xa[TT - 1:TT, :]        # carry for next chunk / final state

        # ---------------- channel-mix (FFN) branch ----------------
        xf = _layernorm(x, ln2_w_ref[...], ln2_b_ref[...])
        xx2 = _time_shift(xf, ffn_shift_out_ref[...])    # carry = last xf row of prev chunk

        ftmk = ffn_tmk_ref[...]
        ftmr = ffn_tmr_ref[...]
        xk2 = xf * ftmk + xx2 * (1.0 - ftmk)
        xr2 = xf * ftmr + xx2 * (1.0 - ftmr)

        # TODO(synk): at production sizes stream ffn_wk/ffn_wv from HBM in F-tiles
        # (emit_pipeline) instead of keeping them VMEM-resident (v7x: 64 MiB/TC).
        kf = _mxu(xk2, ffn_wk_ref[...])
        kf = jnp.square(jnp.maximum(kf, 0.0))            # square(relu(k))
        kv = _mxu(kf, ffn_wv_ref[...])
        rr = jax.nn.sigmoid(_mxu(xr2, ffn_wr_ref[...]))

        x_out_ref[...] = x + rr * kv
        ffn_shift_out_ref[...] = xf[TT - 1:TT, :]

    return kernel


# ----------------------------- wrapper -----------------------------

def _pick_seq_tile(T, max_tile):
    best, best8 = 1, 0
    for d in range(1, min(T, max_tile) + 1):
        if T % d == 0:
            best = d
            if d % 8 == 0:
                best8 = d
    return best8 if best8 else best


def _vmem_limit_bytes(frac=0.8, cap_bytes=100 * 1024 * 1024):
    # Generation-aware: ~80% of the TensorCore's VMEM, capped for v5e/v6e headroom.
    try:
        vmem = pltpu.get_tpu_info().vmem_capacity_bytes
    except Exception:
        vmem = 128 * 1024 * 1024
    return min(int(vmem * frac), cap_bytes)


def rwkv_block_apply(params, x, att_shift, wkv_state, ffn_shift, *,
                     layer_id=0, seq_block=256, single_buffer_weights=True):
    B, T, C = x.shape
    D = params["time_decay"].shape[1]
    F = params["ffn_wk"].shape[1]
    f32 = jnp.float32
    bf16 = jnp.bfloat16

    # Sequence chunking: activation VMEM scales with TT, not T; the recurrent carry and the
    # shift rows are carried across chunks in the resident state-output blocks.
    TT = _pick_seq_tile(T, seq_block)
    nT = T // TT
    CH = 8
    while TT % CH:
        CH //= 2

    # bf16 weights: half the VMEM/HBM footprint, native MXU input dtype.
    w = {k: params[k].astype(bf16)
         for k in ("att_wk", "att_wv", "att_wr", "att_wo",
                   "ffn_wk", "ffn_wr", "ffn_wv")}

    # Shift states as (B, 1, C) so every block's last two dims are full-extent.
    att_shift3 = att_shift[:, None, :]
    ffn_shift3 = ffn_shift[:, None, :]

    inputs = (
        x, att_shift3, wkv_state, ffn_shift3,
        params["ln0_w"], params["ln0_b"],
        params["ln1_w"], params["ln1_b"],
        params["ln2_w"], params["ln2_b"],
        params["att_tmk"], params["att_tmv"], params["att_tmr"],
        params["time_decay"], params["time_first"],
        w["att_wk"], w["att_wv"], w["att_wr"], w["att_wo"],
        params["ffn_tmk"], params["ffn_tmr"],
        w["ffn_wk"], w["ffn_wr"], w["ffn_wv"],
    )

    def rep(shape):
        # Constant-index params/weights: their block never changes, so request a single buffer
        # (default double-buffering would double the resident weight footprint for no benefit).
        n = len(shape)
        idx = lambda b, t, _n=n: (0,) * _n
        if single_buffer_weights:
            return pl.BlockSpec(shape, idx, pipeline_mode=pl.Buffered(1))
        return pl.BlockSpec(shape, idx)

    in_specs = [
        pl.BlockSpec((None, TT, C), lambda b, t: (b, t, 0)),     # x (chunked over T)
        pl.BlockSpec((None, 1, C), lambda b, t: (b, 0, 0)),      # att shift state
        pl.BlockSpec((None, 3, D), lambda b, t: (b, 0, 0)),      # wkv state (aa, bb, pp)
        pl.BlockSpec((None, 1, C), lambda b, t: (b, 0, 0)),      # ffn shift state
        rep((1, C)), rep((1, C)),                                # ln0
        rep((1, C)), rep((1, C)),                                # ln1
        rep((1, C)), rep((1, C)),                                # ln2
        rep((1, C)), rep((1, C)), rep((1, C)),                   # att time-mix k/v/r
        rep((1, D)), rep((1, D)),                                # time_decay, time_first
        rep((C, D)), rep((C, D)), rep((C, D)), rep((D, C)),      # att_wk/wv/wr/wo (bf16)
        rep((1, C)), rep((1, C)),                                # ffn time-mix k/r
        rep((C, F)), rep((C, C)), rep((F, C)),                   # ffn_wk/wr/wv (bf16)
    ]
    out_specs = (
        pl.BlockSpec((None, TT, C), lambda b, t: (b, t, 0)),     # x out (chunked)
        pl.BlockSpec((None, 1, C), lambda b, t: (b, 0, 0)),      # att shift (resident over t)
        pl.BlockSpec((None, 3, D), lambda b, t: (b, 0, 0)),      # wkv state (resident over t)
        pl.BlockSpec((None, 1, C), lambda b, t: (b, 0, 0)),      # ffn shift (resident over t)
    )
    out_shape = (
        jax.ShapeDtypeStruct((B, T, C), f32),
        jax.ShapeDtypeStruct((B, 1, C), f32),
        jax.ShapeDtypeStruct((B, 3, D), f32),
        jax.ShapeDtypeStruct((B, 1, C), f32),
    )

    x_out, att_s, wkv_out, ffn_s = pl.pallas_call(
        make_block_kernel(apply_ln0=(layer_id == 0), seq_chunk=CH),
        out_shape=out_shape,
        grid=(B, nT),
        in_specs=in_specs,
        out_specs=out_specs,
        scratch_shapes=[
            pltpu.VMEM((TT, D), f32),    # k
            pltpu.VMEM((TT, D), f32),    # v
            pltpu.VMEM((TT, D), bf16),   # wkv y (MXU-input only -> bf16 halves scratch+stores)
        ],
        # x and the recurrent state are updated in place (no extra HBM buffers/copies).
        input_output_aliases={0: 0, 1: 1, 2: 2, 3: 3},
        compiler_params=pltpu.CompilerParams(
            dimension_semantics=("parallel", "arbitrary"),
            vmem_limit_bytes=_vmem_limit_bytes(),
        ),
    )(*inputs)
    return x_out, att_s[:, 0, :], wkv_out, ffn_s[:, 0, :]


# ----------------------------- parameter init (deterministic) -----------------------------

def init_params(key, n_embd, dim_att, dim_ffn, n_layer, layer_id):
    C, D, F = n_embd, dim_att, dim_ffn
    ks = jax.random.split(key, 16)

    ratio_0_to_1 = layer_id / max(n_layer - 1, 1)
    ratio_1_to_almost0 = 1.0 - layer_id / n_layer
    ddd = (jnp.arange(C, dtype=jnp.float32) / C)[None, :]                    # (1, C)
    h = jnp.arange(D, dtype=jnp.float32)
    decay_speed = -5.0 + 8.0 * (h / (D - 1)) ** (0.7 + 1.3 * ratio_0_to_1)   # (D,)
    zigzag = jnp.array([(i + 1) % 3 - 1 for i in range(D)], dtype=jnp.float32) * 0.5
    time_first = jnp.full((D,), math.log(0.3), dtype=jnp.float32) + zigzag

    def rnd(k, shape, fan_in):
        return jax.random.normal(k, shape, dtype=jnp.float32) / jnp.sqrt(float(fan_in))

    params = {
        "ln0_w": 1.0 + 0.1 * jax.random.normal(ks[0], (1, C), jnp.float32),
        "ln0_b": 0.1 * jax.random.normal(ks[1], (1, C), jnp.float32),
        "ln1_w": 1.0 + 0.1 * jax.random.normal(ks[2], (1, C), jnp.float32),
        "ln1_b": 0.1 * jax.random.normal(ks[3], (1, C), jnp.float32),
        "ln2_w": 1.0 + 0.1 * jax.random.normal(ks[4], (1, C), jnp.float32),
        "ln2_b": 0.1 * jax.random.normal(ks[5], (1, C), jnp.float32),
        "att_tmk": ddd ** ratio_1_to_almost0,
        "att_tmv": ddd ** ratio_1_to_almost0 + 0.3 * ratio_0_to_1,
        "att_tmr": ddd ** (0.5 * ratio_1_to_almost0),
        "time_decay": decay_speed[None, :],
        "time_first": time_first[None, :],
        "att_wk": rnd(ks[6], (C, D), C),
        "att_wv": rnd(ks[7], (C, D), C),
        "att_wr": rnd(ks[8], (C, D), C),
        "att_wo": rnd(ks[9], (D, C), D),
        "ffn_tmk": ddd ** ratio_1_to_almost0,
        "ffn_tmr": ddd ** ratio_1_to_almost0,
        "ffn_wk": rnd(ks[10], (C, F), C),
        "ffn_wr": rnd(ks[11], (C, C), C),
        "ffn_wv": rnd(ks[12], (F, C), F),
    }
    return params


# ----------------------------- pure-JAX reference (for sanity check) -----------------------------

def _ln_ref(x, w, b, eps=1e-5):
    m = jnp.mean(x, axis=-1, keepdims=True)
    v = jnp.mean((x - m) ** 2, axis=-1, keepdims=True)
    return (x - m) / jnp.sqrt(v + eps) * w + b


def block_ref(params, x, att_shift, wkv_state, ffn_shift, layer_id=0):
    # Matches the kernel's quantization: weights and dot inputs rounded to bf16, products
    # accumulated in f32, and the WKV output y stored in bf16.
    hi = jax.lax.Precision.HIGHEST

    def q(a):
        return a.astype(jnp.bfloat16).astype(jnp.float32)

    def mm(a, w):
        return jnp.einsum("btc,cd->btd", q(a), q(w), precision=hi)

    if layer_id == 0:
        x = _ln_ref(x, params["ln0_w"], params["ln0_b"])
    xa = _ln_ref(x, params["ln1_w"], params["ln1_b"])
    xx = jnp.concatenate([att_shift[:, None, :], xa[:, :-1]], axis=1)
    tmk, tmv, tmr = params["att_tmk"], params["att_tmv"], params["att_tmr"]
    xk = xa * tmk + xx * (1 - tmk)
    xv = xa * tmv + xx * (1 - tmv)
    xr = xa * tmr + xx * (1 - tmr)
    k = mm(xk, params["att_wk"])
    v = mm(xv, params["att_wv"])
    sr = jax.nn.sigmoid(mm(xr, params["att_wr"]))

    w_neg = -jnp.exp(params["time_decay"][0])
    u = params["time_first"][0]
    aa, bb, pp = wkv_state[:, 0], wkv_state[:, 1], wkv_state[:, 2]

    def step(carry, kv):
        aa, bb, pp = carry
        kk, vv = kv
        ww = u + kk
        p = jnp.maximum(pp, ww)
        e1 = jnp.exp(pp - p)
        e2 = jnp.exp(ww - p)
        y = (e1 * aa + e2 * vv) / (e1 * bb + e2)
        ww2 = w_neg + pp
        p2 = jnp.maximum(ww2, kk)
        e1b = jnp.exp(ww2 - p2)
        e2b = jnp.exp(kk - p2)
        return (e1b * aa + e2b * vv, e1b * bb + e2b, p2), y

    (aa, bb, pp), ys = jax.lax.scan(step, (aa, bb, pp),
                                    (jnp.swapaxes(k, 0, 1), jnp.swapaxes(v, 0, 1)))
    y = q(jnp.swapaxes(ys, 0, 1))          # mirror the kernel's bf16 y storage
    att_out = mm(sr * y, params["att_wo"])
    x = x + att_out
    att_shift_out = xa[:, -1]
    new_wkv = jnp.stack([aa, bb, pp], axis=1)

    xf = _ln_ref(x, params["ln2_w"], params["ln2_b"])
    xx2 = jnp.concatenate([ffn_shift[:, None, :], xf[:, :-1]], axis=1)
    ftmk, ftmr = params["ffn_tmk"], params["ffn_tmr"]
    xk2 = xf * ftmk + xx2 * (1 - ftmk)
    xr2 = xf * ftmr + xx2 * (1 - ftmr)
    kf = jnp.square(jnp.maximum(mm(xk2, params["ffn_wk"]), 0.0))
    kv = mm(kf, params["ffn_wv"])
    rr = jax.nn.sigmoid(mm(xr2, params["ffn_wr"]))
    x = x + rr * kv
    ffn_shift_out = xf[:, -1]
    return x, att_shift_out, new_wkv, ffn_shift_out


# ----------------------------- main -----------------------------

if __name__ == "__main__":
    B, T, C = 2, 16, 32         # batch, seq, n_embd
    D, Fdim = 32, 128           # dim_att, dim_ffn
    n_layer, layer_id = 2, 0    # layer 0 -> exercises ln0

    key = jax.random.PRNGKey(0)
    kp, kx, ks1, ks2, ka, kb, kc = jax.random.split(key, 7)
    params = init_params(kp, C, D, Fdim, n_layer, layer_id)

    x = jax.random.normal(kx, (B, T, C), dtype=jnp.float32)
    att_shift = 0.1 * jax.random.normal(ks1, (B, C), dtype=jnp.float32)
    ffn_shift = 0.1 * jax.random.normal(ks2, (B, C), dtype=jnp.float32)
    aa0 = 0.1 * jax.random.normal(ka, (B, D), dtype=jnp.float32)
    bb0 = 0.1 * jnp.abs(jax.random.normal(kb, (B, D), dtype=jnp.float32))
    pp0 = 0.1 * jax.random.normal(kc, (B, D), dtype=jnp.float32)
    wkv_state = jnp.stack([aa0, bb0, pp0], axis=1)   # (B, 3, D)

    def run(single_buffer_weights):
        fn = jax.jit(functools.partial(
            rwkv_block_apply, layer_id=layer_id,
            seq_block=8,   # T=16 -> two seq chunks: exercises the cross-chunk state carry
            single_buffer_weights=single_buffer_weights))
        return jax.block_until_ready(fn(params, x, att_shift, wkv_state, ffn_shift))

    try:
        outs = run(True)
    except Exception:
        # Fallback if this JAX build rejects single-buffered (pl.Buffered(1)) weight specs.
        outs = run(False)

    refs = block_ref(params, x, att_shift, wkv_state, ffn_shift, layer_id=layer_id)
    for o, r in zip(outs, refs):
        assert o.shape == r.shape and o.dtype == r.dtype
        assert jnp.allclose(o, r, rtol=1e-2, atol=5e-3), float(jnp.max(jnp.abs(o - r)))

    print("KERNEL_OK")
</pallas_src>

<mosaic_0001>
module attributes {stable_mosaic.version = 11 : i64} {
  func.func @kernel(%arg0: i32, %arg1: i32, %arg2: memref<1x8x32xf32, #tpu.memory_space<vmem>>, %arg3: memref<1x1x32xf32, #tpu.memory_space<vmem>>, %arg4: memref<1x3x32xf32, #tpu.memory_space<vmem>>, %arg5: memref<1x1x32xf32, #tpu.memory_space<vmem>>, %arg6: memref<1x32xf32, #tpu.memory_space<vmem>>, %arg7: memref<1x32xf32, #tpu.memory_space<vmem>>, %arg8: memref<1x32xf32, #tpu.memory_space<vmem>>, %arg9: memref<1x32xf32, #tpu.memory_space<vmem>>, %arg10: memref<1x32xf32, #tpu.memory_space<vmem>>, %arg11: memref<1x32xf32, #tpu.memory_space<vmem>>, %arg12: memref<1x32xf32, #tpu.memory_space<vmem>>, %arg13: memref<1x32xf32, #tpu.memory_space<vmem>>, %arg14: memref<1x32xf32, #tpu.memory_space<vmem>>, %arg15: memref<1x32xf32, #tpu.memory_space<vmem>>, %arg16: memref<1x32xf32, #tpu.memory_space<vmem>>, %arg17: memref<32x32xbf16, #tpu.memory_space<vmem>>, %arg18: memref<32x32xbf16, #tpu.memory_space<vmem>>, %arg19: memref<32x32xbf16, #tpu.memory_space<vmem>>, %arg20: memref<32x32xbf16, #tpu.memory_space<vmem>>, %arg21: memref<1x32xf32, #tpu.memory_space<vmem>>, %arg22: memref<1x32xf32, #tpu.memory_space<vmem>>, %arg23: memref<32x128xbf16, #tpu.memory_space<vmem>>, %arg24: memref<32x32xbf16, #tpu.memory_space<vmem>>, %arg25: memref<128x32xbf16, #tpu.memory_space<vmem>>, %arg26: memref<1x8x32xf32, #tpu.memory_space<vmem>>, %arg27: memref<1x1x32xf32, #tpu.memory_space<vmem>>, %arg28: memref<1x3x32xf32, #tpu.memory_space<vmem>>, %arg29: memref<1x1x32xf32, #tpu.memory_space<vmem>>, %arg30: memref<8x32xf32, #tpu.memory_space<vmem>>, %arg31: memref<8x32xf32, #tpu.memory_space<vmem>>, %arg32: memref<8x32xbf16, #tpu.memory_space<vmem>>) attributes {dimension_semantics = [#tpu.dimension_semantics<parallel>, #tpu.dimension_semantics<arbitrary>], iteration_bounds = array<i64: 2, 2>, scalar_prefetch = 0 : i64, scratch_operands = 3 : i64, tpu.core_type = #tpu.core_type<tc>, window_params = [{transform_indices = @transform_0, window_bounds = array<i64: 1, 8, 32>}, {transform_indices = @transform_1, window_bounds = array<i64: 1, 1, 32>}, {transform_indices = @transform_2, window_bounds = array<i64: 1, 3, 32>}, {transform_indices = @transform_3, window_bounds = array<i64: 1, 1, 32>}, {pipeline_mode = #tpu.pipeline_mode<synchronous>, transform_indices = @transform_4, window_bounds = array<i64: 1, 32>}, {pipeline_mode = #tpu.pipeline_mode<synchronous>, transform_indices = @transform_5, window_bounds = array<i64: 1, 32>}, {pipeline_mode = #tpu.pipeline_mode<synchronous>, transform_indices = @transform_6, window_bounds = array<i64: 1, 32>}, {pipeline_mode = #tpu.pipeline_mode<synchronous>, transform_indices = @transform_7, window_bounds = array<i64: 1, 32>}, {pipeline_mode = #tpu.pipeline_mode<synchronous>, transform_indices = @transform_8, window_bounds = array<i64: 1, 32>}, {pipeline_mode = #tpu.pipeline_mode<synchronous>, transform_indices = @transform_9, window_bounds = array<i64: 1, 32>}, {pipeline_mode = #tpu.pipeline_mode<synchronous>, transform_indices = @transform_10, window_bounds = array<i64: 1, 32>}, {pipeline_mode = #tpu.pipeline_mode<synchronous>, transform_indices = @transform_11, window_bounds = array<i64: 1, 32>}, {pipeline_mode = #tpu.pipeline_mode<synchronous>, transform_indices = @transform_12, window_bounds = array<i64: 1, 32>}, {pipeline_mode = #tpu.pipeline_mode<synchronous>, transform_indices = @transform_13, window_bounds = array<i64: 1, 32>}, {pipeline_mode = #tpu.pipeline_mode<synchronous>, transform_indices = @transform_14, window_bounds = array<i64: 1, 32>}, {pipeline_mode = #tpu.pipeline_mode<synchronous>, transform_indices = @transform_15, window_bounds = array<i64: 32, 32>}, {pipeline_mode = #tpu.pipeline_mode<synchronous>, transform_indices = @transform_16, window_bounds = array<i64: 32, 32>}, {pipeline_mode = #tpu.pipeline_mode<synchronous>, transform_indices = @transform_17, window_bounds = array<i64: 32, 32>}, {pipeline_mode = #tpu.pipeline_mode<synchronous>, transform_indices = @transform_18, window_bounds = array<i64: 32, 32>}, {pipeline_mode = #tpu.pipeline_mode<synchronous>, transform_indices = @transform_19, window_bounds = array<i64: 1, 32>}, {pipeline_mode = #tpu.pipeline_mode<synchronous>, transform_indices = @transform_20, window_bounds = array<i64: 1, 32>}, {pipeline_mode = #tpu.pipeline_mode<synchronous>, transform_indices = @transform_21, window_bounds = array<i64: 32, 128>}, {pipeline_mode = #tpu.pipeline_mode<synchronous>, transform_indices = @transform_22, window_bounds = array<i64: 32, 32>}, {pipeline_mode = #tpu.pipeline_mode<synchronous>, transform_indices = @transform_23, window_bounds = array<i64: 128, 32>}, {transform_indices = @transform_24, window_bounds = array<i64: 1, 8, 32>}, {transform_indices = @transform_25, window_bounds = array<i64: 1, 1, 32>}, {transform_indices = @transform_26, window_bounds = array<i64: 1, 3, 32>}, {transform_indices = @transform_27, window_bounds = array<i64: 1, 1, 32>}]} {
    %c0_i32 = arith.constant 0 : i32
    %0 = arith.cmpi eq, %arg1, %c0_i32 : i32
    %1 = arith.extui %0 : i1 to i32
    %c0_i32_0 = arith.constant 0 : i32
    %2 = arith.cmpi ne, %1, %c0_i32_0 : i32
    scf.if %2 {
      %c0_121 = arith.constant 0 : index
      %c0_122 = arith.constant 0 : index
      %c0_123 = arith.constant 0 : index
      %467 = vector.load %arg3[%c0_121, %c0_122, %c0_123] : memref<1x1x32xf32, #tpu.memory_space<vmem>>, vector<1x1x32xf32>
      %468 = vector.shape_cast %467 : vector<1x1x32xf32> to vector<1x32xf32>
      %c0_124 = arith.constant 0 : index
      %c0_125 = arith.constant 0 : index
      %c0_126 = arith.constant 0 : index
      %469 = vector.load %arg27[%c0_124, %c0_125, %c0_126] : memref<1x1x32xf32, #tpu.memory_space<vmem>>, vector<1x1x32xf32>
      %470 = vector.shape_cast %469 : vector<1x1x32xf32> to vector<1x32xf32>
      %471 = vector.shape_cast %468 : vector<1x32xf32> to vector<1x1x32xf32>
      tpu.vector_store %arg27[%c0_124, %c0_125, %c0_126], %471 {strides = array<i32>} : memref<1x1x32xf32, #tpu.memory_space<vmem>>, vector<1x1x32xf32>,
      %c0_127 = arith.constant 0 : index
      %c0_128 = arith.constant 0 : index
      %c0_129 = arith.constant 0 : index
      %472 = vector.load %arg5[%c0_127, %c0_128, %c0_129] : memref<1x1x32xf32, #tpu.memory_space<vmem>>, vector<1x1x32xf32>
      %473 = vector.shape_cast %472 : vector<1x1x32xf32> to vector<1x32xf32>
      %c0_130 = arith.constant 0 : index
      %c0_131 = arith.constant 0 : index
      %c0_132 = arith.constant 0 : index
      %474 = vector.load %arg29[%c0_130, %c0_131, %c0_132] : memref<1x1x32xf32, #tpu.memory_space<vmem>>, vector<1x1x32xf32>
      %475 = vector.shape_cast %474 : vector<1x1x32xf32> to vector<1x32xf32>
      %476 = vector.shape_cast %473 : vector<1x32xf32> to vector<1x1x32xf32>
      tpu.vector_store %arg29[%c0_130, %c0_131, %c0_132], %476 {strides = array<i32>} : memref<1x1x32xf32, #tpu.memory_space<vmem>>, vector<1x1x32xf32>,
      %c0_133 = arith.constant 0 : index
      %c0_134 = arith.constant 0 : index
      %c0_135 = arith.constant 0 : index
      %477 = vector.load %arg4[%c0_133, %c0_134, %c0_135] : memref<1x3x32xf32, #tpu.memory_space<vmem>>, vector<1x3x32xf32>
      %478 = vector.shape_cast %477 : vector<1x3x32xf32> to vector<3x32xf32>
      %c0_136 = arith.constant 0 : index
      %c0_137 = arith.constant 0 : index
      %c0_138 = arith.constant 0 : index
      %479 = vector.load %arg28[%c0_136, %c0_137, %c0_138] : memref<1x3x32xf32, #tpu.memory_space<vmem>>, vector<1x3x32xf32>
      %480 = vector.shape_cast %479 : vector<1x3x32xf32> to vector<3x32xf32>
      %481 = vector.shape_cast %478 : vector<3x32xf32> to vector<1x3x32xf32>
      tpu.vector_store %arg28[%c0_136, %c0_137, %c0_138], %481 {strides = array<i32>} : memref<1x3x32xf32, #tpu.memory_space<vmem>>, vector<1x3x32xf32>,
    } else {
    }
    %c0 = arith.constant 0 : index
    %c0_1 = arith.constant 0 : index
    %c0_2 = arith.constant 0 : index
    %3 = vector.load %arg2[%c0, %c0_1, %c0_2] : memref<1x8x32xf32, #tpu.memory_space<vmem>>, vector<1x8x32xf32>
    %4 = vector.shape_cast %3 : vector<1x8x32xf32> to vector<8x32xf32>
    %c0_3 = arith.constant 0 : index
    %c0_4 = arith.constant 0 : index
    %5 = vector.load %arg6[%c0_3, %c0_4] : memref<1x32xf32, #tpu.memory_space<vmem>>, vector<1x32xf32>
    %c0_5 = arith.constant 0 : index
    %c0_6 = arith.constant 0 : index
    %6 = vector.load %arg7[%c0_5, %c0_6] : memref<1x32xf32, #tpu.memory_space<vmem>>, vector<1x32xf32>
    %cst = arith.constant dense<0.000000e+00> : vector<8xf32>
    %7 = vector.multi_reduction <add>, %4, %cst [1] : vector<8x32xf32> to vector<8xf32>
    %8 = vector.shape_cast %7 : vector<8xf32> to vector<8x1xf32>
    %cst_7 = arith.constant 3.200000e+01 : f32
    %9 = vector.broadcast %cst_7 : f32 to vector<8x1xf32>
    %10 = arith.divf %8, %9 : vector<8x1xf32>
    %11 = vector.broadcast %10 : vector<8x1xf32> to vector<8x32xf32>
    %12 = arith.subf %4, %11 : vector<8x32xf32>
    %13 = arith.mulf %12, %12 : vector<8x32xf32>
    %cst_8 = arith.constant dense<0.000000e+00> : vector<8xf32>
    %14 = vector.multi_reduction <add>, %13, %cst_8 [1] : vector<8x32xf32> to vector<8xf32>
    %15 = vector.shape_cast %14 : vector<8xf32> to vector<8x1xf32>
    %cst_9 = arith.constant 3.200000e+01 : f32
    %16 = vector.broadcast %cst_9 : f32 to vector<8x1xf32>
    %17 = arith.divf %15, %16 : vector<8x1xf32>
    %18 = vector.broadcast %10 : vector<8x1xf32> to vector<8x32xf32>
    %19 = arith.subf %4, %18 : vector<8x32xf32>
    %cst_10 = arith.constant 9.99999974E-6 : f32
    %20 = vector.broadcast %cst_10 : f32 to vector<8x1xf32>
    %21 = arith.addf %17, %20 : vector<8x1xf32>
    %22 = math.rsqrt %21 : vector<8x1xf32>
    %23 = vector.broadcast %22 : vector<8x1xf32> to vector<8x32xf32>
    %24 = arith.mulf %19, %23 : vector<8x32xf32>
    %25 = vector.broadcast %5 : vector<1x32xf32> to vector<8x32xf32>
    %26 = arith.mulf %24, %25 : vector<8x32xf32>
    %27 = vector.broadcast %6 : vector<1x32xf32> to vector<8x32xf32>
    %28 = arith.addf %26, %27 : vector<8x32xf32>
    %c0_11 = arith.constant 0 : index
    %c0_12 = arith.constant 0 : index
    %29 = vector.load %arg8[%c0_11, %c0_12] : memref<1x32xf32, #tpu.memory_space<vmem>>, vector<1x32xf32>
    %c0_13 = arith.constant 0 : index
    %c0_14 = arith.constant 0 : index
    %30 = vector.load %arg9[%c0_13, %c0_14] : memref<1x32xf32, #tpu.memory_space<vmem>>, vector<1x32xf32>
    %cst_15 = arith.constant dense<0.000000e+00> : vector<8xf32>
    %31 = vector.multi_reduction <add>, %28, %cst_15 [1] : vector<8x32xf32> to vector<8xf32>
    %32 = vector.shape_cast %31 : vector<8xf32> to vector<8x1xf32>
    %cst_16 = arith.constant 3.200000e+01 : f32
    %33 = vector.broadcast %cst_16 : f32 to vector<8x1xf32>
    %34 = arith.divf %32, %33 : vector<8x1xf32>
    %35 = vector.broadcast %34 : vector<8x1xf32> to vector<8x32xf32>
    %36 = arith.subf %28, %35 : vector<8x32xf32>
    %37 = arith.mulf %36, %36 : vector<8x32xf32>
    %cst_17 = arith.constant dense<0.000000e+00> : vector<8xf32>
    %38 = vector.multi_reduction <add>, %37, %cst_17 [1] : vector<8x32xf32> to vector<8xf32>
    %39 = vector.shape_cast %38 : vector<8xf32> to vector<8x1xf32>
    %cst_18 = arith.constant 3.200000e+01 : f32
    %40 = vector.broadcast %cst_18 : f32 to vector<8x1xf32>
    %41 = arith.divf %39, %40 : vector<8x1xf32>
    %42 = vector.broadcast %34 : vector<8x1xf32> to vector<8x32xf32>
    %43 = arith.subf %28, %42 : vector<8x32xf32>
    %cst_19 = arith.constant 9.99999974E-6 : f32
    %44 = vector.broadcast %cst_19 : f32 to vector<8x1xf32>
    %45 = arith.addf %41, %44 : vector<8x1xf32>
    %46 = math.rsqrt %45 : vector<8x1xf32>
    %47 = vector.broadcast %46 : vector<8x1xf32> to vector<8x32xf32>
    %48 = arith.mulf %43, %47 : vector<8x32xf32>
    %49 = vector.broadcast %29 : vector<1x32xf32> to vector<8x32xf32>
    %50 = arith.mulf %48, %49 : vector<8x32xf32>
    %51 = vector.broadcast %30 : vector<1x32xf32> to vector<8x32xf32>
    %52 = arith.addf %50, %51 : vector<8x32xf32>
    %c0_20 = arith.constant 0 : index
    %c0_21 = arith.constant 0 : index
    %c0_22 = arith.constant 0 : index
    %53 = vector.load %arg27[%c0_20, %c0_21, %c0_22] : memref<1x1x32xf32, #tpu.memory_space<vmem>>, vector<1x1x32xf32>
    %54 = vector.shape_cast %53 : vector<1x1x32xf32> to vector<1x32xf32>
    %c1_i32 = arith.constant 1 : i32
    %55 = tpu.dynamic_rotate %52 by %c1_i32 dim 0 : vector<8x32xf32>, i32 -> vector<8x32xf32>
    %56 = tpu.iota {dimensions = array<i32: 0>} : vector<8x32xi32>
    %c0_i32_23 = arith.constant 0 : i32
    %57 = vector.broadcast %c0_i32_23 : i32 to vector<8x32xi32>
    %58 = arith.cmpi eq, %56, %57 : vector<8x32xi32>
    %59 = vector.shape_cast %54 : vector<1x32xf32> to vector<1x32xf32>
    %60 = vector.broadcast %59 : vector<1x32xf32> to vector<8x32xf32>
    %61 = arith.select %58, %60, %55 : vector<8x32xi1>, vector<8x32xf32>
    %c0_24 = arith.constant 0 : index
    %c0_25 = arith.constant 0 : index
    %62 = vector.load %arg12[%c0_24, %c0_25] : memref<1x32xf32, #tpu.memory_space<vmem>>, vector<1x32xf32>
    %c0_26 = arith.constant 0 : index
    %c0_27 = arith.constant 0 : index
    %63 = vector.load %arg13[%c0_26, %c0_27] : memref<1x32xf32, #tpu.memory_space<vmem>>, vector<1x32xf32>
    %c0_28 = arith.constant 0 : index
    %c0_29 = arith.constant 0 : index
    %64 = vector.load %arg14[%c0_28, %c0_29] : memref<1x32xf32, #tpu.memory_space<vmem>>, vector<1x32xf32>
    %65 = vector.broadcast %62 : vector<1x32xf32> to vector<8x32xf32>
    %66 = arith.mulf %52, %65 : vector<8x32xf32>
    %cst_30 = arith.constant 1.000000e+00 : f32
    %67 = vector.broadcast %cst_30 : f32 to vector<1x32xf32>
    %68 = arith.subf %67, %62 : vector<1x32xf32>
    %69 = vector.broadcast %68 : vector<1x32xf32> to vector<8x32xf32>
    %70 = arith.mulf %61, %69 : vector<8x32xf32>
    %71 = arith.addf %66, %70 : vector<8x32xf32>
    %72 = vector.broadcast %63 : vector<1x32xf32> to vector<8x32xf32>
    %73 = arith.mulf %52, %72 : vector<8x32xf32>
    %cst_31 = arith.constant 1.000000e+00 : f32
    %74 = vector.broadcast %cst_31 : f32 to vector<1x32xf32>
    %75 = arith.subf %74, %63 : vector<1x32xf32>
    %76 = vector.broadcast %75 : vector<1x32xf32> to vector<8x32xf32>
    %77 = arith.mulf %61, %76 : vector<8x32xf32>
    %78 = arith.addf %73, %77 : vector<8x32xf32>
    %79 = vector.broadcast %64 : vector<1x32xf32> to vector<8x32xf32>
    %80 = arith.mulf %52, %79 : vector<8x32xf32>
    %cst_32 = arith.constant 1.000000e+00 : f32
    %81 = vector.broadcast %cst_32 : f32 to vector<1x32xf32>
    %82 = arith.subf %81, %64 : vector<1x32xf32>
    %83 = vector.broadcast %82 : vector<1x32xf32> to vector<8x32xf32>
    %84 = arith.mulf %61, %83 : vector<8x32xf32>
    %85 = arith.addf %80, %84 : vector<8x32xf32>
    %c0_33 = arith.constant 0 : index
    %c0_34 = arith.constant 0 : index
    %86 = vector.load %arg17[%c0_33, %c0_34] : memref<32x32xbf16, #tpu.memory_space<vmem>>, vector<32x32xbf16>
    %87 = arith.truncf %71 : vector<8x32xf32> to vector<8x32xbf16>
    %cst_35 = arith.constant dense<0.000000e+00> : vector<8x32xf32>
    %88 = tpu.matmul %87, %86, %cst_35 {dimension_numbers = #tpu.dot_dimension_numbers<[1], [0], [0], [1], [0, 0, 1, 1], [], []>} : vector<8x32xbf16>, vector<32x32xbf16>, vector<8x32xf32> -> vector<8x32xf32>
    %c0_36 = arith.constant 0 : index
    %c0_37 = arith.constant 0 : index
    %89 = vector.load %arg30[%c0_36, %c0_37] : memref<8x32xf32, #tpu.memory_space<vmem>>, vector<8x32xf32>
    tpu.vector_store %arg30[%c0_36, %c0_37], %88 {strides = array<i32>} : memref<8x32xf32, #tpu.memory_space<vmem>>, vector<8x32xf32>,
    %c0_38 = arith.constant 0 : index
    %c0_39 = arith.constant 0 : index
    %90 = vector.load %arg18[%c0_38, %c0_39] : memref<32x32xbf16, #tpu.memory_space<vmem>>, vector<32x32xbf16>
    %91 = arith.truncf %78 : vector<8x32xf32> to vector<8x32xbf16>
    %cst_40 = arith.constant dense<0.000000e+00> : vector<8x32xf32>
    %92 = tpu.matmul %91, %90, %cst_40 {dimension_numbers = #tpu.dot_dimension_numbers<[1], [0], [0], [1], [0, 0, 1, 1], [], []>} : vector<8x32xbf16>, vector<32x32xbf16>, vector<8x32xf32> -> vector<8x32xf32>
    %c0_41 = arith.constant 0 : index
    %c0_42 = arith.constant 0 : index
    %93 = vector.load %arg31[%c0_41, %c0_42] : memref<8x32xf32, #tpu.memory_space<vmem>>, vector<8x32xf32>
    tpu.vector_store %arg31[%c0_41, %c0_42], %92 {strides = array<i32>} : memref<8x32xf32, #tpu.memory_space<vmem>>, vector<8x32xf32>,
    %c0_43 = arith.constant 0 : index
    %c0_44 = arith.constant 0 : index
    %94 = vector.load %arg19[%c0_43, %c0_44] : memref<32x32xbf16, #tpu.memory_space<vmem>>, vector<32x32xbf16>
    %95 = arith.truncf %85 : vector<8x32xf32> to vector<8x32xbf16>
    %cst_45 = arith.constant dense<0.000000e+00> : vector<8x32xf32>
    %96 = tpu.matmul %95, %94, %cst_45 {dimension_numbers = #tpu.dot_dimension_numbers<[1], [0], [0], [1], [0, 0, 1, 1], [], []>} : vector<8x32xbf16>, vector<32x32xbf16>, vector<8x32xf32> -> vector<8x32xf32>
    %97 = arith.negf %96 : vector<8x32xf32>
    %98 = math.exp %97 : vector<8x32xf32>
    %cst_46 = arith.constant 1.000000e+00 : f32
    %99 = vector.broadcast %cst_46 : f32 to vector<8x32xf32>
    %100 = arith.addf %99, %98 : vector<8x32xf32>
    %101 = arith.divf %99, %100 : vector<8x32xf32>
    %c0_47 = arith.constant 0 : index
    %c0_48 = arith.constant 0 : index
    %102 = vector.load %arg15[%c0_47, %c0_48] : memref<1x32xf32, #tpu.memory_space<vmem>>, vector<1x32xf32>
    %103 = math.exp %102 : vector<1x32xf32>
    %cst_49 = arith.constant 0.000000e+00 : f32
    %104 = vector.broadcast %cst_49 : f32 to vector<1x32xf32>
    %105 = arith.subf %104, %103 : vector<1x32xf32>
    %c0_50 = arith.constant 0 : index
    %c0_51 = arith.constant 0 : index
    %106 = vector.load %arg16[%c0_50, %c0_51] : memref<1x32xf32, #tpu.memory_space<vmem>>, vector<1x32xf32>
    %c0_52 = arith.constant 0 : index
    %c0_53 = arith.constant 0 : index
    %c0_54 = arith.constant 0 : index
    %107 = vector.load %arg28[%c0_52, %c0_53, %c0_54] : memref<1x3x32xf32, #tpu.memory_space<vmem>>, vector<1x1x32xf32>
    %108 = vector.shape_cast %107 : vector<1x1x32xf32> to vector<1x32xf32>
    %c0_55 = arith.constant 0 : index
    %c1 = arith.constant 1 : index
    %c0_56 = arith.constant 0 : index
    %109 = vector.load %arg28[%c0_55, %c1, %c0_56] : memref<1x3x32xf32, #tpu.memory_space<vmem>>, vector<1x1x32xf32>
    %110 = vector.shape_cast %109 : vector<1x1x32xf32> to vector<1x32xf32>
    %c0_57 = arith.constant 0 : index
    %c2 = arith.constant 2 : index
    %c0_58 = arith.constant 0 : index
    %111 = vector.load %arg28[%c0_57, %c2, %c0_58] : memref<1x3x32xf32, #tpu.memory_space<vmem>>, vector<1x1x32xf32>
    %112 = vector.shape_cast %111 : vector<1x1x32xf32> to vector<1x32xf32>
    %113 = tpu.iota {dimensions = array<i32: 0>} : vector<8x32xi32>
    %c0_i32_59 = arith.constant 0 : i32
    %c8_i32 = arith.constant 8 : i32
    %114 = arith.muli %c0_i32_59, %c8_i32 : i32
    %115 = tpu.assume_multiple %114, 8 : i32
    %116 = arith.index_cast %115 : i32 to index
    %c0_60 = arith.constant 0 : index
    %117 = vector.load %arg30[%116, %c0_60] : memref<8x32xf32, #tpu.memory_space<vmem>>, vector<8x32xf32>
    %118 = arith.index_cast %115 : i32 to index
    %c0_61 = arith.constant 0 : index
    %119 = vector.load %arg31[%118, %c0_61] : memref<8x32xf32, #tpu.memory_space<vmem>>, vector<8x32xf32>
    %cst_62 = arith.constant 0.000000e+00 : f32
    %120 = vector.broadcast %cst_62 : f32 to vector<8x32xf32>
    %121 = vector.extract_strided_slice %117 {offsets = [0, 0], sizes = [1, 32], strides = [1, 1]} : vector<8x32xf32> to vector<1x32xf32>
    %122 = vector.extract_strided_slice %119 {offsets = [0, 0], sizes = [1, 32], strides = [1, 1]} : vector<8x32xf32> to vector<1x32xf32>
    %123 = arith.addf %106, %121 : vector<1x32xf32>
    %124 = arith.maximumf %112, %123 : vector<1x32xf32>
    %125 = arith.subf %112, %124 : vector<1x32xf32>
    %126 = math.exp %125 : vector<1x32xf32>
    %127 = arith.subf %123, %124 : vector<1x32xf32>
    %128 = math.exp %127 : vector<1x32xf32>
    %129 = arith.mulf %126, %108 : vector<1x32xf32>
    %130 = arith.mulf %128, %122 : vector<1x32xf32>
    %131 = arith.addf %129, %130 : vector<1x32xf32>
    %132 = arith.mulf %126, %110 : vector<1x32xf32>
    %133 = arith.addf %132, %128 : vector<1x32xf32>
    %134 = tpu.reciprocal %133 {approx = true} : vector<1x32xf32> -> vector<1x32xf32>
    %135 = arith.mulf %131, %134 : vector<1x32xf32>
    %c0_i32_63 = arith.constant 0 : i32
    %136 = vector.broadcast %c0_i32_63 : i32 to vector<8x32xi32>
    %137 = arith.cmpi eq, %113, %136 : vector<8x32xi32>
    %138 = vector.shape_cast %135 : vector<1x32xf32> to vector<1x32xf32>
    %139 = vector.broadcast %138 : vector<1x32xf32> to vector<8x32xf32>
    %140 = arith.select %137, %139, %120 : vector<8x32xi1>, vector<8x32xf32>
    %141 = arith.addf %105, %112 : vector<1x32xf32>
    %142 = arith.maximumf %141, %121 : vector<1x32xf32>
    %143 = arith.subf %141, %142 : vector<1x32xf32>
    %144 = math.exp %143 : vector<1x32xf32>
    %145 = arith.subf %121, %142 : vector<1x32xf32>
    %146 = math.exp %145 : vector<1x32xf32>
    %147 = arith.mulf %144, %108 : vector<1x32xf32>
    %148 = arith.mulf %146, %122 : vector<1x32xf32>
    %149 = arith.addf %147, %148 : vector<1x32xf32>
    %150 = arith.mulf %144, %110 : vector<1x32xf32>
    %151 = arith.addf %150, %146 : vector<1x32xf32>
    %152 = vector.extract_strided_slice %117 {offsets = [1, 0], sizes = [1, 32], strides = [1, 1]} : vector<8x32xf32> to vector<1x32xf32>
    %153 = vector.extract_strided_slice %119 {offsets = [1, 0], sizes = [1, 32], strides = [1, 1]} : vector<8x32xf32> to vector<1x32xf32>
    %154 = arith.addf %106, %152 : vector<1x32xf32>
    %155 = arith.maximumf %142, %154 : vector<1x32xf32>
    %156 = arith.subf %142, %155 : vector<1x32xf32>
    %157 = math.exp %156 : vector<1x32xf32>
    %158 = arith.subf %154, %155 : vector<1x32xf32>
    %159 = math.exp %158 : vector<1x32xf32>
    %160 = arith.mulf %157, %149 : vector<1x32xf32>
    %161 = arith.mulf %159, %153 : vector<1x32xf32>
    %162 = arith.addf %160, %161 : vector<1x32xf32>
    %163 = arith.mulf %157, %151 : vector<1x32xf32>
    %164 = arith.addf %163, %159 : vector<1x32xf32>
    %165 = tpu.reciprocal %164 {approx = true} : vector<1x32xf32> -> vector<1x32xf32>
    %166 = arith.mulf %162, %165 : vector<1x32xf32>
    %c1_i32_64 = arith.constant 1 : i32
    %167 = vector.broadcast %c1_i32_64 : i32 to vector<8x32xi32>
    %168 = arith.cmpi eq, %113, %167 : vector<8x32xi32>
    %169 = vector.shape_cast %166 : vector<1x32xf32> to vector<1x32xf32>
    %170 = vector.broadcast %169 : vector<1x32xf32> to vector<8x32xf32>
    %171 = arith.select %168, %170, %140 : vector<8x32xi1>, vector<8x32xf32>
    %172 = arith.addf %105, %142 : vector<1x32xf32>
    %173 = arith.maximumf %172, %152 : vector<1x32xf32>
    %174 = arith.subf %172, %173 : vector<1x32xf32>
    %175 = math.exp %174 : vector<1x32xf32>
    %176 = arith.subf %152, %173 : vector<1x32xf32>
    %177 = math.exp %176 : vector<1x32xf32>
    %178 = arith.mulf %175, %149 : vector<1x32xf32>
    %179 = arith.mulf %177, %153 : vector<1x32xf32>
    %180 = arith.addf %178, %179 : vector<1x32xf32>
    %181 = arith.mulf %175, %151 : vector<1x32xf32>
    %182 = arith.addf %181, %177 : vector<1x32xf32>
    %183 = vector.extract_strided_slice %117 {offsets = [2, 0], sizes = [1, 32], strides = [1, 1]} : vector<8x32xf32> to vector<1x32xf32>
    %184 = vector.extract_strided_slice %119 {offsets = [2, 0], sizes = [1, 32], strides = [1, 1]} : vector<8x32xf32> to vector<1x32xf32>
    %185 = arith.addf %106, %183 : vector<1x32xf32>
    %186 = arith.maximumf %173, %185 : vector<1x32xf32>
    %187 = arith.subf %173, %186 : vector<1x32xf32>
    %188 = math.exp %187 : vector<1x32xf32>
    %189 = arith.subf %185, %186 : vector<1x32xf32>
    %190 = math.exp %189 : vector<1x32xf32>
    %191 = arith.mulf %188, %180 : vector<1x32xf32>
    %192 = arith.mulf %190, %184 : vector<1x32xf32>
    %193 = arith.addf %191, %192 : vector<1x32xf32>
    %194 = arith.mulf %188, %182 : vector<1x32xf32>
    %195 = arith.addf %194, %190 : vector<1x32xf32>
    %196 = tpu.reciprocal %195 {approx = true} : vector<1x32xf32> -> vector<1x32xf32>
    %197 = arith.mulf %193, %196 : vector<1x32xf32>
    %c2_i32 = arith.constant 2 : i32
    %198 = vector.broadcast %c2_i32 : i32 to vector<8x32xi32>
    %199 = arith.cmpi eq, %113, %198 : vector<8x32xi32>
    %200 = vector.shape_cast %197 : vector<1x32xf32> to vector<1x32xf32>
    %201 = vector.broadcast %200 : vector<1x32xf32> to vector<8x32xf32>
    %202 = arith.select %199, %201, %171 : vector<8x32xi1>, vector<8x32xf32>
    %203 = arith.addf %105, %173 : vector<1x32xf32>
    %204 = arith.maximumf %203, %183 : vector<1x32xf32>
    %205 = arith.subf %203, %204 : vector<1x32xf32>
    %206 = math.exp %205 : vector<1x32xf32>
    %207 = arith.subf %183, %204 : vector<1x32xf32>
    %208 = math.exp %207 : vector<1x32xf32>
    %209 = arith.mulf %206, %180 : vector<1x32xf32>
    %210 = arith.mulf %208, %184 : vector<1x32xf32>
    %211 = arith.addf %209, %210 : vector<1x32xf32>
    %212 = arith.mulf %206, %182 : vector<1x32xf32>
    %213 = arith.addf %212, %208 : vector<1x32xf32>
    %214 = vector.extract_strided_slice %117 {offsets = [3, 0], sizes = [1, 32], strides = [1, 1]} : vector<8x32xf32> to vector<1x32xf32>
    %215 = vector.extract_strided_slice %119 {offsets = [3, 0], sizes = [1, 32], strides = [1, 1]} : vector<8x32xf32> to vector<1x32xf32>
    %216 = arith.addf %106, %214 : vector<1x32xf32>
    %217 = arith.maximumf %204, %216 : vector<1x32xf32>
    %218 = arith.subf %204, %217 : vector<1x32xf32>
    %219 = math.exp %218 : vector<1x32xf32>
    %220 = arith.subf %216, %217 : vector<1x32xf32>
    %221 = math.exp %220 : vector<1x32xf32>
    %222 = arith.mulf %219, %211 : vector<1x32xf32>
    %223 = arith.mulf %221, %215 : vector<1x32xf32>
    %224 = arith.addf %222, %223 : vector<1x32xf32>
    %225 = arith.mulf %219, %213 : vector<1x32xf32>
    %226 = arith.addf %225, %221 : vector<1x32xf32>
    %227 = tpu.reciprocal %226 {approx = true} : vector<1x32xf32> -> vector<1x32xf32>
    %228 = arith.mulf %224, %227 : vector<1x32xf32>
    %c3_i32 = arith.constant 3 : i32
    %229 = vector.broadcast %c3_i32 : i32 to vector<8x32xi32>
    %230 = arith.cmpi eq, %113, %229 : vector<8x32xi32>
    %231 = vector.shape_cast %228 : vector<1x32xf32> to vector<1x32xf32>
    %232 = vector.broadcast %231 : vector<1x32xf32> to vector<8x32xf32>
    %233 = arith.select %230, %232, %202 : vector<8x32xi1>, vector<8x32xf32>
    %234 = arith.addf %105, %204 : vector<1x32xf32>
    %235 = arith.maximumf %234, %214 : vector<1x32xf32>
    %236 = arith.subf %234, %235 : vector<1x32xf32>
    %237 = math.exp %236 : vector<1x32xf32>
    %238 = arith.subf %214, %235 : vector<1x32xf32>
    %239 = math.exp %238 : vector<1x32xf32>
    %240 = arith.mulf %237, %211 : vector<1x32xf32>
    %241 = arith.mulf %239, %215 : vector<1x32xf32>
    %242 = arith.addf %240, %241 : vector<1x32xf32>
    %243 = arith.mulf %237, %213 : vector<1x32xf32>
    %244 = arith.addf %243, %239 : vector<1x32xf32>
    %245 = vector.extract_strided_slice %117 {offsets = [4, 0], sizes = [1, 32], strides = [1, 1]} : vector<8x32xf32> to vector<1x32xf32>
    %246 = vector.extract_strided_slice %119 {offsets = [4, 0], sizes = [1, 32], strides = [1, 1]} : vector<8x32xf32> to vector<1x32xf32>
    %247 = arith.addf %106, %245 : vector<1x32xf32>
    %248 = arith.maximumf %235, %247 : vector<1x32xf32>
    %249 = arith.subf %235, %248 : vector<1x32xf32>
    %250 = math.exp %249 : vector<1x32xf32>
    %251 = arith.subf %247, %248 : vector<1x32xf32>
    %252 = math.exp %251 : vector<1x32xf32>
    %253 = arith.mulf %250, %242 : vector<1x32xf32>
    %254 = arith.mulf %252, %246 : vector<1x32xf32>
    %255 = arith.addf %253, %254 : vector<1x32xf32>
    %256 = arith.mulf %250, %244 : vector<1x32xf32>
    %257 = arith.addf %256, %252 : vector<1x32xf32>
    %258 = tpu.reciprocal %257 {approx = true} : vector<1x32xf32> -> vector<1x32xf32>
    %259 = arith.mulf %255, %258 : vector<1x32xf32>
    %c4_i32 = arith.constant 4 : i32
    %260 = vector.broadcast %c4_i32 : i32 to vector<8x32xi32>
    %261 = arith.cmpi eq, %113, %260 : vector<8x32xi32>
    %262 = vector.shape_cast %259 : vector<1x32xf32> to vector<1x32xf32>
    %263 = vector.broadcast %262 : vector<1x32xf32> to vector<8x32xf32>
    %264 = arith.select %261, %263, %233 : vector<8x32xi1>, vector<8x32xf32>
    %265 = arith.addf %105, %235 : vector<1x32xf32>
    %266 = arith.maximumf %265, %245 : vector<1x32xf32>
    %267 = arith.subf %265, %266 : vector<1x32xf32>
    %268 = math.exp %267 : vector<1x32xf32>
    %269 = arith.subf %245, %266 : vector<1x32xf32>
    %270 = math.exp %269 : vector<1x32xf32>
    %271 = arith.mulf %268, %242 : vector<1x32xf32>
    %272 = arith.mulf %270, %246 : vector<1x32xf32>
    %273 = arith.addf %271, %272 : vector<1x32xf32>
    %274 = arith.mulf %268, %244 : vector<1x32xf32>
    %275 = arith.addf %274, %270 : vector<1x32xf32>
    %276 = vector.extract_strided_slice %117 {offsets = [5, 0], sizes = [1, 32], strides = [1, 1]} : vector<8x32xf32> to vector<1x32xf32>
    %277 = vector.extract_strided_slice %119 {offsets = [5, 0], sizes = [1, 32], strides = [1, 1]} : vector<8x32xf32> to vector<1x32xf32>
    %278 = arith.addf %106, %276 : vector<1x32xf32>
    %279 = arith.maximumf %266, %278 : vector<1x32xf32>
    %280 = arith.subf %266, %279 : vector<1x32xf32>
    %281 = math.exp %280 : vector<1x32xf32>
    %282 = arith.subf %278, %279 : vector<1x32xf32>
    %283 = math.exp %282 : vector<1x32xf32>
    %284 = arith.mulf %281, %273 : vector<1x32xf32>
    %285 = arith.mulf %283, %277 : vector<1x32xf32>
    %286 = arith.addf %284, %285 : vector<1x32xf32>
    %287 = arith.mulf %281, %275 : vector<1x32xf32>
    %288 = arith.addf %287, %283 : vector<1x32xf32>
    %289 = tpu.reciprocal %288 {approx = true} : vector<1x32xf32> -> vector<1x32xf32>
    %290 = arith.mulf %286, %289 : vector<1x32xf32>
    %c5_i32 = arith.constant 5 : i32
    %291 = vector.broadcast %c5_i32 : i32 to vector<8x32xi32>
    %292 = arith.cmpi eq, %113, %291 : vector<8x32xi32>
    %293 = vector.shape_cast %290 : vector<1x32xf32> to vector<1x32xf32>
    %294 = vector.broadcast %293 : vector<1x32xf32> to vector<8x32xf32>
    %295 = arith.select %292, %294, %264 : vector<8x32xi1>, vector<8x32xf32>
    %296 = arith.addf %105, %266 : vector<1x32xf32>
    %297 = arith.maximumf %296, %276 : vector<1x32xf32>
    %298 = arith.subf %296, %297 : vector<1x32xf32>
    %299 = math.exp %298 : vector<1x32xf32>
    %300 = arith.subf %276, %297 : vector<1x32xf32>
    %301 = math.exp %300 : vector<1x32xf32>
    %302 = arith.mulf %299, %273 : vector<1x32xf32>
    %303 = arith.mulf %301, %277 : vector<1x32xf32>
    %304 = arith.addf %302, %303 : vector<1x32xf32>
    %305 = arith.mulf %299, %275 : vector<1x32xf32>
    %306 = arith.addf %305, %301 : vector<1x32xf32>
    %307 = vector.extract_strided_slice %117 {offsets = [6, 0], sizes = [1, 32], strides = [1, 1]} : vector<8x32xf32> to vector<1x32xf32>
    %308 = vector.extract_strided_slice %119 {offsets = [6, 0], sizes = [1, 32], strides = [1, 1]} : vector<8x32xf32> to vector<1x32xf32>
    %309 = arith.addf %106, %307 : vector<1x32xf32>
    %310 = arith.maximumf %297, %309 : vector<1x32xf32>
    %311 = arith.subf %297, %310 : vector<1x32xf32>
    %312 = math.exp %311 : vector<1x32xf32>
    %313 = arith.subf %309, %310 : vector<1x32xf32>
    %314 = math.exp %313 : vector<1x32xf32>
    %315 = arith.mulf %312, %304 : vector<1x32xf32>
    %316 = arith.mulf %314, %308 : vector<1x32xf32>
    %317 = arith.addf %315, %316 : vector<1x32xf32>
    %318 = arith.mulf %312, %306 : vector<1x32xf32>
    %319 = arith.addf %318, %314 : vector<1x32xf32>
    %320 = tpu.reciprocal %319 {approx = true} : vector<1x32xf32> -> vector<1x32xf32>
    %321 = arith.mulf %317, %320 : vector<1x32xf32>
    %c6_i32 = arith.constant 6 : i32
    %322 = vector.broadcast %c6_i32 : i32 to vector<8x32xi32>
    %323 = arith.cmpi eq, %113, %322 : vector<8x32xi32>
    %324 = vector.shape_cast %321 : vector<1x32xf32> to vector<1x32xf32>
    %325 = vector.broadcast %324 : vector<1x32xf32> to vector<8x32xf32>
    %326 = arith.select %323, %325, %295 : vector<8x32xi1>, vector<8x32xf32>
    %327 = arith.addf %105, %297 : vector<1x32xf32>
    %328 = arith.maximumf %327, %307 : vector<1x32xf32>
    %329 = arith.subf %327, %328 : vector<1x32xf32>
    %330 = math.exp %329 : vector<1x32xf32>
    %331 = arith.subf %307, %328 : vector<1x32xf32>
    %332 = math.exp %331 : vector<1x32xf32>
    %333 = arith.mulf %330, %304 : vector<1x32xf32>
    %334 = arith.mulf %332, %308 : vector<1x32xf32>
    %335 = arith.addf %333, %334 : vector<1x32xf32>
    %336 = arith.mulf %330, %306 : vector<1x32xf32>
    %337 = arith.addf %336, %332 : vector<1x32xf32>
    %338 = vector.extract_strided_slice %117 {offsets = [7, 0], sizes = [1, 32], strides = [1, 1]} : vector<8x32xf32> to vector<1x32xf32>
    %339 = vector.extract_strided_slice %119 {offsets = [7, 0], sizes = [1, 32], strides = [1, 1]} : vector<8x32xf32> to vector<1x32xf32>
    %340 = arith.addf %106, %338 : vector<1x32xf32>
    %341 = arith.maximumf %328, %340 : vector<1x32xf32>
    %342 = arith.subf %328, %341 : vector<1x32xf32>
    %343 = math.exp %342 : vector<1x32xf32>
    %344 = arith.subf %340, %341 : vector<1x32xf32>
    %345 = math.exp %344 : vector<1x32xf32>
    %346 = arith.mulf %343, %335 : vector<1x32xf32>
    %347 = arith.mulf %345, %339 : vector<1x32xf32>
    %348 = arith.addf %346, %347 : vector<1x32xf32>
    %349 = arith.mulf %343, %337 : vector<1x32xf32>
    %350 = arith.addf %349, %345 : vector<1x32xf32>
    %351 = tpu.reciprocal %350 {approx = true} : vector<1x32xf32> -> vector<1x32xf32>
    %352 = arith.mulf %348, %351 : vector<1x32xf32>
    %c7_i32 = arith.constant 7 : i32
    %353 = vector.broadcast %c7_i32 : i32 to vector<8x32xi32>
    %354 = arith.cmpi eq, %113, %353 : vector<8x32xi32>
    %355 = vector.shape_cast %352 : vector<1x32xf32> to vector<1x32xf32>
    %356 = vector.broadcast %355 : vector<1x32xf32> to vector<8x32xf32>
    %357 = arith.select %354, %356, %326 : vector<8x32xi1>, vector<8x32xf32>
    %358 = arith.addf %105, %328 : vector<1x32xf32>
    %359 = arith.maximumf %358, %338 : vector<1x32xf32>
    %360 = arith.subf %358, %359 : vector<1x32xf32>
    %361 = math.exp %360 : vector<1x32xf32>
    %362 = arith.subf %338, %359 : vector<1x32xf32>
    %363 = math.exp %362 : vector<1x32xf32>
    %364 = arith.mulf %361, %335 : vector<1x32xf32>
    %365 = arith.mulf %363, %339 : vector<1x32xf32>
    %366 = arith.addf %364, %365 : vector<1x32xf32>
    %367 = arith.mulf %361, %337 : vector<1x32xf32>
    %368 = arith.addf %367, %363 : vector<1x32xf32>
    %369 = arith.truncf %357 : vector<8x32xf32> to vector<8x32xbf16>
    %370 = arith.index_cast %115 : i32 to index
    %c0_65 = arith.constant 0 : index
    %371 = vector.load %arg32[%370, %c0_65] : memref<8x32xbf16, #tpu.memory_space<vmem>>, vector<8x32xbf16>
    tpu.vector_store %arg32[%370, %c0_65], %369 {strides = array<i32>} : memref<8x32xbf16, #tpu.memory_space<vmem>>, vector<8x32xbf16>,
    %c1_i32_66 = arith.constant 1 : i32
    %c0_67 = arith.constant 0 : index
    %c0_68 = arith.constant 0 : index
    %c0_69 = arith.constant 0 : index
    %372 = vector.load %arg28[%c0_67, %c0_68, %c0_69] : memref<1x3x32xf32, #tpu.memory_space<vmem>>, vector<1x1x32xf32>
    %373 = vector.shape_cast %372 : vector<1x1x32xf32> to vector<1x32xf32>
    %374 = vector.shape_cast %366 : vector<1x32xf32> to vector<1x1x32xf32>
    tpu.vector_store %arg28[%c0_67, %c0_68, %c0_69], %374 {strides = array<i32>} : memref<1x3x32xf32, #tpu.memory_space<vmem>>, vector<1x1x32xf32>,
    %c0_70 = arith.constant 0 : index
    %c1_71 = arith.constant 1 : index
    %c0_72 = arith.constant 0 : index
    %375 = vector.load %arg28[%c0_70, %c1_71, %c0_72] : memref<1x3x32xf32, #tpu.memory_space<vmem>>, vector<1x1x32xf32>
    %376 = vector.shape_cast %375 : vector<1x1x32xf32> to vector<1x32xf32>
    %377 = vector.shape_cast %368 : vector<1x32xf32> to vector<1x1x32xf32>
    tpu.vector_store %arg28[%c0_70, %c1_71, %c0_72], %377 {strides = array<i32>} : memref<1x3x32xf32, #tpu.memory_space<vmem>>, vector<1x1x32xf32>,
    %c0_73 = arith.constant 0 : index
    %c2_74 = arith.constant 2 : index
    %c0_75 = arith.constant 0 : index
    %378 = vector.load %arg28[%c0_73, %c2_74, %c0_75] : memref<1x3x32xf32, #tpu.memory_space<vmem>>, vector<1x1x32xf32>
    %379 = vector.shape_cast %378 : vector<1x1x32xf32> to vector<1x32xf32>
    %380 = vector.shape_cast %359 : vector<1x32xf32> to vector<1x1x32xf32>
    tpu.vector_store %arg28[%c0_73, %c2_74, %c0_75], %380 {strides = array<i32>} : memref<1x3x32xf32, #tpu.memory_space<vmem>>, vector<1x1x32xf32>,
    %c0_76 = arith.constant 0 : index
    %c0_77 = arith.constant 0 : index
    %381 = vector.load %arg32[%c0_76, %c0_77] : memref<8x32xbf16, #tpu.memory_space<vmem>>, vector<8x32xbf16>
    %382 = arith.extf %381 : vector<8x32xbf16> to vector<8x32xf32>
    %383 = arith.mulf %101, %382 : vector<8x32xf32>
    %c0_78 = arith.constant 0 : index
    %c0_79 = arith.constant 0 : index
    %384 = vector.load %arg20[%c0_78, %c0_79] : memref<32x32xbf16, #tpu.memory_space<vmem>>, vector<32x32xbf16>
    %385 = arith.truncf %383 : vector<8x32xf32> to vector<8x32xbf16>
    %cst_80 = arith.constant dense<0.000000e+00> : vector<8x32xf32>
    %386 = tpu.matmul %385, %384, %cst_80 {dimension_numbers = #tpu.dot_dimension_numbers<[1], [0], [0], [1], [0, 0, 1, 1], [], []>} : vector<8x32xbf16>, vector<32x32xbf16>, vector<8x32xf32> -> vector<8x32xf32>
    %387 = arith.addf %28, %386 : vector<8x32xf32>
    %388 = vector.extract_strided_slice %52 {offsets = [7, 0], sizes = [1, 32], strides = [1, 1]} : vector<8x32xf32> to vector<1x32xf32>
    %c0_81 = arith.constant 0 : index
    %c0_82 = arith.constant 0 : index
    %c0_83 = arith.constant 0 : index
    %389 = vector.load %arg27[%c0_81, %c0_82, %c0_83] : memref<1x1x32xf32, #tpu.memory_space<vmem>>, vector<1x1x32xf32>
    %390 = vector.shape_cast %389 : vector<1x1x32xf32> to vector<1x32xf32>
    %391 = vector.shape_cast %388 : vector<1x32xf32> to vector<1x1x32xf32>
    tpu.vector_store %arg27[%c0_81, %c0_82, %c0_83], %391 {strides = array<i32>} : memref<1x1x32xf32, #tpu.memory_space<vmem>>, vector<1x1x32xf32>,
    %c0_84 = arith.constant 0 : index
    %c0_85 = arith.constant 0 : index
    %392 = vector.load %arg10[%c0_84, %c0_85] : memref<1x32xf32, #tpu.memory_space<vmem>>, vector<1x32xf32>
    %c0_86 = arith.constant 0 : index
    %c0_87 = arith.constant 0 : index
    %393 = vector.load %arg11[%c0_86, %c0_87] : memref<1x32xf32, #tpu.memory_space<vmem>>, vector<1x32xf32>
    %cst_88 = arith.constant dense<0.000000e+00> : vector<8xf32>
    %394 = vector.multi_reduction <add>, %387, %cst_88 [1] : vector<8x32xf32> to vector<8xf32>
    %395 = vector.shape_cast %394 : vector<8xf32> to vector<8x1xf32>
    %cst_89 = arith.constant 3.200000e+01 : f32
    %396 = vector.broadcast %cst_89 : f32 to vector<8x1xf32>
    %397 = arith.divf %395, %396 : vector<8x1xf32>
    %398 = vector.broadcast %397 : vector<8x1xf32> to vector<8x32xf32>
    %399 = arith.subf %387, %398 : vector<8x32xf32>
    %400 = arith.mulf %399, %399 : vector<8x32xf32>
    %cst_90 = arith.constant dense<0.000000e+00> : vector<8xf32>
    %401 = vector.multi_reduction <add>, %400, %cst_90 [1] : vector<8x32xf32> to vector<8xf32>
    %402 = vector.shape_cast %401 : vector<8xf32> to vector<8x1xf32>
    %cst_91 = arith.constant 3.200000e+01 : f32
    %403 = vector.broadcast %cst_91 : f32 to vector<8x1xf32>
    %404 = arith.divf %402, %403 : vector<8x1xf32>
    %405 = vector.broadcast %397 : vector<8x1xf32> to vector<8x32xf32>
    %406 = arith.subf %387, %405 : vector<8x32xf32>
    %cst_92 = arith.constant 9.99999974E-6 : f32
    %407 = vector.broadcast %cst_92 : f32 to vector<8x1xf32>
    %408 = arith.addf %404, %407 : vector<8x1xf32>
    %409 = math.rsqrt %408 : vector<8x1xf32>
    %410 = vector.broadcast %409 : vector<8x1xf32> to vector<8x32xf32>
    %411 = arith.mulf %406, %410 : vector<8x32xf32>
    %412 = vector.broadcast %392 : vector<1x32xf32> to vector<8x32xf32>
    %413 = arith.mulf %411, %412 : vector<8x32xf32>
    %414 = vector.broadcast %393 : vector<1x32xf32> to vector<8x32xf32>
    %415 = arith.addf %413, %414 : vector<8x32xf32>
    %c0_93 = arith.constant 0 : index
    %c0_94 = arith.constant 0 : index
    %c0_95 = arith.constant 0 : index
    %416 = vector.load %arg29[%c0_93, %c0_94, %c0_95] : memref<1x1x32xf32, #tpu.memory_space<vmem>>, vector<1x1x32xf32>
    %417 = vector.shape_cast %416 : vector<1x1x32xf32> to vector<1x32xf32>
    %c1_i32_96 = arith.constant 1 : i32
    %418 = tpu.dynamic_rotate %415 by %c1_i32_96 dim 0 : vector<8x32xf32>, i32 -> vector<8x32xf32>
    %419 = tpu.iota {dimensions = array<i32: 0>} : vector<8x32xi32>
    %c0_i32_97 = arith.constant 0 : i32
    %420 = vector.broadcast %c0_i32_97 : i32 to vector<8x32xi32>
    %421 = arith.cmpi eq, %419, %420 : vector<8x32xi32>
    %422 = vector.shape_cast %417 : vector<1x32xf32> to vector<1x32xf32>
    %423 = vector.broadcast %422 : vector<1x32xf32> to vector<8x32xf32>
    %424 = arith.select %421, %423, %418 : vector<8x32xi1>, vector<8x32xf32>
    %c0_98 = arith.constant 0 : index
    %c0_99 = arith.constant 0 : index
    %425 = vector.load %arg21[%c0_98, %c0_99] : memref<1x32xf32, #tpu.memory_space<vmem>>, vector<1x32xf32>
    %c0_100 = arith.constant 0 : index
    %c0_101 = arith.constant 0 : index
    %426 = vector.load %arg22[%c0_100, %c0_101] : memref<1x32xf32, #tpu.memory_space<vmem>>, vector<1x32xf32>
    %427 = vector.broadcast %425 : vector<1x32xf32> to vector<8x32xf32>
    %428 = arith.mulf %415, %427 : vector<8x32xf32>
    %cst_102 = arith.constant 1.000000e+00 : f32
    %429 = vector.broadcast %cst_102 : f32 to vector<1x32xf32>
    %430 = arith.subf %429, %425 : vector<1x32xf32>
    %431 = vector.broadcast %430 : vector<1x32xf32> to vector<8x32xf32>
    %432 = arith.mulf %424, %431 : vector<8x32xf32>
    %433 = arith.addf %428, %432 : vector<8x32xf32>
    %434 = vector.broadcast %426 : vector<1x32xf32> to vector<8x32xf32>
    %435 = arith.mulf %415, %434 : vector<8x32xf32>
    %cst_103 = arith.constant 1.000000e+00 : f32
    %436 = vector.broadcast %cst_103 : f32 to vector<1x32xf32>
    %437 = arith.subf %436, %426 : vector<1x32xf32>
    %438 = vector.broadcast %437 : vector<1x32xf32> to vector<8x32xf32>
    %439 = arith.mulf %424, %438 : vector<8x32xf32>
    %440 = arith.addf %435, %439 : vector<8x32xf32>
    %c0_104 = arith.constant 0 : index
    %c0_105 = arith.constant 0 : index
    %441 = vector.load %arg23[%c0_104, %c0_105] : memref<32x128xbf16, #tpu.memory_space<vmem>>, vector<32x128xbf16>
    %442 = arith.truncf %433 : vector<8x32xf32> to vector<8x32xbf16>
    %cst_106 = arith.constant dense<0.000000e+00> : vector<8x128xf32>
    %443 = tpu.matmul %442, %441, %cst_106 {dimension_numbers = #tpu.dot_dimension_numbers<[1], [0], [0], [1], [0, 0, 1, 1], [], []>} : vector<8x32xbf16>, vector<32x128xbf16>, vector<8x128xf32> -> vector<8x128xf32>
    %cst_107 = arith.constant 0.000000e+00 : f32
    %444 = vector.broadcast %cst_107 : f32 to vector<8x128xf32>
    %445 = arith.maximumf %443, %444 : vector<8x128xf32>
    %446 = arith.mulf %445, %445 : vector<8x128xf32>
    %c0_108 = arith.constant 0 : index
    %c0_109 = arith.constant 0 : index
    %447 = vector.load %arg25[%c0_108, %c0_109] : memref<128x32xbf16, #tpu.memory_space<vmem>>, vector<128x32xbf16>
    %448 = arith.truncf %446 : vector<8x128xf32> to vector<8x128xbf16>
    %cst_110 = arith.constant dense<0.000000e+00> : vector<8x32xf32>
    %449 = tpu.matmul %448, %447, %cst_110 {dimension_numbers = #tpu.dot_dimension_numbers<[1], [0], [0], [1], [0, 0, 1, 1], [], []>} : vector<8x128xbf16>, vector<128x32xbf16>, vector<8x32xf32> -> vector<8x32xf32>
    %c0_111 = arith.constant 0 : index
    %c0_112 = arith.constant 0 : index
    %450 = vector.load %arg24[%c0_111, %c0_112] : memref<32x32xbf16, #tpu.memory_space<vmem>>, vector<32x32xbf16>
    %451 = arith.truncf %440 : vector<8x32xf32> to vector<8x32xbf16>
    %cst_113 = arith.constant dense<0.000000e+00> : vector<8x32xf32>
    %452 = tpu.matmul %451, %450, %cst_113 {dimension_numbers = #tpu.dot_dimension_numbers<[1], [0], [0], [1], [0, 0, 1, 1], [], []>} : vector<8x32xbf16>, vector<32x32xbf16>, vector<8x32xf32> -> vector<8x32xf32>
    %453 = arith.negf %452 : vector<8x32xf32>
    %454 = math.exp %453 : vector<8x32xf32>
    %cst_114 = arith.constant 1.000000e+00 : f32
    %455 = vector.broadcast %cst_114 : f32 to vector<8x32xf32>
    %456 = arith.addf %455, %454 : vector<8x32xf32>
    %457 = arith.divf %455, %456 : vector<8x32xf32>
    %458 = arith.mulf %457, %449 : vector<8x32xf32>
    %459 = arith.addf %387, %458 : vector<8x32xf32>
    %c0_115 = arith.constant 0 : index
    %c0_116 = arith.constant 0 : index
    %c0_117 = arith.constant 0 : index
    %460 = vector.load %arg26[%c0_115, %c0_116, %c0_117] : memref<1x8x32xf32, #tpu.memory_space<vmem>>, vector<1x8x32xf32>
    %461 = vector.shape_cast %460 : vector<1x8x32xf32> to vector<8x32xf32>
    %462 = vector.shape_cast %459 : vector<8x32xf32> to vector<1x8x32xf32>
    tpu.vector_store %arg26[%c0_115, %c0_116, %c0_117], %462 {strides = array<i32>} : memref<1x8x32xf32, #tpu.memory_space<vmem>>, vector<1x8x32xf32>,
    %463 = vector.extract_strided_slice %415 {offsets = [7, 0], sizes = [1, 32], strides = [1, 1]} : vector<8x32xf32> to vector<1x32xf32>
    %c0_118 = arith.constant 0 : index
    %c0_119 = arith.constant 0 : index
    %c0_120 = arith.constant 0 : index
    %464 = vector.load %arg29[%c0_118, %c0_119, %c0_120] : memref<1x1x32xf32, #tpu.memory_space<vmem>>, vector<1x1x32xf32>
    %465 = vector.shape_cast %464 : vector<1x1x32xf32> to vector<1x32xf32>
    %466 = vector.shape_cast %463 : vector<1x32xf32> to vector<1x1x32xf32>
    tpu.vector_store %arg29[%c0_118, %c0_119, %c0_120], %466 {strides = array<i32>} : memref<1x1x32xf32, #tpu.memory_space<vmem>>, vector<1x1x32xf32>,
    return
  }
  func.func @transform_0(%arg0: i32, %arg1: i32) -> (i32, i32, i32) {
    %c0_i32 = arith.constant 0 : i32
    %c0_i32_0 = arith.constant 0 : i32
    return %arg0, %arg1, %c0_i32 : i32, i32, i32
  }
  func.func @transform_1(%arg0: i32, %arg1: i32) -> (i32, i32, i32) {
    %c0_i32 = arith.constant 0 : i32
    %c0_i32_0 = arith.constant 0 : i32
    %c0_i32_1 = arith.constant 0 : i32
    return %arg0, %c0_i32, %c0_i32_0 : i32, i32, i32
  }
  func.func @transform_2(%arg0: i32, %arg1: i32) -> (i32, i32, i32) {
    %c0_i32 = arith.constant 0 : i32
    %c0_i32_0 = arith.constant 0 : i32
    %c0_i32_1 = arith.constant 0 : i32
    return %arg0, %c0_i32, %c0_i32_0 : i32, i32, i32
  }
  func.func @transform_3(%arg0: i32, %arg1: i32) -> (i32, i32, i32) {
    %c0_i32 = arith.constant 0 : i32
    %c0_i32_0 = arith.constant 0 : i32
    %c0_i32_1 = arith.constant 0 : i32
    return %arg0, %c0_i32, %c0_i32_0 : i32, i32, i32
  }
  func.func @transform_4(%arg0: i32, %arg1: i32) -> (i32, i32) {
    %c0_i32 = arith.constant 0 : i32
    %c0_i32_0 = arith.constant 0 : i32
    %c0_i32_1 = arith.constant 0 : i32
    return %c0_i32, %c0_i32_0 : i32, i32
  }
  func.func @transform_5(%arg0: i32, %arg1: i32) -> (i32, i32) {
    %c0_i32 = arith.constant 0 : i32
    %c0_i32_0 = arith.constant 0 : i32
    %c0_i32_1 = arith.constant 0 : i32
    return %c0_i32, %c0_i32_0 : i32, i32
  }
  func.func @transform_6(%arg0: i32, %arg1: i32) -> (i32, i32) {
    %c0_i32 = arith.constant 0 : i32
    %c0_i32_0 = arith.constant 0 : i32
    %c0_i32_1 = arith.constant 0 : i32
    return %c0_i32, %c0_i32_0 : i32, i32
  }
  func.func @transform_7(%arg0: i32, %arg1: i32) -> (i32, i32) {
    %c0_i32 = arith.constant 0 : i32
    %c0_i32_0 = arith.constant 0 : i32
    %c0_i32_1 = arith.constant 0 : i32
    return %c0_i32, %c0_i32_0 : i32, i32
  }
  func.func @transform_8(%arg0: i32, %arg1: i32) -> (i32, i32) {
    %c0_i32 = arith.constant 0 : i32
    %c0_i32_0 = arith.constant 0 : i32
    %c0_i32_1 = arith.constant 0 : i32
    return %c0_i32, %c0_i32_0 : i32, i32
  }
  func.func @transform_9(%arg0: i32, %arg1: i32) -> (i32, i32) {
    %c0_i32 = arith.constant 0 : i32
    %c0_i32_0 = arith.constant 0 : i32
    %c0_i32_1 = arith.constant 0 : i32
    return %c0_i32, %c0_i32_0 : i32, i32
  }
  func.func @transform_10(%arg0: i32, %arg1: i32) -> (i32, i32) {
    %c0_i32 = arith.constant 0 : i32
    %c0_i32_0 = arith.constant 0 : i32
    %c0_i32_1 = arith.constant 0 : i32
    return %c0_i32, %c0_i32_0 : i32, i32
  }
  func.func @transform_11(%arg0: i32, %arg1: i32) -> (i32, i32) {
    %c0_i32 = arith.constant 0 : i32
    %c0_i32_0 = arith.constant 0 : i32
    %c0_i32_1 = arith.constant 0 : i32
    return %c0_i32, %c0_i32_0 : i32, i32
  }
  func.func @transform_12(%arg0: i32, %arg1: i32) -> (i32, i32) {
    %c0_i32 = arith.constant 0 : i32
    %c0_i32_0 = arith.constant 0 : i32
    %c0_i32_1 = arith.constant 0 : i32
    return %c0_i32, %c0_i32_0 : i32, i32
  }
  func.func @transform_13(%arg0: i32, %arg1: i32) -> (i32, i32) {
    %c0_i32 = arith.constant 0 : i32
    %c0_i32_0 = arith.constant 0 : i32
    %c0_i32_1 = arith.constant 0 : i32
    return %c0_i32, %c0_i32_0 : i32, i32
  }
  func.func @transform_14(%arg0: i32, %arg1: i32) -> (i32, i32) {
    %c0_i32 = arith.constant 0 : i32
    %c0_i32_0 = arith.constant 0 : i32
    %c0_i32_1 = arith.constant 0 : i32
    return %c0_i32, %c0_i32_0 : i32, i32
  }
  func.func @transform_15(%arg0: i32, %arg1: i32) -> (i32, i32) {
    %c0_i32 = arith.constant 0 : i32
    %c0_i32_0 = arith.constant 0 : i32
    %c0_i32_1 = arith.constant 0 : i32
    return %c0_i32, %c0_i32_0 : i32, i32
  }
  func.func @transform_16(%arg0: i32, %arg1: i32) -> (i32, i32) {
    %c0_i32 = arith.constant 0 : i32
    %c0_i32_0 = arith.constant 0 : i32
    %c0_i32_1 = arith.constant 0 : i32
    return %c0_i32, %c0_i32_0 : i32, i32
  }
  func.func @transform_17(%arg0: i32, %arg1: i32) -> (i32, i32) {
    %c0_i32 = arith.constant 0 : i32
    %c0_i32_0 = arith.constant 0 : i32
    %c0_i32_1 = arith.constant 0 : i32
    return %c0_i32, %c0_i32_0 : i32, i32
  }
  func.func @transform_18(%arg0: i32, %arg1: i32) -> (i32, i32) {
    %c0_i32 = arith.constant 0 : i32
    %c0_i32_0 = arith.constant 0 : i32
    %c0_i32_1 = arith.constant 0 : i32
    return %c0_i32, %c0_i32_0 : i32, i32
  }
  func.func @transform_19(%arg0: i32, %arg1: i32) -> (i32, i32) {
    %c0_i32 = arith.constant 0 : i32
    %c0_i32_0 = arith.constant 0 : i32
    %c0_i32_1 = arith.constant 0 : i32
    return %c0_i32, %c0_i32_0 : i32, i32
  }
  func.func @transform_20(%arg0: i32, %arg1: i32) -> (i32, i32) {
    %c0_i32 = arith.constant 0 : i32
    %c0_i32_0 = arith.constant 0 : i32
    %c0_i32_1 = arith.constant 0 : i32
    return %c0_i32, %c0_i32_0 : i32, i32
  }
  func.func @transform_21(%arg0: i32, %arg1: i32) -> (i32, i32) {
    %c0_i32 = arith.constant 0 : i32
    %c0_i32_0 = arith.constant 0 : i32
    %c0_i32_1 = arith.constant 0 : i32
    return %c0_i32, %c0_i32_0 : i32, i32
  }
  func.func @transform_22(%arg0: i32, %arg1: i32) -> (i32, i32) {
    %c0_i32 = arith.constant 0 : i32
    %c0_i32_0 = arith.constant 0 : i32
    %c0_i32_1 = arith.constant 0 : i32
    return %c0_i32, %c0_i32_0 : i32, i32
  }
  func.func @transform_23(%arg0: i32, %arg1: i32) -> (i32, i32) {
    %c0_i32 = arith.constant 0 : i32
    %c0_i32_0 = arith.constant 0 : i32
    %c0_i32_1 = arith.constant 0 : i32
    return %c0_i32, %c0_i32_0 : i32, i32
  }
  func.func @transform_24(%arg0: i32, %arg1: i32) -> (i32, i32, i32) {
    %c0_i32 = arith.constant 0 : i32
    %c0_i32_0 = arith.constant 0 : i32
    return %arg0, %arg1, %c0_i32 : i32, i32, i32
  }
  func.func @transform_25(%arg0: i32, %arg1: i32) -> (i32, i32, i32) {
    %c0_i32 = arith.constant 0 : i32
    %c0_i32_0 = arith.constant 0 : i32
    %c0_i32_1 = arith.constant 0 : i32
    return %arg0, %c0_i32, %c0_i32_0 : i32, i32, i32
  }
  func.func @transform_26(%arg0: i32, %arg1: i32) -> (i32, i32, i32) {
    %c0_i32 = arith.constant 0 : i32
    %c0_i32_0 = arith.constant 0 : i32
    %c0_i32_1 = arith.constant 0 : i32
    return %arg0, %c0_i32, %c0_i32_0 : i32, i32, i32
  }
  func.func @transform_27(%arg0: i32, %arg1: i32) -> (i32, i32, i32) {
    %c0_i32 = arith.constant 0 : i32
    %c0_i32_0 = arith.constant 0 : i32
    %c0_i32_1 = arith.constant 0 : i32
    return %arg0, %c0_i32, %c0_i32_0 : i32, i32, i32
  }
}

module attributes {stable_mosaic.version = 11 : i64} {
  func.func @kernel(%arg0: i32, %arg1: i32, %arg2: memref<1x8x32xf32, #tpu.memory_space<vmem>>, %arg3: memref<1x1x32xf32, #tpu.memory_space<vmem>>, %arg4: memref<1x3x32xf32, #tpu.memory_space<vmem>>, %arg5: memref<1x1x32xf32, #tpu.memory_space<vmem>>, %arg6: memref<1x32xf32, #tpu.memory_space<vmem>>, %arg7: memref<1x32xf32, #tpu.memory_space<vmem>>, %arg8: memref<1x32xf32, #tpu.memory_space<vmem>>, %arg9: memref<1x32xf32, #tpu.memory_space<vmem>>, %arg10: memref<1x32xf32, #tpu.memory_space<vmem>>, %arg11: memref<1x32xf32, #tpu.memory_space<vmem>>, %arg12: memref<1x32xf32, #tpu.memory_space<vmem>>, %arg13: memref<1x32xf32, #tpu.memory_space<vmem>>, %arg14: memref<1x32xf32, #tpu.memory_space<vmem>>, %arg15: memref<1x32xf32, #tpu.memory_space<vmem>>, %arg16: memref<1x32xf32, #tpu.memory_space<vmem>>, %arg17: memref<32x32xbf16, #tpu.memory_space<vmem>>, %arg18: memref<32x32xbf16, #tpu.memory_space<vmem>>, %arg19: memref<32x32xbf16, #tpu.memory_space<vmem>>, %arg20: memref<32x32xbf16, #tpu.memory_space<vmem>>, %arg21: memref<1x32xf32, #tpu.memory_space<vmem>>, %arg22: memref<1x32xf32, #tpu.memory_space<vmem>>, %arg23: memref<32x128xbf16, #tpu.memory_space<vmem>>, %arg24: memref<32x32xbf16, #tpu.memory_space<vmem>>, %arg25: memref<128x32xbf16, #tpu.memory_space<vmem>>, %arg26: memref<1x8x32xf32, #tpu.memory_space<vmem>>, %arg27: memref<1x1x32xf32, #tpu.memory_space<vmem>>, %arg28: memref<1x3x32xf32, #tpu.memory_space<vmem>>, %arg29: memref<1x1x32xf32, #tpu.memory_space<vmem>>, %arg30: memref<8x32xf32, #tpu.memory_space<vmem>>, %arg31: memref<8x32xf32, #tpu.memory_space<vmem>>, %arg32: memref<8x32xbf16, #tpu.memory_space<vmem>>) attributes {dimension_semantics = [#tpu.dimension_semantics<parallel>, #tpu.dimension_semantics<arbitrary>], iteration_bounds = array<i64: 2, 2>, scalar_prefetch = 0 : i64, scratch_operands = 3 : i64, tpu.core_type = #tpu.core_type<tc>, window_params = [{transform_indices = @transform_0, window_bounds = array<i64: 1, 8, 32>}, {transform_indices = @transform_1, window_bounds = array<i64: 1, 1, 32>}, {transform_indices = @transform_2, window_bounds = array<i64: 1, 3, 32>}, {transform_indices = @transform_3, window_bounds = array<i64: 1, 1, 32>}, {pipeline_mode = #tpu.pipeline_mode<synchronous>, transform_indices = @transform_4, window_bounds = array<i64: 1, 32>}, {pipeline_mode = #tpu.pipeline_mode<synchronous>, transform_indices = @transform_5, window_bounds = array<i64: 1, 32>}, {pipeline_mode = #tpu.pipeline_mode<synchronous>, transform_indices = @transform_6, window_bounds = array<i64: 1, 32>}, {pipeline_mode = #tpu.pipeline_mode<synchronous>, transform_indices = @transform_7, window_bounds = array<i64: 1, 32>}, {pipeline_mode = #tpu.pipeline_mode<synchronous>, transform_indices = @transform_8, window_bounds = array<i64: 1, 32>}, {pipeline_mode = #tpu.pipeline_mode<synchronous>, transform_indices = @transform_9, window_bounds = array<i64: 1, 32>}, {pipeline_mode = #tpu.pipeline_mode<synchronous>, transform_indices = @transform_10, window_bounds = array<i64: 1, 32>}, {pipeline_mode = #tpu.pipeline_mode<synchronous>, transform_indices = @transform_11, window_bounds = array<i64: 1, 32>}, {pipeline_mode = #tpu.pipeline_mode<synchronous>, transform_indices = @transform_12, window_bounds = array<i64: 1, 32>}, {pipeline_mode = #tpu.pipeline_mode<synchronous>, transform_indices = @transform_13, window_bounds = array<i64: 1, 32>}, {pipeline_mode = #tpu.pipeline_mode<synchronous>, transform_indices = @transform_14, window_bounds = array<i64: 1, 32>}, {pipeline_mode = #tpu.pipeline_mode<synchronous>, transform_indices = @transform_15, window_bounds = array<i64: 32, 32>}, {pipeline_mode = #tpu.pipeline_mode<synchronous>, transform_indices = @transform_16, window_bounds = array<i64: 32, 32>}, {pipeline_mode = #tpu.pipeline_mode<synchronous>, transform_indices = @transform_17, window_bounds = array<i64: 32, 32>}, {pipeline_mode = #tpu.pipeline_mode<synchronous>, transform_indices = @transform_18, window_bounds = array<i64: 32, 32>}, {pipeline_mode = #tpu.pipeline_mode<synchronous>, transform_indices = @transform_19, window_bounds = array<i64: 1, 32>}, {pipeline_mode = #tpu.pipeline_mode<synchronous>, transform_indices = @transform_20, window_bounds = array<i64: 1, 32>}, {pipeline_mode = #tpu.pipeline_mode<synchronous>, transform_indices = @transform_21, window_bounds = array<i64: 32, 128>}, {pipeline_mode = #tpu.pipeline_mode<synchronous>, transform_indices = @transform_22, window_bounds = array<i64: 32, 32>}, {pipeline_mode = #tpu.pipeline_mode<synchronous>, transform_indices = @transform_23, window_bounds = array<i64: 128, 32>}, {transform_indices = @transform_24, window_bounds = array<i64: 1, 8, 32>}, {transform_indices = @transform_25, window_bounds = array<i64: 1, 1, 32>}, {transform_indices = @transform_26, window_bounds = array<i64: 1, 3, 32>}, {transform_indices = @transform_27, window_bounds = array<i64: 1, 1, 32>}]} {
    %c0_i32 = arith.constant 0 : i32
    %0 = arith.cmpi eq, %arg1, %c0_i32 : i32
    %1 = arith.extui %0 : i1 to i32
    %c0_i32_0 = arith.constant 0 : i32
    %2 = arith.cmpi ne, %1, %c0_i32_0 : i32
    scf.if %2 {
      %c0_121 = arith.constant 0 : index
      %c0_122 = arith.constant 0 : index
      %c0_123 = arith.constant 0 : index
      %467 = vector.load %arg3[%c0_121, %c0_122, %c0_123] : memref<1x1x32xf32, #tpu.memory_space<vmem>>, vector<1x1x32xf32>
      %468 = vector.shape_cast %467 : vector<1x1x32xf32> to vector<1x32xf32>
      %c0_124 = arith.constant 0 : index
      %c0_125 = arith.constant 0 : index
      %c0_126 = arith.constant 0 : index
      %469 = vector.load %arg27[%c0_124, %c0_125, %c0_126] : memref<1x1x32xf32, #tpu.memory_space<vmem>>, vector<1x1x32xf32>
      %470 = vector.shape_cast %469 : vector<1x1x32xf32> to vector<1x32xf32>
      %471 = vector.shape_cast %468 : vector<1x32xf32> to vector<1x1x32xf32>
      tpu.vector_store %arg27[%c0_124, %c0_125, %c0_126], %471 {strides = array<i32>} : memref<1x1x32xf32, #tpu.memory_space<vmem>>, vector<1x1x32xf32>,
      %c0_127 = arith.constant 0 : index
      %c0_128 = arith.constant 0 : index
      %c0_129 = arith.constant 0 : index
      %472 = vector.load %arg5[%c0_127, %c0_128, %c0_129] : memref<1x1x32xf32, #tpu.memory_space<vmem>>, vector<1x1x32xf32>
      %473 = vector.shape_cast %472 : vector<1x1x32xf32> to vector<1x32xf32>
      %c0_130 = arith.constant 0 : index
      %c0_131 = arith.constant 0 : index
      %c0_132 = arith.constant 0 : index
      %474 = vector.load %arg29[%c0_130, %c0_131, %c0_132] : memref<1x1x32xf32, #tpu.memory_space<vmem>>, vector<1x1x32xf32>
      %475 = vector.shape_cast %474 : vector<1x1x32xf32> to vector<1x32xf32>
      %476 = vector.shape_cast %473 : vector<1x32xf32> to vector<1x1x32xf32>
      tpu.vector_store %arg29[%c0_130, %c0_131, %c0_132], %476 {strides = array<i32>} : memref<1x1x32xf32, #tpu.memory_space<vmem>>, vector<1x1x32xf32>,
      %c0_133 = arith.constant 0 : index
      %c0_134 = arith.constant 0 : index
      %c0_135 = arith.constant 0 : index
      %477 = vector.load %arg4[%c0_133, %c0_134, %c0_135] : memref<1x3x32xf32, #tpu.memory_space<vmem>>, vector<1x3x32xf32>
      %478 = vector.shape_cast %477 : vector<1x3x32xf32> to vector<3x32xf32>
      %c0_136 = arith.constant 0 : index
      %c0_137 = arith.constant 0 : index
      %c0_138 = arith.constant 0 : index
      %479 = vector.load %arg28[%c0_136, %c0_137, %c0_138] : memref<1x3x32xf32, #tpu.memory_space<vmem>>, vector<1x3x32xf32>
      %480 = vector.shape_cast %479 : vector<1x3x32xf32> to vector<3x32xf32>
      %481 = vector.shape_cast %478 : vector<3x32xf32> to vector<1x3x32xf32>
      tpu.vector_store %arg28[%c0_136, %c0_137, %c0_138], %481 {strides = array<i32>} : memref<1x3x32xf32, #tpu.memory_space<vmem>>, vector<1x3x32xf32>,
    } else {
    }
    %c0 = arith.constant 0 : index
    %c0_1 = arith.constant 0 : index
    %c0_2 = arith.constant 0 : index
    %3 = vector.load %arg2[%c0, %c0_1, %c0_2] : memref<1x8x32xf32, #tpu.memory_space<vmem>>, vector<1x8x32xf32>
    %4 = vector.shape_cast %3 : vector<1x8x32xf32> to vector<8x32xf32>
    %c0_3 = arith.constant 0 : index
    %c0_4 = arith.constant 0 : index
    %5 = vector.load %arg6[%c0_3, %c0_4] : memref<1x32xf32, #tpu.memory_space<vmem>>, vector<1x32xf32>
    %c0_5 = arith.constant 0 : index
    %c0_6 = arith.constant 0 : index
    %6 = vector.load %arg7[%c0_5, %c0_6] : memref<1x32xf32, #tpu.memory_space<vmem>>, vector<1x32xf32>
    %cst = arith.constant dense<0.000000e+00> : vector<8xf32>
    %7 = vector.multi_reduction <add>, %4, %cst [1] : vector<8x32xf32> to vector<8xf32>
    %8 = vector.shape_cast %7 : vector<8xf32> to vector<8x1xf32>
    %cst_7 = arith.constant 3.200000e+01 : f32
    %9 = vector.broadcast %cst_7 : f32 to vector<8x1xf32>
    %10 = arith.divf %8, %9 : vector<8x1xf32>
    %11 = vector.broadcast %10 : vector<8x1xf32> to vector<8x32xf32>
    %12 = arith.subf %4, %11 : vector<8x32xf32>
    %13 = arith.mulf %12, %12 : vector<8x32xf32>
    %cst_8 = arith.constant dense<0.000000e+00> : vector<8xf32>
    %14 = vector.multi_reduction <add>, %13, %cst_8 [1] : vector<8x32xf32> to vector<8xf32>
    %15 = vector.shape_cast %14 : vector<8xf32> to vector<8x1xf32>
    %cst_9 = arith.constant 3.200000e+01 : f32
    %16 = vector.broadcast %cst_9 : f32 to vector<8x1xf32>
    %17 = arith.divf %15, %16 : vector<8x1xf32>
    %18 = vector.broadcast %10 : vector<8x1xf32> to vector<8x32xf32>
    %19 = arith.subf %4, %18 : vector<8x32xf32>
    %cst_10 = arith.constant 9.99999974E-6 : f32
    %20 = vector.broadcast %cst_10 : f32 to vector<8x1xf32>
    %21 = arith.addf %17, %20 : vector<8x1xf32>
    %22 = math.rsqrt %21 : vector<8x1xf32>
    %23 = vector.broadcast %22 : vector<8x1xf32> to vector<8x32xf32>
    %24 = arith.mulf %19, %23 : vector<8x32xf32>
    %25 = vector.broadcast %5 : vector<1x32xf32> to vector<8x32xf32>
    %26 = arith.mulf %24, %25 : vector<8x32xf32>
    %27 = vector.broadcast %6 : vector<1x32xf32> to vector<8x32xf32>
    %28 = arith.addf %26, %27 : vector<8x32xf32>
    %c0_11 = arith.constant 0 : index
    %c0_12 = arith.constant 0 : index
    %29 = vector.load %arg8[%c0_11, %c0_12] : memref<1x32xf32, #tpu.memory_space<vmem>>, vector<1x32xf32>
    %c0_13 = arith.constant 0 : index
    %c0_14 = arith.constant 0 : index
    %30 = vector.load %arg9[%c0_13, %c0_14] : memref<1x32xf32, #tpu.memory_space<vmem>>, vector<1x32xf32>
    %cst_15 = arith.constant dense<0.000000e+00> : vector<8xf32>
    %31 = vector.multi_reduction <add>, %28, %cst_15 [1] : vector<8x32xf32> to vector<8xf32>
    %32 = vector.shape_cast %31 : vector<8xf32> to vector<8x1xf32>
    %cst_16 = arith.constant 3.200000e+01 : f32
    %33 = vector.broadcast %cst_16 : f32 to vector<8x1xf32>
    %34 = arith.divf %32, %33 : vector<8x1xf32>
    %35 = vector.broadcast %34 : vector<8x1xf32> to vector<8x32xf32>
    %36 = arith.subf %28, %35 : vector<8x32xf32>
    %37 = arith.mulf %36, %36 : vector<8x32xf32>
    %cst_17 = arith.constant dense<0.000000e+00> : vector<8xf32>
    %38 = vector.multi_reduction <add>, %37, %cst_17 [1] : vector<8x32xf32> to vector<8xf32>
    %39 = vector.shape_cast %38 : vector<8xf32> to vector<8x1xf32>
    %cst_18 = arith.constant 3.200000e+01 : f32
    %40 = vector.broadcast %cst_18 : f32 to vector<8x1xf32>
    %41 = arith.divf %39, %40 : vector<8x1xf32>
    %42 = vector.broadcast %34 : vector<8x1xf32> to vector<8x32xf32>
    %43 = arith.subf %28, %42 : vector<8x32xf32>
    %cst_19 = arith.constant 9.99999974E-6 : f32
    %44 = vector.broadcast %cst_19 : f32 to vector<8x1xf32>
    %45 = arith.addf %41, %44 : vector<8x1xf32>
    %46 = math.rsqrt %45 : vector<8x1xf32>
    %47 = vector.broadcast %46 : vector<8x1xf32> to vector<8x32xf32>
    %48 = arith.mulf %43, %47 : vector<8x32xf32>
    %49 = vector.broadcast %29 : vector<1x32xf32> to vector<8x32xf32>
    %50 = arith.mulf %48, %49 : vector<8x32xf32>
    %51 = vector.broadcast %30 : vector<1x32xf32> to vector<8x32xf32>
    %52 = arith.addf %50, %51 : vector<8x32xf32>
    %c0_20 = arith.constant 0 : index
    %c0_21 = arith.constant 0 : index
    %c0_22 = arith.constant 0 : index
    %53 = vector.load %arg27[%c0_20, %c0_21, %c0_22] : memref<1x1x32xf32, #tpu.memory_space<vmem>>, vector<1x1x32xf32>
    %54 = vector.shape_cast %53 : vector<1x1x32xf32> to vector<1x32xf32>
    %c1_i32 = arith.constant 1 : i32
    %55 = tpu.dynamic_rotate %52 by %c1_i32 dim 0 : vector<8x32xf32>, i32 -> vector<8x32xf32>
    %56 = tpu.iota {dimensions = array<i32: 0>} : vector<8x32xi32>
    %c0_i32_23 = arith.constant 0 : i32
    %57 = vector.broadcast %c0_i32_23 : i32 to vector<8x32xi32>
    %58 = arith.cmpi eq, %56, %57 : vector<8x32xi32>
    %59 = vector.shape_cast %54 : vector<1x32xf32> to vector<1x32xf32>
    %60 = vector.broadcast %59 : vector<1x32xf32> to vector<8x32xf32>
    %61 = arith.select %58, %60, %55 : vector<8x32xi1>, vector<8x32xf32>
    %c0_24 = arith.constant 0 : index
    %c0_25 = arith.constant 0 : index
    %62 = vector.load %arg12[%c0_24, %c0_25] : memref<1x32xf32, #tpu.memory_space<vmem>>, vector<1x32xf32>
    %c0_26 = arith.constant 0 : index
    %c0_27 = arith.constant 0 : index
    %63 = vector.load %arg13[%c0_26, %c0_27] : memref<1x32xf32, #tpu.memory_space<vmem>>, vector<1x32xf32>
    %c0_28 = arith.constant 0 : index
    %c0_29 = arith.constant 0 : index
    %64 = vector.load %arg14[%c0_28, %c0_29] : memref<1x32xf32, #tpu.memory_space<vmem>>, vector<1x32xf32>
    %65 = vector.broadcast %62 : vector<1x32xf32> to vector<8x32xf32>
    %66 = arith.mulf %52, %65 : vector<8x32xf32>
    %cst_30 = arith.constant 1.000000e+00 : f32
    %67 = vector.broadcast %cst_30 : f32 to vector<1x32xf32>
    %68 = arith.subf %67, %62 : vector<1x32xf32>
    %69 = vector.broadcast %68 : vector<1x32xf32> to vector<8x32xf32>
    %70 = arith.mulf %61, %69 : vector<8x32xf32>
    %71 = arith.addf %66, %70 : vector<8x32xf32>
    %72 = vector.broadcast %63 : vector<1x32xf32> to vector<8x32xf32>
    %73 = arith.mulf %52, %72 : vector<8x32xf32>
    %cst_31 = arith.constant 1.000000e+00 : f32
    %74 = vector.broadcast %cst_31 : f32 to vector<1x32xf32>
    %75 = arith.subf %74, %63 : vector<1x32xf32>
    %76 = vector.broadcast %75 : vector<1x32xf32> to vector<8x32xf32>
    %77 = arith.mulf %61, %76 : vector<8x32xf32>
    %78 = arith.addf %73, %77 : vector<8x32xf32>
    %79 = vector.broadcast %64 : vector<1x32xf32> to vector<8x32xf32>
    %80 = arith.mulf %52, %79 : vector<8x32xf32>
    %cst_32 = arith.constant 1.000000e+00 : f32
    %81 = vector.broadcast %cst_32 : f32 to vector<1x32xf32>
    %82 = arith.subf %81, %64 : vector<1x32xf32>
    %83 = vector.broadcast %82 : vector<1x32xf32> to vector<8x32xf32>
    %84 = arith.mulf %61, %83 : vector<8x32xf32>
    %85 = arith.addf %80, %84 : vector<8x32xf32>
    %c0_33 = arith.constant 0 : index
    %c0_34 = arith.constant 0 : index
    %86 = vector.load %arg17[%c0_33, %c0_34] : memref<32x32xbf16, #tpu.memory_space<vmem>>, vector<32x32xbf16>
    %87 = arith.truncf %71 : vector<8x32xf32> to vector<8x32xbf16>
    %cst_35 = arith.constant dense<0.000000e+00> : vector<8x32xf32>
    %88 = tpu.matmul %87, %86, %cst_35 {dimension_numbers = #tpu.dot_dimension_numbers<[1], [0], [0], [1], [0, 0, 1, 1], [], []>} : vector<8x32xbf16>, vector<32x32xbf16>, vector<8x32xf32> -> vector<8x32xf32>
    %c0_36 = arith.constant 0 : index
    %c0_37 = arith.constant 0 : index
    %89 = vector.load %arg30[%c0_36, %c0_37] : memref<8x32xf32, #tpu.memory_space<vmem>>, vector<8x32xf32>
    tpu.vector_store %arg30[%c0_36, %c0_37], %88 {strides = array<i32>} : memref<8x32xf32, #tpu.memory_space<vmem>>, vector<8x32xf32>,
    %c0_38 = arith.constant 0 : index
    %c0_39 = arith.constant 0 : index
    %90 = vector.load %arg18[%c0_38, %c0_39] : memref<32x32xbf16, #tpu.memory_space<vmem>>, vector<32x32xbf16>
    %91 = arith.truncf %78 : vector<8x32xf32> to vector<8x32xbf16>
    %cst_40 = arith.constant dense<0.000000e+00> : vector<8x32xf32>
    %92 = tpu.matmul %91, %90, %cst_40 {dimension_numbers = #tpu.dot_dimension_numbers<[1], [0], [0], [1], [0, 0, 1, 1], [], []>} : vector<8x32xbf16>, vector<32x32xbf16>, vector<8x32xf32> -> vector<8x32xf32>
    %c0_41 = arith.constant 0 : index
    %c0_42 = arith.constant 0 : index
    %93 = vector.load %arg31[%c0_41, %c0_42] : memref<8x32xf32, #tpu.memory_space<vmem>>, vector<8x32xf32>
    tpu.vector_store %arg31[%c0_41, %c0_42], %92 {strides = array<i32>} : memref<8x32xf32, #tpu.memory_space<vmem>>, vector<8x32xf32>,
    %c0_43 = arith.constant 0 : index
    %c0_44 = arith.constant 0 : index
    %94 = vector.load %arg19[%c0_43, %c0_44] : memref<32x32xbf16, #tpu.memory_space<vmem>>, vector<32x32xbf16>
    %95 = arith.truncf %85 : vector<8x32xf32> to vector<8x32xbf16>
    %cst_45 = arith.constant dense<0.000000e+00> : vector<8x32xf32>
    %96 = tpu.matmul %95, %94, %cst_45 {dimension_numbers = #tpu.dot_dimension_numbers<[1], [0], [0], [1], [0, 0, 1, 1], [], []>} : vector<8x32xbf16>, vector<32x32xbf16>, vector<8x32xf32> -> vector<8x32xf32>
    %97 = arith.negf %96 : vector<8x32xf32>
    %98 = math.exp %97 : vector<8x32xf32>
    %cst_46 = arith.constant 1.000000e+00 : f32
    %99 = vector.broadcast %cst_46 : f32 to vector<8x32xf32>
    %100 = arith.addf %99, %98 : vector<8x32xf32>
    %101 = arith.divf %99, %100 : vector<8x32xf32>
    %c0_47 = arith.constant 0 : index
    %c0_48 = arith.constant 0 : index
    %102 = vector.load %arg15[%c0_47, %c0_48] : memref<1x32xf32, #tpu.memory_space<vmem>>, vector<1x32xf32>
    %103 = math.exp %102 : vector<1x32xf32>
    %cst_49 = arith.constant 0.000000e+00 : f32
    %104 = vector.broadcast %cst_49 : f32 to vector<1x32xf32>
    %105 = arith.subf %104, %103 : vector<1x32xf32>
    %c0_50 = arith.constant 0 : index
    %c0_51 = arith.constant 0 : index
    %106 = vector.load %arg16[%c0_50, %c0_51] : memref<1x32xf32, #tpu.memory_space<vmem>>, vector<1x32xf32>
    %c0_52 = arith.constant 0 : index
    %c0_53 = arith.constant 0 : index
    %c0_54 = arith.constant 0 : index
    %107 = vector.load %arg28[%c0_52, %c0_53, %c0_54] : memref<1x3x32xf32, #tpu.memory_space<vmem>>, vector<1x1x32xf32>
    %108 = vector.shape_cast %107 : vector<1x1x32xf32> to vector<1x32xf32>
    %c0_55 = arith.constant 0 : index
    %c1 = arith.constant 1 : index
    %c0_56 = arith.constant 0 : index
    %109 = vector.load %arg28[%c0_55, %c1, %c0_56] : memref<1x3x32xf32, #tpu.memory_space<vmem>>, vector<1x1x32xf32>
    %110 = vector.shape_cast %109 : vector<1x1x32xf32> to vector<1x32xf32>
    %c0_57 = arith.constant 0 : index
    %c2 = arith.constant 2 : index
    %c0_58 = arith.constant 0 : index
    %111 = vector.load %arg28[%c0_57, %c2, %c0_58] : memref<1x3x32xf32, #tpu.memory_space<vmem>>, vector<1x1x32xf32>
    %112 = vector.shape_cast %111 : vector<1x1x32xf32> to vector<1x32xf32>
    %113 = tpu.iota {dimensions = array<i32: 0>} : vector<8x32xi32>
    %c0_i32_59 = arith.constant 0 : i32
    %c8_i32 = arith.constant 8 : i32
    %114 = arith.muli %c0_i32_59, %c8_i32 : i32
    %115 = tpu.assume_multiple %114, 8 : i32
    %116 = arith.index_cast %115 : i32 to index
    %c0_60 = arith.constant 0 : index
    %117 = vector.load %arg30[%116, %c0_60] : memref<8x32xf32, #tpu.memory_space<vmem>>, vector<8x32xf32>
    %118 = arith.index_cast %115 : i32 to index
    %c0_61 = arith.constant 0 : index
    %119 = vector.load %arg31[%118, %c0_61] : memref<8x32xf32, #tpu.memory_space<vmem>>, vector<8x32xf32>
    %cst_62 = arith.constant 0.000000e+00 : f32
    %120 = vector.broadcast %cst_62 : f32 to vector<8x32xf32>
    %121 = vector.extract_strided_slice %117 {offsets = [0, 0], sizes = [1, 32], strides = [1, 1]} : vector<8x32xf32> to vector<1x32xf32>
    %122 = vector.extract_strided_slice %119 {offsets = [0, 0], sizes = [1, 32], strides = [1, 1]} : vector<8x32xf32> to vector<1x32xf32>
    %123 = arith.addf %106, %121 : vector<1x32xf32>
    %124 = arith.maximumf %112, %123 : vector<1x32xf32>
    %125 = arith.subf %112, %124 : vector<1x32xf32>
    %126 = math.exp %125 : vector<1x32xf32>
    %127 = arith.subf %123, %124 : vector<1x32xf32>
    %128 = math.exp %127 : vector<1x32xf32>
    %129 = arith.mulf %126, %108 : vector<1x32xf32>
    %130 = arith.mulf %128, %122 : vector<1x32xf32>
    %131 = arith.addf %129, %130 : vector<1x32xf32>
    %132 = arith.mulf %126, %110 : vector<1x32xf32>
    %133 = arith.addf %132, %128 : vector<1x32xf32>
    %134 = tpu.reciprocal %133 {approx = true} : vector<1x32xf32> -> vector<1x32xf32>
    %135 = arith.mulf %131, %134 : vector<1x32xf32>
    %c0_i32_63 = arith.constant 0 : i32
    %136 = vector.broadcast %c0_i32_63 : i32 to vector<8x32xi32>
    %137 = arith.cmpi eq, %113, %136 : vector<8x32xi32>
    %138 = vector.shape_cast %135 : vector<1x32xf32> to vector<1x32xf32>
    %139 = vector.broadcast %138 : vector<1x32xf32> to vector<8x32xf32>
    %140 = arith.select %137, %139, %120 : vector<8x32xi1>, vector<8x32xf32>
    %141 = arith.addf %105, %112 : vector<1x32xf32>
    %142 = arith.maximumf %141, %121 : vector<1x32xf32>
    %143 = arith.subf %141, %142 : vector<1x32xf32>
    %144 = math.exp %143 : vector<1x32xf32>
    %145 = arith.subf %121, %142 : vector<1x32xf32>
    %146 = math.exp %145 : vector<1x32xf32>
    %147 = arith.mulf %144, %108 : vector<1x32xf32>
    %148 = arith.mulf %146, %122 : vector<1x32xf32>
    %149 = arith.addf %147, %148 : vector<1x32xf32>
    %150 = arith.mulf %144, %110 : vector<1x32xf32>
    %151 = arith.addf %150, %146 : vector<1x32xf32>
    %152 = vector.extract_strided_slice %117 {offsets = [1, 0], sizes = [1, 32], strides = [1, 1]} : vector<8x32xf32> to vector<1x32xf32>
    %153 = vector.extract_strided_slice %119 {offsets = [1, 0], sizes = [1, 32], strides = [1, 1]} : vector<8x32xf32> to vector<1x32xf32>
    %154 = arith.addf %106, %152 : vector<1x32xf32>
    %155 = arith.maximumf %142, %154 : vector<1x32xf32>
    %156 = arith.subf %142, %155 : vector<1x32xf32>
    %157 = math.exp %156 : vector<1x32xf32>
    %158 = arith.subf %154, %155 : vector<1x32xf32>
    %159 = math.exp %158 : vector<1x32xf32>
    %160 = arith.mulf %157, %149 : vector<1x32xf32>
    %161 = arith.mulf %159, %153 : vector<1x32xf32>
    %162 = arith.addf %160, %161 : vector<1x32xf32>
    %163 = arith.mulf %157, %151 : vector<1x32xf32>
    %164 = arith.addf %163, %159 : vector<1x32xf32>
    %165 = tpu.reciprocal %164 {approx = true} : vector<1x32xf32> -> vector<1x32xf32>
    %166 = arith.mulf %162, %165 : vector<1x32xf32>
    %c1_i32_64 = arith.constant 1 : i32
    %167 = vector.broadcast %c1_i32_64 : i32 to vector<8x32xi32>
    %168 = arith.cmpi eq, %113, %167 : vector<8x32xi32>
    %169 = vector.shape_cast %166 : vector<1x32xf32> to vector<1x32xf32>
    %170 = vector.broadcast %169 : vector<1x32xf32> to vector<8x32xf32>
    %171 = arith.select %168, %170, %140 : vector<8x32xi1>, vector<8x32xf32>
    %172 = arith.addf %105, %142 : vector<1x32xf32>
    %173 = arith.maximumf %172, %152 : vector<1x32xf32>
    %174 = arith.subf %172, %173 : vector<1x32xf32>
    %175 = math.exp %174 : vector<1x32xf32>
    %176 = arith.subf %152, %173 : vector<1x32xf32>
    %177 = math.exp %176 : vector<1x32xf32>
    %178 = arith.mulf %175, %149 : vector<1x32xf32>
    %179 = arith.mulf %177, %153 : vector<1x32xf32>
    %180 = arith.addf %178, %179 : vector<1x32xf32>
    %181 = arith.mulf %175, %151 : vector<1x32xf32>
    %182 = arith.addf %181, %177 : vector<1x32xf32>
    %183 = vector.extract_strided_slice %117 {offsets = [2, 0], sizes = [1, 32], strides = [1, 1]} : vector<8x32xf32> to vector<1x32xf32>
    %184 = vector.extract_strided_slice %119 {offsets = [2, 0], sizes = [1, 32], strides = [1, 1]} : vector<8x32xf32> to vector<1x32xf32>
    %185 = arith.addf %106, %183 : vector<1x32xf32>
    %186 = arith.maximumf %173, %185 : vector<1x32xf32>
    %187 = arith.subf %173, %186 : vector<1x32xf32>
    %188 = math.exp %187 : vector<1x32xf32>
    %189 = arith.subf %185, %186 : vector<1x32xf32>
    %190 = math.exp %189 : vector<1x32xf32>
    %191 = arith.mulf %188, %180 : vector<1x32xf32>
    %192 = arith.mulf %190, %184 : vector<1x32xf32>
    %193 = arith.addf %191, %192 : vector<1x32xf32>
    %194 = arith.mulf %188, %182 : vector<1x32xf32>
    %195 = arith.addf %194, %190 : vector<1x32xf32>
    %196 = tpu.reciprocal %195 {approx = true} : vector<1x32xf32> -> vector<1x32xf32>
    %197 = arith.mulf %193, %196 : vector<1x32xf32>
    %c2_i32 = arith.constant 2 : i32
    %198 = vector.broadcast %c2_i32 : i32 to vector<8x32xi32>
    %199 = arith.cmpi eq, %113, %198 : vector<8x32xi32>
    %200 = vector.shape_cast %197 : vector<1x32xf32> to vector<1x32xf32>
    %201 = vector.broadcast %200 : vector<1x32xf32> to vector<8x32xf32>
    %202 = arith.select %199, %201, %171 : vector<8x32xi1>, vector<8x32xf32>
    %203 = arith.addf %105, %173 : vector<1x32xf32>
    %204 = arith.maximumf %203, %183 : vector<1x32xf32>
    %205 = arith.subf %203, %204 : vector<1x32xf32>
    %206 = math.exp %205 : vector<1x32xf32>
    %207 = arith.subf %183, %204 : vector<1x32xf32>
    %208 = math.exp %207 : vector<1x32xf32>
    %209 = arith.mulf %206, %180 : vector<1x32xf32>
    %210 = arith.mulf %208, %184 : vector<1x32xf32>
    %211 = arith.addf %209, %210 : vector<1x32xf32>
    %212 = arith.mulf %206, %182 : vector<1x32xf32>
    %213 = arith.addf %212, %208 : vector<1x32xf32>
    %214 = vector.extract_strided_slice %117 {offsets = [3, 0], sizes = [1, 32], strides = [1, 1]} : vector<8x32xf32> to vector<1x32xf32>
    %215 = vector.extract_strided_slice %119 {offsets = [3, 0], sizes = [1, 32], strides = [1, 1]} : vector<8x32xf32> to vector<1x32xf32>
    %216 = arith.addf %106, %214 : vector<1x32xf32>
    %217 = arith.maximumf %204, %216 : vector<1x32xf32>
    %218 = arith.subf %204, %217 : vector<1x32xf32>
    %219 = math.exp %218 : vector<1x32xf32>
    %220 = arith.subf %216, %217 : vector<1x32xf32>
    %221 = math.exp %220 : vector<1x32xf32>
    %222 = arith.mulf %219, %211 : vector<1x32xf32>
    %223 = arith.mulf %221, %215 : vector<1x32xf32>
    %224 = arith.addf %222, %223 : vector<1x32xf32>
    %225 = arith.mulf %219, %213 : vector<1x32xf32>
    %226 = arith.addf %225, %221 : vector<1x32xf32>
    %227 = tpu.reciprocal %226 {approx = true} : vector<1x32xf32> -> vector<1x32xf32>
    %228 = arith.mulf %224, %227 : vector<1x32xf32>
    %c3_i32 = arith.constant 3 : i32
    %229 = vector.broadcast %c3_i32 : i32 to vector<8x32xi32>
    %230 = arith.cmpi eq, %113, %229 : vector<8x32xi32>
    %231 = vector.shape_cast %228 : vector<1x32xf32> to vector<1x32xf32>
    %232 = vector.broadcast %231 : vector<1x32xf32> to vector<8x32xf32>
    %233 = arith.select %230, %232, %202 : vector<8x32xi1>, vector<8x32xf32>
    %234 = arith.addf %105, %204 : vector<1x32xf32>
    %235 = arith.maximumf %234, %214 : vector<1x32xf32>
    %236 = arith.subf %234, %235 : vector<1x32xf32>
    %237 = math.exp %236 : vector<1x32xf32>
    %238 = arith.subf %214, %235 : vector<1x32xf32>
    %239 = math.exp %238 : vector<1x32xf32>
    %240 = arith.mulf %237, %211 : vector<1x32xf32>
    %241 = arith.mulf %239, %215 : vector<1x32xf32>
    %242 = arith.addf %240, %241 : vector<1x32xf32>
    %243 = arith.mulf %237, %213 : vector<1x32xf32>
    %244 = arith.addf %243, %239 : vector<1x32xf32>
    %245 = vector.extract_strided_slice %117 {offsets = [4, 0], sizes = [1, 32], strides = [1, 1]} : vector<8x32xf32> to vector<1x32xf32>
    %246 = vector.extract_strided_slice %119 {offsets = [4, 0], sizes = [1, 32], strides = [1, 1]} : vector<8x32xf32> to vector<1x32xf32>
    %247 = arith.addf %106, %245 : vector<1x32xf32>
    %248 = arith.maximumf %235, %247 : vector<1x32xf32>
    %249 = arith.subf %235, %248 : vector<1x32xf32>
    %250 = math.exp %249 : vector<1x32xf32>
    %251 = arith.subf %247, %248 : vector<1x32xf32>
    %252 = math.exp %251 : vector<1x32xf32>
    %253 = arith.mulf %250, %242 : vector<1x32xf32>
    %254 = arith.mulf %252, %246 : vector<1x32xf32>
    %255 = arith.addf %253, %254 : vector<1x32xf32>
    %256 = arith.mulf %250, %244 : vector<1x32xf32>
    %257 = arith.addf %256, %252 : vector<1x32xf32>
    %258 = tpu.reciprocal %257 {approx = true} : vector<1x32xf32> -> vector<1x32xf32>
    %259 = arith.mulf %255, %258 : vector<1x32xf32>
    %c4_i32 = arith.constant 4 : i32
    %260 = vector.broadcast %c4_i32 : i32 to vector<8x32xi32>
    %261 = arith.cmpi eq, %113, %260 : vector<8x32xi32>
    %262 = vector.shape_cast %259 : vector<1x32xf32> to vector<1x32xf32>
    %263 = vector.broadcast %262 : vector<1x32xf32> to vector<8x32xf32>
    %264 = arith.select %261, %263, %233 : vector<8x32xi1>, vector<8x32xf32>
    %265 = arith.addf %105, %235 : vector<1x32xf32>
    %266 = arith.maximumf %265, %245 : vector<1x32xf32>
    %267 = arith.subf %265, %266 : vector<1x32xf32>
    %268 = math.exp %267 : vector<1x32xf32>
    %269 = arith.subf %245, %266 : vector<1x32xf32>
    %270 = math.exp %269 : vector<1x32xf32>
    %271 = arith.mulf %268, %242 : vector<1x32xf32>
    %272 = arith.mulf %270, %246 : vector<1x32xf32>
    %273 = arith.addf %271, %272 : vector<1x32xf32>
    %274 = arith.mulf %268, %244 : vector<1x32xf32>
    %275 = arith.addf %274, %270 : vector<1x32xf32>
    %276 = vector.extract_strided_slice %117 {offsets = [5, 0], sizes = [1, 32], strides = [1, 1]} : vector<8x32xf32> to vector<1x32xf32>
    %277 = vector.extract_strided_slice %119 {offsets = [5, 0], sizes = [1, 32], strides = [1, 1]} : vector<8x32xf32> to vector<1x32xf32>
    %278 = arith.addf %106, %276 : vector<1x32xf32>
    %279 = arith.maximumf %266, %278 : vector<1x32xf32>
    %280 = arith.subf %266, %279 : vector<1x32xf32>
    %281 = math.exp %280 : vector<1x32xf32>
    %282 = arith.subf %278, %279 : vector<1x32xf32>
    %283 = math.exp %282 : vector<1x32xf32>
    %284 = arith.mulf %281, %273 : vector<1x32xf32>
    %285 = arith.mulf %283, %277 : vector<1x32xf32>
    %286 = arith.addf %284, %285 : vector<1x32xf32>
    %287 = arith.mulf %281, %275 : vector<1x32xf32>
    %288 = arith.addf %287, %283 : vector<1x32xf32>
    %289 = tpu.reciprocal %288 {approx = true} : vector<1x32xf32> -> vector<1x32xf32>
    %290 = arith.mulf %286, %289 : vector<1x32xf32>
    %c5_i32 = arith.constant 5 : i32
    %291 = vector.broadcast %c5_i32 : i32 to vector<8x32xi32>
    %292 = arith.cmpi eq, %113, %291 : vector<8x32xi32>
    %293 = vector.shape_cast %290 : vector<1x32xf32> to vector<1x32xf32>
    %294 = vector.broadcast %293 : vector<1x32xf32> to vector<8x32xf32>
    %295 = arith.select %292, %294, %264 : vector<8x32xi1>, vector<8x32xf32>
    %296 = arith.addf %105, %266 : vector<1x32xf32>
    %297 = arith.maximumf %296, %276 : vector<1x32xf32>
    %298 = arith.subf %296, %297 : vector<1x32xf32>
    %299 = math.exp %298 : vector<1x32xf32>
    %300 = arith.subf %276, %297 : vector<1x32xf32>
    %301 = math.exp %300 : vector<1x32xf32>
    %302 = arith.mulf %299, %273 : vector<1x32xf32>
    %303 = arith.mulf %301, %277 : vector<1x32xf32>
    %304 = arith.addf %302, %303 : vector<1x32xf32>
    %305 = arith.mulf %299, %275 : vector<1x32xf32>
    %306 = arith.addf %305, %301 : vector<1x32xf32>
    %307 = vector.extract_strided_slice %117 {offsets = [6, 0], sizes = [1, 32], strides = [1, 1]} : vector<8x32xf32> to vector<1x32xf32>
    %308 = vector.extract_strided_slice %119 {offsets = [6, 0], sizes = [1, 32], strides = [1, 1]} : vector<8x32xf32> to vector<1x32xf32>
    %309 = arith.addf %106, %307 : vector<1x32xf32>
    %310 = arith.maximumf %297, %309 : vector<1x32xf32>
    %311 = arith.subf %297, %310 : vector<1x32xf32>
    %312 = math.exp %311 : vector<1x32xf32>
    %313 = arith.subf %309, %310 : vector<1x32xf32>
    %314 = math.exp %313 : vector<1x32xf32>
    %315 = arith.mulf %312, %304 : vector<1x32xf32>
    %316 = arith.mulf %314, %308 : vector<1x32xf32>
    %317 = arith.addf %315, %316 : vector<1x32xf32>
    %318 = arith.mulf %312, %306 : vector<1x32xf32>
    %319 = arith.addf %318, %314 : vector<1x32xf32>
    %320 = tpu.reciprocal %319 {approx = true} : vector<1x32xf32> -> vector<1x32xf32>
    %321 = arith.mulf %317, %320 : vector<1x32xf32>
    %c6_i32 = arith.constant 6 : i32
    %322 = vector.broadcast %c6_i32 : i32 to vector<8x32xi32>
    %323 = arith.cmpi eq, %113, %322 : vector<8x32xi32>
    %324 = vector.shape_cast %321 : vector<1x32xf32> to vector<1x32xf32>
    %325 = vector.broadcast %324 : vector<1x32xf32> to vector<8x32xf32>
    %326 = arith.select %323, %325, %295 : vector<8x32xi1>, vector<8x32xf32>
    %327 = arith.addf %105, %297 : vector<1x32xf32>
    %328 = arith.maximumf %327, %307 : vector<1x32xf32>
    %329 = arith.subf %327, %328 : vector<1x32xf32>
    %330 = math.exp %329 : vector<1x32xf32>
    %331 = arith.subf %307, %328 : vector<1x32xf32>
    %332 = math.exp %331 : vector<1x32xf32>
    %333 = arith.mulf %330, %304 : vector<1x32xf32>
    %334 = arith.mulf %332, %308 : vector<1x32xf32>
    %335 = arith.addf %333, %334 : vector<1x32xf32>
    %336 = arith.mulf %330, %306 : vector<1x32xf32>
    %337 = arith.addf %336, %332 : vector<1x32xf32>
    %338 = vector.extract_strided_slice %117 {offsets = [7, 0], sizes = [1, 32], strides = [1, 1]} : vector<8x32xf32> to vector<1x32xf32>
    %339 = vector.extract_strided_slice %119 {offsets = [7, 0], sizes = [1, 32], strides = [1, 1]} : vector<8x32xf32> to vector<1x32xf32>
    %340 = arith.addf %106, %338 : vector<1x32xf32>
    %341 = arith.maximumf %328, %340 : vector<1x32xf32>
    %342 = arith.subf %328, %341 : vector<1x32xf32>
    %343 = math.exp %342 : vector<1x32xf32>
    %344 = arith.subf %340, %341 : vector<1x32xf32>
    %345 = math.exp %344 : vector<1x32xf32>
    %346 = arith.mulf %343, %335 : vector<1x32xf32>
    %347 = arith.mulf %345, %339 : vector<1x32xf32>
    %348 = arith.addf %346, %347 : vector<1x32xf32>
    %349 = arith.mulf %343, %337 : vector<1x32xf32>
    %350 = arith.addf %349, %345 : vector<1x32xf32>
    %351 = tpu.reciprocal %350 {approx = true} : vector<1x32xf32> -> vector<1x32xf32>
    %352 = arith.mulf %348, %351 : vector<1x32xf32>
    %c7_i32 = arith.constant 7 : i32
    %353 = vector.broadcast %c7_i32 : i32 to vector<8x32xi32>
    %354 = arith.cmpi eq, %113, %353 : vector<8x32xi32>
    %355 = vector.shape_cast %352 : vector<1x32xf32> to vector<1x32xf32>
    %356 = vector.broadcast %355 : vector<1x32xf32> to vector<8x32xf32>
    %357 = arith.select %354, %356, %326 : vector<8x32xi1>, vector<8x32xf32>
    %358 = arith.addf %105, %328 : vector<1x32xf32>
    %359 = arith.maximumf %358, %338 : vector<1x32xf32>
    %360 = arith.subf %358, %359 : vector<1x32xf32>
    %361 = math.exp %360 : vector<1x32xf32>
    %362 = arith.subf %338, %359 : vector<1x32xf32>
    %363 = math.exp %362 : vector<1x32xf32>
    %364 = arith.mulf %361, %335 : vector<1x32xf32>
    %365 = arith.mulf %363, %339 : vector<1x32xf32>
    %366 = arith.addf %364, %365 : vector<1x32xf32>
    %367 = arith.mulf %361, %337 : vector<1x32xf32>
    %368 = arith.addf %367, %363 : vector<1x32xf32>
    %369 = arith.truncf %357 : vector<8x32xf32> to vector<8x32xbf16>
    %370 = arith.index_cast %115 : i32 to index
    %c0_65 = arith.constant 0 : index
    %371 = vector.load %arg32[%370, %c0_65] : memref<8x32xbf16, #tpu.memory_space<vmem>>, vector<8x32xbf16>
    tpu.vector_store %arg32[%370, %c0_65], %369 {strides = array<i32>} : memref<8x32xbf16, #tpu.memory_space<vmem>>, vector<8x32xbf16>,
    %c1_i32_66 = arith.constant 1 : i32
    %c0_67 = arith.constant 0 : index
    %c0_68 = arith.constant 0 : index
    %c0_69 = arith.constant 0 : index
    %372 = vector.load %arg28[%c0_67, %c0_68, %c0_69] : memref<1x3x32xf32, #tpu.memory_space<vmem>>, vector<1x1x32xf32>
    %373 = vector.shape_cast %372 : vector<1x1x32xf32> to vector<1x32xf32>
    %374 = vector.shape_cast %366 : vector<1x32xf32> to vector<1x1x32xf32>
    tpu.vector_store %arg28[%c0_67, %c0_68, %c0_69], %374 {strides = array<i32>} : memref<1x3x32xf32, #tpu.memory_space<vmem>>, vector<1x1x32xf32>,
    %c0_70 = arith.constant 0 : index
    %c1_71 = arith.constant 1 : index
    %c0_72 = arith.constant 0 : index
    %375 = vector.load %arg28[%c0_70, %c1_71, %c0_72] : memref<1x3x32xf32, #tpu.memory_space<vmem>>, vector<1x1x32xf32>
    %376 = vector.shape_cast %375 : vector<1x1x32xf32> to vector<1x32xf32>
    %377 = vector.shape_cast %368 : vector<1x32xf32> to vector<1x1x32xf32>
    tpu.vector_store %arg28[%c0_70, %c1_71, %c0_72], %377 {strides = array<i32>} : memref<1x3x32xf32, #tpu.memory_space<vmem>>, vector<1x1x32xf32>,
    %c0_73 = arith.constant 0 : index
    %c2_74 = arith.constant 2 : index
    %c0_75 = arith.constant 0 : index
    %378 = vector.load %arg28[%c0_73, %c2_74, %c0_75] : memref<1x3x32xf32, #tpu.memory_space<vmem>>, vector<1x1x32xf32>
    %379 = vector.shape_cast %378 : vector<1x1x32xf32> to vector<1x32xf32>
    %380 = vector.shape_cast %359 : vector<1x32xf32> to vector<1x1x32xf32>
    tpu.vector_store %arg28[%c0_73, %c2_74, %c0_75], %380 {strides = array<i32>} : memref<1x3x32xf32, #tpu.memory_space<vmem>>, vector<1x1x32xf32>,
    %c0_76 = arith.constant 0 : index
    %c0_77 = arith.constant 0 : index
    %381 = vector.load %arg32[%c0_76, %c0_77] : memref<8x32xbf16, #tpu.memory_space<vmem>>, vector<8x32xbf16>
    %382 = arith.extf %381 : vector<8x32xbf16> to vector<8x32xf32>
    %383 = arith.mulf %101, %382 : vector<8x32xf32>
    %c0_78 = arith.constant 0 : index
    %c0_79 = arith.constant 0 : index
    %384 = vector.load %arg20[%c0_78, %c0_79] : memref<32x32xbf16, #tpu.memory_space<vmem>>, vector<32x32xbf16>
    %385 = arith.truncf %383 : vector<8x32xf32> to vector<8x32xbf16>
    %cst_80 = arith.constant dense<0.000000e+00> : vector<8x32xf32>
    %386 = tpu.matmul %385, %384, %cst_80 {dimension_numbers = #tpu.dot_dimension_numbers<[1], [0], [0], [1], [0, 0, 1, 1], [], []>} : vector<8x32xbf16>, vector<32x32xbf16>, vector<8x32xf32> -> vector<8x32xf32>
    %387 = arith.addf %28, %386 : vector<8x32xf32>
    %388 = vector.extract_strided_slice %52 {offsets = [7, 0], sizes = [1, 32], strides = [1, 1]} : vector<8x32xf32> to vector<1x32xf32>
    %c0_81 = arith.constant 0 : index
    %c0_82 = arith.constant 0 : index
    %c0_83 = arith.constant 0 : index
    %389 = vector.load %arg27[%c0_81, %c0_82, %c0_83] : memref<1x1x32xf32, #tpu.memory_space<vmem>>, vector<1x1x32xf32>
    %390 = vector.shape_cast %389 : vector<1x1x32xf32> to vector<1x32xf32>
    %391 = vector.shape_cast %388 : vector<1x32xf32> to vector<1x1x32xf32>
    tpu.vector_store %arg27[%c0_81, %c0_82, %c0_83], %391 {strides = array<i32>} : memref<1x1x32xf32, #tpu.memory_space<vmem>>, vector<1x1x32xf32>,
    %c0_84 = arith.constant 0 : index
    %c0_85 = arith.constant 0 : index
    %392 = vector.load %arg10[%c0_84, %c0_85] : memref<1x32xf32, #tpu.memory_space<vmem>>, vector<1x32xf32>
    %c0_86 = arith.constant 0 : index
    %c0_87 = arith.constant 0 : index
    %393 = vector.load %arg11[%c0_86, %c0_87] : memref<1x32xf32, #tpu.memory_space<vmem>>, vector<1x32xf32>
    %cst_88 = arith.constant dense<0.000000e+00> : vector<8xf32>
    %394 = vector.multi_reduction <add>, %387, %cst_88 [1] : vector<8x32xf32> to vector<8xf32>
    %395 = vector.shape_cast %394 : vector<8xf32> to vector<8x1xf32>
    %cst_89 = arith.constant 3.200000e+01 : f32
    %396 = vector.broadcast %cst_89 : f32 to vector<8x1xf32>
    %397 = arith.divf %395, %396 : vector<8x1xf32>
    %398 = vector.broadcast %397 : vector<8x1xf32> to vector<8x32xf32>
    %399 = arith.subf %387, %398 : vector<8x32xf32>
    %400 = arith.mulf %399, %399 : vector<8x32xf32>
    %cst_90 = arith.constant dense<0.000000e+00> : vector<8xf32>
    %401 = vector.multi_reduction <add>, %400, %cst_90 [1] : vector<8x32xf32> to vector<8xf32>
    %402 = vector.shape_cast %401 : vector<8xf32> to vector<8x1xf32>
    %cst_91 = arith.constant 3.200000e+01 : f32
    %403 = vector.broadcast %cst_91 : f32 to vector<8x1xf32>
    %404 = arith.divf %402, %403 : vector<8x1xf32>
    %405 = vector.broadcast %397 : vector<8x1xf32> to vector<8x32xf32>
    %406 = arith.subf %387, %405 : vector<8x32xf32>
    %cst_92 = arith.constant 9.99999974E-6 : f32
    %407 = vector.broadcast %cst_92 : f32 to vector<8x1xf32>
    %408 = arith.addf %404, %407 : vector<8x1xf32>
    %409 = math.rsqrt %408 : vector<8x1xf32>
    %410 = vector.broadcast %409 : vector<8x1xf32> to vector<8x32xf32>
    %411 = arith.mulf %406, %410 : vector<8x32xf32>
    %412 = vector.broadcast %392 : vector<1x32xf32> to vector<8x32xf32>
    %413 = arith.mulf %411, %412 : vector<8x32xf32>
    %414 = vector.broadcast %393 : vector<1x32xf32> to vector<8x32xf32>
    %415 = arith.addf %413, %414 : vector<8x32xf32>
    %c0_93 = arith.constant 0 : index
    %c0_94 = arith.constant 0 : index
    %c0_95 = arith.constant 0 : index
    %416 = vector.load %arg29[%c0_93, %c0_94, %c0_95] : memref<1x1x32xf32, #tpu.memory_space<vmem>>, vector<1x1x32xf32>
    %417 = vector.shape_cast %416 : vector<1x1x32xf32> to vector<1x32xf32>
    %c1_i32_96 = arith.constant 1 : i32
    %418 = tpu.dynamic_rotate %415 by %c1_i32_96 dim 0 : vector<8x32xf32>, i32 -> vector<8x32xf32>
    %419 = tpu.iota {dimensions = array<i32: 0>} : vector<8x32xi32>
    %c0_i32_97 = arith.constant 0 : i32
    %420 = vector.broadcast %c0_i32_97 : i32 to vector<8x32xi32>
    %421 = arith.cmpi eq, %419, %420 : vector<8x32xi32>
    %422 = vector.shape_cast %417 : vector<1x32xf32> to vector<1x32xf32>
    %423 = vector.broadcast %422 : vector<1x32xf32> to vector<8x32xf32>
    %424 = arith.select %421, %423, %418 : vector<8x32xi1>, vector<8x32xf32>
    %c0_98 = arith.constant 0 : index
    %c0_99 = arith.constant 0 : index
    %425 = vector.load %arg21[%c0_98, %c0_99] : memref<1x32xf32, #tpu.memory_space<vmem>>, vector<1x32xf32>
    %c0_100 = arith.constant 0 : index
    %c0_101 = arith.constant 0 : index
    %426 = vector.load %arg22[%c0_100, %c0_101] : memref<1x32xf32, #tpu.memory_space<vmem>>, vector<1x32xf32>
    %427 = vector.broadcast %425 : vector<1x32xf32> to vector<8x32xf32>
    %428 = arith.mulf %415, %427 : vector<8x32xf32>
    %cst_102 = arith.constant 1.000000e+00 : f32
    %429 = vector.broadcast %cst_102 : f32 to vector<1x32xf32>
    %430 = arith.subf %429, %425 : vector<1x32xf32>
    %431 = vector.broadcast %430 : vector<1x32xf32> to vector<8x32xf32>
    %432 = arith.mulf %424, %431 : vector<8x32xf32>
    %433 = arith.addf %428, %432 : vector<8x32xf32>
    %434 = vector.broadcast %426 : vector<1x32xf32> to vector<8x32xf32>
    %435 = arith.mulf %415, %434 : vector<8x32xf32>
    %cst_103 = arith.constant 1.000000e+00 : f32
    %436 = vector.broadcast %cst_103 : f32 to vector<1x32xf32>
    %437 = arith.subf %436, %426 : vector<1x32xf32>
    %438 = vector.broadcast %437 : vector<1x32xf32> to vector<8x32xf32>
    %439 = arith.mulf %424, %438 : vector<8x32xf32>
    %440 = arith.addf %435, %439 : vector<8x32xf32>
    %c0_104 = arith.constant 0 : index
    %c0_105 = arith.constant 0 : index
    %441 = vector.load %arg23[%c0_104, %c0_105] : memref<32x128xbf16, #tpu.memory_space<vmem>>, vector<32x128xbf16>
    %442 = arith.truncf %433 : vector<8x32xf32> to vector<8x32xbf16>
    %cst_106 = arith.constant dense<0.000000e+00> : vector<8x128xf32>
    %443 = tpu.matmul %442, %441, %cst_106 {dimension_numbers = #tpu.dot_dimension_numbers<[1], [0], [0], [1], [0, 0, 1, 1], [], []>} : vector<8x32xbf16>, vector<32x128xbf16>, vector<8x128xf32> -> vector<8x128xf32>
    %cst_107 = arith.constant 0.000000e+00 : f32
    %444 = vector.broadcast %cst_107 : f32 to vector<8x128xf32>
    %445 = arith.maximumf %443, %444 : vector<8x128xf32>
    %446 = arith.mulf %445, %445 : vector<8x128xf32>
    %c0_108 = arith.constant 0 : index
    %c0_109 = arith.constant 0 : index
    %447 = vector.load %arg25[%c0_108, %c0_109] : memref<128x32xbf16, #tpu.memory_space<vmem>>, vector<128x32xbf16>
    %448 = arith.truncf %446 : vector<8x128xf32> to vector<8x128xbf16>
    %cst_110 = arith.constant dense<0.000000e+00> : vector<8x32xf32>
    %449 = tpu.matmul %448, %447, %cst_110 {dimension_numbers = #tpu.dot_dimension_numbers<[1], [0], [0], [1], [0, 0, 1, 1], [], []>} : vector<8x128xbf16>, vector<128x32xbf16>, vector<8x32xf32> -> vector<8x32xf32>
    %c0_111 = arith.constant 0 : index
    %c0_112 = arith.constant 0 : index
    %450 = vector.load %arg24[%c0_111, %c0_112] : memref<32x32xbf16, #tpu.memory_space<vmem>>, vector<32x32xbf16>
    %451 = arith.truncf %440 : vector<8x32xf32> to vector<8x32xbf16>
    %cst_113 = arith.constant dense<0.000000e+00> : vector<8x32xf32>
    %452 = tpu.matmul %451, %450, %cst_113 {dimension_numbers = #tpu.dot_dimension_numbers<[1], [0], [0], [1], [0, 0, 1, 1], [], []>} : vector<8x32xbf16>, vector<32x32xbf16>, vector<8x32xf32> -> vector<8x32xf32>
    %453 = arith.negf %452 : vector<8x32xf32>
    %454 = math.exp %453 : vector<8x32xf32>
    %cst_114 = arith.constant 1.000000e+00 : f32
    %455 = vector.broadcast %cst_114 : f32 to vector<8x32xf32>
    %456 = arith.addf %455, %454 : vector<8x32xf32>
    %457 = arith.divf %455, %456 : vector<8x32xf32>
    %458 = arith.mulf %457, %449 : vector<8x32xf32>
    %459 = arith.addf %387, %458 : vector<8x32xf32>
    %c0_115 = arith.constant 0 : index
    %c0_116 = arith.constant 0 : index
    %c0_117 = arith.constant 0 : index
    %460 = vector.load %arg26[%c0_115, %c0_116, %c0_117] : memref<1x8x32xf32, #tpu.memory_space<vmem>>, vector<1x8x32xf32>
    %461 = vector.shape_cast %460 : vector<1x8x32xf32> to vector<8x32xf32>
    %462 = vector.shape_cast %459 : vector<8x32xf32> to vector<1x8x32xf32>
    tpu.vector_store %arg26[%c0_115, %c0_116, %c0_117], %462 {strides = array<i32>} : memref<1x8x32xf32, #tpu.memory_space<vmem>>, vector<1x8x32xf32>,
    %463 = vector.extract_strided_slice %415 {offsets = [7, 0], sizes = [1, 32], strides = [1, 1]} : vector<8x32xf32> to vector<1x32xf32>
    %c0_118 = arith.constant 0 : index
    %c0_119 = arith.constant 0 : index
    %c0_120 = arith.constant 0 : index
    %464 = vector.load %arg29[%c0_118, %c0_119, %c0_120] : memref<1x1x32xf32, #tpu.memory_space<vmem>>, vector<1x1x32xf32>
    %465 = vector.shape_cast %464 : vector<1x1x32xf32> to vector<1x32xf32>
    %466 = vector.shape_cast %463 : vector<1x32xf32> to vector<1x1x32xf32>
    tpu.vector_store %arg29[%c0_118, %c0_119, %c0_120], %466 {strides = array<i32>} : memref<1x1x32xf32, #tpu.memory_space<vmem>>, vector<1x1x32xf32>,
    return
  }
  func.func @transform_0(%arg0: i32, %arg1: i32) -> (i32, i32, i32) {
    %c0_i32 = arith.constant 0 : i32
    %c0_i32_0 = arith.constant 0 : i32
    return %arg0, %arg1, %c0_i32 : i32, i32, i32
  }
  func.func @transform_1(%arg0: i32, %arg1: i32) -> (i32, i32, i32) {
    %c0_i32 = arith.constant 0 : i32
    %c0_i32_0 = arith.constant 0 : i32
    %c0_i32_1 = arith.constant 0 : i32
    return %arg0, %c0_i32, %c0_i32_0 : i32, i32, i32
  }
  func.func @transform_2(%arg0: i32, %arg1: i32) -> (i32, i32, i32) {
    %c0_i32 = arith.constant 0 : i32
    %c0_i32_0 = arith.constant 0 : i32
    %c0_i32_1 = arith.constant 0 : i32
    return %arg0, %c0_i32, %c0_i32_0 : i32, i32, i32
  }
  func.func @transform_3(%arg0: i32, %arg1: i32) -> (i32, i32, i32) {
    %c0_i32 = arith.constant 0 : i32
    %c0_i32_0 = arith.constant 0 : i32
    %c0_i32_1 = arith.constant 0 : i32
    return %arg0, %c0_i32, %c0_i32_0 : i32, i32, i32
  }
  func.func @transform_4(%arg0: i32, %arg1: i32) -> (i32, i32) {
    %c0_i32 = arith.constant 0 : i32
    %c0_i32_0 = arith.constant 0 : i32
    %c0_i32_1 = arith.constant 0 : i32
    return %c0_i32, %c0_i32_0 : i32, i32
  }
  func.func @transform_5(%arg0: i32, %arg1: i32) -> (i32, i32) {
    %c0_i32 = arith.constant 0 : i32
    %c0_i32_0 = arith.constant 0 : i32
    %c0_i32_1 = arith.constant 0 : i32
    return %c0_i32, %c0_i32_0 : i32, i32
  }
  func.func @transform_6(%arg0: i32, %arg1: i32) -> (i32, i32) {
    %c0_i32 = arith.constant 0 : i32
    %c0_i32_0 = arith.constant 0 : i32
    %c0_i32_1 = arith.constant 0 : i32
    return %c0_i32, %c0_i32_0 : i32, i32
  }
  func.func @transform_7(%arg0: i32, %arg1: i32) -> (i32, i32) {
    %c0_i32 = arith.constant 0 : i32
    %c0_i32_0 = arith.constant 0 : i32
    %c0_i32_1 = arith.constant 0 : i32
    return %c0_i32, %c0_i32_0 : i32, i32
  }
  func.func @transform_8(%arg0: i32, %arg1: i32) -> (i32, i32) {
    %c0_i32 = arith.constant 0 : i32
    %c0_i32_0 = arith.constant 0 : i32
    %c0_i32_1 = arith.constant 0 : i32
    return %c0_i32, %c0_i32_0 : i32, i32
  }
  func.func @transform_9(%arg0: i32, %arg1: i32) -> (i32, i32) {
    %c0_i32 = arith.constant 0 : i32
    %c0_i32_0 = arith.constant 0 : i32
    %c0_i32_1 = arith.constant 0 : i32
    return %c0_i32, %c0_i32_0 : i32, i32
  }
  func.func @transform_10(%arg0: i32, %arg1: i32) -> (i32, i32) {
    %c0_i32 = arith.constant 0 : i32
    %c0_i32_0 = arith.constant 0 : i32
    %c0_i32_1 = arith.constant 0 : i32
    return %c0_i32, %c0_i32_0 : i32, i32
  }
  func.func @transform_11(%arg0: i32, %arg1: i32) -> (i32, i32) {
    %c0_i32 = arith.constant 0 : i32
    %c0_i32_0 = arith.constant 0 : i32
    %c0_i32_1 = arith.constant 0 : i32
    return %c0_i32, %c0_i32_0 : i32, i32
  }
  func.func @transform_12(%arg0: i32, %arg1: i32) -> (i32, i32) {
    %c0_i32 = arith.constant 0 : i32
    %c0_i32_0 = arith.constant 0 : i32
    %c0_i32_1 = arith.constant 0 : i32
    return %c0_i32, %c0_i32_0 : i32, i32
  }
  func.func @transform_13(%arg0: i32, %arg1: i32) -> (i32, i32) {
    %c0_i32 = arith.constant 0 : i32
    %c0_i32_0 = arith.constant 0 : i32
    %c0_i32_1 = arith.constant 0 : i32
    return %c0_i32, %c0_i32_0 : i32, i32
  }
  func.func @transform_14(%arg0: i32, %arg1: i32) -> (i32, i32) {
    %c0_i32 = arith.constant 0 : i32
    %c0_i32_0 = arith.constant 0 : i32
    %c0_i32_1 = arith.constant 0 : i32
    return %c0_i32, %c0_i32_0 : i32, i32
  }
  func.func @transform_15(%arg0: i32, %arg1: i32) -> (i32, i32) {
    %c0_i32 = arith.constant 0 : i32
    %c0_i32_0 = arith.constant 0 : i32
    %c0_i32_1 = arith.constant 0 : i32
    return %c0_i32, %c0_i32_0 : i32, i32
  }
  func.func @transform_16(%arg0: i32, %arg1: i32) -> (i32, i32) {
    %c0_i32 = arith.constant 0 : i32
    %c0_i32_0 = arith.constant 0 : i32
    %c0_i32_1 = arith.constant 0 : i32
    return %c0_i32, %c0_i32_0 : i32, i32
  }
  func.func @transform_17(%arg0: i32, %arg1: i32) -> (i32, i32) {
    %c0_i32 = arith.constant 0 : i32
    %c0_i32_0 = arith.constant 0 : i32
    %c0_i32_1 = arith.constant 0 : i32
    return %c0_i32, %c0_i32_0 : i32, i32
  }
  func.func @transform_18(%arg0: i32, %arg1: i32) -> (i32, i32) {
    %c0_i32 = arith.constant 0 : i32
    %c0_i32_0 = arith.constant 0 : i32
    %c0_i32_1 = arith.constant 0 : i32
    return %c0_i32, %c0_i32_0 : i32, i32
  }
  func.func @transform_19(%arg0: i32, %arg1: i32) -> (i32, i32) {
    %c0_i32 = arith.constant 0 : i32
    %c0_i32_0 = arith.constant 0 : i32
    %c0_i32_1 = arith.constant 0 : i32
    return %c0_i32, %c0_i32_0 : i32, i32
  }
  func.func @transform_20(%arg0: i32, %arg1: i32) -> (i32, i32) {
    %c0_i32 = arith.constant 0 : i32
    %c0_i32_0 = arith.constant 0 : i32
    %c0_i32_1 = arith.constant 0 : i32
    return %c0_i32, %c0_i32_0 : i32, i32
  }
  func.func @transform_21(%arg0: i32, %arg1: i32) -> (i32, i32) {
    %c0_i32 = arith.constant 0 : i32
    %c0_i32_0 = arith.constant 0 : i32
    %c0_i32_1 = arith.constant 0 : i32
    return %c0_i32, %c0_i32_0 : i32, i32
  }
  func.func @transform_22(%arg0: i32, %arg1: i32) -> (i32, i32) {
    %c0_i32 = arith.constant 0 : i32
    %c0_i32_0 = arith.constant 0 : i32
    %c0_i32_1 = arith.constant 0 : i32
    return %c0_i32, %c0_i32_0 : i32, i32
  }
  func.func @transform_23(%arg0: i32, %arg1: i32) -> (i32, i32) {
    %c0_i32 = arith.constant 0 : i32
    %c0_i32_0 = arith.constant 0 : i32
    %c0_i32_1 = arith.constant 0 : i32
    return %c0_i32, %c0_i32_0 : i32, i32
  }
  func.func @transform_24(%arg0: i32, %arg1: i32) -> (i32, i32, i32) {
    %c0_i32 = arith.constant 0 : i32
    %c0_i32_0 = arith.constant 0 : i32
    return %arg0, %arg1, %c0_i32 : i32, i32, i32
  }
  func.func @transform_25(%arg0: i32, %arg1: i32) -> (i32, i32, i32) {
    %c0_i32 = arith.constant 0 : i32
    %c0_i32_0 = arith.constant 0 : i32
    %c0_i32_1 = arith.constant 0 : i32
    return %arg0, %c0_i32, %c0_i32_0 : i32, i32, i32
  }
  func.func @transform_26(%arg0: i32, %arg1: i32) -> (i32, i32, i32) {
    %c0_i32 = arith.constant 0 : i32
    %c0_i32_0 = arith.constant 0 : i32
    %c0_i32_1 = arith.constant 0 : i32
    return %arg0, %c0_i32, %c0_i32_0 : i32, i32, i32
  }
  func.func @transform_27(%arg0: i32, %arg1: i32) -> (i32, i32, i32) {
    %c0_i32 = arith.constant 0 : i32
    %c0_i32_0 = arith.constant 0 : i32
    %c0_i32_1 = arith.constant 0 : i32
    return %arg0, %c0_i32, %c0_i32_0 : i32, i32, i32
  }
}

</mosaic_0001>

<bundles_post_ra>
// kernel: rwkv_block_apply.1
= control target key start
LH: loop header
LB: loop body
LE: loop exit
PB: predicated region body
PF: predicated region fallthrough
CT: control target
= control target key end

     0   :  { %s6306_s0 = inlined_call_operand.hbm [shape: f32[2,16,32], index: 0, kind: input, shape index: {}, may-alias: {0,24}]   ;;  %s6307_s1 = inlined_call_operand.hbm [shape: f32[2,1,32], index: 1, kind: input, shape index: {}, may-alias: {1,25}]   ;;  %s6308_s2 = inlined_call_operand.hbm [shape: f32[2,3,32], index: 2, kind: input, shape index: {}, may-alias: {2,26}]   ;;  %s6309_s3 = inlined_call_operand.hbm [shape: f32[2,1,32], index: 3, kind: input, shape index: {}, may-alias: {3,27}]   ;;  %s6310_s4 = inlined_call_operand.hbm [shape: f32[1,32], index: 4, kind: input, shape index: {}]   ;;  %s6311_s5 = inlined_call_operand.hbm [shape: f32[1,32], index: 5, kind: input, shape index: {}]   ;;  %s6312_s6 = inlined_call_operand.hbm [shape: f32[1,32], index: 6, kind: input, shape index: {}]   ;;  %s6313_s7 = inlined_call_operand.hbm [shape: f32[1,32], index: 7, kind: input, shape index: {}]   ;;  %s6314_s8 = inlined_call_operand.hbm [shape: f32[1,32], index: 8, kind: input, shape index: {}]   ;;  %s6315_s9 = inlined_call_operand.hbm [shape: f32[1,32], index: 9, kind: input, shape index: {}]   ;;  %s6316_s10 = inlined_call_operand.hbm [shape: f32[1,32], index: 10, kind: input, shape index: {}]   ;;  %s6317_s11 = inlined_call_operand.hbm [shape: f32[1,32], index: 11, kind: input, shape index: {}]   ;;  %s6318_s12 = inlined_call_operand.hbm [shape: f32[1,32], index: 12, kind: input, shape index: {}]   ;;  %s6319_s13 = inlined_call_operand.hbm [shape: f32[1,32], index: 13, kind: input, shape index: {}]   ;;  %s6320_s14 = inlined_call_operand.hbm [shape: f32[1,32], index: 14, kind: input, shape index: {}]   ;;  %s6321_s15 = inlined_call_operand.hbm [shape: bf16[32,32], index: 15, kind: input, shape index: {}]   ;;  %s6322_s16 = inlined_call_operand.hbm [shape: bf16[32,32], index: 16, kind: input, shape index: {}]   ;;  %s6323_s17 = inlined_call_operand.hbm [shape: bf16[32,32], index: 17, kind: input, shape index: {}]   ;;  %s6324_s18 = inlined_call_operand.hbm [shape: bf16[32,32], index: 18, kind: input, shape index: {}]   ;;  %s6325_s19 = inlined_call_operand.hbm [shape: f32[1,32], index: 19, kind: input, shape index: {}]   ;;  %s6326_s20 = inlined_call_operand.hbm [shape: f32[1,32], index: 20, kind: input, shape index: {}]   ;;  %s6327_s21 = inlined_call_operand.hbm [shape: bf16[32,128], index: 21, kind: input, shape index: {}]   ;;  %s6328_s22 = inlined_call_operand.hbm [shape: bf16[32,32], index: 22, kind: input, shape index: {}]   ;;  %s6329_s23 = inlined_call_operand.hbm [shape: bf16[128,32], index: 23, kind: input, shape index: {}]   ;;  %s6330_s24 = inlined_call_operand.hbm [shape: f32[2,16,32], index: 24, kind: output, shape index: {0}, may-alias: {0,24}]   ;;  %s6331_s25 = inlined_call_operand.hbm [shape: f32[2,1,32], index: 25, kind: output, shape index: {1}, may-alias: {1,25}]   ;;  %s6332_s26 = inlined_call_operand.hbm [shape: f32[2,3,32], index: 26, kind: output, shape index: {2}, may-alias: {2,26}]   ;;  %s6333_s27 = inlined_call_operand.hbm [shape: f32[2,1,32], index: 27, kind: output, shape index: {3}, may-alias: {3,27}]  }
   0x1   :  { %6411 = sst [smem:[#allocation82_spill]] %s6306_s0 }
   0x2   :  { %6412 = sst [smem:[#allocation83_spill]] %s6307_s1 }
   0x3   :  { %6413 = sst [smem:[#allocation84_spill]] %s6308_s2 }
   0x4   :  { %6414 = sst [smem:[#allocation85_spill]] %s6309_s3 }
   0x5   :  { %6415 = sst [smem:[#allocation86_spill]] %s6310_s4 }
   0x6   :  { %6416 = sst [smem:[#allocation87_spill]] %s6311_s5 }
   0x7   :  { %6417 = sst [smem:[#allocation88_spill]] %s6312_s6 }
   0x8   :  { %6418 = sst [smem:[#allocation89_spill]] %s6313_s7 }
   0x9   :  { %6419 = sst [smem:[#allocation90_spill]] %s6314_s8 }
   0xa   :  { %6420 = sst [smem:[#allocation91_spill]] %s6315_s9 }
   0xb   :  { %6421 = sst [smem:[#allocation92_spill]] %s6316_s10 }
   0xc   :  { %6422 = sst [smem:[#allocation93_spill]] %s6317_s11 }
   0xd   :  { %6423 = sst [smem:[#allocation94_spill]] %s6318_s12 }
   0xe   :  { %6424 = sst [smem:[#allocation95_spill]] %s6319_s13 }
   0xf   :  { %6425 = sst [smem:[#allocation96_spill]] %s6320_s14 }
  0x10   :  { %6426 = sst [smem:[#allocation97_spill]] %s6321_s15 }
  0x11   :  { %6427 = sst [smem:[#allocation98_spill]] %s6322_s16 }
  0x12   :  { %6428 = sst [smem:[#allocation99_spill]] %s6323_s17 }
  0x13   :  { %6429 = sst [smem:[#allocation100_spill]] %s6324_s18 }
  0x14   :  { %6430 = sst [smem:[#allocation101_spill]] %s6325_s19 }
  0x15   :  { %6431 = sst [smem:[#allocation102_spill]] %s6326_s20 }
  0x16   :  { %6432 = sst [smem:[#allocation103_spill]] %s6327_s21 }
  0x17   :  { %6433 = sst [smem:[#allocation104_spill]] %s6328_s22 }
  0x18   :  { %6434 = sst [smem:[#allocation105_spill]] %s6329_s23 }
  0x19   :  { %6435 = sst [smem:[#allocation106_spill]] %s6330_s24 }
  0x1a   :  { %6436 = sst [smem:[#allocation107_spill]] %s6331_s25 }
  0x1b   :  { %6437 = sst [smem:[#allocation108_spill]] %s6332_s26 }
  0x1c   :  { %6438 = sst [smem:[#allocation109_spill]] %s6333_s27 }
  0x1d   :  { %33 = vsyncpa [#allocation6], 0 }
  0x1e   :  { %35 = vsyncpa [#allocation6 + $0x1], 0 }
  0x1f   :  { %36 = vsyncpa [#allocation9], 0 }
  0x20   :  { %38 = vsyncpa [#allocation9 + $0x1], 0 }
  0x21   :  { %39 = vsyncpa [#allocation12], 0 }
  0x22   :  { %41 = vsyncpa [#allocation12 + $0x1], 0 }
  0x23   :  { %42 = vsyncpa [#allocation15], 0 }
  0x24   :  { %43 = vsyncpa [#allocation18], 0 }
  0x25   :  { %44 = vsyncpa [#allocation21], 0 }
  0x26   :  { %45 = vsyncpa [#allocation24], 0 }
  0x27   :  { %46 = vsyncpa [#allocation27], 0 }
  0x28   :  { %47 = vsyncpa [#allocation30], 0 }
  0x29   :  { %48 = vsyncpa [#allocation33], 0 }
  0x2a   :  { %49 = vsyncpa [#allocation36], 0 }
  0x2b   :  { %50 = vsyncpa [#allocation39], 0 }
  0x2c   :  { %51 = vsyncpa [#allocation42], 0 }
  0x2d   :  { %52 = vsyncpa [#allocation7], 0 }
  0x2e   :  { %54 = vsyncpa [#allocation7 + $0x1], 0 }
  0x2f   :  { %55 = vsyncpa [#allocation45], 0 }
  0x30   :  { %57 = vsyncpa [#allocation45 + $0x1], 0 }
  0x31   :  { %58 = vsyncpa [#allocation48], 0 }
  0x32   :  { %60 = vsyncpa [#allocation48 + $0x1], 0  ;;  %s4912_s7 = smov 0   ;;  %s4914_s4 = smov 0  }
  0x33   :  { %s4916_s8 = smov 0   ;;  %s4918_s30 = smov 0  }
  0x34   :  { %s4920_s9 = smov 0   ;;  %s4922_s5 = smov 0  }
  0x35   :  { %s4924_s28 = smov 0   ;;  %s4926_s0 = smov 0  }
  0x36   :  { %s4928_s10 = smov 0   ;;  %s4930_s29 = smov 0  }
  0x37   :  { %s4932_s1 = smov 0  }
  0x38 LB: > { %6439 = sst [smem:[#allocation66_spill]] %s4697_s7  ;;  %s4968_s6 = sadd.s32 4294967295, %s4737_s1   ;;  %s4737_s1 = sphi %s4932_s1, %s66_s1   ;;  %s4733_s29 = sphi %s4930_s29, %s6581_s29   ;;  %s4729_s10 = sphi %s4928_s10, %s6574_s10   ;;  %s4725_s0 = sphi %s4926_s0, %s6580_s0   ;;  %s4721_s28 = sphi %s4924_s28, %s6579_s28   ;;  %s4717_s5 = sphi %s4922_s5, %s6578_s5   ;;  %s4713_s9 = sphi %s4920_s9, %s6572_s9   ;;  %s4709_s30 = sphi %s4918_s30, %s6571_s30   ;;  %s4705_s8 = sphi %s4916_s8, %s6577_s8   ;;  %s4701_s4 = sphi %s4914_s4, %s6576_s4   ;;  %s4697_s7 = sphi %s4912_s7, %s6570_s7  }
  0x39   : > { %6440 = sst [smem:[#allocation67_spill]] %s4701_s4  ;;  %p3140_p0 = scmp.ge.s32.totalorder %s4737_s1, 1 }
  0x3a   : > { %6441 = sst [smem:[#allocation68_spill]] %s4709_s30  ;;  %p6355_p1 = scmp.eq.s32.totalorder %s4968_s6, 0 }
  0x3b   : > { %6442 = sst [smem:[#allocation69_spill]] %s4713_s9  ;;  %p715_p2 = scmp.lt.s32.totalorder %s4737_s1, 5 }
  0x3c   : > { %6443 = sst [smem:[#allocation70_spill]] %s4717_s5  ;;  %s4739_s2 = smov [#allocation13]  }
  0x3d   : > { %6444 = sst [smem:[#allocation71_spill]] %s4721_s28  ;;  %p4973_p3 = pnand %p3140_p0, %p715_p2 }
  0x3e   : > { %6445 = sst [smem:[#allocation72_spill]] %s4725_s0  ;;  %s728_s3 = sshll.u32 %s4739_s2, 4  ;;  %s729_s3 = int_to_ptr.vmem [resolvable:$true] %s728_s3 }
  0x3f   : > { %6446 = sst [smem:[#allocation73_spill]] %s4729_s10  ;;  %p3431_p4 = pneg %p4973_p3 }
  0x40   : > { %6447 = sst [smem:[#allocation74_spill]] %s4968_s6  ;;  %s4740_s24 = smov [#allocation14]  }
  0x41   : > { %s6448_s11 = scalar_select %p4973_p3, 1, 0 }
  0x42   : > { %s739_s27 = sshll.u32 %s4740_s24, 4  ;;  %p4981_p5 = pnand %p3431_p4, %p6355_p1  ;;  %s4985_s27 = int_to_ptr.vmem [resolvable:$true] %s739_s27 }
  0x43   : > { %6449 = sst [smem:[#allocation75_spill]] %s6448_s11  ;;  %s4741_s25 = smov [#allocation17]  }
  0x44   : > { %s6450_s26 = scalar_select %p4981_p5, 1, 0 }
  0x45   : > { %s761_s0 = sshll.u32 %s4741_s25, 4  ;;  %s6451_s2 = sld [smem:[#allocation86_spill]]  ;;  %s4987_s0 = int_to_ptr.vmem [resolvable:$true] %s761_s0 }
  0x46   : > { %p4997_p7 = pneg %p4981_p5 }
  0x48   : > { %s6452_s24 = scalar_select %p4997_p7, 1, 0 }
  0x4b   : > { %s3791_s9 = scalar_lea.hbm %s6451_s2, 16 }
  0x4c   : > { %p3792_p6 = scmp.ne.s32.totalorder %s6451_s2, %s3791_s9  ;;  %p3798_p10 = scmp.lt.u32.totalorder %s3791_s9, %s6451_s2 }
  0x4e   : > { %p3794_p8 = pnand %p4997_p7, %p3792_p6 }
  0x50   : > { %p3795_p9 = pneg %p3794_p8 }
  0x52   : > { %p3800_p11 = pnand %p3798_p10, %p3795_p9 }
  0x54   : > { %3803 = shalt.err (!%p3800_p11)
}
  0x55   : > { %s3804_s30 = scalar_lea.vmem %s729_s3, 16  ;;  %s3811_s5 = scalar_lea.vmem %s729_s3, 32 }
  0x56   : > { %p3805_p12 = scmp.ne.s32.totalorder %s729_s3, %s3804_s30  ;;  %p3812_p2 = scmp.lt.s32.totalorder %s729_s3, %s729_s3 }
  0x57   : > { %p3813_p4 = scmp.lt.s32.totalorder %s3811_s5, %s3804_s30 }
  0x58   : > { %p3807_p13 = pnand %p3805_p12, %p4997_p7 }
  0x59   : > { %p3814_p1 = por %p3813_p4, %p3812_p2 }
  0x5a   : > { %p3808_p0 = pneg %p3807_p13 }
  0x5c   : > { %p3815_p3 = pnand %p3814_p1, %p3808_p0 }
  0x5e   : > { %3818 = shalt.err (!%p3815_p3)
}
  0x5f   : > { %3434 = dma.hbm_to_vmem [thread:$0]  (!%p4981_p5), %s6451_s2, 16, %s729_s3, [#allocation12]  }
  0x60   : > { %s6453_s25 = sld [smem:[#allocation87_spill]] }
  0x66   : > { %s3819_s23 = scalar_lea.hbm %s6453_s25, 16 }
  0x67   : > { %p3820_p6 = scmp.ne.s32.totalorder %s6453_s25, %s3819_s23  ;;  %p3826_p1 = scmp.lt.u32.totalorder %s3819_s23, %s6453_s25 }
  0x69   : > { %p3822_p8 = pnand %p3820_p6, %p4997_p7 }
  0x6b   : > { %p3823_p9 = pneg %p3822_p8 }
  0x6d   : > { %p3828_p3 = pnand %p3826_p1, %p3823_p9 }
  0x6f   : > { %3831 = shalt.err (!%p3828_p3)
}
  0x70   : > { %s3832_s3 = scalar_lea.vmem %s4985_s27, 16  ;;  %s3839_s20 = scalar_lea.vmem %s4985_s27, 32 }
  0x71   : > { %p3833_p10 = scmp.ne.s32.totalorder %s4985_s27, %s3832_s3  ;;  %p3840_p13 = scmp.lt.s32.totalorder %s4985_s27, %s4985_s27 }
  0x72   : > { %p3841_p0 = scmp.lt.s32.totalorder %s3839_s20, %s3832_s3 }
  0x73   : > { %p3835_p11 = pnand %p3833_p10, %p4997_p7 }
  0x74   : > { %p3842_p2 = por %p3841_p0, %p3840_p13 }
  0x75   : > { %p3836_p12 = pneg %p3835_p11 }
  0x77   : > { %p3843_p4 = pnand %p3842_p2, %p3836_p12 }
  0x79   : > { %3846 = shalt.err (!%p3843_p4)
}
  0x7a   : > { %3437 = dma.hbm_to_vmem [thread:$0]  (!%p4981_p5), %s6453_s25, 16, %s4985_s27, [#allocation15]  }
  0x7b   : > { %s6454_s9 = sld [smem:[#allocation89_spill]] }
  0x81   : > { %s6455_s2 = smov %s6454_s9  ;;  %s3847_s10 = scalar_lea.hbm %s6454_s9, 16 }
  0x82   : > { %p3848_p6 = scmp.ne.s32.totalorder %s6455_s2, %s3847_s10  ;;  %p3854_p1 = scmp.lt.u32.totalorder %s3847_s10, %s6455_s2 }
  0x84   : > { %p3850_p8 = pnand %p3848_p6, %p4997_p7 }
  0x86   : > { %p3851_p9 = pneg %p3850_p8 }
  0x88   : > { %p3856_p3 = pnand %p3854_p1, %p3851_p9 }
  0x8a   : > { %3859 = shalt.err (!%p3856_p3)
}
  0x8b   : > { %s3860_s27 = scalar_lea.vmem %s4987_s0, 16  ;;  %s3867_s22 = scalar_lea.vmem %s4987_s0, 32 }
  0x8c   : > { %p3861_p10 = scmp.ne.s32.totalorder %s4987_s0, %s3860_s27  ;;  %p3868_p13 = scmp.lt.s32.totalorder %s4987_s0, %s4987_s0 }
  0x8d   : > { %p3869_p0 = scmp.lt.s32.totalorder %s3867_s22, %s3860_s27 }
  0x8e   : > { %p3863_p11 = pnand %p3861_p10, %p4997_p7 }
  0x8f   : > { %p3870_p2 = por %p3869_p0, %p3868_p13 }
  0x90   : > { %p3864_p12 = pneg %p3863_p11 }
  0x92   : > { %p3871_p4 = pnand %p3870_p2, %p3864_p12 }
  0x94   : > { %3874 = shalt.err (!%p3871_p4)
}
  0x95   : > { %3443 = dma.hbm_to_vmem [thread:$0]  (!%p4981_p5), %s6455_s2, 16, %s4987_s0, [#allocation18]  }
  0x96   : > { %s4742_s11 = smov [#allocation20]   ;;  %s4743_s10 = smov [#allocation23]  }
  0x97   : > { %s783_s9 = sshll.u32 %s4742_s11, 4  ;;  %s805_s30 = sshll.u32 %s4743_s10, 4  ;;  %s784_s9 = int_to_ptr.vmem [resolvable:$true] %s783_s9  ;;  %s806_s30 = int_to_ptr.vmem [resolvable:$true] %s805_s30 }
  0x98   : > { %s6456_s20 = sld [smem:[#allocation91_spill]] }
  0x9e   : > { %s3875_s27 = scalar_lea.hbm %s6456_s20, 16 }
  0x9f   : > { %p3876_p6 = scmp.ne.s32.totalorder %s6456_s20, %s3875_s27  ;;  %p3882_p1 = scmp.lt.u32.totalorder %s3875_s27, %s6456_s20 }
  0xa1   : > { %p3878_p8 = pnand %p3876_p6, %p4997_p7 }
  0xa3   : > { %p3879_p9 = pneg %p3878_p8 }
  0xa5   : > { %p3884_p3 = pnand %p3882_p1, %p3879_p9 }
  0xa7   : > { %3887 = shalt.err (!%p3884_p3)
}
  0xa8   : > { %s3888_s0 = scalar_lea.vmem %s784_s9, 16  ;;  %s3895_s28 = scalar_lea.vmem %s784_s9, 32 }
  0xa9   : > { %p3889_p10 = scmp.ne.s32.totalorder %s784_s9, %s3888_s0  ;;  %p3896_p13 = scmp.lt.s32.totalorder %s784_s9, %s784_s9 }
  0xaa   : > { %p3897_p0 = scmp.lt.s32.totalorder %s3895_s28, %s3888_s0 }
  0xab   : > { %p3891_p11 = pnand %p3889_p10, %p4997_p7 }
  0xac   : > { %p3898_p2 = por %p3897_p0, %p3896_p13 }
  0xad   : > { %p3892_p12 = pneg %p3891_p11 }
  0xaf   : > { %p3899_p4 = pnand %p3898_p2, %p3892_p12 }
  0xb1   : > { %3902 = shalt.err (!%p3899_p4)
}
  0xb2   : > { %3449 = dma.hbm_to_vmem [thread:$0]  (!%p4981_p5), %s6456_s20, 16, %s784_s9, [#allocation21]  }
  0xb3   : > { %s6457_s5 = sld [smem:[#allocation93_spill]] }
  0xb9   : > { %s6458_s3 = smov %s6457_s5  ;;  %s3903_s27 = scalar_lea.hbm %s6457_s5, 16 }
  0xba   : > { %p3904_p6 = scmp.ne.s32.totalorder %s6458_s3, %s3903_s27  ;;  %p3910_p1 = scmp.lt.u32.totalorder %s3903_s27, %s6458_s3 }
  0xbc   : > { %p3906_p8 = pnand %p3904_p6, %p4997_p7 }
  0xbe   : > { %p3907_p9 = pneg %p3906_p8 }
  0xc0   : > { %p3912_p3 = pnand %p3910_p1, %p3907_p9 }
  0xc2   : > { %3915 = shalt.err (!%p3912_p3)
}
  0xc3   : > { %s3916_s25 = scalar_lea.vmem %s806_s30, 16  ;;  %s3923_s9 = scalar_lea.vmem %s806_s30, 32 }
  0xc4   : > { %p3917_p10 = scmp.ne.s32.totalorder %s806_s30, %s3916_s25  ;;  %p3924_p13 = scmp.lt.s32.totalorder %s806_s30, %s806_s30 }
  0xc5   : > { %p3925_p0 = scmp.lt.s32.totalorder %s3923_s9, %s3916_s25 }
  0xc6   : > { %p3919_p11 = pnand %p3917_p10, %p4997_p7 }
  0xc7   : > { %p3926_p2 = por %p3925_p0, %p3924_p13 }
  0xc8   : > { %p3920_p12 = pneg %p3919_p11 }
  0xca   : > { %p3927_p4 = pnand %p3926_p2, %p3920_p12 }
  0xcc   : > { %3930 = shalt.err (!%p3927_p4)
}
  0xcd   : > { %3455 = dma.hbm_to_vmem [thread:$0]  (!%p4981_p5), %s6458_s3, 16, %s806_s30, [#allocation24]  }
  0xce   : > { %s4744_s10 = smov [#allocation26]   ;;  %s4745_s27 = smov [#allocation29]  }
  0xcf   : > { %s827_s5 = sshll.u32 %s4744_s10, 4  ;;  %s848_s22 = sshll.u32 %s4745_s27, 4  ;;  %s828_s5 = int_to_ptr.vmem [resolvable:$true] %s827_s5  ;;  %s849_s22 = int_to_ptr.vmem [resolvable:$true] %s848_s22 }
  0xd0   : > { %s6459_s13 = sld [smem:[#allocation95_spill]] }
  0xd6   : > { %s3931_s28 = scalar_lea.hbm %s6459_s13, 16 }
  0xd7   : > { %p3932_p6 = scmp.ne.s32.totalorder %s6459_s13, %s3931_s28  ;;  %p3938_p1 = scmp.lt.u32.totalorder %s3931_s28, %s6459_s13 }
  0xd9   : > { %p3934_p8 = pnand %p3932_p6, %p4997_p7 }
  0xdb   : > { %p3935_p9 = pneg %p3934_p8 }
  0xdd   : > { %p3940_p3 = pnand %p3938_p1, %p3935_p9 }
  0xdf   : > { %3943 = shalt.err (!%p3940_p3)
}
  0xe0   : > { %s3944_s30 = scalar_lea.vmem %s828_s5, 16  ;;  %s3951_s18 = scalar_lea.vmem %s828_s5, 32 }
  0xe1   : > { %p3945_p10 = scmp.ne.s32.totalorder %s828_s5, %s3944_s30  ;;  %p3952_p13 = scmp.lt.s32.totalorder %s828_s5, %s828_s5 }
  0xe2   : > { %p3953_p0 = scmp.lt.s32.totalorder %s3951_s18, %s3944_s30 }
  0xe3   : > { %p3947_p11 = pnand %p3945_p10, %p4997_p7 }
  0xe4   : > { %p3954_p2 = por %p3953_p0, %p3952_p13 }
  0xe5   : > { %p3948_p12 = pneg %p3947_p11 }
  0xe7   : > { %p3955_p4 = pnand %p3954_p2, %p3948_p12 }
  0xe9   : > { %3958 = shalt.err (!%p3955_p4)
}
  0xea   : > { %3461 = dma.hbm_to_vmem [thread:$0]  (!%p4981_p5), %s6459_s13, 16, %s828_s5, [#allocation27]  }
  0xeb   : > { %s6460_s15 = sld [smem:[#allocation97_spill]] }
  0xf1   : > { %s3959_s0 = scalar_lea.hbm %s6460_s15, 256 }
  0xf2   : > { %p3960_p6 = scmp.ne.s32.totalorder %s6460_s15, %s3959_s0  ;;  %p3966_p1 = scmp.lt.u32.totalorder %s3959_s0, %s6460_s15 }
  0xf4   : > { %p3962_p8 = pnand %p3960_p6, %p4997_p7 }
  0xf6   : > { %p3963_p9 = pneg %p3962_p8 }
  0xf8   : > { %p3968_p3 = pnand %p3966_p1, %p3963_p9 }
  0xfa   : > { %3971 = shalt.err (!%p3968_p3)
}
  0xfb   : > { %s3972_s30 = scalar_lea.vmem %s849_s22, 256  ;;  %p3980_p13 = scmp.lt.s32.totalorder %s849_s22, %s849_s22 }
  0xfc   : > { %p3973_p10 = scmp.ne.s32.totalorder %s849_s22, %s3972_s30  ;;  %p3981_p0 = scmp.lt.s32.totalorder %s3972_s30, %s3972_s30 }
  0xfe   : > { %p3975_p11 = pnand %p3973_p10, %p4997_p7  ;;  %p3982_p2 = por %p3981_p0, %p3980_p13 }
 0x100   : > { %p3976_p12 = pneg %p3975_p11 }
 0x102   : > { %p3983_p4 = pnand %p3982_p2, %p3976_p12 }
 0x104   : > { %3986 = shalt.err (!%p3983_p4)
}
 0x105   : > { %s6367_s5 = smov 64   ;;  %s6369_s18 = smov 4  }
 0x106   : > { %3467 = dma.hbm_to_vmem [thread:$0]  (!%p4981_p5), %s6460_s15, 256, %s849_s22, [#allocation30], %s6367_s5, %s6367_s5, %s6369_s18  }
 0x107   : > { %s4748_s2 = smov [#allocation32]   ;;  %s4749_s0 = smov [#allocation35]  }
 0x108   : > { %s874_s23 = sshll.u32 %s4748_s2, 4  ;;  %s901_s28 = sshll.u32 %s4749_s0, 4  ;;  %s875_s23 = int_to_ptr.vmem [resolvable:$true] %s874_s23  ;;  %s902_s28 = int_to_ptr.vmem [resolvable:$true] %s901_s28 }
 0x109   : > { %s6461_s17 = sld [smem:[#allocation99_spill]] }
 0x10f   : > { %s3987_s11 = scalar_lea.hbm %s6461_s17, 256 }
 0x110   : > { %p3988_p6 = scmp.ne.s32.totalorder %s6461_s17, %s3987_s11  ;;  %p3994_p1 = scmp.lt.u32.totalorder %s3987_s11, %s6461_s17 }
 0x112   : > { %p3990_p8 = pnand %p3988_p6, %p4997_p7 }
 0x114   : > { %p3991_p9 = pneg %p3990_p8 }
 0x116   : > { %p3996_p3 = pnand %p3994_p1, %p3991_p9 }
 0x118   : > { %3999 = shalt.err (!%p3996_p3)
}
 0x119   : > { %s4000_s22 = scalar_lea.vmem %s875_s23, 256  ;;  %p4008_p13 = scmp.lt.s32.totalorder %s875_s23, %s875_s23 }
 0x11a   : > { %p4001_p10 = scmp.ne.s32.totalorder %s875_s23, %s4000_s22  ;;  %p4009_p0 = scmp.lt.s32.totalorder %s4000_s22, %s4000_s22 }
 0x11c   : > { %p4003_p11 = pnand %p4001_p10, %p4997_p7  ;;  %p4010_p2 = por %p4009_p0, %p4008_p13 }
 0x11e   : > { %p4004_p12 = pneg %p4003_p11 }
 0x120   : > { %p4011_p4 = pnand %p4010_p2, %p4004_p12 }
 0x122   : > { %4014 = shalt.err (!%p4011_p4)
}
 0x123   : > { %3473 = dma.hbm_to_vmem [thread:$0]  (!%p4981_p5), %s6461_s17, 256, %s875_s23, [#allocation33], %s6367_s5, %s6367_s5, %s6369_s18  }
 0x124   : > { %s6462_s19 = sld [smem:[#allocation101_spill]] }
 0x12a   : > { %s4015_s27 = scalar_lea.hbm %s6462_s19, 16 }
 0x12b   : > { %p4016_p6 = scmp.ne.s32.totalorder %s6462_s19, %s4015_s27  ;;  %p4022_p1 = scmp.lt.u32.totalorder %s4015_s27, %s6462_s19 }
 0x12d   : > { %p4018_p8 = pnand %p4016_p6, %p4997_p7 }
 0x12f   : > { %p4019_p9 = pneg %p4018_p8 }
 0x131   : > { %p4024_p3 = pnand %p4022_p1, %p4019_p9 }
 0x133   : > { %4027 = shalt.err (!%p4024_p3)
}
 0x134   : > { %s4028_s11 = scalar_lea.vmem %s902_s28, 16  ;;  %s4035_s23 = scalar_lea.vmem %s902_s28, 32 }
 0x135   : > { %p4029_p10 = scmp.ne.s32.totalorder %s902_s28, %s4028_s11  ;;  %p4036_p13 = scmp.lt.s32.totalorder %s902_s28, %s902_s28 }
 0x136   : > { %p4037_p0 = scmp.lt.s32.totalorder %s4035_s23, %s4028_s11 }
 0x137   : > { %p4031_p11 = pnand %p4029_p10, %p4997_p7 }
 0x138   : > { %p4038_p2 = por %p4037_p0, %p4036_p13 }
 0x139   : > { %p4032_p12 = pneg %p4031_p11 }
 0x13b   : > { %p4039_p4 = pnand %p4038_p2, %p4032_p12 }
 0x13d   : > { %4042 = shalt.err (!%p4039_p4)
}
 0x13e   : > { %3479 = dma.hbm_to_vmem [thread:$0]  (!%p4981_p5), %s6462_s19, 16, %s902_s28, [#allocation36]  }
 0x13f   : > { %s4750_s13 = smov [#allocation38]   ;;  %s6463_s21 = sld [smem:[#allocation103_spill]] }
 0x140   : > { %s922_s20 = sshll.u32 %s4750_s13, 4  ;;  %s923_s20 = int_to_ptr.vmem [resolvable:$true] %s922_s20 }
 0x145   : > { %s4043_s27 = scalar_lea.hbm %s6463_s21, 256 }
 0x146   : > { %p4044_p6 = scmp.ne.s32.totalorder %s6463_s21, %s4043_s27  ;;  %p4050_p1 = scmp.lt.u32.totalorder %s4043_s27, %s6463_s21 }
 0x148   : > { %p4046_p8 = pnand %p4044_p6, %p4997_p7 }
 0x14a   : > { %p4047_p9 = pneg %p4046_p8 }
 0x14c   : > { %p4052_p3 = pnand %p4050_p1, %p4047_p9 }
 0x14e   : > { %4055 = shalt.err (!%p4052_p3)
}
 0x14f   : > { %s4056_s28 = scalar_lea.vmem %s923_s20, 256  ;;  %p4064_p13 = scmp.lt.s32.totalorder %s923_s20, %s923_s20 }
 0x150   : > { %p4057_p10 = scmp.ne.s32.totalorder %s923_s20, %s4056_s28  ;;  %p4065_p0 = scmp.lt.s32.totalorder %s4056_s28, %s4056_s28 }
 0x152   : > { %p4059_p11 = pnand %p4057_p10, %p4997_p7  ;;  %p4066_p2 = por %p4065_p0, %p4064_p13 }
 0x154   : > { %p4060_p12 = pneg %p4059_p11 }
 0x156   : > { %p4067_p4 = pnand %p4066_p2, %p4060_p12 }
 0x158   : > { %4070 = shalt.err (!%p4067_p4)
}
 0x159   : > { %3485 = dma.hbm_to_vmem [thread:$0]  (!%p4981_p5), %s6463_s21, 256, %s923_s20, [#allocation39], %s6367_s5, %s6367_s5, %s6369_s18  }
 0x15a   : > { %s6366_s30 = sadd.s32 4294967294, %s4737_s1   ;;  %p6374_p6 = scmp.eq.s32.totalorder %s4737_s1, 0 }
 0x15b   : > { %p120_p8 = scmp.ne.s32.totalorder %s4705_s8, %s4701_s4  ;;  %p126_p9 = scmp.ne.s32.totalorder %s4701_s4, %s4697_s7 }
 0x15c   : > { %p6373_p1 = scmp.eq.s32.totalorder %s4968_s6, 3  ;;  %p5212_p10 = scmp.eq.s32.totalorder %s6366_s30, 3 }
 0x15d   : > { %p5206_p3 = por %p120_p8, %p6374_p6  ;;  %p6466_p11 = scmp.eq.s32.totalorder %s4968_s6, 0 }
 0x15e   : > { %s6465_s3 = scalar_select %p5212_p10, 1, 0 }
 0x15f   : > { %p5218_p12 = por %p126_p9, %p6466_p11  ;;  %p5224_p13 = por %p6373_p1, %p120_p8 }
 0x160   : > { %p5230_p0 = por %p5212_p10, %p126_p9  ;;  %p6372_p2 = scmp.lt.s32.totalorder %s4737_s1, 4 }
 0x161   : > { %s6467_s20 = scalar_select %p5218_p12, 1, 0 }
 0x162   : > { %s6469_s10 = scalar_select %p5224_p13, 1, 0 }
 0x163   : > { %6468 = sst [smem:[#allocation76_spill]] %s6467_s20  ;;  %s5237_s0 = sand.u32 1, %s4705_s8  }
 0x164   : > { %6470 = sst [smem:[#allocation77_spill]] %s6469_s10  ;;  %s3165_s25 = sshll.u32 %s4733_s29, 4 }
 0x165   : > { %s6471_s27 = scalar_select %p5230_p0, 1, 0 }
 0x166   : > { %s985_s9 = scalar_lea.vmem [#allocation8], %s5237_s0  ;;  %s6473_s30 = sld [smem:[#allocation83_spill]] }
 0x167   : > { %6472 = sst [smem:[#allocation78_spill]] %s6471_s27  ;;  %s992_s28 = sshll.u32 %s985_s9, 4  ;;  %s5246_s28 = int_to_ptr.vmem [resolvable:$true] %s992_s28 }
 0x168   : > { %p5252_p4 = pnand %p6372_p2, %p5206_p3  ;;  %s6476_s9 = sld [smem:[#allocation85_spill]] }
 0x169   : > { %s6478_s23 = sand.u32 1, %s4737_s1  }
 0x16a   : > { %s6475_s18 = scalar_select %p5252_p4, 1, 0 }
 0x16b   : > { %s5265_s21 = scalar_lea.sflag [#allocation9], %s6478_s23  ;;  %p5271_p9 = pneg %p5252_p4 }
 0x16c   : > { %s6474_s22 = smov %s6473_s30  ;;  %s5244_s5 = scalar_lea.hbm %s6473_s30, %s3165_s25 }
 0x16d   : > { %s4751_s30 = smov [#allocation16]   ;;  %s4071_s7 = scalar_lea.hbm %s5244_s5, 16 }
 0x16e   : > { %s6477_s17 = smov %s6476_s9  ;;  %s5259_s19 = scalar_lea.hbm %s6476_s9, %s3165_s25 }
 0x16f   : > { %s5261_s11 = sshll.u32 %s4751_s30, 4  ;;  %p4072_p8 = scmp.ne.s32.totalorder %s5244_s5, %s4071_s7  ;;  %s751_s11 = int_to_ptr.vmem [resolvable:$true] %s5261_s11 }
 0x170   : > { %s6479_s13 = scalar_select %p5271_p9, 1, 0 }
 0x171   : > { %p4074_p3 = pnand %p5271_p9, %p4072_p8  ;;  %s4076_s25 = scalar_lea.hbm %s6474_s22, 32 }
 0x172   : > { %p4077_p2 = scmp.lt.u32.totalorder %s5244_s5, %s6474_s22  ;;  %p4078_p1 = scmp.lt.u32.totalorder %s4076_s25, %s4071_s7 }
 0x173   : > { %p4075_p11 = pneg %p4074_p3  ;;  %p4080_p0 = scmp.lt.u32.totalorder %s4071_s7, %s5244_s5 }
 0x174   : > { %p4079_p6 = por %p4078_p1, %p4077_p2 }
 0x176   : > { %p4081_p13 = por %p4080_p0, %p4079_p6 }
 0x178   : > { %p4082_p12 = pnand %p4081_p13, %p4075_p11 }
 0x17a   : > { %4085 = shalt.err (!%p4082_p12)
}
 0x17b   : > { %s4086_s23 = scalar_lea.vmem %s5246_s28, 16  ;;  %s4752_s15 = smov [#allocation8]  }
 0x17c   : > { %p4087_p8 = scmp.ne.s32.totalorder %s5246_s28, %s4086_s23  ;;  %s4091_s2 = sshll.u32 %s4752_s15, 4  ;;  %s4092_s2 = int_to_ptr.vmem [resolvable:$false] %s4091_s2 }
 0x17d   : > { %s4093_s9 = scalar_lea.vmem %s4092_s2, 32  ;;  %p4094_p5 = scmp.lt.s32.totalorder %s5246_s28, %s4092_s2 }
 0x17e   : > { %p4089_p3 = pnand %p4087_p8, %p5271_p9  ;;  %p4095_p7 = scmp.lt.s32.totalorder %s4093_s9, %s4086_s23 }
 0x180   : > { %p4090_p10 = pneg %p4089_p3  ;;  %p4096_p1 = por %p4095_p7, %p4094_p5 }
 0x182   : > { %p4097_p2 = pnand %p4096_p1, %p4090_p10 }
 0x184   : > { %4100 = shalt.err (!%p4097_p2)
}
 0x185   : > { %3498 = dma.hbm_to_vmem [thread:$0]  (!%p5252_p4), %s5244_s5, 16, %s5246_s28, %s5265_s21  }
 0x186   : > { %s6480_s30 = sld [smem:[#allocation88_spill]]  ;;  %p6482_p5 = scmp.ne.s32.totalorder %s6452_s24, 0 }
 0x18c   : > { %s6481_s22 = smov %s6480_s30  ;;  %s4101_s15 = scalar_lea.hbm %s6480_s30, 16 }
 0x18d   : > { %p4102_p6 = scmp.ne.s32.totalorder %s6481_s22, %s4101_s15  ;;  %p4108_p12 = scmp.lt.u32.totalorder %s4101_s15, %s6481_s22 }
 0x18f   : > { %p4104_p7 = pnand %p4102_p6, %p6482_p5 }
 0x191   : > { %p4105_p10 = pneg %p4104_p7 }
 0x193   : > { %p4110_p13 = pnand %p4108_p12, %p4105_p10 }
 0x195   : > { %4113 = shalt.err (!%p4110_p13)
}
 0x196   : > { %s4114_s9 = scalar_lea.vmem %s751_s11, 16  ;;  %s4121_s5 = scalar_lea.vmem %s751_s11, 32 }
 0x197   : > { %p4115_p0 = scmp.ne.s32.totalorder %s751_s11, %s4114_s9  ;;  %p4122_p3 = scmp.lt.s32.totalorder %s751_s11, %s751_s11 }
 0x198   : > { %p4123_p1 = scmp.lt.s32.totalorder %s4121_s5, %s4114_s9 }
 0x199   : > { %p4117_p11 = pnand %p4115_p0, %p6482_p5 }
 0x19a   : > { %p4124_p2 = por %p4123_p1, %p4122_p3 }
 0x19b   : > { %p4118_p8 = pneg %p4117_p11 }
 0x19d   : > { %p4125_p4 = pnand %p4124_p2, %p4118_p8 }
 0x19f   : > { %4128 = shalt.err (!%p4125_p4)
}
 0x1a0   : > { %p6483_p6 = scmp.ne.s32.totalorder %s6450_s26, 0  ;;  %s4753_s28 = smov [#allocation19]  }
 0x1a1   : > { %s772_s7 = sshll.u32 %s4753_s28, 4  ;;  %s4754_s25 = smov [#allocation22]   ;;  %s773_s7 = int_to_ptr.vmem [resolvable:$true] %s772_s7 }
 0x1a2   : > { %3440 = dma.hbm_to_vmem [thread:$0]  (!%p6483_p6), %s6481_s22, 16, %s751_s11, [#allocation15]  }
 0x1a3   : > { %s794_s30 = sshll.u32 %s4754_s25, 4  ;;  %s6484_s2 = sld [smem:[#allocation90_spill]]  ;;  %s795_s30 = int_to_ptr.vmem [resolvable:$true] %s794_s30 }
 0x1a9   : > { %s4129_s20 = scalar_lea.hbm %s6484_s2, 16 }
 0x1aa   : > { %p4130_p4 = scmp.ne.s32.totalorder %s6484_s2, %s4129_s20  ;;  %p4136_p12 = scmp.lt.u32.totalorder %s4129_s20, %s6484_s2 }
 0x1ac   : > { %p4132_p7 = pnand %p4130_p4, %p6482_p5 }
 0x1ae   : > { %p4133_p10 = pneg %p4132_p7 }
 0x1b0   : > { %p4138_p13 = pnand %p4136_p12, %p4133_p10 }
 0x1b2   : > { %4141 = shalt.err (!%p4138_p13)
}
 0x1b3   : > { %s4142_s11 = scalar_lea.vmem %s773_s7, 16  ;;  %s4149_s27 = scalar_lea.vmem %s773_s7, 32 }
 0x1b4   : > { %p4143_p0 = scmp.ne.s32.totalorder %s773_s7, %s4142_s11  ;;  %p4150_p3 = scmp.lt.s32.totalorder %s773_s7, %s773_s7 }
 0x1b5   : > { %p4151_p1 = scmp.lt.s32.totalorder %s4149_s27, %s4142_s11 }
 0x1b6   : > { %p4145_p11 = pnand %p4143_p0, %p6482_p5 }
 0x1b7   : > { %p4152_p2 = por %p4151_p1, %p4150_p3 }
 0x1b8   : > { %p4146_p8 = pneg %p4145_p11 }
 0x1ba   : > { %p4153_p9 = pnand %p4152_p2, %p4146_p8 }
 0x1bc   : > { %4156 = shalt.err (!%p4153_p9)
}
 0x1bd   : > { %3446 = dma.hbm_to_vmem [thread:$0]  (!%p6483_p6), %s6484_s2, 16, %s773_s7, [#allocation18]  }
 0x1be   : > { %s6485_s15 = sld [smem:[#allocation92_spill]] }
 0x1c4   : > { %s4157_s23 = scalar_lea.hbm %s6485_s15, 16 }
 0x1c5   : > { %p4158_p4 = scmp.ne.s32.totalorder %s6485_s15, %s4157_s23  ;;  %p4164_p9 = scmp.lt.u32.totalorder %s4157_s23, %s6485_s15 }
 0x1c7   : > { %p4160_p7 = pnand %p4158_p4, %p6482_p5 }
 0x1c9   : > { %p4161_p10 = pneg %p4160_p7 }
 0x1cb   : > { %p4166_p12 = pnand %p4164_p9, %p4161_p10 }
 0x1cd   : > { %4169 = shalt.err (!%p4166_p12)
}
 0x1ce   : > { %s4170_s27 = scalar_lea.vmem %s795_s30, 16  ;;  %s4177_s7 = scalar_lea.vmem %s795_s30, 32 }
 0x1cf   : > { %p4171_p13 = scmp.ne.s32.totalorder %s795_s30, %s4170_s27  ;;  %p4178_p8 = scmp.lt.s32.totalorder %s795_s30, %s795_s30 }
 0x1d0   : > { %p4179_p3 = scmp.lt.s32.totalorder %s4177_s7, %s4170_s27 }
 0x1d1   : > { %p4173_p0 = pnand %p4171_p13, %p6482_p5 }
 0x1d2   : > { %p4180_p1 = por %p4179_p3, %p4178_p8 }
 0x1d3   : > { %p4174_p11 = pneg %p4173_p0 }
 0x1d5   : > { %p4181_p2 = pnand %p4180_p1, %p4174_p11 }
 0x1d7   : > { %4184 = shalt.err (!%p4181_p2)
}
 0x1d8   : > { %3452 = dma.hbm_to_vmem [thread:$0]  (!%p6483_p6), %s6485_s15, 16, %s795_s30, [#allocation21]  }
 0x1d9   : > { %s4755_s4 = smov [#allocation25]   ;;  %s4756_s23 = smov [#allocation28]  }
 0x1da   : > { %s816_s20 = sshll.u32 %s4755_s4, 4  ;;  %s838_s9 = sshll.u32 %s4756_s23, 4  ;;  %s817_s20 = int_to_ptr.vmem [resolvable:$true] %s816_s20  ;;  %s839_s9 = int_to_ptr.vmem [resolvable:$true] %s838_s9 }
 0x1db   : > { %s6486_s12 = sld [smem:[#allocation94_spill]] }
 0x1e1   : > { %s4185_s11 = scalar_lea.hbm %s6486_s12, 16 }
 0x1e2   : > { %p4186_p4 = scmp.ne.s32.totalorder %s6486_s12, %s4185_s11  ;;  %p4192_p9 = scmp.lt.u32.totalorder %s4185_s11, %s6486_s12 }
 0x1e4   : > { %p4188_p7 = pnand %p4186_p4, %p6482_p5 }
 0x1e6   : > { %p4189_p10 = pneg %p4188_p7 }
 0x1e8   : > { %p4194_p12 = pnand %p4192_p9, %p4189_p10 }
 0x1ea   : > { %4197 = shalt.err (!%p4194_p12)
}
 0x1eb   : > { %s4198_s30 = scalar_lea.vmem %s817_s20, 16  ;;  %s4205_s25 = scalar_lea.vmem %s817_s20, 32 }
 0x1ec   : > { %p4199_p13 = scmp.ne.s32.totalorder %s817_s20, %s4198_s30  ;;  %p4206_p8 = scmp.lt.s32.totalorder %s817_s20, %s817_s20 }
 0x1ed   : > { %p4207_p3 = scmp.lt.s32.totalorder %s4205_s25, %s4198_s30 }
 0x1ee   : > { %p4201_p0 = pnand %p4199_p13, %p6482_p5 }
 0x1ef   : > { %p4208_p1 = por %p4207_p3, %p4206_p8 }
 0x1f0   : > { %p4202_p11 = pneg %p4201_p0 }
 0x1f2   : > { %p4209_p2 = pnand %p4208_p1, %p4202_p11 }
 0x1f4   : > { %4212 = shalt.err (!%p4209_p2)
}
 0x1f5   : > { %3458 = dma.hbm_to_vmem [thread:$0]  (!%p6483_p6), %s6486_s12, 16, %s817_s20, [#allocation24]  }
 0x1f6   : > { %s6487_s14 = sld [smem:[#allocation96_spill]] }
 0x1fc   : > { %s4213_s10 = scalar_lea.hbm %s6487_s14, 16 }
 0x1fd   : > { %p4214_p4 = scmp.ne.s32.totalorder %s6487_s14, %s4213_s10  ;;  %p4220_p9 = scmp.lt.u32.totalorder %s4213_s10, %s6487_s14 }
 0x1ff   : > { %p4216_p7 = pnand %p4214_p4, %p6482_p5 }
 0x201   : > { %p4217_p10 = pneg %p4216_p7 }
 0x203   : > { %p4222_p12 = pnand %p4220_p9, %p4217_p10 }
 0x205   : > { %4225 = shalt.err (!%p4222_p12)
}
 0x206   : > { %s4226_s30 = scalar_lea.vmem %s839_s9, 16  ;;  %s4233_s20 = scalar_lea.vmem %s839_s9, 32 }
 0x207   : > { %p4227_p13 = scmp.ne.s32.totalorder %s839_s9, %s4226_s30  ;;  %p4234_p8 = scmp.lt.s32.totalorder %s839_s9, %s839_s9 }
 0x208   : > { %p4235_p3 = scmp.lt.s32.totalorder %s4233_s20, %s4226_s30 }
 0x209   : > { %p4229_p0 = pnand %p4227_p13, %p6482_p5 }
 0x20a   : > { %p4236_p1 = por %p4235_p3, %p4234_p8 }
 0x20b   : > { %p4230_p11 = pneg %p4229_p0 }
 0x20d   : > { %p4237_p2 = pnand %p4236_p1, %p4230_p11 }
 0x20f   : > { %4240 = shalt.err (!%p4237_p2)
}
 0x210   : > { %3464 = dma.hbm_to_vmem [thread:$0]  (!%p6483_p6), %s6487_s14, 16, %s839_s9, [#allocation27]  }
 0x211   : > { %s4757_s23 = smov [#allocation31]   ;;  %s4758_s5 = smov [#allocation34]  }
 0x212   : > { %s861_s2 = sshll.u32 %s4757_s23, 4  ;;  %s887_s10 = sshll.u32 %s4758_s5, 4  ;;  %s862_s2 = int_to_ptr.vmem [resolvable:$true] %s861_s2  ;;  %s888_s10 = int_to_ptr.vmem [resolvable:$true] %s887_s10 }
 0x213   : > { %s6488_s16 = sld [smem:[#allocation98_spill]] }
 0x219   : > { %s4241_s7 = scalar_lea.hbm %s6488_s16, 256 }
 0x21a   : > { %p4242_p4 = scmp.ne.s32.totalorder %s6488_s16, %s4241_s7  ;;  %p4248_p9 = scmp.lt.u32.totalorder %s4241_s7, %s6488_s16 }
 0x21c   : > { %p4244_p7 = pnand %p4242_p4, %p6482_p5 }
 0x21e   : > { %p4245_p10 = pneg %p4244_p7 }
 0x220   : > { %p4250_p12 = pnand %p4248_p9, %p4245_p10 }
 0x222   : > { %4253 = shalt.err (!%p4250_p12)
}
 0x223   : > { %s4254_s9 = scalar_lea.vmem %s862_s2, 256  ;;  %p4262_p8 = scmp.lt.s32.totalorder %s862_s2, %s862_s2 }
 0x224   : > { %p4255_p13 = scmp.ne.s32.totalorder %s862_s2, %s4254_s9  ;;  %p4263_p3 = scmp.lt.s32.totalorder %s4254_s9, %s4254_s9 }
 0x226   : > { %p4257_p0 = pnand %p4255_p13, %p6482_p5  ;;  %p4264_p1 = por %p4263_p3, %p4262_p8 }
 0x228   : > { %p4258_p11 = pneg %p4257_p0 }
 0x22a   : > { %p4265_p2 = pnand %p4264_p1, %p4258_p11 }
 0x22c   : > { %4268 = shalt.err (!%p4265_p2)
}
 0x22d   : > { %s6489_s4 = smov 4   ;;  %s6490_s23 = smov 64  }
 0x22e   : > { %3470 = dma.hbm_to_vmem [thread:$0]  (!%p6483_p6), %s6488_s16, 256, %s862_s2, [#allocation30], %s6490_s23, %s6490_s23, %s6489_s4  }
 0x22f   : > { %s6491_s28 = sld [smem:[#allocation100_spill]] }
 0x235   : > { %s6492_s20 = smov %s6491_s28  ;;  %s4269_s30 = scalar_lea.hbm %s6491_s28, 256 }
 0x236   : > { %p4270_p4 = scmp.ne.s32.totalorder %s6492_s20, %s4269_s30  ;;  %p4276_p9 = scmp.lt.u32.totalorder %s4269_s30, %s6492_s20 }
 0x238   : > { %p4272_p7 = pnand %p4270_p4, %p6482_p5 }
 0x23a   : > { %p4273_p10 = pneg %p4272_p7 }
 0x23c   : > { %p4278_p12 = pnand %p4276_p9, %p4273_p10 }
 0x23e   : > { %4281 = shalt.err (!%p4278_p12)
}
 0x23f   : > { %s4282_s5 = scalar_lea.vmem %s888_s10, 256  ;;  %p4290_p8 = scmp.lt.s32.totalorder %s888_s10, %s888_s10 }
 0x240   : > { %p4283_p13 = scmp.ne.s32.totalorder %s888_s10, %s4282_s5  ;;  %p4291_p3 = scmp.lt.s32.totalorder %s4282_s5, %s4282_s5 }
 0x242   : > { %p4285_p0 = pnand %p4283_p13, %p6482_p5  ;;  %p4292_p1 = por %p4291_p3, %p4290_p8 }
 0x244   : > { %p4286_p11 = pneg %p4285_p0 }
 0x246   : > { %p4293_p2 = pnand %p4292_p1, %p4286_p11 }
 0x248   : > { %4296 = shalt.err (!%p4293_p2)
}
 0x249   : > { %3476 = dma.hbm_to_vmem [thread:$0]  (!%p6483_p6), %s6492_s20, 256, %s888_s10, [#allocation33], %s6490_s23, %s6490_s23, %s6489_s4  }
 0x24a   : > { %s4759_s2 = smov [#allocation37]   ;;  %s4760_s27 = smov [#allocation40]  }
 0x24b   : > { %s912_s11 = sshll.u32 %s4759_s2, 4  ;;  %s935_s7 = sshll.u32 %s4760_s27, 4  ;;  %s913_s11 = int_to_ptr.vmem [resolvable:$true] %s912_s11  ;;  %s936_s7 = int_to_ptr.vmem [resolvable:$true] %s935_s7 }
 0x24c   : > { %s6493_s25 = sld [smem:[#allocation102_spill]] }
 0x252   : > { %s4297_s9 = scalar_lea.hbm %s6493_s25, 16 }
 0x253   : > { %p4298_p4 = scmp.ne.s32.totalorder %s6493_s25, %s4297_s9  ;;  %p4304_p9 = scmp.lt.u32.totalorder %s4297_s9, %s6493_s25 }
 0x255   : > { %p4300_p7 = pnand %p4298_p4, %p6482_p5 }
 0x257   : > { %p4301_p10 = pneg %p4300_p7 }
 0x259   : > { %p4306_p12 = pnand %p4304_p9, %p4301_p10 }
 0x25b   : > { %4309 = shalt.err (!%p4306_p12)
}
 0x25c   : > { %s4310_s10 = scalar_lea.vmem %s913_s11, 16  ;;  %s4317_s14 = scalar_lea.vmem %s913_s11, 32 }
 0x25d   : > { %p4311_p13 = scmp.ne.s32.totalorder %s913_s11, %s4310_s10  ;;  %p4318_p8 = scmp.lt.s32.totalorder %s913_s11, %s913_s11 }
 0x25e   : > { %p4319_p3 = scmp.lt.s32.totalorder %s4317_s14, %s4310_s10 }
 0x25f   : > { %p4313_p0 = pnand %p4311_p13, %p6482_p5 }
 0x260   : > { %p4320_p1 = por %p4319_p3, %p4318_p8 }
 0x261   : > { %p4314_p11 = pneg %p4313_p0 }
 0x263   : > { %p4321_p2 = pnand %p4320_p1, %p4314_p11 }
 0x265   : > { %4324 = shalt.err (!%p4321_p2)
}
 0x266   : > { %3482 = dma.hbm_to_vmem [thread:$0]  (!%p6483_p6), %s6493_s25, 16, %s913_s11, [#allocation36]  }
 0x267   : > { %s6494_s28 = sld [smem:[#allocation104_spill]] }
 0x26d   : > { %s6495_s12 = smov %s6494_s28  ;;  %s4325_s30 = scalar_lea.hbm %s6494_s28, 256 }
 0x26e   : > { %p4326_p4 = scmp.ne.s32.totalorder %s6495_s12, %s4325_s30  ;;  %p4332_p9 = scmp.lt.u32.totalorder %s4325_s30, %s6495_s12 }
 0x270   : > { %p4328_p7 = pnand %p4326_p4, %p6482_p5 }
 0x272   : > { %p4329_p10 = pneg %p4328_p7 }
 0x274   : > { %p4334_p12 = pnand %p4332_p9, %p4329_p10 }
 0x276   : > { %4337 = shalt.err (!%p4334_p12)
}
 0x277   : > { %s4338_s15 = scalar_lea.vmem %s936_s7, 256  ;;  %p4346_p8 = scmp.lt.s32.totalorder %s936_s7, %s936_s7 }
 0x278   : > { %p4339_p13 = scmp.ne.s32.totalorder %s936_s7, %s4338_s15  ;;  %p4347_p3 = scmp.lt.s32.totalorder %s4338_s15, %s4338_s15 }
 0x27a   : > { %p4341_p0 = pnand %p4339_p13, %p6482_p5  ;;  %p4348_p1 = por %p4347_p3, %p4346_p8 }
 0x27c   : > { %p4342_p11 = pneg %p4341_p0 }
 0x27e   : > { %p4349_p2 = pnand %p4348_p1, %p4342_p11 }
 0x280   : > { %4352 = shalt.err (!%p4349_p2)
}
 0x281   : > { %3488 = dma.hbm_to_vmem [thread:$0]  (!%p6483_p6), %s6495_s12, 256, %s936_s7, [#allocation39], %s6490_s23, %s6490_s23, %s6489_s4  }
 0x282   : > { %s4761_s16 = smov [#allocation41]   ;;  %s6496_s9 = sld [smem:[#allocation105_spill]] }
 0x283   : > { %s948_s27 = sshll.u32 %s4761_s16, 4  ;;  %s949_s27 = int_to_ptr.vmem [resolvable:$true] %s948_s27 }
 0x288   : > { %s6497_s14 = smov %s6496_s9  ;;  %s4353_s5 = scalar_lea.hbm %s6496_s9, 1024 }
 0x289   : > { %p4354_p4 = scmp.ne.s32.totalorder %s6497_s14, %s4353_s5  ;;  %p4360_p9 = scmp.lt.u32.totalorder %s4353_s5, %s6497_s14 }
 0x28b   : > { %p4356_p7 = pnand %p4354_p4, %p6482_p5 }
 0x28d   : > { %p4357_p10 = pneg %p4356_p7 }
 0x28f   : > { %p4362_p12 = pnand %p4360_p9, %p4357_p10 }
 0x291   : > { %4365 = shalt.err (!%p4362_p12)
}
 0x292   : > { %s4366_s7 = scalar_lea.vmem %s949_s27, 1024  ;;  %p4374_p8 = scmp.lt.s32.totalorder %s949_s27, %s949_s27 }
 0x293   : > { %p4367_p13 = scmp.ne.s32.totalorder %s949_s27, %s4366_s7  ;;  %p4375_p3 = scmp.lt.s32.totalorder %s4366_s7, %s4366_s7 }
 0x295   : > { %p4369_p0 = pnand %p4367_p13, %p6482_p5  ;;  %p4376_p1 = por %p4375_p3, %p4374_p8 }
 0x297   : > { %p4370_p11 = pneg %p4369_p0 }
 0x299   : > { %p4377_p2 = pnand %p4376_p1, %p4370_p11 }
 0x29b   : > { %4380 = shalt.err (!%p4377_p2)
}
 0x29c   : > { %s6498_s11 = sld [smem:[#allocation73_spill]]  ;;  %s6499_s2 = sld [smem:[#allocation70_spill]] }
 0x29d   : > { %s6500_s16 = sld [smem:[#allocation69_spill]]  ;;  %s6501_s24 = sld [smem:[#allocation68_spill]] }
 0x29e   : > { %3491 = dma.hbm_to_vmem [thread:$0]  (!%p6483_p6), %s6497_s14, 1024, %s949_s27, [#allocation42], %s6490_s23, %s6490_s23, %s6489_s4  }
 0x29f   : > { %s78_s28 = sadd.s32 1, %s4733_s29  ;;  %p6503_p10 = scmp.eq.s32.totalorder %s4737_s1, 0 }
 0x2a0   : > { %p6505_p12 = scmp.eq.s32.totalorder %s4968_s6, 0  ;;  %p6507_p0 = scmp.eq.s32.totalorder %s4968_s6, 3 }
 0x2a1   : > { %p6510_p8 = scmp.ne.s32.totalorder %s6465_s3, 0  ;;  %s3163_s15 = sshll.u32 %s4733_s29, 1 }
 0x2a2   : > { %s75_s26 = sadd.s32 1, %s6498_s11  ;;  %s87_s30 = sadd.s32 1, %s6499_s2 }
 0x2a3   : > { %p76_p5 = scmp.ge.s32.totalorder %s75_s26, 2  ;;  %p94_p4 = scmp.ne.s32.totalorder %s6499_s2, %s6500_s16 }
 0x2a4   : > { %p100_p7 = scmp.ne.s32.totalorder %s6500_s16, %s6501_s24  ;;  %s962_s10 = sand.u32 1, %s6499_s2  }
 0x2a5   : > { %s6583_s26 = smov (%p76_p5, %s75_s26), 0  ;;  %s6585_s28 = smov (!%p76_p5, %s78_s28), %s4733_s29 }
 0x2a6   : > { %6502 = sst [smem:[#allocation79_spill]] %s6583_s26  ;;  %s83_s9 = ssub.s32 %s6498_s11, %s6583_s26 }
 0x2a7   : > { %p5502_p6 = por %p6503_p10, %p94_p4  ;;  %p80_p9 = scmp.ge.s32.totalorder %s6585_s28, 2 }
 0x2a8   : > { %p5508_p13 = por %p6505_p12, %p100_p7  ;;  %p5514_p11 = por %p6507_p0, %p94_p4 }
 0x2a9   : > { %p5520_p3 = por %p6510_p8, %p100_p7  ;;  %s6587_s28 = smov (%p80_p9, %s6585_s28), 0 }
 0x2aa   : > { %s6506_s23 = scalar_select %p5508_p13, 1, 0 }
 0x2ab   : > { %s6508_s27 = scalar_select %p5514_p11, 1, 0 }
 0x2ac   : > { %s6511_s5 = scalar_select %p5520_p3, 1, 0 }
 0x2ad   : > { %6509 = sst [smem:[#allocation80_spill]] %s6508_s27  ;;  %s82_s7 = ssub.s32 %s4733_s29, %s6587_s28 }
 0x2ae   : > { %6512 = sst [smem:[#allocation81_spill]] %s6511_s5  ;;  %s84_s22 = sor.u32 %s83_s9, %s82_s7 }
 0x2af   : > { %p111_p1 = scmp.eq.s32.totalorder %s82_s7, 0  ;;  %p85_p2 = scmp.eq.s32.totalorder %s84_s22, 0 }
 0x2b0   : > { %s3162_s20 = sshll.u32 %s962_s10, 3  ;;  %s6513_s16 = sadd.s32 1, %s4705_s8 }
 0x2b1   : > { %s5533_s3 = scalar_select %p111_p1, %s4705_s8, %s6513_s16  }
 0x2b2   : > { %s6589_s2 = smov (!%p85_p2, %s6499_s2), %s87_s30  ;;  %s971_s24 = sadd.s32 %s6498_s11, %s3163_s15 }
 0x2b3   : > { %s3164_s12 = sshll.u32 %s971_s24, 7  ;;  %s966_s14 = scalar_lea.vmem [#allocation5], %s3162_s20 }
 0x2b4   : > { %s975_s25 = sshll.u32 %s966_s14, 4  ;;  %s6514_s27 = sld [smem:[#allocation82_spill]]  ;;  %s5544_s25 = int_to_ptr.vmem [resolvable:$true] %s975_s25 }
 0x2b5   : > { %p6515_p5 = scmp.lt.s32.totalorder %s4737_s1, 4  ;;  %s3166_s14 = sshll.u32 %s5237_s0, 2 }
 0x2b6   : > { %s3167_s11 = sshll.u32 %s4733_s29, 6  ;;  %s963_s15 = scalar_lea.sflag [#allocation6], %s962_s10 }
 0x2b7   : > { %p5550_p4 = pnand %p6515_p5, %p5502_p6 }
 0x2b9   : > { %p4383_p10 = pneg %p5550_p4 }
 0x2ba   : > { %s5542_s6 = scalar_lea.hbm %s6514_s27, %s3164_s12  ;;  %s6517_s12 = sld [smem:[#allocation84_spill]] }
 0x2bb   : > { %s4381_s7 = scalar_lea.hbm %s5542_s6, 128  ;;  %s4386_s20 = scalar_lea.hbm %s6514_s27, 512 }
 0x2bc   : > { %p4382_p7 = scmp.ne.s32.totalorder %s5542_s6, %s4381_s7  ;;  %p4387_p12 = scmp.lt.u32.totalorder %s5542_s6, %s6514_s27 }
 0x2bd   : > { %p4388_p0 = scmp.lt.u32.totalorder %s4386_s20, %s4381_s7  ;;  %p4390_p1 = scmp.lt.u32.totalorder %s4381_s7, %s5542_s6 }
 0x2be   : > { %p4384_p6 = pnand %p4383_p10, %p4382_p7 }
 0x2bf   : > { %p4389_p8 = por %p4388_p0, %p4387_p12 }
 0x2c0   : > { %s5559_s5 = scalar_lea.hbm %s6517_s12, %s3167_s11  ;;  %p4385_p9 = pneg %p4384_p6 }
 0x2c1   : > { %p4391_p2 = por %p4390_p1, %p4389_p8 }
 0x2c3   : > { %p4392_p5 = pnand %p4391_p2, %p4385_p9 }
 0x2c5   : > { %4395 = shalt.err (!%p4392_p5)
}
 0x2c6   : > { %s4396_s10 = scalar_lea.vmem %s5544_s25, 128  ;;  %s4762_s11 = smov [#allocation5]  }
 0x2c7   : > { %p4397_p7 = scmp.ne.s32.totalorder %s5544_s25, %s4396_s10  ;;  %s4401_s9 = sshll.u32 %s4762_s11, 4  ;;  %s4402_s9 = int_to_ptr.vmem [resolvable:$false] %s4401_s9 }
 0x2c8   : > { %s4403_s26 = scalar_lea.vmem %s4402_s9, 256  ;;  %p4404_p11 = scmp.lt.s32.totalorder %s5544_s25, %s4402_s9 }
 0x2c9   : > { %p4399_p6 = pnand %p4397_p7, %p4383_p10  ;;  %p4405_p12 = scmp.lt.s32.totalorder %s4403_s26, %s4396_s10 }
 0x2cb   : > { %p4400_p3 = pneg %p4399_p6  ;;  %p4406_p0 = por %p4405_p12, %p4404_p11 }
 0x2cd   : > { %p4407_p8 = pnand %p4406_p0, %p4400_p3 }
 0x2cf   : > { %4410 = shalt.err (!%p4407_p8)
}
 0x2d0   : > { %3495 = dma.hbm_to_vmem [thread:$0]  (!%p5550_p4), %s5542_s6, 128, %s5544_s25, %s963_s15  }
 0x2d1   : > { %s1003_s7 = scalar_lea.vmem [#allocation10], %s3166_s14  ;;  %s1020_s22 = scalar_lea.vmem [#allocation11], %s5237_s0 }
 0x2d2   : > { %s1010_s4 = sshll.u32 %s1003_s7, 4  ;;  %s1027_s20 = sshll.u32 %s1020_s22, 4  ;;  %s5588_s4 = int_to_ptr.vmem [resolvable:$true] %s1010_s4  ;;  %s1028_s20 = int_to_ptr.vmem [resolvable:$true] %s1027_s20 }
 0x2d3   : > { %s4411_s16 = scalar_lea.hbm %s5559_s5, 64  ;;  %p6518_p3 = scmp.ne.s32.totalorder %s6479_s13, 0 }
 0x2d4   : > { %p4412_p11 = scmp.ne.s32.totalorder %s5559_s5, %s4411_s16  ;;  %s4416_s10 = scalar_lea.hbm %s6517_s12, 128 }
 0x2d5   : > { %p4417_p4 = scmp.lt.u32.totalorder %s5559_s5, %s6517_s12  ;;  %p4418_p1 = scmp.lt.u32.totalorder %s4416_s10, %s4411_s16 }
 0x2d6   : > { %p4414_p10 = pnand %p4412_p11, %p6518_p3  ;;  %p4420_p5 = scmp.lt.u32.totalorder %s4411_s16, %s5559_s5 }
 0x2d7   : > { %p4419_p2 = por %p4418_p1, %p4417_p4 }
 0x2d8   : > { %p4415_p9 = pneg %p4414_p10 }
 0x2d9   : > { %p4421_p7 = por %p4420_p5, %p4419_p2 }
 0x2db   : > { %p4422_p6 = pnand %p4421_p7, %p4415_p9 }
 0x2dd   : > { %4425 = shalt.err (!%p4422_p6)
}
 0x2de   : > { %s4426_s6 = scalar_lea.vmem %s5588_s4, 64  ;;  %s4763_s0 = smov [#allocation10]  }
 0x2df   : > { %p4427_p12 = scmp.ne.s32.totalorder %s5588_s4, %s4426_s6  ;;  %s4431_s25 = sshll.u32 %s4763_s0, 4  ;;  %s4432_s25 = int_to_ptr.vmem [resolvable:$false] %s4431_s25 }
 0x2e0   : > { %s4433_s14 = scalar_lea.vmem %s4432_s25, 128  ;;  %p4434_p11 = scmp.lt.s32.totalorder %s5588_s4, %s4432_s25 }
 0x2e1   : > { %p4429_p0 = pnand %p4427_p12, %p6518_p3  ;;  %p4435_p10 = scmp.lt.s32.totalorder %s4433_s14, %s4426_s6 }
 0x2e3   : > { %p4430_p8 = pneg %p4429_p0  ;;  %p4436_p4 = por %p4435_p10, %p4434_p11 }
 0x2e5   : > { %p4437_p1 = pnand %p4436_p4, %p4430_p8 }
 0x2e7   : > { %4440 = shalt.err (!%p4437_p1)
}
 0x2e8   : > { %p6519_p9 = scmp.ne.s32.totalorder %s6475_s18, 0  ;;  %s6520_s15 = sand.u32 1, %s4737_s1  }
 0x2e9   : > { %s1018_s26 = scalar_lea.sflag [#allocation12], %s6520_s15  ;;  %s4441_s7 = scalar_lea.hbm %s5259_s19, 16 }
 0x2ea   : > { %3501 = dma.hbm_to_vmem [thread:$0]  (!%p6519_p9), %s5559_s5, 64, %s5588_s4, %s5265_s21  }
 0x2eb   : > { %p4442_p2 = scmp.ne.s32.totalorder %s5259_s19, %s4441_s7  ;;  %s4446_s30 = scalar_lea.hbm %s6477_s17, 32 }
 0x2ec   : > { %p4447_p6 = scmp.lt.u32.totalorder %s5259_s19, %s6477_s17  ;;  %p4448_p12 = scmp.lt.u32.totalorder %s4446_s30, %s4441_s7 }
 0x2ed   : > { %p4444_p5 = pnand %p4442_p2, %p6518_p3  ;;  %p4450_p8 = scmp.lt.u32.totalorder %s4441_s7, %s5259_s19 }
 0x2ee   : > { %p4449_p0 = por %p4448_p12, %p4447_p6 }
 0x2ef   : > { %p4445_p7 = pneg %p4444_p5 }
 0x2f0   : > { %p4451_p11 = por %p4450_p8, %p4449_p0 }
 0x2f2   : > { %p4452_p10 = pnand %p4451_p11, %p4445_p7 }
 0x2f4   : > { %4455 = shalt.err (!%p4452_p10)
}
 0x2f5   : > { %s4456_s21 = scalar_lea.vmem %s1028_s20, 16  ;;  %s4764_s5 = smov [#allocation11]  }
 0x2f6   : > { %p4457_p4 = scmp.ne.s32.totalorder %s1028_s20, %s4456_s21  ;;  %s4461_s4 = sshll.u32 %s4764_s5, 4  ;;  %s4462_s4 = int_to_ptr.vmem [resolvable:$false] %s4461_s4 }
 0x2f7   : > { %s4463_s11 = scalar_lea.vmem %s4462_s4, 32  ;;  %p4464_p5 = scmp.lt.s32.totalorder %s1028_s20, %s4462_s4 }
 0x2f8   : > { %p4459_p1 = pnand %p4457_p4, %p6518_p3  ;;  %p4465_p13 = scmp.lt.s32.totalorder %s4463_s11, %s4456_s21 }
 0x2fa   : > { %p4460_p2 = pneg %p4459_p1  ;;  %p4466_p9 = por %p4465_p13, %p4464_p5 }
 0x2fc   : > { %p4467_p6 = pnand %p4466_p9, %p4460_p2 }
 0x2fe   : > { %4470 = shalt.err (!%p4467_p6)
}
 0x2ff   : > { %p6521_p12 = scmp.ne.s32.totalorder %s6475_s18, 0  ;;  %s6522_s9 = sld [smem:[#allocation75_spill]] }
 0x301   : > { %3504 = dma.hbm_to_vmem [thread:$0]  (!%p6521_p12), %s5259_s19, 16, %s1028_s20, %s1018_s26  }
 0x305   : > { %p6523_p7 = scmp.ne.s32.totalorder %s6522_s9, 0 }
 0x306   : > { %s6524_s6 = sld [smem:[#allocation69_spill]] (!%p6523_p7)  ;;  %p6525_p13 = scmp.ne.s32.totalorder (!%p6523_p7), %s6506_s23, 0 }
 0x307   : > { %1036 = sbr.rel (%p6523_p7) target bundleno = 2797 (0xaed), region = 116 }
 0x30c   : > { %s5635_s13 = sand.u32 (!%p6523_p7), 1, %s6524_s6  }
 0x30d   : > { %s3170_s0 = sshll.u32 (!%p6523_p7), %s5635_s13, 3  ;;  %s1039_s25 = scalar_lea.sflag (!%p6523_p7), [#allocation6], %s5635_s13 }
 0x30e   : > { %s5641_s14 = scalar_lea.vmem [#allocation5], %s3170_s0 }
 0x30f   : > { %4628 = dma.done.wait (%p6525_p13), %s1039_s25, 128  }
 0x310   : > { %4630 = vsyncadd (%p6525_p13), %s1039_s25, 4294967168  ;;  %s6526_s19 = sld [smem:[#allocation74_spill]]  ;;  %s6527_s18 = sld [smem:[#allocation67_spill]] }
 0x311   : > { %s6528_s20 = sld [smem:[#allocation76_spill]] }
 0x316   : > { %s5648_s15 = sand.u32 1, %s6526_s19   ;;  %s5651_s26 = sand.u32 1, %s6527_s18  }
 0x317   : > { %s1048_s7 = scalar_lea.sflag [#allocation9], %s5648_s15  ;;  %s1050_s22 = scalar_lea.vmem [#allocation8], %s5651_s26 }
 0x318   : > { %p6529_p3 = scmp.ne.s32.totalorder %s6528_s20, 0 }
 0x31a   : > { %4632 = dma.done.wait (%p6529_p3), %s1048_s7, 80  }
 0x31b   : > { %4634 = vsyncadd (%p6529_p3), %s1048_s7, 4294967216  ;;  %s3171_s23 = sshll.u32 %s5651_s26, 2  ;;  %s1065_s30 = scalar_lea.sflag [#allocation12], %s5648_s15 }
 0x31c   : > { %s5662_s16 = scalar_lea.vmem [#allocation10], %s3171_s23  ;;  %s1067_s24 = scalar_lea.vmem [#allocation11], %s5651_s26 }
 0x31d   : > { %4636 = dma.done.wait (%p6529_p3), %s1065_s30, 16  }
 0x31e   : > { %4638 = vsyncadd (%p6529_p3), %s1065_s30, 4294967280  ;;  %p6530_p9 = scmp.eq.s32.totalorder %s6526_s19, 0 }
 0x320   : > { %4640 = dma.done.wait (%p6530_p9), [#allocation12], 16   ;;  %p6531_p0 = pmov %p6530_p9 }
 0x322   : > { %4642 = vsyncadd (%p6531_p0), [#allocation12], 4294967280  ;;  %p6532_p8 = pmov %p6531_p0 }
 0x323   : > { %p6533_p11 = pmov %p6531_p0 }
 0x324   : > { %4644 = dma.done.wait (%p6532_p8), [#allocation15], 32  }
 0x325   : > { %4646 = vsyncadd (%p6533_p11), [#allocation15], 4294967264  ;;  %p6534_p10 = pmov %p6531_p0 }
 0x326   : > { %p6535_p4 = pmov %p6531_p0 }
 0x327   : > { %4648 = dma.done.wait (%p6534_p10), [#allocation18], 32  }
 0x328   : > { %4650 = vsyncadd (%p6535_p4), [#allocation18], 4294967264  ;;  %p6536_p1 = pmov %p6531_p0 }
 0x329   : > { %p6537_p2 = pmov %p6531_p0 }
 0x32a   : > { %4652 = dma.done.wait (%p6536_p1), [#allocation21], 32  }
 0x32b   : > { %4654 = vsyncadd (%p6537_p2), [#allocation21], 4294967264  ;;  %p6538_p5 = pmov %p6531_p0 }
 0x32c   : > { %p6539_p6 = pmov %p6531_p0 }
 0x32d   : > { %4656 = dma.done.wait (%p6538_p5), [#allocation24], 32  }
 0x32e   : > { %4658 = vsyncadd (%p6539_p6), [#allocation24], 4294967264  ;;  %p6540_p12 = pmov %p6531_p0 }
 0x32f   : > { %p6541_p7 = pmov %p6531_p0 }
 0x330   : > { %4660 = dma.done.wait (%p6540_p12), [#allocation27], 32  }
 0x331   : > { %4662 = vsyncadd (%p6541_p7), [#allocation27], 4294967264  ;;  %p6542_p13 = pmov %p6531_p0 }
 0x332   : > { %p6543_p3 = pmov %p6531_p0 }
 0x333   : > { %4664 = dma.done.wait (%p6542_p13), [#allocation30], 512  }
 0x334   : > { %4666 = vsyncadd (%p6543_p3), [#allocation30], 4294966784  ;;  %p6544_p9 = pmov %p6531_p0 }
 0x336   : > { %4668 = dma.done.wait (%p6544_p9), [#allocation33], 512  }
 0x337   : > { %4670 = vsyncadd (%p6531_p0), [#allocation33], 4294966784  ;;  %p6545_p8 = pmov %p6531_p0 }
 0x338   : > { %p6546_p11 = pmov %p6531_p0 }
 0x339   : > { %4672 = dma.done.wait (%p6545_p8), [#allocation36], 32  }
 0x33a   : > { %4674 = vsyncadd (%p6546_p11), [#allocation36], 4294967264  ;;  %p6547_p10 = pmov %p6531_p0 }
 0x33b   : > { %p6548_p4 = pmov %p6531_p0 }
 0x33c   : > { %4676 = dma.done.wait (%p6547_p10), [#allocation39], 512  }
 0x33d   : > { %4678 = vsyncadd (%p6548_p4), [#allocation39], 4294966784  ;;  %p6549_p1 = pmov %p6531_p0 }
 0x33e   : > { %p6550_p2 = pmov %p6531_p0 }
 0x33f   : > { %4680 = dma.done.wait (%p6549_p1), [#allocation42], 1024  }
 0x340   : > { %4682 = vsyncadd (%p6550_p2), [#allocation42], 4294966272  ;;  %s5716_s10 = scalar_lea.vmem [#allocation43], %s3170_s0  ;;  %s5719_s21 = scalar_lea.vmem [#allocation44], %s5651_s26 }
 0x341   : > { %s5723_s5 = scalar_lea.vmem [#allocation46], %s3171_s23  ;;  %s5726_s4 = scalar_lea.vmem [#allocation47], %s5651_s26 }
 0x342   : > { %s6551_s11 = sld [smem:[#allocation71_spill]] }
 0x348   : > { %p3194_p5 = scmp.ne.s32.totalorder %s6551_s11, 0 }
 0x349   : > { %v1249_v0 = vld [vmem:[%s1050_s22] sm:$0x1] (!%p3194_p5)  ;;  %vm1250_vm0 = vcmask (!%p3194_p5), 253952   ;;  %vm1255_vm1 = vcmask (!%p3194_p5), 256000   ;;  %v1254_v2 = vld [vmem:[%s5662_s16] sm:$0x7] (!%p3194_p5) }
 0x34a   : > { %1248 = sbr.rel (%p3194_p5) target bundleno = 849 (0x351), region = 216  ;;  %v1252_v1 = vld [vmem:[%s1067_s24] sm:$0x1] (!%p3194_p5)  ;;  %1251 = vst.msk [vmem:[%s5719_s21] sm:$0x1] (!%p3194_p5), %vm1250_vm0, %v1249_v0 }
 0x34b   : > { %1253 = vst.msk [vmem:[%s5726_s4] sm:$0x1] (!%p3194_p5), %vm1250_vm0, %v1252_v1 }
 0x34c   : > { %1256 = vst.msk [vmem:[%s5723_s5] sm:$0x7] (!%p3194_p5), %vm1255_vm1, %v1254_v2 }
 0x351 PF: > { %v1257_v3 = vld [vmem:[%s5641_s14] sm:$0xff]  ;;  %vm1260_vm2 = vcmask 261120   ;;  %v3195_v14 = vld [vmem:[#allocation13] ss:$0 sm:$0xff]  ;;  %v3196_v16 = vld [vmem:[#allocation14] ss:$0 sm:$0xff]  ;;  %v1320_v31 = vlaneseq }
 0x352   : > { %v1261_v4 = vsel %vm1260_vm2, %v1257_v3, 0.0  ;;  %v3673_v25 = vld [vmem:[#allocation29] sm:$0xff]   ;;  %v4765_v26 = vmov 0.0   ;;  %vm4766_vm3 = vmmov 0   ;;  %v3674_v27 = vld [vmem:[#allocation29 + $0x8] sm:$0xff]   ;;  %vm2339_vm4 = vcmask 261127  }
 0x353   : > { %1262 = vadd.xlane.f32.xlu0 %v1261_v4  ;;  %3267 = vmatprep.subr.bf16.mxu0 %v4765_v26  ;;  %v5754_v32 = vshrl.u32 %v1320_v31, 7  ;;  %v1330_v33 = vld [vmem:[#allocation22] sm:$0x1]  ;;  %v3197_v35 = vld [vmem:[#allocation16] ss:$0 sm:$0xff]  ;;  %v3676_v60 = vld [vmem:[#allocation31 + $0x8] sm:$0xff]  }
 0x354   : > { %3271 = vmatprep.mubr.msk.bf16.mxu0 %vm4766_vm3, %v4765_v26  ;;  %3268 = vmatpush3.bf16.msra.mxu0 %v3673_v25  ;;  %v3198_v37 = vld [vmem:[#allocation17] ss:$0 sm:$0xff]  ;;  %v1340_v39 = vsub.f32 1.0, %v1330_v33  ;;  %v1331_v41 = vld [vmem:[#allocation23] sm:$0x1]  ;;  %v3677_v0 = vld [vmem:[#allocation32] sm:$0xff]  }
 0x355   : > { %3291 = vmatprep.subr.bf16.mxu1 %v4765_v26  ;;  %3269 = vmatprep.subr.bf16.mxu0 %v4765_v26  ;;  %v5757_v38 = vsub.s32 0, %v5754_v32  ;;  %v3199_v42 = vld [vmem:[%s5719_s21] ss:$0 sm:$0xff]  ;;  %vm1322_vm5 = vcmp.eq.s32.totalorder %v5754_v32, 0  ;;  %v1356_v46 = vsub.f32 1.0, %v1331_v41  ;;  %v3675_v55 = vld [vmem:[#allocation31] sm:$0xff]  }
 0x356   : > { %3295 = vmatprep.mubr.msk.bf16.mxu1 %vm4766_vm3, %v4765_v26  ;;  %v1332_v52 = vld [vmem:[#allocation25] sm:$0x1]  ;;  %v3678_v4 = vld [vmem:[#allocation32 + $0x8] sm:$0xff]   ;;  %vm2271_vm6 = vcmask 253952   ;;  %vm1675_vm7 = vcmp.eq.s32.totalorder %v5754_v32, 1  ;;  %vm1755_vm8 = vcmp.eq.s32.totalorder %v5754_v32, 2 }
 0x357   : > { %v1337_v44 = vrot.slane %v1330_v33, %v5757_v38  ;;  %v1345_v45 = vrot.slane %v1340_v39, %v5757_v38  ;;  %v1361_v51 = vrot.slane %v1356_v46, %v5757_v38  ;;  %v1353_v54 = vrot.slane %v1331_v41, %v5757_v38  ;;  %s6552_s9 = sld [smem:[#allocation72_spill]]  ;;  %s6553_s6 = sld [smem:[#allocation77_spill]] }
 0x358   : > { %3270 = vmatpush3.bf16.msra.mxu0 %v3674_v27  ;;  %v1372_v58 = vsub.f32 1.0, %v1332_v52  ;;  %v1369_v63 = vrot.slane %v1332_v52, %v5757_v38  ;;  %vm1835_vm9 = vcmp.eq.s32.totalorder %v5754_v32, 3  ;;  %vm1945_vm10 = vcmp.eq.s32.totalorder %v5754_v32, 4  ;;  %s6554_s19 = sld [smem:[#allocation107_spill]]  ;;  %s2692_s20 = sshll.u32 %s5719_s21, 4  ;;  %s2693_s20 = int_to_ptr.vmem [resolvable:$true] %s2692_s20 }
 0x359   : > { %3275 = vmatprep.subr.bf16.mxu0 %v4765_v26  ;;  %vm2039_vm11 = vcmp.eq.s32.totalorder %v5754_v32, 5  ;;  %vm2121_vm12 = vcmp.eq.s32.totalorder %v5754_v32, 6  ;;  %vm2203_vm13 = vcmp.eq.s32.totalorder %v5754_v32, 7  ;;  %vm2269_vm14 = vcmask 257024   ;;  %s6410_s7 = scalar_lea.sflag [#allocation45], %s5648_s15  ;;  %s4471_s22 = scalar_lea.vmem %s2693_s20, 16 }
 0x35a   : > { %v1377_v62 = vrot.slane %v1372_v58, %v5757_v38  ;;  %p4472_p6 = scmp.ne.s32.totalorder %s2693_s20, %s4471_s22  ;;  %s4768_s23 = smov [#allocation44]  }
 0x35b   : > { %s4475_s16 = sshll.u32 %s4768_s23, 4  ;;  %s4476_s16 = int_to_ptr.vmem [resolvable:$false] %s4475_s16 }
 0x35c   : > { %s4477_s30 = scalar_lea.vmem %s4476_s16, 32  ;;  %p4478_p3 = scmp.lt.s32.totalorder %s2693_s20, %s4476_s16 }
 0x35d   : > { %s3235_s0 = sshll.u32 %s6552_s9, 4  ;;  %p6555_p12 = scmp.ne.s32.totalorder %s6553_s6, 0 }
 0x35e   : > { %s6153_s18 = scalar_lea.hbm %s6554_s19, %s3235_s0  ;;  %p4479_p9 = scmp.lt.s32.totalorder %s4477_s30, %s4471_s22 }
 0x35f   : > { %p4473_p7 = pnand %p4472_p6, %p6555_p12 }
 0x360   : > { %p4480_p0 = por %p4479_p9, %p4478_p3 }
 0x361   : > { %p4474_p13 = pneg %p4473_p7 }
 0x363   : > { %p4481_p8 = pnand %p4480_p0, %p4474_p13 }
 0x3e0   : > { %v1263_v5 = vpop.xlane.xlu0 %1262 }
 0x3e1   : > { %v1265_v6 = vmul.f32 0.03125, %v1263_v5 }
 0x3e3   : > { %v1266_v7 = vsub.f32 %v1257_v3, %v1265_v6 }
 0x3e5   : > { %v1267_v8 = vmul.f32 %v1266_v7, %v1266_v7 }
 0x3e7   : > { %v1268_v9 = vsel %vm1260_vm2, %v1267_v8, 0.0  ;;  %v3682_v8 = vld [vmem:[#allocation34 + $0x8] sm:$0xff]  }
 0x3e8   : > { %1269 = vadd.xlane.f32.xlu0 %v1268_v9  ;;  %v1569_v9 = vld [vmem:[#allocation26] sm:$0x1] }
 0x475   : > { %v1270_v10 = vpop.xlane.xlu0 %1269 }
 0x476   : > { %v1271_v11 = vmul.f32 0.03125, %v1270_v10  ;;  %v1570_v10 = vmul.f32 1.442695, %v1569_v9 }
 0x478   : > { %v1272_v12 = vadd.f32 1e-05, %v1271_v11  ;;  %v4767_v11 = vmov 1966171168  }
 0x47a   : > { %3695 = vrsqrt.f32 %v1272_v12  ;;  %v1614_v12 = vunpack.c.l.s4 %v4767_v11 }
 0x484   : > { %v3696_v13 = vpop.eup %3695 }
 0x485   : > { %v1274_v15 = vmul.f32 %v3696_v13, %v1266_v7  ;;  %v3681_v7 = vld [vmem:[#allocation34] sm:$0xff]  }
 0x486   : > { %3292 = vmatpush3.bf16.msra.mxu1 %v3681_v7 }
 0x487   : > { %v1281_v17 = vmul.f32 %v3195_v14, %v1274_v15  ;;  %3293 = vmatprep.subr.bf16.mxu1 %v4765_v26  ;;  %v1615_v15 = vunpack.c.0.s8 %v1614_v12 }
 0x489   : > { %v5740_v18 = vadd.f32 %v3196_v16, %v1281_v17 }
 0x48a   : > { %3294 = vmatpush3.bf16.msra.mxu1 %v3682_v8 }
 0x48b   : > { %v1291_v19 = vsel %vm1260_vm2, %v5740_v18, 0.0  ;;  %3307 = vmatprep.subr.bf16.mxu1 %v4765_v26 }
 0x48c   : > { %1292 = vadd.xlane.f32.xlu1 %v1291_v19 }
 0x519   : > { %v1293_v20 = vpop.xlane.xlu1 %1292 }
 0x51a   : > { %v1294_v21 = vmul.f32 0.03125, %v1293_v20  ;;  %v1576_v20 = vld [vmem:[%s5723_s5 + $0x2] sm:$0x1] }
 0x51c   : > { %v1295_v22 = vsub.f32 %v5740_v18, %v1294_v21 }
 0x51e   : > { %v1296_v23 = vmul.f32 %v1295_v22, %v1295_v22 }
 0x520   : > { %v1297_v24 = vsel %vm1260_vm2, %v1296_v23, 0.0 }
 0x521   : > { %1298 = vadd.xlane.f32.xlu1 %v1297_v24 }
 0x5ae   : > { %v1299_v28 = vpop.xlane.xlu1 %1298 }
 0x5af   : > { %v1300_v29 = vmul.f32 0.03125, %v1299_v28 }
 0x5b1   : > { %v1301_v30 = vadd.f32 1e-05, %v1300_v29 }
 0x5b3   : > { %3697 = vrsqrt.f32 %v1301_v30 }
 0x5b4   : > { %3699 = vpow2.f32 %v1570_v10 }
 0x5bd   : > { %v3698_v34 = vpop.eup %3697 }
 0x5be   : > { %v1303_v36 = vmul.f32 %v3698_v34, %v1295_v22  ;;  %v3700_v13 = vpop.eup %3699  ;;  %v5791_v22 = vsub.s32 %v1615_v15, %v5754_v32 }
 0x5bf   : > { %v5787_v17 = vsub.f32 0.0, %v3700_v13 }
 0x5c0   : > { %v1310_v40 = vmul.f32 %v3197_v35, %v1303_v36 }
 0x5c1   : > { %v1599_v23 = vadd.f32 %v1576_v20, %v5787_v17 }
 0x5c2   : > { %v1317_v43 = vadd.f32 %v3198_v37, %v1310_v40 }
 0x5c4   : > { %v1319_v47 = vrot.slane %v1317_v43, 7  ;;  %2340 = vst.msk [vmem:[%s5719_s21 - $0x7] sm:$0x80] %vm2339_vm4, %v1317_v43  ;;  %v1339_v49 = vmul.f32 %v1337_v44, %v1317_v43  ;;  %v1355_v59 = vmul.f32 %v1353_v54, %v1317_v43  ;;  %v1371_v3 = vmul.f32 %v1369_v63, %v1317_v43  ;;  %v5814_v44 = vld [vmem:[#allocation28] sm:$0x1] }
 0x5c6   : > { %v1329_v48 = vsel %vm1322_vm5, %v3199_v42, %v1319_v47 }
 0x5c7   : > { %v1347_v50 = vmul.f32 %v1345_v45, %v1329_v48  ;;  %v1363_v57 = vmul.f32 %v1361_v51, %v1329_v48  ;;  %v1379_v2 = vmul.f32 %v1377_v62, %v1329_v48 }
 0x5c9   : > { %v1348_v53 = vadd.f32 %v1347_v50, %v1339_v49  ;;  %v1364_v61 = vadd.f32 %v1363_v57, %v1355_v59  ;;  %v1380_v5 = vadd.f32 %v1379_v2, %v1371_v3 }
 0x5cb   : > { %v1385_v56 = vpack.c.bf16 %v1348_v53, %v1348_v53  ;;  %v1446_v1 = vpack.c.bf16 %v1364_v61, %v1364_v61  ;;  %v1507_v6 = vpack.c.bf16 %v1380_v5, %v1380_v5 }
 0x5cd   : > { %3272 = vmatmul.mubr.msk.bf16.vlgmr.msra.gmra.mrb[0].mxu0 %vm1260_vm2, %v1385_v56 }
 0x5ce   : > { %3276 = vmatpush3.bf16.msra.mxu0 %v3675_v55  ;;  %3279 = vmatprep.mubr.msk.bf16.mxu0 %vm4766_vm3, %v4765_v26 }
 0x5cf   : > { %3277 = vmatprep.subr.bf16.mxu0 %v4765_v26 }
 0x5d2   : > { %3278 = vmatpush3.bf16.msra.mxu0 %v3676_v60 }
 0x5d3   : > { %3283 = vmatprep.subr.bf16.mxu0 %v4765_v26 }
 0x5d5   : > { %3280 = vmatmul.mubr.msk.bf16.vlgmr.msra.gmra.mrb[4].mxu0 %vm1260_vm2, %v1446_v1 }
 0x5d6   : > { %3284 = vmatpush3.bf16.msra.mxu0 %v3677_v0  ;;  %3287 = vmatprep.mubr.msk.bf16.mxu0 %vm4766_vm3, %v4765_v26 }
 0x5d7   : > { %3285 = vmatprep.subr.bf16.mxu0 %v4765_v26 }
 0x5da   : > { %3286 = vmatpush3.bf16.msra.mxu0 %v3678_v4 }
 0x5db   : > { %3299 = vmatprep.subr.bf16.mxu0 %v4765_v26 }
 0x5dd   : > { %3288 = vmatmul.mubr.msk.bf16.vlgmr.msra.gmra.mrb[8].mxu0 %vm1260_vm2, %v1507_v6 }
 0x5de   : > { %3303 = vmatprep.mubr.msk.bf16.mxu0 %vm4766_vm3, %v4765_v26 }
 0x6a0   : > { %v1435_v14 = vpop.f32.mrb[0].mxu0 }
 0x6a1   : > { %1441 = vst.msk [vmem:[#allocation2] sm:$0xff] %vm1260_vm2, %v1435_v14  ;;  %v3273_v16 = vpop.f32.mrb[1].mxu0 }
 0x6a2   : > { %v1438_v19 = vpop.f32.mrb[2].mxu0 }
 0x6a3   : > { %v3274_v21 = vpop.f32.mrb[3].mxu0 }
 0x6a8   : > { %v5794_v24 = vld [vmem:[#allocation2] sm:$0xff]  ;;  %v1496_v25 = vpop.f32.mrb[4].mxu0 }
 0x6a9   : > { %v1619_v27 = vrot.slane %v5794_v24, %v5791_v22  ;;  %1502 = vst.msk [vmem:[#allocation3] sm:$0xff] %vm1260_vm2, %v1496_v25  ;;  %v3281_v28 = vpop.f32.mrb[5].mxu0  ;;  %v5800_v29 = vmax.f32 %v1599_v23, %v5794_v24  ;;  %v1898_v42 = vcombine.high %v5794_v24, %v5794_v24  ;;  %v1579_v50 = vadd.f32 %v5794_v24, %v5814_v44 }
 0x6aa   : > { %v1499_v30 = vpop.f32.mrb[6].mxu0 }
 0x6ab   : > { %v1620_v31 = vcombine.high %v1619_v27, %v1619_v27  ;;  %v3282_v33 = vpop.f32.mrb[7].mxu0  ;;  %v1683_v35 = vadd.f32 %v5800_v29, %v5787_v17  ;;  %v1627_v36 = vrot.slane %v1619_v27, %v5791_v22  ;;  %v1601_v51 = vsub.f32 %v1599_v23, %v5800_v29 }
 0x6ac   : > { %v1905_v52 = vrot.slane %v1898_v42, %v5791_v22  ;;  %v1580_v58 = vmax.f32 %v1576_v20, %v1579_v50  ;;  %v1604_v60 = vsub.f32 %v5794_v24, %v5800_v29  ;;  %v1575_v42 = vld [vmem:[%s5723_s5 + $0x1] sm:$0x1] }
 0x6ad   : > { %v1634_v34 = vrot.slane %v1620_v31, %v5791_v22  ;;  %v1736_v45 = vcombine.high %v1627_v36, %v1627_v36  ;;  %v1602_v59 = vmul.f32 1.442695, %v1601_v51 }
 0x6ae   : > { %v5840_v61 = vrot.slane %v1905_v52, %v5791_v22  ;;  %v2006_v1 = vcombine.high %v1905_v52, %v1905_v52  ;;  %v1581_v5 = vsub.f32 %v1576_v20, %v1580_v58  ;;  %v1605_v6 = vmul.f32 1.442695, %v1604_v60  ;;  %v5899_v52 = vld [vmem:[%s5723_s5] sm:$0x1] }
 0x6af   : > { %v5806_v37 = vmax.f32 %v1683_v35, %v1634_v34  ;;  %v5827_v55 = vcombine.high %v1634_v34, %v1634_v34  ;;  %v1738_v7 = vadd.f32 %v1736_v45, %v5814_v44  ;;  %v5857_v8 = vadd.f32 %v1634_v34, %v5814_v44 }
 0x6b0   : > { %v5808_v39 = vpop.f32.mrb[8].mxu0  ;;  %v5864_v11 = vrot.slane %v2006_v1, %v5791_v22  ;;  %v1582_v16 = vmul.f32 1.442695, %v1581_v5  ;;  %v1584_v20 = vsub.f32 %v1579_v50, %v1580_v58 }
 0x6b1   : > { %v3289_v40 = vpop.f32.mrb[9].mxu0  ;;  %v1692_v41 = vrot.slane %v5806_v37, %v5757_v38  ;;  %v1763_v46 = vadd.f32 %v5806_v37, %v5787_v17  ;;  %v1685_v2 = vsub.f32 %v1683_v35, %v5806_v37  ;;  %v1739_v14 = vmax.f32 %v5806_v37, %v1738_v7 }
 0x6b2   : > { %v1560_v43 = vpop.f32.mrb[10].mxu0  ;;  %v1637_v19 = vmax.f32 %v5800_v29, %v5857_v8  ;;  %v1585_v33 = vmul.f32 1.442695, %v1584_v20  ;;  %v5886_v35 = vcombine.high %v5840_v61, %v5840_v61 }
 0x6b3   : > { %v3290_v47 = vpop.f32.mrb[11].mxu0  ;;  %v1694_v48 = vsub.f32 %v5794_v24, %v1692_v41  ;;  %v5819_v49 = vmax.f32 %v1763_v46, %v1736_v45  ;;  %v1686_v12 = vmul.f32 1.442695, %v1685_v2  ;;  %v1743_v27 = vsub.f32 %v1738_v7, %v1739_v14 }
 0x6b4   : > { %v1638_v31 = vsub.f32 %v5800_v29, %v1637_v19  ;;  %v1641_v58 = vsub.f32 %v5857_v8, %v1637_v19  ;;  %v1818_v2 = vadd.f32 %v5827_v55, %v5814_v44 }
 0x6b5   : > { %v1695_v53 = vmul.f32 1.442695, %v1694_v48  ;;  %v1772_v54 = vrot.slane %v5819_v49, %v5757_v38  ;;  %v5831_v56 = vadd.f32 %v5819_v49, %v5787_v17  ;;  %v1765_v23 = vsub.f32 %v1763_v46, %v5819_v49  ;;  %v5894_v46 = vld [vmem:[#allocation3] sm:$0xff] }
 0x6b6   : > { %v1744_v43 = vmul.f32 1.442695, %v1743_v27  ;;  %v1639_v47 = vmul.f32 1.442695, %v1638_v31 }
 0x6b7   : > { %v5835_v57 = vmax.f32 %v5831_v56, %v5827_v55  ;;  %3701 = vpow2.f32 %v1695_v53  ;;  %v1774_v62 = vsub.f32 %v5794_v24, %v1772_v54  ;;  %v1766_v40 = vmul.f32 1.442695, %v1765_v23 }
 0x6b8   : > { %3703 = vpow2.f32 %v1602_v59  ;;  %v1819_v55 = vmax.f32 %v5819_v49, %v1818_v2 }
 0x6b9   : > { %v1852_v63 = vrot.slane %v5835_v57, %v5757_v38  ;;  %v5847_v0 = vadd.f32 %v5835_v57, %v5787_v17  ;;  %v1775_v9 = vmul.f32 1.442695, %v1774_v62  ;;  %3705 = vpow2.f32 %v1605_v6 }
 0x6ba   : > { %v1845_v60 = vsub.f32 %v5831_v56, %v5835_v57 }
 0x6bb   : > { %v1854_v3 = vsub.f32 %v5794_v24, %v1852_v63  ;;  %v5853_v4 = vmax.f32 %v5847_v0, %v5840_v61  ;;  %3707 = vpow2.f32 %v1775_v9  ;;  %v1740_v63 = vsub.f32 %v5806_v37, %v1739_v14 }
 0x6bc   : > { %3709 = vpow2.f32 %v1686_v12 }
 0x6bd   : > { %v5861_v10 = vadd.f32 %v5853_v4, %v5787_v17  ;;  %v1855_v13 = vmul.f32 1.442695, %v1854_v3  ;;  %v1962_v25 = vrot.slane %v5853_v4, %v5757_v38  ;;  %v1741_v23 = vmul.f32 1.442695, %v1740_v63 }
 0x6bf   : > { %v5869_v15 = vmax.f32 %v5861_v10, %v5864_v11  ;;  %3711 = vpow2.f32 %v1855_v13  ;;  %v1964_v41 = vsub.f32 %v5794_v24, %v1962_v25  ;;  %v1846_v13 = vmul.f32 1.442695, %v1845_v60 }
 0x6c0   : > { %3713 = vpow2.f32 %v1582_v16 }
 0x6c1   : > { %v3702_v21 = vpop.eup %3701  ;;  %v5878_v28 = vadd.f32 %v5869_v15, %v5787_v17  ;;  %v2056_v30 = vrot.slane %v5869_v15, %v5757_v38  ;;  %3715 = vpow2.f32 %v1585_v33  ;;  %v1965_v59 = vmul.f32 1.442695, %v1964_v41 }
 0x6c2   : > { %v1725_v34 = vrot.slane %v3702_v21, %v5791_v22  ;;  %v3704_v36 = vpop.eup %3703  ;;  %v1698_v48 = vmul.f32 %v3702_v21, %v5894_v46  ;;  %3717 = vpow2.f32 %v1766_v40  ;;  %v1642_v21 = vmul.f32 1.442695, %v1641_v58 }
 0x6c3   : > { %v5892_v45 = vmax.f32 %v5878_v28, %v5886_v35  ;;  %v2058_v29 = vsub.f32 %v5794_v24, %v2056_v30  ;;  %v3706_v50 = vpop.eup %3705  ;;  %v1610_v53 = vmul.f32 %v3704_v36, %v1575_v42  ;;  %3719 = vpow2.f32 %v1744_v43 }
 0x6c4   : > { %v1726_v51 = vcombine.high %v1725_v34, %v1725_v34  ;;  %v1607_v6 = vmul.f32 %v3704_v36, %v5899_v52  ;;  %3721 = vpow2.f32 %v1639_v47  ;;  %v1706_v7 = vrot.slane %v1698_v48, %v5791_v22 }
 0x6c5   : > { %v3708_v54 = vpop.eup %3707  ;;  %v2138_v1 = vrot.slane %v5892_v45, %v5757_v38  ;;  %v2059_v5 = vmul.f32 1.442695, %v2058_v29  ;;  %v1608_v8 = vmul.f32 %v3706_v50, %v5894_v46  ;;  %v5912_v56 = vadd.f32 %v3706_v50, %v1610_v53 }
 0x6c6   : > { %v3710_v62 = vpop.eup %3709  ;;  %v1733_v37 = vrot.slane %v1726_v51, %v5791_v22  ;;  %v1805_v9 = vrot.slane %v3708_v54, %v5791_v22  ;;  %3723 = vpow2.f32 %v1965_v59  ;;  %v1778_v16 = vmul.f32 %v3708_v54, %v5894_v46 }
 0x6c7   : > { %v2140_v14 = vsub.f32 %v5794_v24, %v2138_v1  ;;  %v1717_v19 = vmul.f32 %v3710_v62, %v5912_v56  ;;  %3725 = vpow2.f32 %v2059_v5  ;;  %v1707_v25 = vcombine.high %v1706_v7, %v1706_v7 }
 0x6c8   : > { %v5923_v27 = vadd.f32 %v1608_v8, %v1607_v6  ;;  %v1812_v33 = vrot.slane %v1805_v9, %v5791_v22  ;;  %v1820_v36 = vsub.f32 %v5819_v49, %v1819_v55  ;;  %3727 = vpow2.f32 %v1846_v13 }
 0x6c9   : > { %v3712_v3 = vpop.eup %3711  ;;  %v5926_v31 = vadd.f32 %v1733_v37, %v1717_v19  ;;  %v1914_v40 = vadd.f32 %v5840_v61, %v5814_v44  ;;  %v2141_v43 = vmul.f32 1.442695, %v2140_v14  ;;  %v1786_v29 = vrot.slane %v1778_v16, %v5791_v22 }
 0x6ca   : > { %v5916_v12 = vpop.eup %3713  ;;  %v1886_v20 = vrot.slane %v3712_v3, %v5791_v22  ;;  %v1858_v34 = vmul.f32 %v3712_v3, %v5894_v46  ;;  %v1714_v50 = vrot.slane %v1707_v25, %v5791_v22  ;;  %3729 = vpow2.f32 %v1642_v21 }
 0x6cb   : > { %v1590_v30 = vmul.f32 %v5916_v12, %v1575_v42  ;;  %v5933_v41 = vpop.eup %3715  ;;  %v1955_v42 = vsub.f32 %v5847_v0, %v5853_v4  ;;  %v1823_v51 = vsub.f32 %v1818_v2, %v1819_v55  ;;  %v1915_v49 = vmax.f32 %v5835_v57, %v1914_v40 }
 0x6cc   : > { %v1887_v47 = vcombine.high %v1886_v20, %v1886_v20  ;;  %v3718_v48 = vpop.eup %3717  ;;  %v1813_v54 = vcombine.high %v1812_v33, %v1812_v33  ;;  %v2015_v59 = vadd.f32 %v5864_v11, %v5814_v44  ;;  %v1697_v0 = vmul.f32 %v3710_v62, %v5923_v27 }
 0x6cd   : > { %v5940_v53 = vpop.eup %3719  ;;  %v1797_v61 = vmul.f32 %v3718_v48, %v5926_v31  ;;  %v1956_v58 = vmul.f32 1.442695, %v1955_v42  ;;  %v1866_v63 = vrot.slane %v1858_v34, %v5791_v22  ;;  %v1821_v1 = vmul.f32 1.442695, %v1820_v36 }
 0x6ce   : > { %v5945_v60 = vpop.eup %3721  ;;  %v2049_v2 = vsub.f32 %v5861_v10, %v5869_v15  ;;  %3731 = vpow2.f32 %v2141_v43  ;;  %v1793_v3 = vrot.slane %v1786_v29, %v5791_v22  ;;  %v1894_v5 = vrot.slane %v1887_v47, %v5791_v22 }
 0x6cf   : > { %v2016_v6 = vmax.f32 %v5853_v4, %v2015_v59  ;;  %v5954_v8 = vadd.f32 %v1714_v50, %v1697_v0  ;;  %v1824_v37 = vmul.f32 1.442695, %v1823_v51  ;;  %v1916_v9 = vsub.f32 %v5835_v57, %v1915_v49 }
 0x6d0   : > { %v3724_v7 = vpop.eup %3723  ;;  %3733 = vpow2.f32 %v1956_v58  ;;  %v5959_v62 = vrot.slane %v5894_v46, %v5791_v22  ;;  %v5961_v10 = vadd.f32 %v1813_v54, %v1797_v61  ;;  %v1867_v14 = vcombine.high %v1866_v63, %v1866_v63 }
 0x6d1   : > { %3735 = vpow2.f32 %v1741_v23  ;;  %v2017_v55 = vsub.f32 %v5853_v4, %v2016_v6  ;;  %v3726_v13 = vpop.eup %3725  ;;  %v1591_v16 = vadd.f32 %v5933_v41, %v1590_v30  ;;  %v2050_v19 = vmul.f32 1.442695, %v2049_v2 }
 0x6d2   : > { %3737 = vpow2.f32 %v1821_v1  ;;  %v1794_v20 = vcombine.high %v1793_v3, %v1793_v3  ;;  %v1895_v21 = vcombine.high %v1894_v5, %v1894_v5  ;;  %v1919_v25 = vsub.f32 %v1914_v40, %v1915_v49  ;;  %v3728_v33 = vpop.eup %3727 }
 0x6d3   : > { %v1989_v57 = vcombine.high %v3724_v7, %v3724_v7  ;;  %v1777_v34 = vmul.f32 %v3718_v48, %v5954_v8  ;;  %3739 = vpow2.f32 %v1824_v37  ;;  %v1917_v36 = vmul.f32 1.442695, %v1916_v9 }
 0x6d4   : > { %v2020_v23 = vsub.f32 %v2015_v59, %v2016_v6  ;;  %v1878_v43 = vmul.f32 %v3728_v33, %v5961_v10  ;;  %v2018_v29 = vmul.f32 1.442695, %v2017_v55  ;;  %v2084_v4 = vcombine.high %v3726_v13, %v3726_v13  ;;  %v5969_v30 = vpop.eup %3729 }
 0x6d5   : > { %v2104_v47 = vadd.f32 %v5886_v35, %v5814_v44  ;;  %v1968_v42 = vmul.f32 %v3724_v7, %v5894_v46  ;;  %v1874_v40 = vrot.slane %v1867_v14, %v5791_v22  ;;  %3741 = vpow2.f32 %v2050_v19 }
 0x6d6   : > { %v2131_v48 = vsub.f32 %v5878_v28, %v5892_v45  ;;  %v1897_v50 = vadd.f32 %v1895_v21, %v1878_v43  ;;  %v1920_v51 = vmul.f32 1.442695, %v1919_v25  ;;  %v1996_v49 = vrot.slane %v1989_v57, %v5791_v22 }
 0x6d7   : > { %v2105_v61 = vmax.f32 %v5869_v15, %v2104_v47  ;;  %v1671_v54 = vmul.f32 %v5945_v60, %v5912_v56  ;;  %v5979_v35 = vadd.f32 %v1794_v20, %v1777_v34  ;;  %3743 = vpow2.f32 %v1917_v36 }
 0x6d8   : > { %v2021_v58 = vmul.f32 1.442695, %v2020_v23  ;;  %v3732_v59 = vpop.eup %3731  ;;  %3745 = vpow2.f32 %v2018_v29  ;;  %v2091_v0 = vrot.slane %v2084_v4, %v5791_v22  ;;  %v2132_v28 = vmul.f32 1.442695, %v2131_v48 }
 0x6d9   : > { %v2106_v63 = vsub.f32 %v5869_v15, %v2105_v61  ;;  %v2062_v2 = vmul.f32 %v3726_v13, %v5894_v46  ;;  %v1875_v3 = vcombine.high %v1874_v40, %v1874_v40  ;;  %v2109_v5 = vsub.f32 %v2104_v47, %v2105_v61 }
 0x6da   : > { %v3734_v1 = vpop.eup %3733  ;;  %v2184_v6 = vcombine.high %v5864_v11, %v5864_v11  ;;  %v1970_v7 = vcombine.high %v1968_v42, %v1968_v42  ;;  %3747 = vpow2.f32 %v1920_v51  ;;  %v2003_v9 = vrot.slane %v1996_v49, %v5791_v22 }
 0x6db   : > { %v5986_v56 = vpop.eup %3735  ;;  %v1987_v37 = vmul.f32 %v3734_v1, %v1897_v50  ;;  %v1857_v15 = vmul.f32 %v3728_v33, %v5979_v35  ;;  %3749 = vpow2.f32 %v2021_v58  ;;  %v2107_v14 = vmul.f32 1.442695, %v2106_v63 }
 0x6dc   : > { %v5989_v55 = vpop.eup %3737  ;;  %v2110_v19 = vmul.f32 1.442695, %v2109_v5  ;;  %v2092_v20 = vcombine.high %v2091_v0, %v2091_v0  ;;  %3751 = vpow2.f32 %v2132_v28  ;;  %v2166_v21 = vcombine.high %v3732_v59, %v3732_v59 }
 0x6dd   : > { %v2005_v13 = vadd.f32 %v2003_v9, %v1987_v37  ;;  %v5992_v11 = vpop.eup %3739  ;;  %v2064_v25 = vcombine.high %v2062_v2, %v2062_v2  ;;  %v5994_v57 = vadd.f32 %v1875_v3, %v1857_v15  ;;  %3753 = vpow2.f32 %v2107_v14 }
 0x6de   : > { %v2186_v34 = vadd.f32 %v2184_v6, %v5814_v44  ;;  %v1653_v36 = vcombine.high %v5959_v62, %v5959_v62  ;;  %3755 = vrcp.f32 %v1591_v16  ;;  %v1672_v33 = vadd.f32 %v5969_v30, %v1671_v54 }
 0x6df   : > { %v1751_v23 = vmul.f32 %v5986_v56, %v5926_v31  ;;  %v3742_v43 = vpop.eup %3741  ;;  %v1977_v29 = vrot.slane %v1970_v7, %v5791_v22  ;;  %v1831_v4 = vmul.f32 %v5989_v55, %v5961_v10  ;;  %3757 = vpow2.f32 %v2110_v19 }
 0x6e0   : > { %v2187_v47 = vmax.f32 %v5892_v45, %v2186_v34  ;;  %v2144_v44 = vmul.f32 %v3732_v59, %v5894_v46  ;;  %v2082_v42 = vmul.f32 %v3742_v43, %v2005_v13  ;;  %v2099_v40 = vrot.slane %v2092_v20, %v5791_v22 }
 0x6e1   : > { %v2173_v16 = vrot.slane %v2166_v21, %v5791_v22  ;;  %v6009_v48 = vpop.eup %3743  ;;  %v1967_v31 = vmul.f32 %v3734_v1, %v5994_v57  ;;  %v2071_v51 = vrot.slane %v2064_v25, %v5791_v22  ;;  %3759 = vrcp.f32 %v1672_v33 }
 0x6e2   : > { %v2188_v49 = vsub.f32 %v5892_v45, %v2187_v47  ;;  %v2191_v61 = vsub.f32 %v2186_v34, %v2187_v47  ;;  %v6014_v10 = vpop.eup %3745  ;;  %v1752_v54 = vadd.f32 %v5940_v53, %v1751_v23  ;;  %v1941_v58 = vmul.f32 %v6009_v48, %v1897_v50 }
 0x6e3   : > { %v6020_v59 = vadd.f32 %v5892_v45, %v5787_v17  ;;  %v1984_v0 = vrot.slane %v1977_v29, %v5791_v22  ;;  %v2035_v63 = vmul.f32 %v6014_v10, %v2005_v13  ;;  %v1832_v3 = vadd.f32 %v5992_v11, %v1831_v4 }
 0x6e4   : > { %v2189_v28 = vmul.f32 1.442695, %v2188_v49  ;;  %v2192_v1 = vmul.f32 1.442695, %v2191_v61  ;;  %v6024_v2 = vpop.eup %3747  ;;  %v2101_v5 = vadd.f32 %v2099_v40, %v2082_v42  ;;  %v2180_v7 = vrot.slane %v2173_v16, %v5791_v22 }
 0x6e5   : > { %v2212_v50 = vmax.f32 %v6020_v59, %v2184_v6  ;;  %v6029_v37 = vpop.eup %3749  ;;  %v2146_v17 = vcombine.high %v2144_v44, %v2144_v44  ;;  %v6031_v45 = vadd.f32 %v1984_v0, %v1967_v31  ;;  %v2072_v9 = vcombine.high %v2071_v51, %v2071_v51 }
 0x6e6   : > { %3761 = vpow2.f32 %v2189_v28  ;;  %v3752_v15 = vpop.eup %3751  ;;  %v1660_v14 = vrot.slane %v5959_v62, %v5791_v22  ;;  %v1923_v19 = vcombine.high %v5894_v46, %v5894_v46  ;;  %v1942_v13 = vadd.f32 %v6024_v2, %v1941_v58 }
 0x6e7   : > { %3763 = vrcp.f32 %v1752_v54  ;;  %2274 = vst.msk [vmem:[%s5723_s5 + $0x2] sm:$0x1] %vm2271_vm6, %v2212_v50  ;;  %v3754_v6 = vpop.eup %3753  ;;  %v1667_v20 = vrot.slane %v1653_v36, %v5791_v22  ;;  %v2036_v21 = vadd.f32 %v6029_v37, %v2035_v63  ;;  %v2220_v25 = vrot.slane %v2212_v50, %v5757_v38 }
 0x6e8   : > { %3765 = vpow2.f32 %v2192_v1  ;;  %v3756_v34 = vpop.eup %3755  ;;  %v2117_v33 = vmul.f32 %v3754_v6, %v2101_v5  ;;  %v2164_v62 = vmul.f32 %v3752_v15, %v2101_v5  ;;  %v2181_v23 = vcombine.high %v2180_v7, %v2180_v7 }
 0x6e9   : > { %3767 = vrcp.f32 %v1832_v3  ;;  %v3758_v29 = vpop.eup %3757  ;;  %v2061_v4 = vmul.f32 %v3742_v43, %v6031_v45  ;;  %v2079_v47 = vrot.slane %v2072_v9, %v5791_v22  ;;  %v2153_v44 = vrot.slane %v2146_v17, %v5791_v22 }
 0x6ea   : > { %v2222_v42 = vsub.f32 %v5794_v24, %v2220_v25  ;;  %v1587_v36 = vmul.f32 %v5916_v12, %v5899_v52  ;;  %v3209_v40 = vmul.f32 -1.442695, %v5808_v39  ;;  %3769 = vrcp.f32 %v1942_v13 }
 0x6eb   : > { %v2118_v16 = vadd.f32 %v3758_v29, %v2117_v33  ;;  %v1588_v31 = vmul.f32 %v5933_v41, %v5894_v46  ;;  %v1930_v51 = vrot.slane %v1923_v19, %v5791_v22  ;;  %3771 = vrcp.f32 %v2036_v21  ;;  %v3760_v49 = vpop.eup %3759 }
 0x6ec   : > { %v2223_v43 = vmul.f32 1.442695, %v2222_v42  ;;  %v1644_v61 = vmul.f32 %v5945_v60, %v5923_v27  ;;  %v1669_v24 = vmul.f32 %v5969_v30, %v1667_v20  ;;  %v6056_v54 = vadd.f32 %v2181_v23, %v2164_v62 }
 0x6ed   : > { %3773 = vrcp.f32 %v2118_v16  ;;  %v2081_v52 = vadd.f32 %v2079_v47, %v2061_v4  ;;  %v2160_v39 = vrot.slane %v2153_v44, %v5791_v22  ;;  %v2213_v12 = vsub.f32 %v6020_v59, %v2212_v50 }
 0x6ee   : > { %3775 = vpow2.f32 %v2223_v43  ;;  %v1747_v41 = vcombine.high %v1660_v14, %v1660_v14  ;;  %v1746_v58 = vmul.f32 %v5986_v56, %v5954_v8  ;;  %v1589_v63 = vadd.f32 %v1588_v31, %v1587_v36 }
 0x6ef   : > { %3777 = vpow2.f32 %v3209_v40  ;;  %v1827_v28 = vcombine.high %v1667_v20, %v1667_v20  ;;  %v2024_v27 = vcombine.high %v1930_v51, %v1930_v51  ;;  %v1670_v30 = vadd.f32 %v1669_v24, %v1644_v61 }
 0x6f0   : > { %v3762_v0 = vpop.eup %3761  ;;  %v1749_v1 = vmul.f32 %v5940_v53, %v1747_v41  ;;  %v1937_v3 = vrot.slane %v1930_v51, %v5791_v22  ;;  %v1826_v59 = vmul.f32 %v5989_v55, %v5979_v35  ;;  %v2143_v50 = vmul.f32 %v3752_v15, %v2081_v52 }
 0x6f1   : > { %v3764_v60 = vpop.eup %3763  ;;  %v2199_v5 = vmul.f32 %v3762_v0, %v6056_v54  ;;  %v2161_v17 = vcombine.high %v2160_v39, %v2160_v39  ;;  %v2214_v8 = vmul.f32 1.442695, %v2213_v12  ;;  %v1593_v9 = vmul.f32 %v3756_v34, %v1589_v63 }
 0x6f2   : > { %v3766_v7 = vpop.eup %3765  ;;  %v1750_v14 = vadd.f32 %v1749_v1, %v1746_v58  ;;  %v1922_v19 = vmul.f32 %v6009_v48, %v5994_v57  ;;  %v1674_v20 = vmul.f32 %v3760_v49, %v1670_v30  ;;  %v1829_v53 = vmul.f32 %v5992_v11, %v1827_v28 }
 0x6f3   : > { %v3768_v56 = vpop.eup %3767  ;;  %v2200_v13 = vadd.f32 %v3766_v7, %v2199_v5  ;;  %v2023_v21 = vmul.f32 %v6014_v10, %v6031_v45  ;;  %v2031_v25 = vrot.slane %v2024_v27, %v5791_v22  ;;  %v1939_v35 = vmul.f32 %v6024_v2, %v1937_v3 }
 0x6f4   : > { %v3770_v33 = vpop.eup %3769  ;;  %v2112_v55 = vmul.f32 %v3754_v6, %v2081_v52  ;;  %v2113_v15 = vcombine.high %v1937_v3, %v1937_v3  ;;  %v1830_v62 = vadd.f32 %v1829_v53, %v1826_v59  ;;  %v2163_v57 = vadd.f32 %v2161_v17, %v2143_v50 }
 0x6f5   : > { %3779 = vrcp.f32 %v2200_v13  ;;  %v3772_v34 = vpop.eup %3771  ;;  %v2033_v23 = vmul.f32 %v6029_v37, %v2031_v25  ;;  %v1754_v11 = vmul.f32 %v3764_v60, %v1750_v14  ;;  %v1940_v4 = vadd.f32 %v1939_v35, %v1922_v19 }
 0x6f6   : > { %3781 = vpow2.f32 %v2214_v8  ;;  %v2115_v10 = vmul.f32 %v3758_v29, %v2113_v15  ;;  %v1597_v47 = vrot.slane %v1593_v9, %v5757_v38  ;;  %v1834_v2 = vmul.f32 %v3768_v56, %v1830_v62 }
 0x6f7   : > { %v3774_v48 = vpop.eup %3773  ;;  %v2034_v6 = vadd.f32 %v2033_v23, %v2023_v21  ;;  %v1944_v44 = vmul.f32 %v3770_v33, %v1940_v4  ;;  %v1680_v16 = vrot.slane %v1674_v20, %v5757_v38  ;;  %v2194_v51 = vmul.f32 %v3762_v0, %v2163_v57 }
 0x6f8   : > { %v3776_v45 = vpop.eup %3775  ;;  %v2116_v42 = vadd.f32 %v2115_v10, %v2112_v55  ;;  %v2195_v43 = vcombine.high %v2031_v25, %v2031_v25  ;;  %v1760_v29 = vrot.slane %v1754_v11, %v5757_v38  ;;  %v1840_v52 = vrot.slane %v1834_v2, %v5757_v38 }
 0x6f9   : > { %v2226_v36 = vmul.f32 %v3776_v45, %v5894_v46  ;;  %v2249_v37 = vcombine.high %v3776_v45, %v3776_v45  ;;  %v3778_v40 = vpop.eup %3777  ;;  %v2038_v31 = vmul.f32 %v3772_v34, %v2034_v6  ;;  %v1598_v39 = vsel %vm1322_vm5, %v1597_v47, 0.0 }
 0x6fa   : > { %v2120_v49 = vmul.f32 %v3774_v48, %v2116_v42  ;;  %v2197_v46 = vmul.f32 %v3766_v7, %v2195_v43  ;;  %v1950_v12 = vrot.slane %v1944_v44, %v5757_v38  ;;  %v1682_v0 = vsel %vm1675_vm7, %v1680_v16, %v1598_v39  ;;  %v3683_v44 = vld [vmem:[#allocation38] sm:$0xff]   ;;  %v3684_v42 = vld [vmem:[#allocation38 + $0x8] sm:$0xff]  }
 0x6fb   : > { %v2228_v61 = vcombine.high %v2226_v36, %v2226_v36  ;;  %v2256_v24 = vrot.slane %v2249_v37, %v5791_v22  ;;  %v2044_v63 = vrot.slane %v2038_v31, %v5757_v38  ;;  %v1762_v60 = vsel %vm1755_vm8, %v1760_v29, %v1682_v0  ;;  %3300 = vmatpush3.bf16.msra.mxu0 %v3683_v44  ;;  %v3688_v36 = vld [vmem:[#allocation41 + $0x8] sm:$0xff]   ;;  %v3689_v37 = vld [vmem:[#allocation41 + $0x10] sm:$0xff]   ;;  %v3691_v16 = vld [vmem:[#allocation41 + $0x20] sm:$0xff]  }
 0x6fc   : > { %v2198_v28 = vadd.f32 %v2197_v46, %v2194_v51  ;;  %v2126_v30 = vrot.slane %v2120_v49, %v5757_v38  ;;  %v1842_v7 = vsel %vm1835_vm9, %v1840_v52, %v1762_v60  ;;  %v1566_v9 = vadd.f32 1.0, %v3778_v40  ;;  %3301 = vmatprep.subr.bf16.mxu0 %v4765_v26  ;;  %v3690_v40 = vld [vmem:[#allocation41 + $0x18] sm:$0xff]   ;;  %v3692_v31 = vld [vmem:[#allocation41 + $0x28] sm:$0xff]   ;;  %v3214_v46 = vld [vmem:[#allocation20] ss:$0 sm:$0xff] }
 0x6fd   : > { %v2235_v41 = vrot.slane %v2228_v61, %v5791_v22  ;;  %v2257_v58 = vcombine.high %v2256_v24, %v2256_v24  ;;  %v1952_v50 = vsel %vm1945_vm10, %v1950_v12, %v1842_v7  ;;  %v2379_v49 = vld [vmem:[#allocation35] sm:$0x1]  ;;  %v3213_v24 = vld [vmem:[#allocation19] ss:$0 sm:$0xff] }
 0x6fe   : > { %v2046_v14 = vsel %vm2039_vm11, %v2044_v63, %v1952_v50  ;;  %3783 = vrcp.f32 %v1566_v9  ;;  %v2388_v39 = vsub.f32 1.0, %v2379_v49  ;;  %v2385_v63 = vrot.slane %v2379_v49, %v5757_v38  ;;  %v3685_v50 = vld [vmem:[#allocation40] sm:$0xff]   ;;  %v3686_v9 = vld [vmem:[#allocation40 + $0x8] sm:$0xff]  }
 0x6ff   : > { %v3780_v27 = vpop.eup %3779  ;;  %v2236_v1 = vcombine.high %v2235_v41, %v2235_v41  ;;  %v2264_v3 = vrot.slane %v2257_v58, %v5791_v22  ;;  %v2128_v13 = vsel %vm2121_vm12, %v2126_v30, %v2046_v14  ;;  %3302 = vmatpush3.bf16.msra.mxu0 %v3684_v42  ;;  %v2380_v41 = vld [vmem:[#allocation37] sm:$0x1]  ;;  %v3215_v58 = vld [vmem:[%s5726_s4] ss:$0 sm:$0xff] }
 0x700   : > { %v3782_v5 = vpop.eup %3781  ;;  %v2202_v59 = vmul.f32 %v3780_v27, %v2198_v28  ;;  %3327 = vmatprep.subr.bf16.mxu0 %v4765_v26  ;;  %v2393_v28 = vrot.slane %v2388_v39, %v5757_v38  ;;  %v2404_v27 = vsub.f32 1.0, %v2380_v41 }
 0x701   : > { %v2243_v17 = vrot.slane %v2236_v1, %v5791_v22  ;;  %v2247_v8 = vmul.f32 %v3782_v5, %v6056_v54  ;;  %v2265_v56 = vcombine.high %v2264_v3, %v2264_v3  ;;  %v2225_v20 = vmul.f32 %v3782_v5, %v2163_v57 }
 0x702   : > { %v2208_v19 = vrot.slane %v2202_v59, %v5757_v38  ;;  %v2409_v5 = vrot.slane %v2404_v27, %v5757_v38  ;;  %v2401_v59 = vrot.slane %v2380_v41, %v5757_v38  ;;  %v3694_v38 = vld [vmem:[#allocation41 + $0x38] sm:$0xff]  }
 0x703   : > { %v2244_v53 = vcombine.high %v2243_v17, %v2243_v17  ;;  %v2267_v21 = vadd.f32 %v2265_v56, %v2247_v8 }
 0x704   : > { %v2210_v25 = vsel %vm2203_vm13, %v2208_v19, %v2128_v13  ;;  %v3693_v19 = vld [vmem:[#allocation41 + $0x30] sm:$0xff]  }
 0x705   : > { %v2268_v33 = vpack.c.bf16 %v2210_v25, %v2210_v25  ;;  %v2246_v35 = vadd.f32 %v2244_v53, %v2225_v20  ;;  %2273 = vst.msk [vmem:[%s5723_s5 + $0x1] sm:$0x1] %vm2271_vm6, %v2267_v21 }
 0x707   : > { %2270 = vst.msk [vmem:[#allocation4] sm:$0xf] %vm2269_vm14, %v2268_v33 }
 0x708   : > { %2272 = vst.msk [vmem:[%s5723_s5] sm:$0x1] %vm2271_vm6, %v2246_v35  ;;  %v3784_v55 = vpop.eup %3783 }
 0x70e   : > { %v2275_v22 = vld [vmem:[#allocation4] sm:$0xf] }
 0x70f   : > { %v2276_v54 = vunpack.c.l.bf16 %v2275_v22 }
 0x711   : > { %v2277_v15 = vmul.f32 %v3784_v55, %v2276_v54 }
 0x713   : > { %v2282_v34 = vpack.c.bf16 %v2277_v15, %v2277_v15 }
 0x715   : > { %3296 = vmatmul.mubr.msk.bf16.vlgmr.msra.gmra.mrb[0].mxu1 %vm1260_vm2, %v2282_v34 }
 0x716   : > { %3323 = vmatprep.mubr.msk.bf16.mxu1 %vm4766_vm3, %v4765_v26 }
 0x7e8   : > { %v2332_v62 = vpop.f32.mrb[0].mxu1 }
 0x7e9   : > { %v6116_v23 = vadd.f32 %v2332_v62, %v5740_v18  ;;  %v3297_v57 = vpop.f32.mrb[1].mxu1  ;;  %v3687_v18 = vld [vmem:[#allocation41] sm:$0xff]  }
 0x7ea   : > { %v2335_v48 = vpop.f32.mrb[2].mxu1  ;;  %3308 = vmatpush3.bf16.msra.mxu1 %v3687_v18 }
 0x7eb   : > { %v3298_v11 = vpop.f32.mrb[3].mxu1  ;;  %v2343_v4 = vsel %vm1260_vm2, %v6116_v23, 0.0  ;;  %3309 = vmatprep.subr.bf16.mxu1 %v4765_v26 }
 0x7ec   : > { %2344 = vadd.xlane.f32.xlu0 %v2343_v4 }
 0x7ee   : > { %3310 = vmatpush3.bf16.msra.mxu1 %v3688_v36 }
 0x7ef   : > { %3311 = vmatprep.subr.bf16.mxu1 %v4765_v26 }
 0x7f2   : > { %3312 = vmatpush3.bf16.msra.mxu1 %v3689_v37 }
 0x7f3   : > { %3313 = vmatprep.subr.bf16.mxu1 %v4765_v26 }
 0x7f6   : > { %3314 = vmatpush3.bf16.msra.mxu1 %v3690_v40 }
 0x7f7   : > { %3315 = vmatprep.subr.bf16.mxu1 %v4765_v26 }
 0x7fa   : > { %3316 = vmatpush3.bf16.msra.mxu1 %v3691_v16 }
 0x7fb   : > { %3317 = vmatprep.subr.bf16.mxu1 %v4765_v26 }
 0x7fe   : > { %3318 = vmatpush3.bf16.msra.mxu1 %v3692_v31 }
 0x7ff   : > { %3319 = vmatprep.subr.bf16.mxu1 %v4765_v26 }
 0x802   : > { %3320 = vmatpush3.bf16.msra.mxu1 %v3693_v19 }
 0x803   : > { %3321 = vmatprep.subr.bf16.mxu1 %v4765_v26 }
 0x806   : > { %3322 = vmatpush3.bf16.msra.mxu1 %v3694_v38 }
 0x879   : > { %v2345_v10 = vpop.xlane.xlu0 %2344 }
 0x87a   : > { %v2346_v45 = vmul.f32 0.03125, %v2345_v10 }
 0x87c   : > { %v2347_v47 = vsub.f32 %v6116_v23, %v2346_v45 }
 0x87e   : > { %v2348_v2 = vmul.f32 %v2347_v47, %v2347_v47 }
 0x880   : > { %v2349_v6 = vsel %vm1260_vm2, %v2348_v2, 0.0 }
 0x881   : > { %2350 = vadd.xlane.f32.xlu1 %v2349_v6 }
 0x90e   : > { %v2351_v51 = vpop.xlane.xlu1 %2350 }
 0x90f   : > { %v2352_v43 = vmul.f32 0.03125, %v2351_v51 }
 0x911   : > { %v2353_v29 = vadd.f32 1e-05, %v2352_v43 }
 0x913   : > { %3785 = vrsqrt.f32 %v2353_v29 }
 0x91d   : > { %v3786_v61 = vpop.eup %3785 }
 0x91e   : > { %v2355_v52 = vmul.f32 %v3786_v61, %v2347_v47 }
 0x920   : > { %v2362_v12 = vmul.f32 %v3213_v24, %v2355_v52 }
 0x922   : > { %v2369_v0 = vadd.f32 %v3214_v46, %v2362_v12 }
 0x924   : > { %v2371_v60 = vrot.slane %v2369_v0, 7  ;;  %2649 = vst.msk [vmem:[%s5726_s4 - $0x7] sm:$0x80] %vm2339_vm4, %v2369_v0  ;;  %v2387_v1 = vmul.f32 %v2385_v63, %v2369_v0  ;;  %v2403_v56 = vmul.f32 %v2401_v59, %v2369_v0 }
 0x926   : > { %v2378_v30 = vsel %vm1322_vm5, %v3215_v58, %v2371_v60 }
 0x927   : > { %v2395_v3 = vmul.f32 %v2393_v28, %v2378_v30  ;;  %v2411_v8 = vmul.f32 %v2409_v5, %v2378_v30 }
 0x929   : > { %v2396_v7 = vadd.f32 %v2395_v3, %v2387_v1  ;;  %v2412_v32 = vadd.f32 %v2411_v8, %v2403_v56 }
 0x92b   : > { %v2417_v17 = vpack.c.bf16 %v2396_v7, %v2396_v7  ;;  %v2584_v14 = vpack.c.bf16 %v2412_v32, %v2412_v32 }
 0x92d   : > { %3304 = vmatmul.mubr.msk.bf16.vlgmr.msra.gmra.mrb[12].mxu0 %vm1260_vm2, %v2417_v17 }
 0x92e   : > { %3328 = vmatpush3.bf16.msra.mxu0 %v3685_v50  ;;  %3331 = vmatprep.mubr.msk.bf16.mxu0 %vm4766_vm3, %v4765_v26 }
 0x92f   : > { %3329 = vmatprep.subr.bf16.mxu0 %v4765_v26 }
 0x932   : > { %3330 = vmatpush3.bf16.msra.mxu0 %v3686_v9 }
 0x935   : > { %3332 = vmatmul.mubr.msk.bf16.vlgmr.msra.gmra.mrb[16].mxu0 %vm1260_vm2, %v2584_v14 }
 0xa00   : > { %v2467_v13 = vpop.f32.mrb[12].mxu0 }
 0xa01   : > { %v2473_v20 = vmax.f32 %v2467_v13, 0.0  ;;  %v3305_v53 = vpop.f32.mrb[13].mxu0 }
 0xa02   : > { %v2470_v21 = vpop.f32.mrb[14].mxu0 }
 0xa03   : > { %v2474_v25 = vmul.f32 %v2473_v20, %v2473_v20  ;;  %v3306_v33 = vpop.f32.mrb[15].mxu0 }
 0xa05   : > { %v2491_v35 = vpack.c.bf16 %v2474_v25, %v2474_v25 }
 0xa07   : > { %3324 = vmatmul.mubr.bf16.vlgmr.msra.gmra.mrb[4].mxu1 %v2491_v35 }
 0xa08   : > { %v6145_v22 = vpop.f32.mrb[16].mxu0 }
 0xa09   : > { %v3333_v54 = vpop.f32.mrb[17].mxu0 }
 0xa0a   : > { %v2637_v55 = vpop.f32.mrb[18].mxu0 }
 0xa0b   : > { %v3334_v15 = vpop.f32.mrb[19].mxu0 }
 0xa0c   : > { %4484 = shalt.err (!%p4481_p8)
}
 0xa0d   : > { %s4485_s24 = scalar_lea.hbm %s6153_s18, 16  ;;  %s4489_s25 = scalar_lea.hbm %s6554_s19, 32 }
 0xa0e   : > { %p4486_p11 = scmp.ne.s32.totalorder %s6153_s18, %s4485_s24  ;;  %p4490_p1 = scmp.lt.u32.totalorder %s6153_s18, %s6554_s19 }
 0xa0f   : > { %p4491_p2 = scmp.lt.u32.totalorder %s4489_s25, %s4485_s24  ;;  %p4493_p6 = scmp.lt.u32.totalorder %s4485_s24, %s6153_s18 }
 0xa10   : > { %p4487_p10 = pnand %p4486_p11, %p6555_p12 }
 0xa11   : > { %p4492_p5 = por %p4491_p2, %p4490_p1 }
 0xa12   : > { %p4488_p4 = pneg %p4487_p10 }
 0xa13   : > { %p4494_p7 = por %p4493_p6, %p4492_p5 }
 0xa15   : > { %p4495_p13 = pnand %p4494_p7, %p4488_p4 }
 0xa17   : > { %4498 = shalt.err (!%p4495_p13)
}
 0xa18   : > { %3424 = dma.vmem_to_hbm [thread:$0]  (%p6555_p12), %s2693_s20, 16, %s6153_s18, %s6410_s7  }
 0xa19   : > { %s3236_s22 = sshll.u32 %s6552_s9, 6  ;;  %s6556_s21 = sld [smem:[#allocation108_spill]] }
 0xa1a   : > { %s2705_s24 = sshll.u32 %s5723_s5, 4  ;;  %s6557_s23 = sld [smem:[#allocation109_spill]]  ;;  %s2706_s24 = int_to_ptr.vmem [resolvable:$true] %s2705_s24 }
 0xa1b   : > { %s4499_s17 = scalar_lea.vmem %s2706_s24, 64  ;;  %s4769_s18 = smov [#allocation46]  }
 0xa1c   : > { %p4500_p3 = scmp.ne.s32.totalorder %s2706_s24, %s4499_s17  ;;  %s4503_s20 = sshll.u32 %s4769_s18, 4  ;;  %s4504_s20 = int_to_ptr.vmem [resolvable:$false] %s4503_s20 }
 0xa1d   : > { %s4505_s7 = scalar_lea.vmem %s4504_s20, 128  ;;  %p4506_p8 = scmp.lt.s32.totalorder %s2706_s24, %s4504_s20 }
 0xa1e   : > { %p4501_p9 = pnand %p4500_p3, %p6555_p12  ;;  %p4507_p11 = scmp.lt.s32.totalorder %s4505_s7, %s4499_s17 }
 0xa1f   : > { %s6180_s11 = scalar_lea.hbm %s6556_s21, %s3236_s22 }
 0xa20   : > { %s6188_s12 = scalar_lea.hbm %s6557_s23, %s3235_s0  ;;  %p4502_p0 = pneg %p4501_p9 }
 0xa21   : > { %p4508_p10 = por %p4507_p11, %p4506_p8 }
 0xa23   : > { %p4509_p4 = pnand %p4508_p10, %p4502_p0 }
 0xa25   : > { %4512 = shalt.err (!%p4509_p4)
}
 0xa26   : > { %s4513_s5 = scalar_lea.hbm %s6180_s11, 64  ;;  %s4517_s16 = scalar_lea.hbm %s6556_s21, 128 }
 0xa27   : > { %p4514_p1 = scmp.ne.s32.totalorder %s6180_s11, %s4513_s5  ;;  %p4518_p6 = scmp.lt.u32.totalorder %s6180_s11, %s6556_s21 }
 0xa28   : > { %p4519_p7 = scmp.lt.u32.totalorder %s4517_s16, %s4513_s5  ;;  %p4521_p3 = scmp.lt.u32.totalorder %s4513_s5, %s6180_s11 }
 0xa29   : > { %p4515_p2 = pnand %p4514_p1, %p6555_p12 }
 0xa2a   : > { %p4520_p13 = por %p4519_p7, %p4518_p6 }
 0xa2b   : > { %p4516_p5 = pneg %p4515_p2 }
 0xa2c   : > { %p4522_p9 = por %p4521_p3, %p4520_p13 }
 0xa2e   : > { %p4523_p0 = pnand %p4522_p9, %p4516_p5 }
 0xa30   : > { %4526 = shalt.err (!%p4523_p0)
}
 0xa31   : > { %s6558_s17 = scalar_lea.sflag [#allocation45], %s5648_s15  ;;  %s2718_s7 = sshll.u32 %s5726_s4, 4  ;;  %s2719_s7 = int_to_ptr.vmem [resolvable:$true] %s2718_s7 }
 0xa32   : > { %3425 = dma.vmem_to_hbm [thread:$0]  (%p6555_p12), %s2706_s24, 64, %s6180_s11, %s6558_s17  }
 0xa33   : > { %s2665_s14 = scalar_lea.sflag [#allocation48], %s5651_s26  ;;  %s4527_s18 = scalar_lea.vmem %s2719_s7, 16 }
 0xa34   : > { %p4528_p8 = scmp.ne.s32.totalorder %s2719_s7, %s4527_s18  ;;  %s4770_s20 = smov [#allocation47]  }
 0xa35   : > { %s4531_s5 = sshll.u32 %s4770_s20, 4  ;;  %s4532_s5 = int_to_ptr.vmem [resolvable:$false] %s4531_s5 }
 0xa36   : > { %p4529_p11 = pnand %p4528_p8, %p6555_p12  ;;  %s4533_s0 = scalar_lea.vmem %s4532_s5, 32 }
 0xa37   : > { %p4534_p4 = scmp.lt.s32.totalorder %s2719_s7, %s4532_s5  ;;  %p4535_p1 = scmp.lt.s32.totalorder %s4533_s0, %s4527_s18 }
 0xa38   : > { %p4530_p10 = pneg %p4529_p11 }
 0xa39   : > { %p4536_p2 = por %p4535_p1, %p4534_p4 }
 0xa3b   : > { %p4537_p5 = pnand %p4536_p2, %p4530_p10 }
 0xa3d   : > { %4540 = shalt.err (!%p4537_p5)
}
 0xa3e   : > { %s4541_s15 = scalar_lea.hbm %s6188_s12, 16  ;;  %s4545_s11 = scalar_lea.hbm %s6557_s23, 32 }
 0xa3f   : > { %p4542_p6 = scmp.ne.s32.totalorder %s6188_s12, %s4541_s15  ;;  %p4546_p3 = scmp.lt.u32.totalorder %s6188_s12, %s6557_s23 }
 0xa40   : > { %p4547_p9 = scmp.lt.u32.totalorder %s4545_s11, %s4541_s15  ;;  %p4549_p8 = scmp.lt.u32.totalorder %s4541_s15, %s6188_s12 }
 0xa41   : > { %p4543_p7 = pnand %p4542_p6, %p6555_p12 }
 0xa42   : > { %p4548_p0 = por %p4547_p9, %p4546_p3 }
 0xa43   : > { %p4544_p13 = pneg %p4543_p7 }
 0xa44   : > { %p4550_p11 = por %p4549_p8, %p4548_p0 }
 0xa46   : > { %p4551_p10 = pnand %p4550_p11, %p4544_p13 }
 0xa48   : > { %4554 = shalt.err (!%p4551_p10)
}
 0xa49   : > { %s6559_s16 = sld [smem:[#allocation71_spill]]  ;;  %v3230_v26 = vmul.f32 -1.442695, %v6145_v22  ;;  %s3233_s30 = sshll.u32 %s6552_s9, 1 }
 0xa4a   : > { %3426 = dma.vmem_to_hbm [thread:$0]  (%p6555_p12), %s2719_s7, 16, %s6188_s12, %s2665_s14  }
 0xa4b   : > { %3787 = vpow2.f32 %v3230_v26  ;;  %s6560_s17 = sld [smem:[#allocation80_spill]]  ;;  %s2679_s6 = sshll.u32 %s5716_s10, 4  ;;  %s6238_s6 = int_to_ptr.vmem [resolvable:$true] %s2679_s6 }
 0xa4c   : > { %s6561_s14 = sld [smem:[#allocation106_spill]]  ;;  %s2651_s9 = scalar_lea.sflag [#allocation7], %s5635_s13 }
 0xa4d   : > { %s4555_s5 = scalar_lea.vmem %s6238_s6, 128  ;;  %s4771_s0 = smov [#allocation43]  }
 0xa4e   : > { %p4556_p12 = scmp.ne.s32.totalorder %s6238_s6, %s4555_s5  ;;  %s4559_s15 = sshll.u32 %s4771_s0, 4  ;;  %s4560_s15 = int_to_ptr.vmem [resolvable:$false] %s4559_s15 }
 0xa4f   : > { %s2675_s25 = sadd.s32 %s6559_s16, %s3233_s30  ;;  %s4561_s26 = scalar_lea.vmem %s4560_s15, 256 }
 0xa50   : > { %s3234_s18 = sshll.u32 %s2675_s25, 7  ;;  %p4562_p5 = scmp.lt.s32.totalorder %s6238_s6, %s4560_s15 }
 0xa51   : > { %p6562_p4 = scmp.ne.s32.totalorder %s6560_s17, 0  ;;  %p4563_p6 = scmp.lt.s32.totalorder %s4561_s26, %s4555_s5 }
 0xa52   : > { %s6236_s20 = scalar_lea.hbm %s6561_s14, %s3234_s18 }
 0xa53   : > { %p4557_p1 = pnand %p4556_p12, %p6562_p4  ;;  %p4564_p7 = por %p4563_p6, %p4562_p5 }
 0xa55   : > { %v3788_v34 = vpop.eup %3787  ;;  %p4558_p2 = pneg %p4557_p1 }
 0xa56   : > { %v2643_v62 = vadd.f32 1.0, %v3788_v34 }
 0xa57   : > { %p4565_p13 = pnand %p4564_p7, %p4558_p2 }
 0xa58   : > { %3789 = vrcp.f32 %v2643_v62 }
 0xa62   : > { %v3790_v57 = vpop.eup %3789 }
 0xada   : > { %v2574_v48 = vpop.f32.mrb[4].mxu1 }
 0xadb   : > { %v2646_v11 = vmul.f32 %v3790_v57, %v2574_v48  ;;  %v3325_v4 = vpop.f32.mrb[5].mxu1 }
 0xadc   : > { %v2577_v10 = vpop.f32.mrb[6].mxu1 }
 0xadd   : > { %v2647_v45 = vadd.f32 %v2646_v11, %v6116_v23  ;;  %v3326_v47 = vpop.f32.mrb[7].mxu1 }
 0xadf   : > { %2648 = vst.msk [vmem:[%s5716_s10] sm:$0xff] %vm1260_vm2, %v2647_v45 }
 0xae0   : > { %4568 = shalt.err (!%p4565_p13)
}
 0xae1   : > { %s4569_s13 = scalar_lea.hbm %s6236_s20, 128  ;;  %s4573_s11 = scalar_lea.hbm %s6561_s14, 512 }
 0xae2   : > { %p4570_p3 = scmp.ne.s32.totalorder %s6236_s20, %s4569_s13  ;;  %p4574_p8 = scmp.lt.u32.totalorder %s6236_s20, %s6561_s14 }
 0xae3   : > { %p4575_p11 = scmp.lt.u32.totalorder %s4573_s11, %s4569_s13  ;;  %p4577_p12 = scmp.lt.u32.totalorder %s4569_s13, %s6236_s20 }
 0xae4   : > { %p4571_p9 = pnand %p4570_p3, %p6562_p4 }
 0xae5   : > { %p4576_p10 = por %p4575_p11, %p4574_p8 }
 0xae6   : > { %p4572_p0 = pneg %p4571_p9 }
 0xae7   : > { %p4578_p1 = por %p4577_p12, %p4576_p10 }
 0xae9   : > { %p4579_p2 = pnand %p4578_p1, %p4572_p0 }
 0xaeb   : > { %4582 = shalt.err (!%p4579_p2)
}
 0xaec   : > { %3423 = dma.vmem_to_hbm [thread:$0]  (%p6562_p4), %s6238_s6, 128, %s6236_s20, %s2651_s9  }
 0xaed PF: > { %s6563_s16 = sld [smem:[#allocation68_spill]]  ;;  %s6564_s30 = sld [smem:[#allocation81_spill]] }
 0xaee   : > { %p3559_p5 = scmp.ge.s32.totalorder %s4737_s1, 2 }
 0xaf3   : > { %s2730_s25 = sand.u32 1, %s6563_s16   ;;  %p6565_p6 = scmp.ne.s32.totalorder %s6564_s30, 0 }
 0xaf4   : > { %s2731_s18 = scalar_lea.sflag [#allocation7], %s2730_s25 }
 0xaf5   : > { %p3506_p7 = pnand %p3559_p5, %p6565_p6 }
 0xaf7   : > { %4684 = dma.done.wait (!%p3506_p7), %s2731_s18, 128  }
 0xaf8   : > { %4686 = vsyncadd (!%p3506_p7), %s2731_s18, 4294967168  ;;  %s6566_s12 = sadd.s32 4294967294, %s4737_s1   ;;  %s6567_s7 = sld [smem:[#allocation78_spill]] }
 0xaf9   : > { %s2739_s5 = sand.u32 1, %s6566_s12  }
 0xafa   : > { %s2740_s17 = scalar_lea.sflag [#allocation45], %s2739_s5 }
 0xafe   : > { %p6568_p13 = scmp.ne.s32.totalorder %s6567_s7, 0 }
 0xb00   : > { %p3509_p3 = pnand %p3559_p5, %p6568_p13 }
 0xb02   : > { %4688 = dma.done.wait (!%p3509_p3), %s2740_s17, 80  }
 0xb03   : > { %4690 = vsyncadd (!%p3509_p3), %s2740_s17, 4294967216  ;;  %s6569_s6 = sld [smem:[#allocation66_spill]] }
 0xb09   : > { %s2756_s20 = sand.u32 1, %s6569_s6  }
 0xb0a   : > { %s2757_s9 = scalar_lea.sflag [#allocation48], %s2756_s20 }
 0xb0b   : > { %4692 = dma.done.wait (!%p3509_p3), %s2757_s9, 16  }
 0xb0c   : > { %4694 = vsyncadd (!%p3509_p3), %s2757_s9, 4294967280  ;;  %s66_s1 = sadd.s32 1, %s4737_s1   ;;  %s6570_s7 = sld [smem:[#allocation67_spill]] }
 0xb0d   : > { %p63_p4 = scmp.ge.s32.totalorder %s66_s1, 6   ;;  %s6571_s30 = sld [smem:[#allocation69_spill]] }
 0xb0e   : > { %s6572_s9 = sld [smem:[#allocation70_spill]]  ;;  %s6573_s0 = sld [smem:[#allocation73_spill]] }
 0xb0f   : > { %s6574_s10 = sld [smem:[#allocation79_spill]]  ;;  %s6575_s15 = smov %s6587_s28 }
 0xb10   : > { %s6576_s4 = smov %s4705_s8  ;;  %s6577_s8 = smov %s5533_s3 }
 0xb11   : > { %s6578_s5 = smov %s6589_s2  ;;  %65 = sbr.rel (!%p63_p4) target bundleno = 56 (0x38), region = 331 }
 0xb14   : > { %s6579_s28 = smov %s6573_s0  ;;  %s6580_s0 = smov %s4733_s29 }
 0xb15   : > { %s6581_s29 = smov %s6575_s15 }
 0xb18   :  { %2761 = vsyncpa [#allocation6], 1 }
 0xb19   :  { %2763 = vsyncpa [#allocation6 + $0x1], 1 }
 0xb1a   :  { %2764 = vsyncpa [#allocation9], 1 }
 0xb1b   :  { %2766 = vsyncpa [#allocation9 + $0x1], 1 }
 0xb1c   :  { %2767 = vsyncpa [#allocation12], 1 }
 0xb1d   :  { %2769 = vsyncpa [#allocation12 + $0x1], 1 }
 0xb1e   :  { %2770 = vsyncpa [#allocation15], 1 }
 0xb1f   :  { %2771 = vsyncpa [#allocation18], 1 }
 0xb20   :  { %2772 = vsyncpa [#allocation21], 1 }
 0xb21   :  { %2773 = vsyncpa [#allocation24], 1 }
 0xb22   :  { %2774 = vsyncpa [#allocation27], 1 }
 0xb23   :  { %2775 = vsyncpa [#allocation30], 1 }
 0xb24   :  { %2776 = vsyncpa [#allocation33], 1 }
 0xb25   :  { %2777 = vsyncpa [#allocation36], 1 }
 0xb26   :  { %2778 = vsyncpa [#allocation39], 1 }
 0xb27   :  { %2779 = vsyncpa [#allocation42], 1 }
 0xb28   :  { %2780 = vsyncpa [#allocation7], 1 }
 0xb29   :  { %2782 = vsyncpa [#allocation7 + $0x1], 1 }
 0xb2a   :  { %2783 = vsyncpa [#allocation45], 1 }
 0xb2b   :  { %2785 = vsyncpa [#allocation45 + $0x1], 1 }
 0xb2c   :  { %2786 = vsyncpa [#allocation48], 1 }
 0xb2d   :  { %2788 = vsyncpa [#allocation48 + $0x1], 1 }

// kernel: rwkv_block_apply.1
= control target key start
LH: loop header
LB: loop body
LE: loop exit
PB: predicated region body
PF: predicated region fallthrough
CT: control target
= control target key end

     0   :  { %s6306_s0 = inlined_call_operand.hbm [shape: f32[2,16,32], index: 0, kind: input, shape index: {}, may-alias: {0,24}]   ;;  %s6307_s1 = inlined_call_operand.hbm [shape: f32[2,1,32], index: 1, kind: input, shape index: {}, may-alias: {1,25}]   ;;  %s6308_s2 = inlined_call_operand.hbm [shape: f32[2,3,32], index: 2, kind: input, shape index: {}, may-alias: {2,26}]   ;;  %s6309_s3 = inlined_call_operand.hbm [shape: f32[2,1,32], index: 3, kind: input, shape index: {}, may-alias: {3,27}]   ;;  %s6310_s4 = inlined_call_operand.hbm [shape: f32[1,32], index: 4, kind: input, shape index: {}]   ;;  %s6311_s5 = inlined_call_operand.hbm [shape: f32[1,32], index: 5, kind: input, shape index: {}]   ;;  %s6312_s6 = inlined_call_operand.hbm [shape: f32[1,32], index: 6, kind: input, shape index: {}]   ;;  %s6313_s7 = inlined_call_operand.hbm [shape: f32[1,32], index: 7, kind: input, shape index: {}]   ;;  %s6314_s8 = inlined_call_operand.hbm [shape: f32[1,32], index: 8, kind: input, shape index: {}]   ;;  %s6315_s9 = inlined_call_operand.hbm [shape: f32[1,32], index: 9, kind: input, shape index: {}]   ;;  %s6316_s10 = inlined_call_operand.hbm [shape: f32[1,32], index: 10, kind: input, shape index: {}]   ;;  %s6317_s11 = inlined_call_operand.hbm [shape: f32[1,32], index: 11, kind: input, shape index: {}]   ;;  %s6318_s12 = inlined_call_operand.hbm [shape: f32[1,32], index: 12, kind: input, shape index: {}]   ;;  %s6319_s13 = inlined_call_operand.hbm [shape: f32[1,32], index: 13, kind: input, shape index: {}]   ;;  %s6320_s14 = inlined_call_operand.hbm [shape: f32[1,32], index: 14, kind: input, shape index: {}]   ;;  %s6321_s15 = inlined_call_operand.hbm [shape: bf16[32,32], index: 15, kind: input, shape index: {}]   ;;  %s6322_s16 = inlined_call_operand.hbm [shape: bf16[32,32], index: 16, kind: input, shape index: {}]   ;;  %s6323_s17 = inlined_call_operand.hbm [shape: bf16[32,32], index: 17, kind: input, shape index: {}]   ;;  %s6324_s18 = inlined_call_operand.hbm [shape: bf16[32,32], index: 18, kind: input, shape index: {}]   ;;  %s6325_s19 = inlined_call_operand.hbm [shape: f32[1,32], index: 19, kind: input, shape index: {}]   ;;  %s6326_s20 = inlined_call_operand.hbm [shape: f32[1,32], index: 20, kind: input, shape index: {}]   ;;  %s6327_s21 = inlined_call_operand.hbm [shape: bf16[32,128], index: 21, kind: input, shape index: {}]   ;;  %s6328_s22 = inlined_call_operand.hbm [shape: bf16[32,32], index: 22, kind: input, shape index: {}]   ;;  %s6329_s23 = inlined_call_operand.hbm [shape: bf16[128,32], index: 23, kind: input, shape index: {}]   ;;  %s6330_s24 = inlined_call_operand.hbm [shape: f32[2,16,32], index: 24, kind: output, shape index: {0}, may-alias: {0,24}]   ;;  %s6331_s25 = inlined_call_operand.hbm [shape: f32[2,1,32], index: 25, kind: output, shape index: {1}, may-alias: {1,25}]   ;;  %s6332_s26 = inlined_call_operand.hbm [shape: f32[2,3,32], index: 26, kind: output, shape index: {2}, may-alias: {2,26}]   ;;  %s6333_s27 = inlined_call_operand.hbm [shape: f32[2,1,32], index: 27, kind: output, shape index: {3}, may-alias: {3,27}]  }
   0x1   :  { %6411 = sst [smem:[#allocation82_spill]] %s6306_s0 }
   0x2   :  { %6412 = sst [smem:[#allocation83_spill]] %s6307_s1 }
   0x3   :  { %6413 = sst [smem:[#allocation84_spill]] %s6308_s2 }
   0x4   :  { %6414 = sst [smem:[#allocation85_spill]] %s6309_s3 }
   0x5   :  { %6415 = sst [smem:[#allocation86_spill]] %s6310_s4 }
   0x6   :  { %6416 = sst [smem:[#allocation87_spill]] %s6311_s5 }
   0x7   :  { %6417 = sst [smem:[#allocation88_spill]] %s6312_s6 }
   0x8   :  { %6418 = sst [smem:[#allocation89_spill]] %s6313_s7 }
   0x9   :  { %6419 = sst [smem:[#allocation90_spill]] %s6314_s8 }
   0xa   :  { %6420 = sst [smem:[#allocation91_spill]] %s6315_s9 }
   0xb   :  { %6421 = sst [smem:[#allocation92_spill]] %s6316_s10 }
   0xc   :  { %6422 = sst [smem:[#allocation93_spill]] %s6317_s11 }
   0xd   :  { %6423 = sst [smem:[#allocation94_spill]] %s6318_s12 }
   0xe   :  { %6424 = sst [smem:[#allocation95_spill]] %s6319_s13 }
   0xf   :  { %6425 = sst [smem:[#allocation96_spill]] %s6320_s14 }
  0x10   :  { %6426 = sst [smem:[#allocation97_spill]] %s6321_s15 }
  0x11   :  { %6427 = sst [smem:[#allocation98_spill]] %s6322_s16 }
  0x12   :  { %6428 = sst [smem:[#allocation99_spill]] %s6323_s17 }
  0x13   :  { %6429 = sst [smem:[#allocation100_spill]] %s6324_s18 }
  0x14   :  { %6430 = sst [smem:[#allocation101_spill]] %s6325_s19 }
  0x15   :  { %6431 = sst [smem:[#allocation102_spill]] %s6326_s20 }
  0x16   :  { %6432 = sst [smem:[#allocation103_spill]] %s6327_s21 }
  0x17   :  { %6433 = sst [smem:[#allocation104_spill]] %s6328_s22 }
  0x18   :  { %6434 = sst [smem:[#allocation105_spill]] %s6329_s23 }
  0x19   :  { %6435 = sst [smem:[#allocation106_spill]] %s6330_s24 }
  0x1a   :  { %6436 = sst [smem:[#allocation107_spill]] %s6331_s25 }
  0x1b   :  { %6437 = sst [smem:[#allocation108_spill]] %s6332_s26 }
  0x1c   :  { %6438 = sst [smem:[#allocation109_spill]] %s6333_s27 }
  0x1d   :  { %33 = vsyncpa [#allocation6], 0 }
  0x1e   :  { %35 = vsyncpa [#allocation6 + $0x1], 0 }
  0x1f   :  { %36 = vsyncpa [#allocation9], 0 }
  0x20   :  { %38 = vsyncpa [#allocation9 + $0x1], 0 }
  0x21   :  { %39 = vsyncpa [#allocation12], 0 }
  0x22   :  { %41 = vsyncpa [#allocation12 + $0x1], 0 }
  0x23   :  { %42 = vsyncpa [#allocation15], 0 }
  0x24   :  { %43 = vsyncpa [#allocation18], 0 }
  0x25   :  { %44 = vsyncpa [#allocation21], 0 }
  0x26   :  { %45 = vsyncpa [#allocation24], 0 }
  0x27   :  { %46 = vsyncpa [#allocation27], 0 }
  0x28   :  { %47 = vsyncpa [#allocation30], 0 }
  0x29   :  { %48 = vsyncpa [#allocation33], 0 }
  0x2a   :  { %49 = vsyncpa [#allocation36], 0 }
  0x2b   :  { %50 = vsyncpa [#allocation39], 0 }
  0x2c   :  { %51 = vsyncpa [#allocation42], 0 }
  0x2d   :  { %52 = vsyncpa [#allocation7], 0 }
  0x2e   :  { %54 = vsyncpa [#allocation7 + $0x1], 0 }
  0x2f   :  { %55 = vsyncpa [#allocation45], 0 }
  0x30   :  { %57 = vsyncpa [#allocation45 + $0x1], 0 }
  0x31   :  { %58 = vsyncpa [#allocation48], 0 }
  0x32   :  { %60 = vsyncpa [#allocation48 + $0x1], 0  ;;  %s4912_s7 = smov 0   ;;  %s4914_s4 = smov 0  }
  0x33   :  { %s4916_s8 = smov 0   ;;  %s4918_s30 = smov 0  }
  0x34   :  { %s4920_s9 = smov 0   ;;  %s4922_s5 = smov 0  }
  0x35   :  { %s4924_s28 = smov 0   ;;  %s4926_s0 = smov 0  }
  0x36   :  { %s4928_s10 = smov 0   ;;  %s4930_s29 = smov 0  }
  0x37   :  { %s4932_s1 = smov 0  }
  0x38 LB: > { %6439 = sst [smem:[#allocation66_spill]] %s4697_s7  ;;  %s4968_s6 = sadd.s32 4294967295, %s4737_s1   ;;  %s4737_s1 = sphi %s4932_s1, %s66_s1   ;;  %s4733_s29 = sphi %s4930_s29, %s6581_s29   ;;  %s4729_s10 = sphi %s4928_s10, %s6574_s10   ;;  %s4725_s0 = sphi %s4926_s0, %s6580_s0   ;;  %s4721_s28 = sphi %s4924_s28, %s6579_s28   ;;  %s4717_s5 = sphi %s4922_s5, %s6578_s5   ;;  %s4713_s9 = sphi %s4920_s9, %s6572_s9   ;;  %s4709_s30 = sphi %s4918_s30, %s6571_s30   ;;  %s4705_s8 = sphi %s4916_s8, %s6577_s8   ;;  %s4701_s4 = sphi %s4914_s4, %s6576_s4   ;;  %s4697_s7 = sphi %s4912_s7, %s6570_s7  }
  0x39   : > { %6440 = sst [smem:[#allocation67_spill]] %s4701_s4  ;;  %p3140_p0 = scmp.ge.s32.totalorder %s4737_s1, 1 }
  0x3a   : > { %6441 = sst [smem:[#allocation68_spill]] %s4709_s30  ;;  %p6355_p1 = scmp.eq.s32.totalorder %s4968_s6, 0 }
  0x3b   : > { %6442 = sst [smem:[#allocation69_spill]] %s4713_s9  ;;  %p715_p2 = scmp.lt.s32.totalorder %s4737_s1, 5 }
  0x3c   : > { %6443 = sst [smem:[#allocation70_spill]] %s4717_s5  ;;  %s4739_s2 = smov [#allocation13]  }
  0x3d   : > { %6444 = sst [smem:[#allocation71_spill]] %s4721_s28  ;;  %p4973_p3 = pnand %p3140_p0, %p715_p2 }
  0x3e   : > { %6445 = sst [smem:[#allocation72_spill]] %s4725_s0  ;;  %s728_s3 = sshll.u32 %s4739_s2, 4  ;;  %s729_s3 = int_to_ptr.vmem [resolvable:$true] %s728_s3 }
  0x3f   : > { %6446 = sst [smem:[#allocation73_spill]] %s4729_s10  ;;  %p3431_p4 = pneg %p4973_p3 }
  0x40   : > { %6447 = sst [smem:[#allocation74_spill]] %s4968_s6  ;;  %s4740_s24 = smov [#allocation14]  }
  0x41   : > { %s6448_s11 = scalar_select %p4973_p3, 1, 0 }
  0x42   : > { %s739_s27 = sshll.u32 %s4740_s24, 4  ;;  %p4981_p5 = pnand %p3431_p4, %p6355_p1  ;;  %s4985_s27 = int_to_ptr.vmem [resolvable:$true] %s739_s27 }
  0x43   : > { %6449 = sst [smem:[#allocation75_spill]] %s6448_s11  ;;  %s4741_s25 = smov [#allocation17]  }
  0x44   : > { %s6450_s26 = scalar_select %p4981_p5, 1, 0 }
  0x45   : > { %s761_s0 = sshll.u32 %s4741_s25, 4  ;;  %s6451_s2 = sld [smem:[#allocation86_spill]]  ;;  %s4987_s0 = int_to_ptr.vmem [resolvable:$true] %s761_s0 }
  0x46   : > { %p4997_p7 = pneg %p4981_p5 }
  0x48   : > { %s6452_s24 = scalar_select %p4997_p7, 1, 0 }
  0x4b   : > { %s3791_s9 = scalar_lea.hbm %s6451_s2, 16 }
  0x4c   : > { %p3792_p6 = scmp.ne.s32.totalorder %s6451_s2, %s3791_s9  ;;  %p3798_p10 = scmp.lt.u32.totalorder %s3791_s9, %s6451_s2 }
  0x4e   : > { %p3794_p8 = pnand %p4997_p7, %p3792_p6 }
  0x50   : > { %p3795_p9 = pneg %p3794_p8 }
  0x52   : > { %p3800_p11 = pnand %p3798_p10, %p3795_p9 }
  0x54   : > { %3803 = shalt.err (!%p3800_p11)
}
  0x55   : > { %s3804_s30 = scalar_lea.vmem %s729_s3, 16  ;;  %s3811_s5 = scalar_lea.vmem %s729_s3, 32 }
  0x56   : > { %p3805_p12 = scmp.ne.s32.totalorder %s729_s3, %s3804_s30  ;;  %p3812_p2 = scmp.lt.s32.totalorder %s729_s3, %s729_s3 }
  0x57   : > { %p3813_p4 = scmp.lt.s32.totalorder %s3811_s5, %s3804_s30 }
  0x58   : > { %p3807_p13 = pnand %p3805_p12, %p4997_p7 }
  0x59   : > { %p3814_p1 = por %p3813_p4, %p3812_p2 }
  0x5a   : > { %p3808_p0 = pneg %p3807_p13 }
  0x5c   : > { %p3815_p3 = pnand %p3814_p1, %p3808_p0 }
  0x5e   : > { %3818 = shalt.err (!%p3815_p3)
}
  0x5f   : > { %3434 = dma.hbm_to_vmem [thread:$0]  (!%p4981_p5), %s6451_s2, 16, %s729_s3, [#allocation12]  }
  0x60   : > { %s6453_s25 = sld [smem:[#allocation87_spill]] }
  0x66   : > { %s3819_s23 = scalar_lea.hbm %s6453_s25, 16 }
  0x67   : > { %p3820_p6 = scmp.ne.s32.totalorder %s6453_s25, %s3819_s23  ;;  %p3826_p1 = scmp.lt.u32.totalorder %s3819_s23, %s6453_s25 }
  0x69   : > { %p3822_p8 = pnand %p3820_p6, %p4997_p7 }
  0x6b   : > { %p3823_p9 = pneg %p3822_p8 }
  0x6d   : > { %p3828_p3 = pnand %p3826_p1, %p3823_p9 }
  0x6f   : > { %3831 = shalt.err (!%p3828_p3)
}
  0x70   : > { %s3832_s3 = scalar_lea.vmem %s4985_s27, 16  ;;  %s3839_s20 = scalar_lea.vmem %s4985_s27, 32 }
  0x71   : > { %p3833_p10 = scmp.ne.s32.totalorder %s4985_s27, %s3832_s3  ;;  %p3840_p13 = scmp.lt.s32.totalorder %s4985_s27, %s4985_s27 }
  0x72   : > { %p3841_p0 = scmp.lt.s32.totalorder %s3839_s20, %s3832_s3 }
  0x73   : > { %p3835_p11 = pnand %p3833_p10, %p4997_p7 }
  0x74   : > { %p3842_p2 = por %p3841_p0, %p3840_p13 }
  0x75   : > { %p3836_p12 = pneg %p3835_p11 }
  0x77   : > { %p3843_p4 = pnand %p3842_p2, %p3836_p12 }
  0x79   : > { %3846 = shalt.err (!%p3843_p4)
}
  0x7a   : > { %3437 = dma.hbm_to_vmem [thread:$0]  (!%p4981_p5), %s6453_s25, 16, %s4985_s27, [#allocation15]  }
  0x7b   : > { %s6454_s9 = sld [smem:[#allocation89_spill]] }
  0x81   : > { %s6455_s2 = smov %s6454_s9  ;;  %s3847_s10 = scalar_lea.hbm %s6454_s9, 16 }
  0x82   : > { %p3848_p6 = scmp.ne.s32.totalorder %s6455_s2, %s3847_s10  ;;  %p3854_p1 = scmp.lt.u32.totalorder %s3847_s10, %s6455_s2 }
  0x84   : > { %p3850_p8 = pnand %p3848_p6, %p4997_p7 }
  0x86   : > { %p3851_p9 = pneg %p3850_p8 }
  0x88   : > { %p3856_p3 = pnand %p3854_p1, %p3851_p9 }
  0x8a   : > { %3859 = shalt.err (!%p3856_p3)
}
  0x8b   : > { %s3860_s27 = scalar_lea.vmem %s4987_s0, 16  ;;  %s3867_s22 = scalar_lea.vmem %s4987_s0, 32 }
  0x8c   : > { %p3861_p10 = scmp.ne.s32.totalorder %s4987_s0, %s3860_s27  ;;  %p3868_p13 = scmp.lt.s32.totalorder %s4987_s0, %s4987_s0 }
  0x8d   : > { %p3869_p0 = scmp.lt.s32.totalorder %s3867_s22, %s3860_s27 }
  0x8e   : > { %p3863_p11 = pnand %p3861_p10, %p4997_p7 }
  0x8f   : > { %p3870_p2 = por %p3869_p0, %p3868_p13 }
  0x90   : > { %p3864_p12 = pneg %p3863_p11 }
  0x92   : > { %p3871_p4 = pnand %p3870_p2, %p3864_p12 }
  0x94   : > { %3874 = shalt.err (!%p3871_p4)
}
  0x95   : > { %3443 = dma.hbm_to_vmem [thread:$0]  (!%p4981_p5), %s6455_s2, 16, %s4987_s0, [#allocation18]  }
  0x96   : > { %s4742_s11 = smov [#allocation20]   ;;  %s4743_s10 = smov [#allocation23]  }
  0x97   : > { %s783_s9 = sshll.u32 %s4742_s11, 4  ;;  %s805_s30 = sshll.u32 %s4743_s10, 4  ;;  %s784_s9 = int_to_ptr.vmem [resolvable:$true] %s783_s9  ;;  %s806_s30 = int_to_ptr.vmem [resolvable:$true] %s805_s30 }
  0x98   : > { %s6456_s20 = sld [smem:[#allocation91_spill]] }
  0x9e   : > { %s3875_s27 = scalar_lea.hbm %s6456_s20, 16 }
  0x9f   : > { %p3876_p6 = scmp.ne.s32.totalorder %s6456_s20, %s3875_s27  ;;  %p3882_p1 = scmp.lt.u32.totalorder %s3875_s27, %s6456_s20 }
  0xa1   : > { %p3878_p8 = pnand %p3876_p6, %p4997_p7 }
  0xa3   : > { %p3879_p9 = pneg %p3878_p8 }
  0xa5   : > { %p3884_p3 = pnand %p3882_p1, %p3879_p9 }
  0xa7   : > { %3887 = shalt.err (!%p3884_p3)
}
  0xa8   : > { %s3888_s0 = scalar_lea.vmem %s784_s9, 16  ;;  %s3895_s28 = scalar_lea.vmem %s784_s9, 32 }
  0xa9   : > { %p3889_p10 = scmp.ne.s32.totalorder %s784_s9, %s3888_s0  ;;  %p3896_p13 = scmp.lt.s32.totalorder %s784_s9, %s784_s9 }
  0xaa   : > { %p3897_p0 = scmp.lt.s32.totalorder %s3895_s28, %s3888_s0 }
  0xab   : > { %p3891_p11 = pnand %p3889_p10, %p4997_p7 }
  0xac   : > { %p3898_p2 = por %p3897_p0, %p3896_p13 }
  0xad   : > { %p3892_p12 = pneg %p3891_p11 }
  0xaf   : > { %p3899_p4 = pnand %p3898_p2, %p3892_p12 }
  0xb1   : > { %3902 = shalt.err (!%p3899_p4)
}
  0xb2   : > { %3449 = dma.hbm_to_vmem [thread:$0]  (!%p4981_p5), %s6456_s20, 16, %s784_s9, [#allocation21]  }
  0xb3   : > { %s6457_s5 = sld [smem:[#allocation93_spill]] }
  0xb9   : > { %s6458_s3 = smov %s6457_s5  ;;  %s3903_s27 = scalar_lea.hbm %s6457_s5, 16 }
  0xba   : > { %p3904_p6 = scmp.ne.s32.totalorder %s6458_s3, %s3903_s27  ;;  %p3910_p1 = scmp.lt.u32.totalorder %s3903_s27, %s6458_s3 }
  0xbc   : > { %p3906_p8 = pnand %p3904_p6, %p4997_p7 }
  0xbe   : > { %p3907_p9 = pneg %p3906_p8 }
  0xc0   : > { %p3912_p3 = pnand %p3910_p1, %p3907_p9 }
  0xc2   : > { %3915 = shalt.err (!%p3912_p3)
}
  0xc3   : > { %s3916_s25 = scalar_lea.vmem %s806_s30, 16  ;;  %s3923_s9 = scalar_lea.vmem %s806_s30, 32 }
  0xc4   : > { %p3917_p10 = scmp.ne.s32.totalorder %s806_s30, %s3916_s25  ;;  %p3924_p13 = scmp.lt.s32.totalorder %s806_s30, %s806_s30 }
  0xc5   : > { %p3925_p0 = scmp.lt.s32.totalorder %s3923_s9, %s3916_s25 }
  0xc6   : > { %p3919_p11 = pnand %p3917_p10, %p4997_p7 }
  0xc7   : > { %p3926_p2 = por %p3925_p0, %p3924_p13 }
  0xc8   : > { %p3920_p12 = pneg %p3919_p11 }
  0xca   : > { %p3927_p4 = pnand %p3926_p2, %p3920_p12 }
  0xcc   : > { %3930 = shalt.err (!%p3927_p4)
}
  0xcd   : > { %3455 = dma.hbm_to_vmem [thread:$0]  (!%p4981_p5), %s6458_s3, 16, %s806_s30, [#allocation24]  }
  0xce   : > { %s4744_s10 = smov [#allocation26]   ;;  %s4745_s27 = smov [#allocation29]  }
  0xcf   : > { %s827_s5 = sshll.u32 %s4744_s10, 4  ;;  %s848_s22 = sshll.u32 %s4745_s27, 4  ;;  %s828_s5 = int_to_ptr.vmem [resolvable:$true] %s827_s5  ;;  %s849_s22 = int_to_ptr.vmem [resolvable:$true] %s848_s22 }
  0xd0   : > { %s6459_s13 = sld [smem:[#allocation95_spill]] }
  0xd6   : > { %s3931_s28 = scalar_lea.hbm %s6459_s13, 16 }
  0xd7   : > { %p3932_p6 = scmp.ne.s32.totalorder %s6459_s13, %s3931_s28  ;;  %p3938_p1 = scmp.lt.u32.totalorder %s3931_s28, %s6459_s13 }
  0xd9   : > { %p3934_p8 = pnand %p3932_p6, %p4997_p7 }
  0xdb   : > { %p3935_p9 = pneg %p3934_p8 }
  0xdd   : > { %p3940_p3 = pnand %p3938_p1, %p3935_p9 }
  0xdf   : > { %3943 = shalt.err (!%p3940_p3)
}
  0xe0   : > { %s3944_s30 = scalar_lea.vmem %s828_s5, 16  ;;  %s3951_s18 = scalar_lea.vmem %s828_s5, 32 }
  0xe1   : > { %p3945_p10 = scmp.ne.s32.totalorder %s828_s5, %s3944_s30  ;;  %p3952_p13 = scmp.lt.s32.totalorder %s828_s5, %s828_s5 }
  0xe2   : > { %p3953_p0 = scmp.lt.s32.totalorder %s3951_s18, %s3944_s30 }
  0xe3   : > { %p3947_p11 = pnand %p3945_p10, %p4997_p7 }
  0xe4   : > { %p3954_p2 = por %p3953_p0, %p3952_p13 }
  0xe5   : > { %p3948_p12 = pneg %p3947_p11 }
  0xe7   : > { %p3955_p4 = pnand %p3954_p2, %p3948_p12 }
  0xe9   : > { %3958 = shalt.err (!%p3955_p4)
}
  0xea   : > { %3461 = dma.hbm_to_vmem [thread:$0]  (!%p4981_p5), %s6459_s13, 16, %s828_s5, [#allocation27]  }
  0xeb   : > { %s6460_s15 = sld [smem:[#allocation97_spill]] }
  0xf1   : > { %s3959_s0 = scalar_lea.hbm %s6460_s15, 256 }
  0xf2   : > { %p3960_p6 = scmp.ne.s32.totalorder %s6460_s15, %s3959_s0  ;;  %p3966_p1 = scmp.lt.u32.totalorder %s3959_s0, %s6460_s15 }
  0xf4   : > { %p3962_p8 = pnand %p3960_p6, %p4997_p7 }
  0xf6   : > { %p3963_p9 = pneg %p3962_p8 }
  0xf8   : > { %p3968_p3 = pnand %p3966_p1, %p3963_p9 }
  0xfa   : > { %3971 = shalt.err (!%p3968_p3)
}
  0xfb   : > { %s3972_s30 = scalar_lea.vmem %s849_s22, 256  ;;  %p3980_p13 = scmp.lt.s32.totalorder %s849_s22, %s849_s22 }
  0xfc   : > { %p3973_p10 = scmp.ne.s32.totalorder %s849_s22, %s3972_s30  ;;  %p3981_p0 = scmp.lt.s32.totalorder %s3972_s30, %s3972_s30 }
  0xfe   : > { %p3975_p11 = pnand %p3973_p10, %p4997_p7  ;;  %p3982_p2 = por %p3981_p0, %p3980_p13 }
 0x100   : > { %p3976_p12 = pneg %p3975_p11 }
 0x102   : > { %p3983_p4 = pnand %p3982_p2, %p3976_p12 }
 0x104   : > { %3986 = shalt.err (!%p3983_p4)
}
 0x105   : > { %s6367_s5 = smov 64   ;;  %s6369_s18 = smov 4  }
 0x106   : > { %3467 = dma.hbm_to_vmem [thread:$0]  (!%p4981_p5), %s6460_s15, 256, %s849_s22, [#allocation30], %s6367_s5, %s6367_s5, %s6369_s18  }
 0x107   : > { %s4748_s2 = smov [#allocation32]   ;;  %s4749_s0 = smov [#allocation35]  }
 0x108   : > { %s874_s23 = sshll.u32 %s4748_s2, 4  ;;  %s901_s28 = sshll.u32 %s4749_s0, 4  ;;  %s875_s23 = int_to_ptr.vmem [resolvable:$true] %s874_s23  ;;  %s902_s28 = int_to_ptr.vmem [resolvable:$true] %s901_s28 }
 0x109   : > { %s6461_s17 = sld [smem:[#allocation99_spill]] }
 0x10f   : > { %s3987_s11 = scalar_lea.hbm %s6461_s17, 256 }
 0x110   : > { %p3988_p6 = scmp.ne.s32.totalorder %s6461_s17, %s3987_s11  ;;  %p3994_p1 = scmp.lt.u32.totalorder %s3987_s11, %s6461_s17 }
 0x112   : > { %p3990_p8 = pnand %p3988_p6, %p4997_p7 }
 0x114   : > { %p3991_p9 = pneg %p3990_p8 }
 0x116   : > { %p3996_p3 = pnand %p3994_p1, %p3991_p9 }
 0x118   : > { %3999 = shalt.err (!%p3996_p3)
}
 0x119   : > { %s4000_s22 = scalar_lea.vmem %s875_s23, 256  ;;  %p4008_p13 = scmp.lt.s32.totalorder %s875_s23, %s875_s23 }
 0x11a   : > { %p4001_p10 = scmp.ne.s32.totalorder %s875_s23, %s4000_s22  ;;  %p4009_p0 = scmp.lt.s32.totalorder %s4000_s22, %s4000_s22 }
 0x11c   : > { %p4003_p11 = pnand %p4001_p10, %p4997_p7  ;;  %p4010_p2 = por %p4009_p0, %p4008_p13 }
 0x11e   : > { %p4004_p12 = pneg %p4003_p11 }
 0x120   : > { %p4011_p4 = pnand %p4010_p2, %p4004_p12 }
 0x122   : > { %4014 = shalt.err (!%p4011_p4)
}
 0x123   : > { %3473 = dma.hbm_to_vmem [thread:$0]  (!%p4981_p5), %s6461_s17, 256, %s875_s23, [#allocation33], %s6367_s5, %s6367_s5, %s6369_s18  }
 0x124   : > { %s6462_s19 = sld [smem:[#allocation101_spill]] }
 0x12a   : > { %s4015_s27 = scalar_lea.hbm %s6462_s19, 16 }
 0x12b   : > { %p4016_p6 = scmp.ne.s32.totalorder %s6462_s19, %s4015_s27  ;;  %p4022_p1 = scmp.lt.u32.totalorder %s4015_s27, %s6462_s19 }
 0x12d   : > { %p4018_p8 = pnand %p4016_p6, %p4997_p7 }
 0x12f   : > { %p4019_p9 = pneg %p4018_p8 }
 0x131   : > { %p4024_p3 = pnand %p4022_p1, %p4019_p9 }
 0x133   : > { %4027 = shalt.err (!%p4024_p3)
}
 0x134   : > { %s4028_s11 = scalar_lea.vmem %s902_s28, 16  ;;  %s4035_s23 = scalar_lea.vmem %s902_s28, 32 }
 0x135   : > { %p4029_p10 = scmp.ne.s32.totalorder %s902_s28, %s4028_s11  ;;  %p4036_p13 = scmp.lt.s32.totalorder %s902_s28, %s902_s28 }
 0x136   : > { %p4037_p0 = scmp.lt.s32.totalorder %s4035_s23, %s4028_s11 }
 0x137   : > { %p4031_p11 = pnand %p4029_p10, %p4997_p7 }
 0x138   : > { %p4038_p2 = por %p4037_p0, %p4036_p13 }
 0x139   : > { %p4032_p12 = pneg %p4031_p11 }
 0x13b   : > { %p4039_p4 = pnand %p4038_p2, %p4032_p12 }
 0x13d   : > { %4042 = shalt.err (!%p4039_p4)
}
 0x13e   : > { %3479 = dma.hbm_to_vmem [thread:$0]  (!%p4981_p5), %s6462_s19, 16, %s902_s28, [#allocation36]  }
 0x13f   : > { %s4750_s13 = smov [#allocation38]   ;;  %s6463_s21 = sld [smem:[#allocation103_spill]] }
 0x140   : > { %s922_s20 = sshll.u32 %s4750_s13, 4  ;;  %s923_s20 = int_to_ptr.vmem [resolvable:$true] %s922_s20 }
 0x145   : > { %s4043_s27 = scalar_lea.hbm %s6463_s21, 256 }
 0x146   : > { %p4044_p6 = scmp.ne.s32.totalorder %s6463_s21, %s4043_s27  ;;  %p4050_p1 = scmp.lt.u32.totalorder %s4043_s27, %s6463_s21 }
 0x148   : > { %p4046_p8 = pnand %p4044_p6, %p4997_p7 }
 0x14a   : > { %p4047_p9 = pneg %p4046_p8 }
 0x14c   : > { %p4052_p3 = pnand %p4050_p1, %p4047_p9 }
 0x14e   : > { %4055 = shalt.err (!%p4052_p3)
}
 0x14f   : > { %s4056_s28 = scalar_lea.vmem %s923_s20, 256  ;;  %p4064_p13 = scmp.lt.s32.totalorder %s923_s20, %s923_s20 }
 0x150   : > { %p4057_p10 = scmp.ne.s32.totalorder %s923_s20, %s4056_s28  ;;  %p4065_p0 = scmp.lt.s32.totalorder %s4056_s28, %s4056_s28 }
 0x152   : > { %p4059_p11 = pnand %p4057_p10, %p4997_p7  ;;  %p4066_p2 = por %p4065_p0, %p4064_p13 }
 0x154   : > { %p4060_p12 = pneg %p4059_p11 }
 0x156   : > { %p4067_p4 = pnand %p4066_p2, %p4060_p12 }
 0x158   : > { %4070 = shalt.err (!%p4067_p4)
}
 0x159   : > { %3485 = dma.hbm_to_vmem [thread:$0]  (!%p4981_p5), %s6463_s21, 256, %s923_s20, [#allocation39], %s6367_s5, %s6367_s5, %s6369_s18  }
 0x15a   : > { %s6366_s30 = sadd.s32 4294967294, %s4737_s1   ;;  %p6374_p6 = scmp.eq.s32.totalorder %s4737_s1, 0 }
 0x15b   : > { %p120_p8 = scmp.ne.s32.totalorder %s4705_s8, %s4701_s4  ;;  %p126_p9 = scmp.ne.s32.totalorder %s4701_s4, %s4697_s7 }
 0x15c   : > { %p6373_p1 = scmp.eq.s32.totalorder %s4968_s6, 3  ;;  %p5212_p10 = scmp.eq.s32.totalorder %s6366_s30, 3 }
 0x15d   : > { %p5206_p3 = por %p120_p8, %p6374_p6  ;;  %p6466_p11 = scmp.eq.s32.totalorder %s4968_s6, 0 }
 0x15e   : > { %s6465_s3 = scalar_select %p5212_p10, 1, 0 }
 0x15f   : > { %p5218_p12 = por %p126_p9, %p6466_p11  ;;  %p5224_p13 = por %p6373_p1, %p120_p8 }
 0x160   : > { %p5230_p0 = por %p5212_p10, %p126_p9  ;;  %p6372_p2 = scmp.lt.s32.totalorder %s4737_s1, 4 }
 0x161   : > { %s6467_s20 = scalar_select %p5218_p12, 1, 0 }
 0x162   : > { %s6469_s10 = scalar_select %p5224_p13, 1, 0 }
 0x163   : > { %6468 = sst [smem:[#allocation76_spill]] %s6467_s20  ;;  %s5237_s0 = sand.u32 1, %s4705_s8  }
 0x164   : > { %6470 = sst [smem:[#allocation77_spill]] %s6469_s10  ;;  %s3165_s25 = sshll.u32 %s4733_s29, 4 }
 0x165   : > { %s6471_s27 = scalar_select %p5230_p0, 1, 0 }
 0x166   : > { %s985_s9 = scalar_lea.vmem [#allocation8], %s5237_s0  ;;  %s6473_s30 = sld [smem:[#allocation83_spill]] }
 0x167   : > { %6472 = sst [smem:[#allocation78_spill]] %s6471_s27  ;;  %s992_s28 = sshll.u32 %s985_s9, 4  ;;  %s5246_s28 = int_to_ptr.vmem [resolvable:$true] %s992_s28 }
 0x168   : > { %p5252_p4 = pnand %p6372_p2, %p5206_p3  ;;  %s6476_s9 = sld [smem:[#allocation85_spill]] }
 0x169   : > { %s6478_s23 = sand.u32 1, %s4737_s1  }
 0x16a   : > { %s6475_s18 = scalar_select %p5252_p4, 1, 0 }
 0x16b   : > { %s5265_s21 = scalar_lea.sflag [#allocation9], %s6478_s23  ;;  %p5271_p9 = pneg %p5252_p4 }
 0x16c   : > { %s6474_s22 = smov %s6473_s30  ;;  %s5244_s5 = scalar_lea.hbm %s6473_s30, %s3165_s25 }
 0x16d   : > { %s4751_s30 = smov [#allocation16]   ;;  %s4071_s7 = scalar_lea.hbm %s5244_s5, 16 }
 0x16e   : > { %s6477_s17 = smov %s6476_s9  ;;  %s5259_s19 = scalar_lea.hbm %s6476_s9, %s3165_s25 }
 0x16f   : > { %s5261_s11 = sshll.u32 %s4751_s30, 4  ;;  %p4072_p8 = scmp.ne.s32.totalorder %s5244_s5, %s4071_s7  ;;  %s751_s11 = int_to_ptr.vmem [resolvable:$true] %s5261_s11 }
 0x170   : > { %s6479_s13 = scalar_select %p5271_p9, 1, 0 }
 0x171   : > { %p4074_p3 = pnand %p5271_p9, %p4072_p8  ;;  %s4076_s25 = scalar_lea.hbm %s6474_s22, 32 }
 0x172   : > { %p4077_p2 = scmp.lt.u32.totalorder %s5244_s5, %s6474_s22  ;;  %p4078_p1 = scmp.lt.u32.totalorder %s4076_s25, %s4071_s7 }
 0x173   : > { %p4075_p11 = pneg %p4074_p3  ;;  %p4080_p0 = scmp.lt.u32.totalorder %s4071_s7, %s5244_s5 }
 0x174   : > { %p4079_p6 = por %p4078_p1, %p4077_p2 }
 0x176   : > { %p4081_p13 = por %p4080_p0, %p4079_p6 }
 0x178   : > { %p4082_p12 = pnand %p4081_p13, %p4075_p11 }
 0x17a   : > { %4085 = shalt.err (!%p4082_p12)
}
 0x17b   : > { %s4086_s23 = scalar_lea.vmem %s5246_s28, 16  ;;  %s4752_s15 = smov [#allocation8]  }
 0x17c   : > { %p4087_p8 = scmp.ne.s32.totalorder %s5246_s28, %s4086_s23  ;;  %s4091_s2 = sshll.u32 %s4752_s15, 4  ;;  %s4092_s2 = int_to_ptr.vmem [resolvable:$false] %s4091_s2 }
 0x17d   : > { %s4093_s9 = scalar_lea.vmem %s4092_s2, 32  ;;  %p4094_p5 = scmp.lt.s32.totalorder %s5246_s28, %s4092_s2 }
 0x17e   : > { %p4089_p3 = pnand %p4087_p8, %p5271_p9  ;;  %p4095_p7 = scmp.lt.s32.totalorder %s4093_s9, %s4086_s23 }
 0x180   : > { %p4090_p10 = pneg %p4089_p3  ;;  %p4096_p1 = por %p4095_p7, %p4094_p5 }
 0x182   : > { %p4097_p2 = pnand %p4096_p1, %p4090_p10 }
 0x184   : > { %4100 = shalt.err (!%p4097_p2)
}
 0x185   : > { %3498 = dma.hbm_to_vmem [thread:$0]  (!%p5252_p4), %s5244_s5, 16, %s5246_s28, %s5265_s21  }
 0x186   : > { %s6480_s30 = sld [smem:[#allocation88_spill]]  ;;  %p6482_p5 = scmp.ne.s32.totalorder %s6452_s24, 0 }
 0x18c   : > { %s6481_s22 = smov %s6480_s30  ;;  %s4101_s15 = scalar_lea.hbm %s6480_s30, 16 }
 0x18d   : > { %p4102_p6 = scmp.ne.s32.totalorder %s6481_s22, %s4101_s15  ;;  %p4108_p12 = scmp.lt.u32.totalorder %s4101_s15, %s6481_s22 }
 0x18f   : > { %p4104_p7 = pnand %p4102_p6, %p6482_p5 }
 0x191   : > { %p4105_p10 = pneg %p4104_p7 }
 0x193   : > { %p4110_p13 = pnand %p4108_p12, %p4105_p10 }
 0x195   : > { %4113 = shalt.err (!%p4110_p13)
}
 0x196   : > { %s4114_s9 = scalar_lea.vmem %s751_s11, 16  ;;  %s4121_s5 = scalar_lea.vmem %s751_s11, 32 }
 0x197   : > { %p4115_p0 = scmp.ne.s32.totalorder %s751_s11, %s4114_s9  ;;  %p4122_p3 = scmp.lt.s32.totalorder %s751_s11, %s751_s11 }
 0x198   : > { %p4123_p1 = scmp.lt.s32.totalorder %s4121_s5, %s4114_s9 }
 0x199   : > { %p4117_p11 = pnand %p4115_p0, %p6482_p5 }
 0x19a   : > { %p4124_p2 = por %p4123_p1, %p4122_p3 }
 0x19b   : > { %p4118_p8 = pneg %p4117_p11 }
 0x19d   : > { %p4125_p4 = pnand %p4124_p2, %p4118_p8 }
 0x19f   : > { %4128 = shalt.err (!%p4125_p4)
}
 0x1a0   : > { %p6483_p6 = scmp.ne.s32.totalorder %s6450_s26, 0  ;;  %s4753_s28 = smov [#allocation19]  }
 0x1a1   : > { %s772_s7 = sshll.u32 %s4753_s28, 4  ;;  %s4754_s25 = smov [#allocation22]   ;;  %s773_s7 = int_to_ptr.vmem [resolvable:$true] %s772_s7 }
 0x1a2   : > { %3440 = dma.hbm_to_vmem [thread:$0]  (!%p6483_p6), %s6481_s22, 16, %s751_s11, [#allocation15]  }
 0x1a3   : > { %s794_s30 = sshll.u32 %s4754_s25, 4  ;;  %s6484_s2 = sld [smem:[#allocation90_spill]]  ;;  %s795_s30 = int_to_ptr.vmem [resolvable:$true] %s794_s30 }
 0x1a9   : > { %s4129_s20 = scalar_lea.hbm %s6484_s2, 16 }
 0x1aa   : > { %p4130_p4 = scmp.ne.s32.totalorder %s6484_s2, %s4129_s20  ;;  %p4136_p12 = scmp.lt.u32.totalorder %s4129_s20, %s6484_s2 }
 0x1ac   : > { %p4132_p7 = pnand %p4130_p4, %p6482_p5 }
 0x1ae   : > { %p4133_p10 = pneg %p4132_p7 }
 0x1b0   : > { %p4138_p13 = pnand %p4136_p12, %p4133_p10 }
 0x1b2   : > { %4141 = shalt.err (!%p4138_p13)
}
 0x1b3   : > { %s4142_s11 = scalar_lea.vmem %s773_s7, 16  ;;  %s4149_s27 = scalar_lea.vmem %s773_s7, 32 }
 0x1b4   : > { %p4143_p0 = scmp.ne.s32.totalorder %s773_s7, %s4142_s11  ;;  %p4150_p3 = scmp.lt.s32.totalorder %s773_s7, %s773_s7 }
 0x1b5   : > { %p4151_p1 = scmp.lt.s32.totalorder %s4149_s27, %s4142_s11 }
 0x1b6   : > { %p4145_p11 = pnand %p4143_p0, %p6482_p5 }
 0x1b7   : > { %p4152_p2 = por %p4151_p1, %p4150_p3 }
 0x1b8   : > { %p4146_p8 = pneg %p4145_p11 }
 0x1ba   : > { %p4153_p9 = pnand %p4152_p2, %p4146_p8 }
 0x1bc   : > { %4156 = shalt.err (!%p4153_p9)
}
 0x1bd   : > { %3446 = dma.hbm_to_vmem [thread:$0]  (!%p6483_p6), %s6484_s2, 16, %s773_s7, [#allocation18]  }
 0x1be   : > { %s6485_s15 = sld [smem:[#allocation92_spill]] }
 0x1c4   : > { %s4157_s23 = scalar_lea.hbm %s6485_s15, 16 }
 0x1c5   : > { %p4158_p4 = scmp.ne.s32.totalorder %s6485_s15, %s4157_s23  ;;  %p4164_p9 = scmp.lt.u32.totalorder %s4157_s23, %s6485_s15 }
 0x1c7   : > { %p4160_p7 = pnand %p4158_p4, %p6482_p5 }
 0x1c9   : > { %p4161_p10 = pneg %p4160_p7 }
 0x1cb   : > { %p4166_p12 = pnand %p4164_p9, %p4161_p10 }
 0x1cd   : > { %4169 = shalt.err (!%p4166_p12)
}
 0x1ce   : > { %s4170_s27 = scalar_lea.vmem %s795_s30, 16  ;;  %s4177_s7 = scalar_lea.vmem %s795_s30, 32 }
 0x1cf   : > { %p4171_p13 = scmp.ne.s32.totalorder %s795_s30, %s4170_s27  ;;  %p4178_p8 = scmp.lt.s32.totalorder %s795_s30, %s795_s30 }
 0x1d0   : > { %p4179_p3 = scmp.lt.s32.totalorder %s4177_s7, %s4170_s27 }
 0x1d1   : > { %p4173_p0 = pnand %p4171_p13, %p6482_p5 }
 0x1d2   : > { %p4180_p1 = por %p4179_p3, %p4178_p8 }
 0x1d3   : > { %p4174_p11 = pneg %p4173_p0 }
 0x1d5   : > { %p4181_p2 = pnand %p4180_p1, %p4174_p11 }
 0x1d7   : > { %4184 = shalt.err (!%p4181_p2)
}
 0x1d8   : > { %3452 = dma.hbm_to_vmem [thread:$0]  (!%p6483_p6), %s6485_s15, 16, %s795_s30, [#allocation21]  }
 0x1d9   : > { %s4755_s4 = smov [#allocation25]   ;;  %s4756_s23 = smov [#allocation28]  }
 0x1da   : > { %s816_s20 = sshll.u32 %s4755_s4, 4  ;;  %s838_s9 = sshll.u32 %s4756_s23, 4  ;;  %s817_s20 = int_to_ptr.vmem [resolvable:$true] %s816_s20  ;;  %s839_s9 = int_to_ptr.vmem [resolvable:$true] %s838_s9 }
 0x1db   : > { %s6486_s12 = sld [smem:[#allocation94_spill]] }
 0x1e1   : > { %s4185_s11 = scalar_lea.hbm %s6486_s12, 16 }
 0x1e2   : > { %p4186_p4 = scmp.ne.s32.totalorder %s6486_s12, %s4185_s11  ;;  %p4192_p9 = scmp.lt.u32.totalorder %s4185_s11, %s6486_s12 }
 0x1e4   : > { %p4188_p7 = pnand %p4186_p4, %p6482_p5 }
 0x1e6   : > { %p4189_p10 = pneg %p4188_p7 }
 0x1e8   : > { %p4194_p12 = pnand %p4192_p9, %p4189_p10 }
 0x1ea   : > { %4197 = shalt.err (!%p4194_p12)
}
 0x1eb   : > { %s4198_s30 = scalar_lea.vmem %s817_s20, 16  ;;  %s4205_s25 = scalar_lea.vmem %s817_s20, 32 }
 0x1ec   : > { %p4199_p13 = scmp.ne.s32.totalorder %s817_s20, %s4198_s30  ;;  %p4206_p8 = scmp.lt.s32.totalorder %s817_s20, %s817_s20 }
 0x1ed   : > { %p4207_p3 = scmp.lt.s32.totalorder %s4205_s25, %s4198_s30 }
 0x1ee   : > { %p4201_p0 = pnand %p4199_p13, %p6482_p5 }
 0x1ef   : > { %p4208_p1 = por %p4207_p3, %p4206_p8 }
 0x1f0   : > { %p4202_p11 = pneg %p4201_p0 }
 0x1f2   : > { %p4209_p2 = pnand %p4208_p1, %p4202_p11 }
 0x1f4   : > { %4212 = shalt.err (!%p4209_p2)
}
 0x1f5   : > { %3458 = dma.hbm_to_vmem [thread:$0]  (!%p6483_p6), %s6486_s12, 16, %s817_s20, [#allocation24]  }
 0x1f6   : > { %s6487_s14 = sld [smem:[#allocation96_spill]] }
 0x1fc   : > { %s4213_s10 = scalar_lea.hbm %s6487_s14, 16 }
 0x1fd   : > { %p4214_p4 = scmp.ne.s32.totalorder %s6487_s14, %s4213_s10  ;;  %p4220_p9 = scmp.lt.u32.totalorder %s4213_s10, %s6487_s14 }
 0x1ff   : > { %p4216_p7 = pnand %p4214_p4, %p6482_p5 }
 0x201   : > { %p4217_p10 = pneg %p4216_p7 }
 0x203   : > { %p4222_p12 = pnand %p4220_p9, %p4217_p10 }
 0x205   : > { %4225 = shalt.err (!%p4222_p12)
}
 0x206   : > { %s4226_s30 = scalar_lea.vmem %s839_s9, 16  ;;  %s4233_s20 = scalar_lea.vmem %s839_s9, 32 }
 0x207   : > { %p4227_p13 = scmp.ne.s32.totalorder %s839_s9, %s4226_s30  ;;  %p4234_p8 = scmp.lt.s32.totalorder %s839_s9, %s839_s9 }
 0x208   : > { %p4235_p3 = scmp.lt.s32.totalorder %s4233_s20, %s4226_s30 }
 0x209   : > { %p4229_p0 = pnand %p4227_p13, %p6482_p5 }
 0x20a   : > { %p4236_p1 = por %p4235_p3, %p4234_p8 }
 0x20b   : > { %p4230_p11 = pneg %p4229_p0 }
 0x20d   : > { %p4237_p2 = pnand %p4236_p1, %p4230_p11 }
 0x20f   : > { %4240 = shalt.err (!%p4237_p2)
}
 0x210   : > { %3464 = dma.hbm_to_vmem [thread:$0]  (!%p6483_p6), %s6487_s14, 16, %s839_s9, [#allocation27]  }
 0x211   : > { %s4757_s23 = smov [#allocation31]   ;;  %s4758_s5 = smov [#allocation34]  }
 0x212   : > { %s861_s2 = sshll.u32 %s4757_s23, 4  ;;  %s887_s10 = sshll.u32 %s4758_s5, 4  ;;  %s862_s2 = int_to_ptr.vmem [resolvable:$true] %s861_s2  ;;  %s888_s10 = int_to_ptr.vmem [resolvable:$true] %s887_s10 }
 0x213   : > { %s6488_s16 = sld [smem:[#allocation98_spill]] }
 0x219   : > { %s4241_s7 = scalar_lea.hbm %s6488_s16, 256 }
 0x21a   : > { %p4242_p4 = scmp.ne.s32.totalorder %s6488_s16, %s4241_s7  ;;  %p4248_p9 = scmp.lt.u32.totalorder %s4241_s7, %s6488_s16 }
 0x21c   : > { %p4244_p7 = pnand %p4242_p4, %p6482_p5 }
 0x21e   : > { %p4245_p10 = pneg %p4244_p7 }
 0x220   : > { %p4250_p12 = pnand %p4248_p9, %p4245_p10 }
 0x222   : > { %4253 = shalt.err (!%p4250_p12)
}
 0x223   : > { %s4254_s9 = scalar_lea.vmem %s862_s2, 256  ;;  %p4262_p8 = scmp.lt.s32.totalorder %s862_s2, %s862_s2 }
 0x224   : > { %p4255_p13 = scmp.ne.s32.totalorder %s862_s2, %s4254_s9  ;;  %p4263_p3 = scmp.lt.s32.totalorder %s4254_s9, %s4254_s9 }
 0x226   : > { %p4257_p0 = pnand %p4255_p13, %p6482_p5  ;;  %p4264_p1 = por %p4263_p3, %p4262_p8 }
 0x228   : > { %p4258_p11 = pneg %p4257_p0 }
 0x22a   : > { %p4265_p2 = pnand %p4264_p1, %p4258_p11 }
 0x22c   : > { %4268 = shalt.err (!%p4265_p2)
}
 0x22d   : > { %s6489_s4 = smov 4   ;;  %s6490_s23 = smov 64  }
 0x22e   : > { %3470 = dma.hbm_to_vmem [thread:$0]  (!%p6483_p6), %s6488_s16, 256, %s862_s2, [#allocation30], %s6490_s23, %s6490_s23, %s6489_s4  }
 0x22f   : > { %s6491_s28 = sld [smem:[#allocation100_spill]] }
 0x235   : > { %s6492_s20 = smov %s6491_s28  ;;  %s4269_s30 = scalar_lea.hbm %s6491_s28, 256 }
 0x236   : > { %p4270_p4 = scmp.ne.s32.totalorder %s6492_s20, %s4269_s30  ;;  %p4276_p9 = scmp.lt.u32.totalorder %s4269_s30, %s6492_s20 }
 0x238   : > { %p4272_p7 = pnand %p4270_p4, %p6482_p5 }
 0x23a   : > { %p4273_p10 = pneg %p4272_p7 }
 0x23c   : > { %p4278_p12 = pnand %p4276_p9, %p4273_p10 }
 0x23e   : > { %4281 = shalt.err (!%p4278_p12)
}
 0x23f   : > { %s4282_s5 = scalar_lea.vmem %s888_s10, 256  ;;  %p4290_p8 = scmp.lt.s32.totalorder %s888_s10, %s888_s10 }
 0x240   : > { %p4283_p13 = scmp.ne.s32.totalorder %s888_s10, %s4282_s5  ;;  %p4291_p3 = scmp.lt.s32.totalorder %s4282_s5, %s4282_s5 }
 0x242   : > { %p4285_p0 = pnand %p4283_p13, %p6482_p5  ;;  %p4292_p1 = por %p4291_p3, %p4290_p8 }
 0x244   : > { %p4286_p11 = pneg %p4285_p0 }
 0x246   : > { %p4293_p2 = pnand %p4292_p1, %p4286_p11 }
 0x248   : > { %4296 = shalt.err (!%p4293_p2)
}
 0x249   : > { %3476 = dma.hbm_to_vmem [thread:$0]  (!%p6483_p6), %s6492_s20, 256, %s888_s10, [#allocation33], %s6490_s23, %s6490_s23, %s6489_s4  }
 0x24a   : > { %s4759_s2 = smov [#allocation37]   ;;  %s4760_s27 = smov [#allocation40]  }
 0x24b   : > { %s912_s11 = sshll.u32 %s4759_s2, 4  ;;  %s935_s7 = sshll.u32 %s4760_s27, 4  ;;  %s913_s11 = int_to_ptr.vmem [resolvable:$true] %s912_s11  ;;  %s936_s7 = int_to_ptr.vmem [resolvable:$true] %s935_s7 }
 0x24c   : > { %s6493_s25 = sld [smem:[#allocation102_spill]] }
 0x252   : > { %s4297_s9 = scalar_lea.hbm %s6493_s25, 16 }
 0x253   : > { %p4298_p4 = scmp.ne.s32.totalorder %s6493_s25, %s4297_s9  ;;  %p4304_p9 = scmp.lt.u32.totalorder %s4297_s9, %s6493_s25 }
 0x255   : > { %p4300_p7 = pnand %p4298_p4, %p6482_p5 }
 0x257   : > { %p4301_p10 = pneg %p4300_p7 }
 0x259   : > { %p4306_p12 = pnand %p4304_p9, %p4301_p10 }
 0x25b   : > { %4309 = shalt.err (!%p4306_p12)
}
 0x25c   : > { %s4310_s10 = scalar_lea.vmem %s913_s11, 16  ;;  %s4317_s14 = scalar_lea.vmem %s913_s11, 32 }
 0x25d   : > { %p4311_p13 = scmp.ne.s32.totalorder %s913_s11, %s4310_s10  ;;  %p4318_p8 = scmp.lt.s32.totalorder %s913_s11, %s913_s11 }
 0x25e   : > { %p4319_p3 = scmp.lt.s32.totalorder %s4317_s14, %s4310_s10 }
 0x25f   : > { %p4313_p0 = pnand %p4311_p13, %p6482_p5 }
 0x260   : > { %p4320_p1 = por %p4319_p3, %p4318_p8 }
 0x261   : > { %p4314_p11 = pneg %p4313_p0 }
 0x263   : > { %p4321_p2 = pnand %p4320_p1, %p4314_p11 }
 0x265   : > { %4324 = shalt.err (!%p4321_p2)
}
 0x266   : > { %3482 = dma.hbm_to_vmem [thread:$0]  (!%p6483_p6), %s6493_s25, 16, %s913_s11, [#allocation36]  }
 0x267   : > { %s6494_s28 = sld [smem:[#allocation104_spill]] }
 0x26d   : > { %s6495_s12 = smov %s6494_s28  ;;  %s4325_s30 = scalar_lea.hbm %s6494_s28, 256 }
 0x26e   : > { %p4326_p4 = scmp.ne.s32.totalorder %s6495_s12, %s4325_s30  ;;  %p4332_p9 = scmp.lt.u32.totalorder %s4325_s30, %s6495_s12 }
 0x270   : > { %p4328_p7 = pnand %p4326_p4, %p6482_p5 }
 0x272   : > { %p4329_p10 = pneg %p4328_p7 }
 0x274   : > { %p4334_p12 = pnand %p4332_p9, %p4329_p10 }
 0x276   : > { %4337 = shalt.err (!%p4334_p12)
}
 0x277   : > { %s4338_s15 = scalar_lea.vmem %s936_s7, 256  ;;  %p4346_p8 = scmp.lt.s32.totalorder %s936_s7, %s936_s7 }
 0x278   : > { %p4339_p13 = scmp.ne.s32.totalorder %s936_s7, %s4338_s15  ;;  %p4347_p3 = scmp.lt.s32.totalorder %s4338_s15, %s4338_s15 }
 0x27a   : > { %p4341_p0 = pnand %p4339_p13, %p6482_p5  ;;  %p4348_p1 = por %p4347_p3, %p4346_p8 }
 0x27c   : > { %p4342_p11 = pneg %p4341_p0 }
 0x27e   : > { %p4349_p2 = pnand %p4348_p1, %p4342_p11 }
 0x280   : > { %4352 = shalt.err (!%p4349_p2)
}
 0x281   : > { %3488 = dma.hbm_to_vmem [thread:$0]  (!%p6483_p6), %s6495_s12, 256, %s936_s7, [#allocation39], %s6490_s23, %s6490_s23, %s6489_s4  }
 0x282   : > { %s4761_s16 = smov [#allocation41]   ;;  %s6496_s9 = sld [smem:[#allocation105_spill]] }
 0x283   : > { %s948_s27 = sshll.u32 %s4761_s16, 4  ;;  %s949_s27 = int_to_ptr.vmem [resolvable:$true] %s948_s27 }
 0x288   : > { %s6497_s14 = smov %s6496_s9  ;;  %s4353_s5 = scalar_lea.hbm %s6496_s9, 1024 }
 0x289   : > { %p4354_p4 = scmp.ne.s32.totalorder %s6497_s14, %s4353_s5  ;;  %p4360_p9 = scmp.lt.u32.totalorder %s4353_s5, %s6497_s14 }
 0x28b   : > { %p4356_p7 = pnand %p4354_p4, %p6482_p5 }
 0x28d   : > { %p4357_p10 = pneg %p4356_p7 }
 0x28f   : > { %p4362_p12 = pnand %p4360_p9, %p4357_p10 }
 0x291   : > { %4365 = shalt.err (!%p4362_p12)
}
 0x292   : > { %s4366_s7 = scalar_lea.vmem %s949_s27, 1024  ;;  %p4374_p8 = scmp.lt.s32.totalorder %s949_s27, %s949_s27 }
 0x293   : > { %p4367_p13 = scmp.ne.s32.totalorder %s949_s27, %s4366_s7  ;;  %p4375_p3 = scmp.lt.s32.totalorder %s4366_s7, %s4366_s7 }
 0x295   : > { %p4369_p0 = pnand %p4367_p13, %p6482_p5  ;;  %p4376_p1 = por %p4375_p3, %p4374_p8 }
 0x297   : > { %p4370_p11 = pneg %p4369_p0 }
 0x299   : > { %p4377_p2 = pnand %p4376_p1, %p4370_p11 }
 0x29b   : > { %4380 = shalt.err (!%p4377_p2)
}
 0x29c   : > { %s6498_s11 = sld [smem:[#allocation73_spill]]  ;;  %s6499_s2 = sld [smem:[#allocation70_spill]] }
 0x29d   : > { %s6500_s16 = sld [smem:[#allocation69_spill]]  ;;  %s6501_s24 = sld [smem:[#allocation68_spill]] }
 0x29e   : > { %3491 = dma.hbm_to_vmem [thread:$0]  (!%p6483_p6), %s6497_s14, 1024, %s949_s27, [#allocation42], %s6490_s23, %s6490_s23, %s6489_s4  }
 0x29f   : > { %s78_s28 = sadd.s32 1, %s4733_s29  ;;  %p6503_p10 = scmp.eq.s32.totalorder %s4737_s1, 0 }
 0x2a0   : > { %p6505_p12 = scmp.eq.s32.totalorder %s4968_s6, 0  ;;  %p6507_p0 = scmp.eq.s32.totalorder %s4968_s6, 3 }
 0x2a1   : > { %p6510_p8 = scmp.ne.s32.totalorder %s6465_s3, 0  ;;  %s3163_s15 = sshll.u32 %s4733_s29, 1 }
 0x2a2   : > { %s75_s26 = sadd.s32 1, %s6498_s11  ;;  %s87_s30 = sadd.s32 1, %s6499_s2 }
 0x2a3   : > { %p76_p5 = scmp.ge.s32.totalorder %s75_s26, 2  ;;  %p94_p4 = scmp.ne.s32.totalorder %s6499_s2, %s6500_s16 }
 0x2a4   : > { %p100_p7 = scmp.ne.s32.totalorder %s6500_s16, %s6501_s24  ;;  %s962_s10 = sand.u32 1, %s6499_s2  }
 0x2a5   : > { %s6583_s26 = smov (%p76_p5, %s75_s26), 0  ;;  %s6585_s28 = smov (!%p76_p5, %s78_s28), %s4733_s29 }
 0x2a6   : > { %6502 = sst [smem:[#allocation79_spill]] %s6583_s26  ;;  %s83_s9 = ssub.s32 %s6498_s11, %s6583_s26 }
 0x2a7   : > { %p5502_p6 = por %p6503_p10, %p94_p4  ;;  %p80_p9 = scmp.ge.s32.totalorder %s6585_s28, 2 }
 0x2a8   : > { %p5508_p13 = por %p6505_p12, %p100_p7  ;;  %p5514_p11 = por %p6507_p0, %p94_p4 }
 0x2a9   : > { %p5520_p3 = por %p6510_p8, %p100_p7  ;;  %s6587_s28 = smov (%p80_p9, %s6585_s28), 0 }
 0x2aa   : > { %s6506_s23 = scalar_select %p5508_p13, 1, 0 }
 0x2ab   : > { %s6508_s27 = scalar_select %p5514_p11, 1, 0 }
 0x2ac   : > { %s6511_s5 = scalar_select %p5520_p3, 1, 0 }
 0x2ad   : > { %6509 = sst [smem:[#allocation80_spill]] %s6508_s27  ;;  %s82_s7 = ssub.s32 %s4733_s29, %s6587_s28 }
 0x2ae   : > { %6512 = sst [smem:[#allocation81_spill]] %s6511_s5  ;;  %s84_s22 = sor.u32 %s83_s9, %s82_s7 }
 0x2af   : > { %p111_p1 = scmp.eq.s32.totalorder %s82_s7, 0  ;;  %p85_p2 = scmp.eq.s32.totalorder %s84_s22, 0 }
 0x2b0   : > { %s3162_s20 = sshll.u32 %s962_s10, 3  ;;  %s6513_s16 = sadd.s32 1, %s4705_s8 }
 0x2b1   : > { %s5533_s3 = scalar_select %p111_p1, %s4705_s8, %s6513_s16  }
 0x2b2   : > { %s6589_s2 = smov (!%p85_p2, %s6499_s2), %s87_s30  ;;  %s971_s24 = sadd.s32 %s6498_s11, %s3163_s15 }
 0x2b3   : > { %s3164_s12 = sshll.u32 %s971_s24, 7  ;;  %s966_s14 = scalar_lea.vmem [#allocation5], %s3162_s20 }
 0x2b4   : > { %s975_s25 = sshll.u32 %s966_s14, 4  ;;  %s6514_s27 = sld [smem:[#allocation82_spill]]  ;;  %s5544_s25 = int_to_ptr.vmem [resolvable:$true] %s975_s25 }
 0x2b5   : > { %p6515_p5 = scmp.lt.s32.totalorder %s4737_s1, 4  ;;  %s3166_s14 = sshll.u32 %s5237_s0, 2 }
 0x2b6   : > { %s3167_s11 = sshll.u32 %s4733_s29, 6  ;;  %s963_s15 = scalar_lea.sflag [#allocation6], %s962_s10 }
 0x2b7   : > { %p5550_p4 = pnand %p6515_p5, %p5502_p6 }
 0x2b9   : > { %p4383_p10 = pneg %p5550_p4 }
 0x2ba   : > { %s5542_s6 = scalar_lea.hbm %s6514_s27, %s3164_s12  ;;  %s6517_s12 = sld [smem:[#allocation84_spill]] }
 0x2bb   : > { %s4381_s7 = scalar_lea.hbm %s5542_s6, 128  ;;  %s4386_s20 = scalar_lea.hbm %s6514_s27, 512 }
 0x2bc   : > { %p4382_p7 = scmp.ne.s32.totalorder %s5542_s6, %s4381_s7  ;;  %p4387_p12 = scmp.lt.u32.totalorder %s5542_s6, %s6514_s27 }
 0x2bd   : > { %p4388_p0 = scmp.lt.u32.totalorder %s4386_s20, %s4381_s7  ;;  %p4390_p1 = scmp.lt.u32.totalorder %s4381_s7, %s5542_s6 }
 0x2be   : > { %p4384_p6 = pnand %p4383_p10, %p4382_p7 }
 0x2bf   : > { %p4389_p8 = por %p4388_p0, %p4387_p12 }
 0x2c0   : > { %s5559_s5 = scalar_lea.hbm %s6517_s12, %s3167_s11  ;;  %p4385_p9 = pneg %p4384_p6 }
 0x2c1   : > { %p4391_p2 = por %p4390_p1, %p4389_p8 }
 0x2c3   : > { %p4392_p5 = pnand %p4391_p2, %p4385_p9 }
 0x2c5   : > { %4395 = shalt.err (!%p4392_p5)
}
 0x2c6   : > { %s4396_s10 = scalar_lea.vmem %s5544_s25, 128  ;;  %s4762_s11 = smov [#allocation5]  }
 0x2c7   : > { %p4397_p7 = scmp.ne.s32.totalorder %s5544_s25, %s4396_s10  ;;  %s4401_s9 = sshll.u32 %s4762_s11, 4  ;;  %s4402_s9 = int_to_ptr.vmem [resolvable:$false] %s4401_s9 }
 0x2c8   : > { %s4403_s26 = scalar_lea.vmem %s4402_s9, 256  ;;  %p4404_p11 = scmp.lt.s32.totalorder %s5544_s25, %s4402_s9 }
 0x2c9   : > { %p4399_p6 = pnand %p4397_p7, %p4383_p10  ;;  %p4405_p12 = scmp.lt.s32.totalorder %s4403_s26, %s4396_s10 }
 0x2cb   : > { %p4400_p3 = pneg %p4399_p6  ;;  %p4406_p0 = por %p4405_p12, %p4404_p11 }
 0x2cd   : > { %p4407_p8 = pnand %p4406_p0, %p4400_p3 }
 0x2cf   : > { %4410 = shalt.err (!%p4407_p8)
}
 0x2d0   : > { %3495 = dma.hbm_to_vmem [thread:$0]  (!%p5550_p4), %s5542_s6, 128, %s5544_s25, %s963_s15  }
 0x2d1   : > { %s1003_s7 = scalar_lea.vmem [#allocation10], %s3166_s14  ;;  %s1020_s22 = scalar_lea.vmem [#allocation11], %s5237_s0 }
 0x2d2   : > { %s1010_s4 = sshll.u32 %s1003_s7, 4  ;;  %s1027_s20 = sshll.u32 %s1020_s22, 4  ;;  %s5588_s4 = int_to_ptr.vmem [resolvable:$true] %s1010_s4  ;;  %s1028_s20 = int_to_ptr.vmem [resolvable:$true] %s1027_s20 }
 0x2d3   : > { %s4411_s16 = scalar_lea.hbm %s5559_s5, 64  ;;  %p6518_p3 = scmp.ne.s32.totalorder %s6479_s13, 0 }
 0x2d4   : > { %p4412_p11 = scmp.ne.s32.totalorder %s5559_s5, %s4411_s16  ;;  %s4416_s10 = scalar_lea.hbm %s6517_s12, 128 }
 0x2d5   : > { %p4417_p4 = scmp.lt.u32.totalorder %s5559_s5, %s6517_s12  ;;  %p4418_p1 = scmp.lt.u32.totalorder %s4416_s10, %s4411_s16 }
 0x2d6   : > { %p4414_p10 = pnand %p4412_p11, %p6518_p3  ;;  %p4420_p5 = scmp.lt.u32.totalorder %s4411_s16, %s5559_s5 }
 0x2d7   : > { %p4419_p2 = por %p4418_p1, %p4417_p4 }
 0x2d8   : > { %p4415_p9 = pneg %p4414_p10 }
 0x2d9   : > { %p4421_p7 = por %p4420_p5, %p4419_p2 }
 0x2db   : > { %p4422_p6 = pnand %p4421_p7, %p4415_p9 }
 0x2dd   : > { %4425 = shalt.err (!%p4422_p6)
}
 0x2de   : > { %s4426_s6 = scalar_lea.vmem %s5588_s4, 64  ;;  %s4763_s0 = smov [#allocation10]  }
 0x2df   : > { %p4427_p12 = scmp.ne.s32.totalorder %s5588_s4, %s4426_s6  ;;  %s4431_s25 = sshll.u32 %s4763_s0, 4  ;;  %s4432_s25 = int_to_ptr.vmem [resolvable:$false] %s4431_s25 }
 0x2e0   : > { %s4433_s14 = scalar_lea.vmem %s4432_s25, 128  ;;  %p4434_p11 = scmp.lt.s32.totalorder %s5588_s4, %s4432_s25 }
 0x2e1   : > { %p4429_p0 = pnand %p4427_p12, %p6518_p3  ;;  %p4435_p10 = scmp.lt.s32.totalorder %s4433_s14, %s4426_s6 }
 0x2e3   : > { %p4430_p8 = pneg %p4429_p0  ;;  %p4436_p4 = por %p4435_p10, %p4434_p11 }
 0x2e5   : > { %p4437_p1 = pnand %p4436_p4, %p4430_p8 }
 0x2e7   : > { %4440 = shalt.err (!%p4437_p1)
}
 0x2e8   : > { %p6519_p9 = scmp.ne.s32.totalorder %s6475_s18, 0  ;;  %s6520_s15 = sand.u32 1, %s4737_s1  }
 0x2e9   : > { %s1018_s26 = scalar_lea.sflag [#allocation12], %s6520_s15  ;;  %s4441_s7 = scalar_lea.hbm %s5259_s19, 16 }
 0x2ea   : > { %3501 = dma.hbm_to_vmem [thread:$0]  (!%p6519_p9), %s5559_s5, 64, %s5588_s4, %s5265_s21  }
 0x2eb   : > { %p4442_p2 = scmp.ne.s32.totalorder %s5259_s19, %s4441_s7  ;;  %s4446_s30 = scalar_lea.hbm %s6477_s17, 32 }
 0x2ec   : > { %p4447_p6 = scmp.lt.u32.totalorder %s5259_s19, %s6477_s17  ;;  %p4448_p12 = scmp.lt.u32.totalorder %s4446_s30, %s4441_s7 }
 0x2ed   : > { %p4444_p5 = pnand %p4442_p2, %p6518_p3  ;;  %p4450_p8 = scmp.lt.u32.totalorder %s4441_s7, %s5259_s19 }
 0x2ee   : > { %p4449_p0 = por %p4448_p12, %p4447_p6 }
 0x2ef   : > { %p4445_p7 = pneg %p4444_p5 }
 0x2f0   : > { %p4451_p11 = por %p4450_p8, %p4449_p0 }
 0x2f2   : > { %p4452_p10 = pnand %p4451_p11, %p4445_p7 }
 0x2f4   : > { %4455 = shalt.err (!%p4452_p10)
}
 0x2f5   : > { %s4456_s21 = scalar_lea.vmem %s1028_s20, 16  ;;  %s4764_s5 = smov [#allocation11]  }
 0x2f6   : > { %p4457_p4 = scmp.ne.s32.totalorder %s1028_s20, %s4456_s21  ;;  %s4461_s4 = sshll.u32 %s4764_s5, 4  ;;  %s4462_s4 = int_to_ptr.vmem [resolvable:$false] %s4461_s4 }
 0x2f7   : > { %s4463_s11 = scalar_lea.vmem %s4462_s4, 32  ;;  %p4464_p5 = scmp.lt.s32.totalorder %s1028_s20, %s4462_s4 }
 0x2f8   : > { %p4459_p1 = pnand %p4457_p4, %p6518_p3  ;;  %p4465_p13 = scmp.lt.s32.totalorder %s4463_s11, %s4456_s21 }
 0x2fa   : > { %p4460_p2 = pneg %p4459_p1  ;;  %p4466_p9 = por %p4465_p13, %p4464_p5 }
 0x2fc   : > { %p4467_p6 = pnand %p4466_p9, %p4460_p2 }
 0x2fe   : > { %4470 = shalt.err (!%p4467_p6)
}
 0x2ff   : > { %p6521_p12 = scmp.ne.s32.totalorder %s6475_s18, 0  ;;  %s6522_s9 = sld [smem:[#allocation75_spill]] }
 0x301   : > { %3504 = dma.hbm_to_vmem [thread:$0]  (!%p6521_p12), %s5259_s19, 16, %s1028_s20, %s1018_s26  }
 0x305   : > { %p6523_p7 = scmp.ne.s32.totalorder %s6522_s9, 0 }
 0x306   : > { %s6524_s6 = sld [smem:[#allocation69_spill]] (!%p6523_p7)  ;;  %p6525_p13 = scmp.ne.s32.totalorder (!%p6523_p7), %s6506_s23, 0 }
 0x307   : > { %1036 = sbr.rel (%p6523_p7) target bundleno = 2797 (0xaed), region = 116 }
 0x30c   : > { %s5635_s13 = sand.u32 (!%p6523_p7), 1, %s6524_s6  }
 0x30d   : > { %s3170_s0 = sshll.u32 (!%p6523_p7), %s5635_s13, 3  ;;  %s1039_s25 = scalar_lea.sflag (!%p6523_p7), [#allocation6], %s5635_s13 }
 0x30e   : > { %s5641_s14 = scalar_lea.vmem [#allocation5], %s3170_s0 }
 0x30f   : > { %4628 = dma.done.wait (%p6525_p13), %s1039_s25, 128  }
 0x310   : > { %4630 = vsyncadd (%p6525_p13), %s1039_s25, 4294967168  ;;  %s6526_s19 = sld [smem:[#allocation74_spill]]  ;;  %s6527_s18 = sld [smem:[#allocation67_spill]] }
 0x311   : > { %s6528_s20 = sld [smem:[#allocation76_spill]] }
 0x316   : > { %s5648_s15 = sand.u32 1, %s6526_s19   ;;  %s5651_s26 = sand.u32 1, %s6527_s18  }
 0x317   : > { %s1048_s7 = scalar_lea.sflag [#allocation9], %s5648_s15  ;;  %s1050_s22 = scalar_lea.vmem [#allocation8], %s5651_s26 }
 0x318   : > { %p6529_p3 = scmp.ne.s32.totalorder %s6528_s20, 0 }
 0x31a   : > { %4632 = dma.done.wait (%p6529_p3), %s1048_s7, 80  }
 0x31b   : > { %4634 = vsyncadd (%p6529_p3), %s1048_s7, 4294967216  ;;  %s3171_s23 = sshll.u32 %s5651_s26, 2  ;;  %s1065_s30 = scalar_lea.sflag [#allocation12], %s5648_s15 }
 0x31c   : > { %s5662_s16 = scalar_lea.vmem [#allocation10], %s3171_s23  ;;  %s1067_s24 = scalar_lea.vmem [#allocation11], %s5651_s26 }
 0x31d   : > { %4636 = dma.done.wait (%p6529_p3), %s1065_s30, 16  }
 0x31e   : > { %4638 = vsyncadd (%p6529_p3), %s1065_s30, 4294967280  ;;  %p6530_p9 = scmp.eq.s32.totalorder %s6526_s19, 0 }
 0x320   : > { %4640 = dma.done.wait (%p6530_p9), [#allocation12], 16   ;;  %p6531_p0 = pmov %p6530_p9 }
 0x322   : > { %4642 = vsyncadd (%p6531_p0), [#allocation12], 4294967280  ;;  %p6532_p8 = pmov %p6531_p0 }
 0x323   : > { %p6533_p11 = pmov %p6531_p0 }
 0x324   : > { %4644 = dma.done.wait (%p6532_p8), [#allocation15], 32  }
 0x325   : > { %4646 = vsyncadd (%p6533_p11), [#allocation15], 4294967264  ;;  %p6534_p10 = pmov %p6531_p0 }
 0x326   : > { %p6535_p4 = pmov %p6531_p0 }
 0x327   : > { %4648 = dma.done.wait (%p6534_p10), [#allocation18], 32  }
 0x328   : > { %4650 = vsyncadd (%p6535_p4), [#allocation18], 4294967264  ;;  %p6536_p1 = pmov %p6531_p0 }
 0x329   : > { %p6537_p2 = pmov %p6531_p0 }
 0x32a   : > { %4652 = dma.done.wait (%p6536_p1), [#allocation21], 32  }
 0x32b   : > { %4654 = vsyncadd (%p6537_p2), [#allocation21], 4294967264  ;;  %p6538_p5 = pmov %p6531_p0 }
 0x32c   : > { %p6539_p6 = pmov %p6531_p0 }
 0x32d   : > { %4656 = dma.done.wait (%p6538_p5), [#allocation24], 32  }
 0x32e   : > { %4658 = vsyncadd (%p6539_p6), [#allocation24], 4294967264  ;;  %p6540_p12 = pmov %p6531_p0 }
 0x32f   : > { %p6541_p7 = pmov %p6531_p0 }
 0x330   : > { %4660 = dma.done.wait (%p6540_p12), [#allocation27], 32  }
 0x331   : > { %4662 = vsyncadd (%p6541_p7), [#allocation27], 4294967264  ;;  %p6542_p13 = pmov %p6531_p0 }
 0x332   : > { %p6543_p3 = pmov %p6531_p0 }
 0x333   : > { %4664 = dma.done.wait (%p6542_p13), [#allocation30], 512  }
 0x334   : > { %4666 = vsyncadd (%p6543_p3), [#allocation30], 4294966784  ;;  %p6544_p9 = pmov %p6531_p0 }
 0x336   : > { %4668 = dma.done.wait (%p6544_p9), [#allocation33], 512  }
 0x337   : > { %4670 = vsyncadd (%p6531_p0), [#allocation33], 4294966784  ;;  %p6545_p8 = pmov %p6531_p0 }
 0x338   : > { %p6546_p11 = pmov %p6531_p0 }
 0x339   : > { %4672 = dma.done.wait (%p6545_p8), [#allocation36], 32  }
 0x33a   : > { %4674 = vsyncadd (%p6546_p11), [#allocation36], 4294967264  ;;  %p6547_p10 = pmov %p6531_p0 }
 0x33b   : > { %p6548_p4 = pmov %p6531_p0 }
 0x33c   : > { %4676 = dma.done.wait (%p6547_p10), [#allocation39], 512  }
 0x33d   : > { %4678 = vsyncadd (%p6548_p4), [#allocation39], 4294966784  ;;  %p6549_p1 = pmov %p6531_p0 }
 0x33e   : > { %p6550_p2 = pmov %p6531_p0 }
 0x33f   : > { %4680 = dma.done.wait (%p6549_p1), [#allocation42], 1024  }
 0x340   : > { %4682 = vsyncadd (%p6550_p2), [#allocation42], 4294966272  ;;  %s5716_s10 = scalar_lea.vmem [#allocation43], %s3170_s0  ;;  %s5719_s21 = scalar_lea.vmem [#allocation44], %s5651_s26 }
 0x341   : > { %s5723_s5 = scalar_lea.vmem [#allocation46], %s3171_s23  ;;  %s5726_s4 = scalar_lea.vmem [#allocation47], %s5651_s26 }
 0x342   : > { %s6551_s11 = sld [smem:[#allocation71_spill]] }
 0x348   : > { %p3194_p5 = scmp.ne.s32.totalorder %s6551_s11, 0 }
 0x349   : > { %v1249_v0 = vld [vmem:[%s1050_s22] sm:$0x1] (!%p3194_p5)  ;;  %vm1250_vm0 = vcmask (!%p3194_p5), 253952   ;;  %vm1255_vm1 = vcmask (!%p3194_p5), 256000   ;;  %v1254_v2 = vld [vmem:[%s5662_s16] sm:$0x7] (!%p3194_p5) }
 0x34a   : > { %1248 = sbr.rel (%p3194_p5) target bundleno = 849 (0x351), region = 216  ;;  %v1252_v1 = vld [vmem:[%s1067_s24] sm:$0x1] (!%p3194_p5)  ;;  %1251 = vst.msk [vmem:[%s5719_s21] sm:$0x1] (!%p3194_p5), %vm1250_vm0, %v1249_v0 }
 0x34b   : > { %1253 = vst.msk [vmem:[%s5726_s4] sm:$0x1] (!%p3194_p5), %vm1250_vm0, %v1252_v1 }
 0x34c   : > { %1256 = vst.msk [vmem:[%s5723_s5] sm:$0x7] (!%p3194_p5), %vm1255_vm1, %v1254_v2 }
 0x351 PF: > { %v1257_v3 = vld [vmem:[%s5641_s14] sm:$0xff]  ;;  %vm1260_vm2 = vcmask 261120   ;;  %v3195_v14 = vld [vmem:[#allocation13] ss:$0 sm:$0xff]  ;;  %v3196_v16 = vld [vmem:[#allocation14] ss:$0 sm:$0xff]  ;;  %v1320_v31 = vlaneseq }
 0x352   : > { %v1261_v4 = vsel %vm1260_vm2, %v1257_v3, 0.0  ;;  %v3673_v25 = vld [vmem:[#allocation29] sm:$0xff]   ;;  %v4765_v26 = vmov 0.0   ;;  %vm4766_vm3 = vmmov 0   ;;  %v3674_v27 = vld [vmem:[#allocation29 + $0x8] sm:$0xff]   ;;  %vm2339_vm4 = vcmask 261127  }
 0x353   : > { %1262 = vadd.xlane.f32.xlu0 %v1261_v4  ;;  %3267 = vmatprep.subr.bf16.mxu0 %v4765_v26  ;;  %v5754_v32 = vshrl.u32 %v1320_v31, 7  ;;  %v1330_v33 = vld [vmem:[#allocation22] sm:$0x1]  ;;  %v3197_v35 = vld [vmem:[#allocation16] ss:$0 sm:$0xff]  ;;  %v3676_v60 = vld [vmem:[#allocation31 + $0x8] sm:$0xff]  }
 0x354   : > { %3271 = vmatprep.mubr.msk.bf16.mxu0 %vm4766_vm3, %v4765_v26  ;;  %3268 = vmatpush3.bf16.msra.mxu0 %v3673_v25  ;;  %v3198_v37 = vld [vmem:[#allocation17] ss:$0 sm:$0xff]  ;;  %v1340_v39 = vsub.f32 1.0, %v1330_v33  ;;  %v1331_v41 = vld [vmem:[#allocation23] sm:$0x1]  ;;  %v3677_v0 = vld [vmem:[#allocation32] sm:$0xff]  }
 0x355   : > { %3291 = vmatprep.subr.bf16.mxu1 %v4765_v26  ;;  %3269 = vmatprep.subr.bf16.mxu0 %v4765_v26  ;;  %v5757_v38 = vsub.s32 0, %v5754_v32  ;;  %v3199_v42 = vld [vmem:[%s5719_s21] ss:$0 sm:$0xff]  ;;  %vm1322_vm5 = vcmp.eq.s32.totalorder %v5754_v32, 0  ;;  %v1356_v46 = vsub.f32 1.0, %v1331_v41  ;;  %v3675_v55 = vld [vmem:[#allocation31] sm:$0xff]  }
 0x356   : > { %3295 = vmatprep.mubr.msk.bf16.mxu1 %vm4766_vm3, %v4765_v26  ;;  %v1332_v52 = vld [vmem:[#allocation25] sm:$0x1]  ;;  %v3678_v4 = vld [vmem:[#allocation32 + $0x8] sm:$0xff]   ;;  %vm2271_vm6 = vcmask 253952   ;;  %vm1675_vm7 = vcmp.eq.s32.totalorder %v5754_v32, 1  ;;  %vm1755_vm8 = vcmp.eq.s32.totalorder %v5754_v32, 2 }
 0x357   : > { %v1337_v44 = vrot.slane %v1330_v33, %v5757_v38  ;;  %v1345_v45 = vrot.slane %v1340_v39, %v5757_v38  ;;  %v1361_v51 = vrot.slane %v1356_v46, %v5757_v38  ;;  %v1353_v54 = vrot.slane %v1331_v41, %v5757_v38  ;;  %s6552_s9 = sld [smem:[#allocation72_spill]]  ;;  %s6553_s6 = sld [smem:[#allocation77_spill]] }
 0x358   : > { %3270 = vmatpush3.bf16.msra.mxu0 %v3674_v27  ;;  %v1372_v58 = vsub.f32 1.0, %v1332_v52  ;;  %v1369_v63 = vrot.slane %v1332_v52, %v5757_v38  ;;  %vm1835_vm9 = vcmp.eq.s32.totalorder %v5754_v32, 3  ;;  %vm1945_vm10 = vcmp.eq.s32.totalorder %v5754_v32, 4  ;;  %s6554_s19 = sld [smem:[#allocation107_spill]]  ;;  %s2692_s20 = sshll.u32 %s5719_s21, 4  ;;  %s2693_s20 = int_to_ptr.vmem [resolvable:$true] %s2692_s20 }
 0x359   : > { %3275 = vmatprep.subr.bf16.mxu0 %v4765_v26  ;;  %vm2039_vm11 = vcmp.eq.s32.totalorder %v5754_v32, 5  ;;  %vm2121_vm12 = vcmp.eq.s32.totalorder %v5754_v32, 6  ;;  %vm2203_vm13 = vcmp.eq.s32.totalorder %v5754_v32, 7  ;;  %vm2269_vm14 = vcmask 257024   ;;  %s6410_s7 = scalar_lea.sflag [#allocation45], %s5648_s15  ;;  %s4471_s22 = scalar_lea.vmem %s2693_s20, 16 }
 0x35a   : > { %v1377_v62 = vrot.slane %v1372_v58, %v5757_v38  ;;  %p4472_p6 = scmp.ne.s32.totalorder %s2693_s20, %s4471_s22  ;;  %s4768_s23 = smov [#allocation44]  }
 0x35b   : > { %s4475_s16 = sshll.u32 %s4768_s23, 4  ;;  %s4476_s16 = int_to_ptr.vmem [resolvable:$false] %s4475_s16 }
 0x35c   : > { %s4477_s30 = scalar_lea.vmem %s4476_s16, 32  ;;  %p4478_p3 = scmp.lt.s32.totalorder %s2693_s20, %s4476_s16 }
 0x35d   : > { %s3235_s0 = sshll.u32 %s6552_s9, 4  ;;  %p6555_p12 = scmp.ne.s32.totalorder %s6553_s6, 0 }
 0x35e   : > { %s6153_s18 = scalar_lea.hbm %s6554_s19, %s3235_s0  ;;  %p4479_p9 = scmp.lt.s32.totalorder %s4477_s30, %s4471_s22 }
 0x35f   : > { %p4473_p7 = pnand %p4472_p6, %p6555_p12 }
 0x360   : > { %p4480_p0 = por %p4479_p9, %p4478_p3 }
 0x361   : > { %p4474_p13 = pneg %p4473_p7 }
 0x363   : > { %p4481_p8 = pnand %p4480_p0, %p4474_p13 }
 0x3e0   : > { %v1263_v5 = vpop.xlane.xlu0 %1262 }
 0x3e1   : > { %v1265_v6 = vmul.f32 0.03125, %v1263_v5 }
 0x3e3   : > { %v1266_v7 = vsub.f32 %v1257_v3, %v1265_v6 }
 0x3e5   : > { %v1267_v8 = vmul.f32 %v1266_v7, %v1266_v7 }
 0x3e7   : > { %v1268_v9 = vsel %vm1260_vm2, %v1267_v8, 0.0  ;;  %v3682_v8 = vld [vmem:[#allocation34 + $0x8] sm:$0xff]  }
 0x3e8   : > { %1269 = vadd.xlane.f32.xlu0 %v1268_v9  ;;  %v1569_v9 = vld [vmem:[#allocation26] sm:$0x1] }
 0x475   : > { %v1270_v10 = vpop.xlane.xlu0 %1269 }
 0x476   : > { %v1271_v11 = vmul.f32 0.03125, %v1270_v10  ;;  %v1570_v10 = vmul.f32 1.442695, %v1569_v9 }
 0x478   : > { %v1272_v12 = vadd.f32 1e-05, %v1271_v11  ;;  %v4767_v11 = vmov 1966171168  }
 0x47a   : > { %3695 = vrsqrt.f32 %v1272_v12  ;;  %v1614_v12 = vunpack.c.l.s4 %v4767_v11 }
 0x484   : > { %v3696_v13 = vpop.eup %3695 }
 0x485   : > { %v1274_v15 = vmul.f32 %v3696_v13, %v1266_v7  ;;  %v3681_v7 = vld [vmem:[#allocation34] sm:$0xff]  }
 0x486   : > { %3292 = vmatpush3.bf16.msra.mxu1 %v3681_v7 }
 0x487   : > { %v1281_v17 = vmul.f32 %v3195_v14, %v1274_v15  ;;  %3293 = vmatprep.subr.bf16.mxu1 %v4765_v26  ;;  %v1615_v15 = vunpack.c.0.s8 %v1614_v12 }
 0x489   : > { %v5740_v18 = vadd.f32 %v3196_v16, %v1281_v17 }
 0x48a   : > { %3294 = vmatpush3.bf16.msra.mxu1 %v3682_v8 }
 0x48b   : > { %v1291_v19 = vsel %vm1260_vm2, %v5740_v18, 0.0  ;;  %3307 = vmatprep.subr.bf16.mxu1 %v4765_v26 }
 0x48c   : > { %1292 = vadd.xlane.f32.xlu1 %v1291_v19 }
 0x519   : > { %v1293_v20 = vpop.xlane.xlu1 %1292 }
 0x51a   : > { %v1294_v21 = vmul.f32 0.03125, %v1293_v20  ;;  %v1576_v20 = vld [vmem:[%s5723_s5 + $0x2] sm:$0x1] }
 0x51c   : > { %v1295_v22 = vsub.f32 %v5740_v18, %v1294_v21 }
 0x51e   : > { %v1296_v23 = vmul.f32 %v1295_v22, %v1295_v22 }
 0x520   : > { %v1297_v24 = vsel %vm1260_vm2, %v1296_v23, 0.0 }
 0x521   : > { %1298 = vadd.xlane.f32.xlu1 %v1297_v24 }
 0x5ae   : > { %v1299_v28 = vpop.xlane.xlu1 %1298 }
 0x5af   : > { %v1300_v29 = vmul.f32 0.03125, %v1299_v28 }
 0x5b1   : > { %v1301_v30 = vadd.f32 1e-05, %v1300_v29 }
 0x5b3   : > { %3697 = vrsqrt.f32 %v1301_v30 }
 0x5b4   : > { %3699 = vpow2.f32 %v1570_v10 }
 0x5bd   : > { %v3698_v34 = vpop.eup %3697 }
 0x5be   : > { %v1303_v36 = vmul.f32 %v3698_v34, %v1295_v22  ;;  %v3700_v13 = vpop.eup %3699  ;;  %v5791_v22 = vsub.s32 %v1615_v15, %v5754_v32 }
 0x5bf   : > { %v5787_v17 = vsub.f32 0.0, %v3700_v13 }
 0x5c0   : > { %v1310_v40 = vmul.f32 %v3197_v35, %v1303_v36 }
 0x5c1   : > { %v1599_v23 = vadd.f32 %v1576_v20, %v5787_v17 }
 0x5c2   : > { %v1317_v43 = vadd.f32 %v3198_v37, %v1310_v40 }
 0x5c4   : > { %v1319_v47 = vrot.slane %v1317_v43, 7  ;;  %2340 = vst.msk [vmem:[%s5719_s21 - $0x7] sm:$0x80] %vm2339_vm4, %v1317_v43  ;;  %v1339_v49 = vmul.f32 %v1337_v44, %v1317_v43  ;;  %v1355_v59 = vmul.f32 %v1353_v54, %v1317_v43  ;;  %v1371_v3 = vmul.f32 %v1369_v63, %v1317_v43  ;;  %v5814_v44 = vld [vmem:[#allocation28] sm:$0x1] }
 0x5c6   : > { %v1329_v48 = vsel %vm1322_vm5, %v3199_v42, %v1319_v47 }
 0x5c7   : > { %v1347_v50 = vmul.f32 %v1345_v45, %v1329_v48  ;;  %v1363_v57 = vmul.f32 %v1361_v51, %v1329_v48  ;;  %v1379_v2 = vmul.f32 %v1377_v62, %v1329_v48 }
 0x5c9   : > { %v1348_v53 = vadd.f32 %v1347_v50, %v1339_v49  ;;  %v1364_v61 = vadd.f32 %v1363_v57, %v1355_v59  ;;  %v1380_v5 = vadd.f32 %v1379_v2, %v1371_v3 }
 0x5cb   : > { %v1385_v56 = vpack.c.bf16 %v1348_v53, %v1348_v53  ;;  %v1446_v1 = vpack.c.bf16 %v1364_v61, %v1364_v61  ;;  %v1507_v6 = vpack.c.bf16 %v1380_v5, %v1380_v5 }
 0x5cd   : > { %3272 = vmatmul.mubr.msk.bf16.vlgmr.msra.gmra.mrb[0].mxu0 %vm1260_vm2, %v1385_v56 }
 0x5ce   : > { %3276 = vmatpush3.bf16.msra.mxu0 %v3675_v55  ;;  %3279 = vmatprep.mubr.msk.bf16.mxu0 %vm4766_vm3, %v4765_v26 }
 0x5cf   : > { %3277 = vmatprep.subr.bf16.mxu0 %v4765_v26 }
 0x5d2   : > { %3278 = vmatpush3.bf16.msra.mxu0 %v3676_v60 }
 0x5d3   : > { %3283 = vmatprep.subr.bf16.mxu0 %v4765_v26 }
 0x5d5   : > { %3280 = vmatmul.mubr.msk.bf16.vlgmr.msra.gmra.mrb[4].mxu0 %vm1260_vm2, %v1446_v1 }
 0x5d6   : > { %3284 = vmatpush3.bf16.msra.mxu0 %v3677_v0  ;;  %3287 = vmatprep.mubr.msk.bf16.mxu0 %vm4766_vm3, %v4765_v26 }
 0x5d7   : > { %3285 = vmatprep.subr.bf16.mxu0 %v4765_v26 }
 0x5da   : > { %3286 = vmatpush3.bf16.msra.mxu0 %v3678_v4 }
 0x5db   : > { %3299 = vmatprep.subr.bf16.mxu0 %v4765_v26 }
 0x5dd   : > { %3288 = vmatmul.mubr.msk.bf16.vlgmr.msra.gmra.mrb[8].mxu0 %vm1260_vm2, %v1507_v6 }
 0x5de   : > { %3303 = vmatprep.mubr.msk.bf16.mxu0 %vm4766_vm3, %v4765_v26 }
 0x6a0   : > { %v1435_v14 = vpop.f32.mrb[0].mxu0 }
 0x6a1   : > { %1441 = vst.msk [vmem:[#allocation2] sm:$0xff] %vm1260_vm2, %v1435_v14  ;;  %v3273_v16 = vpop.f32.mrb[1].mxu0 }
 0x6a2   : > { %v1438_v19 = vpop.f32.mrb[2].mxu0 }
 0x6a3   : > { %v3274_v21 = vpop.f32.mrb[3].mxu0 }
 0x6a8   : > { %v5794_v24 = vld [vmem:[#allocation2] sm:$0xff]  ;;  %v1496_v25 = vpop.f32.mrb[4].mxu0 }
 0x6a9   : > { %v1619_v27 = vrot.slane %v5794_v24, %v5791_v22  ;;  %1502 = vst.msk [vmem:[#allocation3] sm:$0xff] %vm1260_vm2, %v1496_v25  ;;  %v3281_v28 = vpop.f32.mrb[5].mxu0  ;;  %v5800_v29 = vmax.f32 %v1599_v23, %v5794_v24  ;;  %v1898_v42 = vcombine.high %v5794_v24, %v5794_v24  ;;  %v1579_v50 = vadd.f32 %v5794_v24, %v5814_v44 }
 0x6aa   : > { %v1499_v30 = vpop.f32.mrb[6].mxu0 }
 0x6ab   : > { %v1620_v31 = vcombine.high %v1619_v27, %v1619_v27  ;;  %v3282_v33 = vpop.f32.mrb[7].mxu0  ;;  %v1683_v35 = vadd.f32 %v5800_v29, %v5787_v17  ;;  %v1627_v36 = vrot.slane %v1619_v27, %v5791_v22  ;;  %v1601_v51 = vsub.f32 %v1599_v23, %v5800_v29 }
 0x6ac   : > { %v1905_v52 = vrot.slane %v1898_v42, %v5791_v22  ;;  %v1580_v58 = vmax.f32 %v1576_v20, %v1579_v50  ;;  %v1604_v60 = vsub.f32 %v5794_v24, %v5800_v29  ;;  %v1575_v42 = vld [vmem:[%s5723_s5 + $0x1] sm:$0x1] }
 0x6ad   : > { %v1634_v34 = vrot.slane %v1620_v31, %v5791_v22  ;;  %v1736_v45 = vcombine.high %v1627_v36, %v1627_v36  ;;  %v1602_v59 = vmul.f32 1.442695, %v1601_v51 }
 0x6ae   : > { %v5840_v61 = vrot.slane %v1905_v52, %v5791_v22  ;;  %v2006_v1 = vcombine.high %v1905_v52, %v1905_v52  ;;  %v1581_v5 = vsub.f32 %v1576_v20, %v1580_v58  ;;  %v1605_v6 = vmul.f32 1.442695, %v1604_v60  ;;  %v5899_v52 = vld [vmem:[%s5723_s5] sm:$0x1] }
 0x6af   : > { %v5806_v37 = vmax.f32 %v1683_v35, %v1634_v34  ;;  %v5827_v55 = vcombine.high %v1634_v34, %v1634_v34  ;;  %v1738_v7 = vadd.f32 %v1736_v45, %v5814_v44  ;;  %v5857_v8 = vadd.f32 %v1634_v34, %v5814_v44 }
 0x6b0   : > { %v5808_v39 = vpop.f32.mrb[8].mxu0  ;;  %v5864_v11 = vrot.slane %v2006_v1, %v5791_v22  ;;  %v1582_v16 = vmul.f32 1.442695, %v1581_v5  ;;  %v1584_v20 = vsub.f32 %v1579_v50, %v1580_v58 }
 0x6b1   : > { %v3289_v40 = vpop.f32.mrb[9].mxu0  ;;  %v1692_v41 = vrot.slane %v5806_v37, %v5757_v38  ;;  %v1763_v46 = vadd.f32 %v5806_v37, %v5787_v17  ;;  %v1685_v2 = vsub.f32 %v1683_v35, %v5806_v37  ;;  %v1739_v14 = vmax.f32 %v5806_v37, %v1738_v7 }
 0x6b2   : > { %v1560_v43 = vpop.f32.mrb[10].mxu0  ;;  %v1637_v19 = vmax.f32 %v5800_v29, %v5857_v8  ;;  %v1585_v33 = vmul.f32 1.442695, %v1584_v20  ;;  %v5886_v35 = vcombine.high %v5840_v61, %v5840_v61 }
 0x6b3   : > { %v3290_v47 = vpop.f32.mrb[11].mxu0  ;;  %v1694_v48 = vsub.f32 %v5794_v24, %v1692_v41  ;;  %v5819_v49 = vmax.f32 %v1763_v46, %v1736_v45  ;;  %v1686_v12 = vmul.f32 1.442695, %v1685_v2  ;;  %v1743_v27 = vsub.f32 %v1738_v7, %v1739_v14 }
 0x6b4   : > { %v1638_v31 = vsub.f32 %v5800_v29, %v1637_v19  ;;  %v1641_v58 = vsub.f32 %v5857_v8, %v1637_v19  ;;  %v1818_v2 = vadd.f32 %v5827_v55, %v5814_v44 }
 0x6b5   : > { %v1695_v53 = vmul.f32 1.442695, %v1694_v48  ;;  %v1772_v54 = vrot.slane %v5819_v49, %v5757_v38  ;;  %v5831_v56 = vadd.f32 %v5819_v49, %v5787_v17  ;;  %v1765_v23 = vsub.f32 %v1763_v46, %v5819_v49  ;;  %v5894_v46 = vld [vmem:[#allocation3] sm:$0xff] }
 0x6b6   : > { %v1744_v43 = vmul.f32 1.442695, %v1743_v27  ;;  %v1639_v47 = vmul.f32 1.442695, %v1638_v31 }
 0x6b7   : > { %v5835_v57 = vmax.f32 %v5831_v56, %v5827_v55  ;;  %3701 = vpow2.f32 %v1695_v53  ;;  %v1774_v62 = vsub.f32 %v5794_v24, %v1772_v54  ;;  %v1766_v40 = vmul.f32 1.442695, %v1765_v23 }
 0x6b8   : > { %3703 = vpow2.f32 %v1602_v59  ;;  %v1819_v55 = vmax.f32 %v5819_v49, %v1818_v2 }
 0x6b9   : > { %v1852_v63 = vrot.slane %v5835_v57, %v5757_v38  ;;  %v5847_v0 = vadd.f32 %v5835_v57, %v5787_v17  ;;  %v1775_v9 = vmul.f32 1.442695, %v1774_v62  ;;  %3705 = vpow2.f32 %v1605_v6 }
 0x6ba   : > { %v1845_v60 = vsub.f32 %v5831_v56, %v5835_v57 }
 0x6bb   : > { %v1854_v3 = vsub.f32 %v5794_v24, %v1852_v63  ;;  %v5853_v4 = vmax.f32 %v5847_v0, %v5840_v61  ;;  %3707 = vpow2.f32 %v1775_v9  ;;  %v1740_v63 = vsub.f32 %v5806_v37, %v1739_v14 }
 0x6bc   : > { %3709 = vpow2.f32 %v1686_v12 }
 0x6bd   : > { %v5861_v10 = vadd.f32 %v5853_v4, %v5787_v17  ;;  %v1855_v13 = vmul.f32 1.442695, %v1854_v3  ;;  %v1962_v25 = vrot.slane %v5853_v4, %v5757_v38  ;;  %v1741_v23 = vmul.f32 1.442695, %v1740_v63 }
 0x6bf   : > { %v5869_v15 = vmax.f32 %v5861_v10, %v5864_v11  ;;  %3711 = vpow2.f32 %v1855_v13  ;;  %v1964_v41 = vsub.f32 %v5794_v24, %v1962_v25  ;;  %v1846_v13 = vmul.f32 1.442695, %v1845_v60 }
 0x6c0   : > { %3713 = vpow2.f32 %v1582_v16 }
 0x6c1   : > { %v3702_v21 = vpop.eup %3701  ;;  %v5878_v28 = vadd.f32 %v5869_v15, %v5787_v17  ;;  %v2056_v30 = vrot.slane %v5869_v15, %v5757_v38  ;;  %3715 = vpow2.f32 %v1585_v33  ;;  %v1965_v59 = vmul.f32 1.442695, %v1964_v41 }
 0x6c2   : > { %v1725_v34 = vrot.slane %v3702_v21, %v5791_v22  ;;  %v3704_v36 = vpop.eup %3703  ;;  %v1698_v48 = vmul.f32 %v3702_v21, %v5894_v46  ;;  %3717 = vpow2.f32 %v1766_v40  ;;  %v1642_v21 = vmul.f32 1.442695, %v1641_v58 }
 0x6c3   : > { %v5892_v45 = vmax.f32 %v5878_v28, %v5886_v35  ;;  %v2058_v29 = vsub.f32 %v5794_v24, %v2056_v30  ;;  %v3706_v50 = vpop.eup %3705  ;;  %v1610_v53 = vmul.f32 %v3704_v36, %v1575_v42  ;;  %3719 = vpow2.f32 %v1744_v43 }
 0x6c4   : > { %v1726_v51 = vcombine.high %v1725_v34, %v1725_v34  ;;  %v1607_v6 = vmul.f32 %v3704_v36, %v5899_v52  ;;  %3721 = vpow2.f32 %v1639_v47  ;;  %v1706_v7 = vrot.slane %v1698_v48, %v5791_v22 }
 0x6c5   : > { %v3708_v54 = vpop.eup %3707  ;;  %v2138_v1 = vrot.slane %v5892_v45, %v5757_v38  ;;  %v2059_v5 = vmul.f32 1.442695, %v2058_v29  ;;  %v1608_v8 = vmul.f32 %v3706_v50, %v5894_v46  ;;  %v5912_v56 = vadd.f32 %v3706_v50, %v1610_v53 }
 0x6c6   : > { %v3710_v62 = vpop.eup %3709  ;;  %v1733_v37 = vrot.slane %v1726_v51, %v5791_v22  ;;  %v1805_v9 = vrot.slane %v3708_v54, %v5791_v22  ;;  %3723 = vpow2.f32 %v1965_v59  ;;  %v1778_v16 = vmul.f32 %v3708_v54, %v5894_v46 }
 0x6c7   : > { %v2140_v14 = vsub.f32 %v5794_v24, %v2138_v1  ;;  %v1717_v19 = vmul.f32 %v3710_v62, %v5912_v56  ;;  %3725 = vpow2.f32 %v2059_v5  ;;  %v1707_v25 = vcombine.high %v1706_v7, %v1706_v7 }
 0x6c8   : > { %v5923_v27 = vadd.f32 %v1608_v8, %v1607_v6  ;;  %v1812_v33 = vrot.slane %v1805_v9, %v5791_v22  ;;  %v1820_v36 = vsub.f32 %v5819_v49, %v1819_v55  ;;  %3727 = vpow2.f32 %v1846_v13 }
 0x6c9   : > { %v3712_v3 = vpop.eup %3711  ;;  %v5926_v31 = vadd.f32 %v1733_v37, %v1717_v19  ;;  %v1914_v40 = vadd.f32 %v5840_v61, %v5814_v44  ;;  %v2141_v43 = vmul.f32 1.442695, %v2140_v14  ;;  %v1786_v29 = vrot.slane %v1778_v16, %v5791_v22 }
 0x6ca   : > { %v5916_v12 = vpop.eup %3713  ;;  %v1886_v20 = vrot.slane %v3712_v3, %v5791_v22  ;;  %v1858_v34 = vmul.f32 %v3712_v3, %v5894_v46  ;;  %v1714_v50 = vrot.slane %v1707_v25, %v5791_v22  ;;  %3729 = vpow2.f32 %v1642_v21 }
 0x6cb   : > { %v1590_v30 = vmul.f32 %v5916_v12, %v1575_v42  ;;  %v5933_v41 = vpop.eup %3715  ;;  %v1955_v42 = vsub.f32 %v5847_v0, %v5853_v4  ;;  %v1823_v51 = vsub.f32 %v1818_v2, %v1819_v55  ;;  %v1915_v49 = vmax.f32 %v5835_v57, %v1914_v40 }
 0x6cc   : > { %v1887_v47 = vcombine.high %v1886_v20, %v1886_v20  ;;  %v3718_v48 = vpop.eup %3717  ;;  %v1813_v54 = vcombine.high %v1812_v33, %v1812_v33  ;;  %v2015_v59 = vadd.f32 %v5864_v11, %v5814_v44  ;;  %v1697_v0 = vmul.f32 %v3710_v62, %v5923_v27 }
 0x6cd   : > { %v5940_v53 = vpop.eup %3719  ;;  %v1797_v61 = vmul.f32 %v3718_v48, %v5926_v31  ;;  %v1956_v58 = vmul.f32 1.442695, %v1955_v42  ;;  %v1866_v63 = vrot.slane %v1858_v34, %v5791_v22  ;;  %v1821_v1 = vmul.f32 1.442695, %v1820_v36 }
 0x6ce   : > { %v5945_v60 = vpop.eup %3721  ;;  %v2049_v2 = vsub.f32 %v5861_v10, %v5869_v15  ;;  %3731 = vpow2.f32 %v2141_v43  ;;  %v1793_v3 = vrot.slane %v1786_v29, %v5791_v22  ;;  %v1894_v5 = vrot.slane %v1887_v47, %v5791_v22 }
 0x6cf   : > { %v2016_v6 = vmax.f32 %v5853_v4, %v2015_v59  ;;  %v5954_v8 = vadd.f32 %v1714_v50, %v1697_v0  ;;  %v1824_v37 = vmul.f32 1.442695, %v1823_v51  ;;  %v1916_v9 = vsub.f32 %v5835_v57, %v1915_v49 }
 0x6d0   : > { %v3724_v7 = vpop.eup %3723  ;;  %3733 = vpow2.f32 %v1956_v58  ;;  %v5959_v62 = vrot.slane %v5894_v46, %v5791_v22  ;;  %v5961_v10 = vadd.f32 %v1813_v54, %v1797_v61  ;;  %v1867_v14 = vcombine.high %v1866_v63, %v1866_v63 }
 0x6d1   : > { %3735 = vpow2.f32 %v1741_v23  ;;  %v2017_v55 = vsub.f32 %v5853_v4, %v2016_v6  ;;  %v3726_v13 = vpop.eup %3725  ;;  %v1591_v16 = vadd.f32 %v5933_v41, %v1590_v30  ;;  %v2050_v19 = vmul.f32 1.442695, %v2049_v2 }
 0x6d2   : > { %3737 = vpow2.f32 %v1821_v1  ;;  %v1794_v20 = vcombine.high %v1793_v3, %v1793_v3  ;;  %v1895_v21 = vcombine.high %v1894_v5, %v1894_v5  ;;  %v1919_v25 = vsub.f32 %v1914_v40, %v1915_v49  ;;  %v3728_v33 = vpop.eup %3727 }
 0x6d3   : > { %v1989_v57 = vcombine.high %v3724_v7, %v3724_v7  ;;  %v1777_v34 = vmul.f32 %v3718_v48, %v5954_v8  ;;  %3739 = vpow2.f32 %v1824_v37  ;;  %v1917_v36 = vmul.f32 1.442695, %v1916_v9 }
 0x6d4   : > { %v2020_v23 = vsub.f32 %v2015_v59, %v2016_v6  ;;  %v1878_v43 = vmul.f32 %v3728_v33, %v5961_v10  ;;  %v2018_v29 = vmul.f32 1.442695, %v2017_v55  ;;  %v2084_v4 = vcombine.high %v3726_v13, %v3726_v13  ;;  %v5969_v30 = vpop.eup %3729 }
 0x6d5   : > { %v2104_v47 = vadd.f32 %v5886_v35, %v5814_v44  ;;  %v1968_v42 = vmul.f32 %v3724_v7, %v5894_v46  ;;  %v1874_v40 = vrot.slane %v1867_v14, %v5791_v22  ;;  %3741 = vpow2.f32 %v2050_v19 }
 0x6d6   : > { %v2131_v48 = vsub.f32 %v5878_v28, %v5892_v45  ;;  %v1897_v50 = vadd.f32 %v1895_v21, %v1878_v43  ;;  %v1920_v51 = vmul.f32 1.442695, %v1919_v25  ;;  %v1996_v49 = vrot.slane %v1989_v57, %v5791_v22 }
 0x6d7   : > { %v2105_v61 = vmax.f32 %v5869_v15, %v2104_v47  ;;  %v1671_v54 = vmul.f32 %v5945_v60, %v5912_v56  ;;  %v5979_v35 = vadd.f32 %v1794_v20, %v1777_v34  ;;  %3743 = vpow2.f32 %v1917_v36 }
 0x6d8   : > { %v2021_v58 = vmul.f32 1.442695, %v2020_v23  ;;  %v3732_v59 = vpop.eup %3731  ;;  %3745 = vpow2.f32 %v2018_v29  ;;  %v2091_v0 = vrot.slane %v2084_v4, %v5791_v22  ;;  %v2132_v28 = vmul.f32 1.442695, %v2131_v48 }
 0x6d9   : > { %v2106_v63 = vsub.f32 %v5869_v15, %v2105_v61  ;;  %v2062_v2 = vmul.f32 %v3726_v13, %v5894_v46  ;;  %v1875_v3 = vcombine.high %v1874_v40, %v1874_v40  ;;  %v2109_v5 = vsub.f32 %v2104_v47, %v2105_v61 }
 0x6da   : > { %v3734_v1 = vpop.eup %3733  ;;  %v2184_v6 = vcombine.high %v5864_v11, %v5864_v11  ;;  %v1970_v7 = vcombine.high %v1968_v42, %v1968_v42  ;;  %3747 = vpow2.f32 %v1920_v51  ;;  %v2003_v9 = vrot.slane %v1996_v49, %v5791_v22 }
 0x6db   : > { %v5986_v56 = vpop.eup %3735  ;;  %v1987_v37 = vmul.f32 %v3734_v1, %v1897_v50  ;;  %v1857_v15 = vmul.f32 %v3728_v33, %v5979_v35  ;;  %3749 = vpow2.f32 %v2021_v58  ;;  %v2107_v14 = vmul.f32 1.442695, %v2106_v63 }
 0x6dc   : > { %v5989_v55 = vpop.eup %3737  ;;  %v2110_v19 = vmul.f32 1.442695, %v2109_v5  ;;  %v2092_v20 = vcombine.high %v2091_v0, %v2091_v0  ;;  %3751 = vpow2.f32 %v2132_v28  ;;  %v2166_v21 = vcombine.high %v3732_v59, %v3732_v59 }
 0x6dd   : > { %v2005_v13 = vadd.f32 %v2003_v9, %v1987_v37  ;;  %v5992_v11 = vpop.eup %3739  ;;  %v2064_v25 = vcombine.high %v2062_v2, %v2062_v2  ;;  %v5994_v57 = vadd.f32 %v1875_v3, %v1857_v15  ;;  %3753 = vpow2.f32 %v2107_v14 }
 0x6de   : > { %v2186_v34 = vadd.f32 %v2184_v6, %v5814_v44  ;;  %v1653_v36 = vcombine.high %v5959_v62, %v5959_v62  ;;  %3755 = vrcp.f32 %v1591_v16  ;;  %v1672_v33 = vadd.f32 %v5969_v30, %v1671_v54 }
 0x6df   : > { %v1751_v23 = vmul.f32 %v5986_v56, %v5926_v31  ;;  %v3742_v43 = vpop.eup %3741  ;;  %v1977_v29 = vrot.slane %v1970_v7, %v5791_v22  ;;  %v1831_v4 = vmul.f32 %v5989_v55, %v5961_v10  ;;  %3757 = vpow2.f32 %v2110_v19 }
 0x6e0   : > { %v2187_v47 = vmax.f32 %v5892_v45, %v2186_v34  ;;  %v2144_v44 = vmul.f32 %v3732_v59, %v5894_v46  ;;  %v2082_v42 = vmul.f32 %v3742_v43, %v2005_v13  ;;  %v2099_v40 = vrot.slane %v2092_v20, %v5791_v22 }
 0x6e1   : > { %v2173_v16 = vrot.slane %v2166_v21, %v5791_v22  ;;  %v6009_v48 = vpop.eup %3743  ;;  %v1967_v31 = vmul.f32 %v3734_v1, %v5994_v57  ;;  %v2071_v51 = vrot.slane %v2064_v25, %v5791_v22  ;;  %3759 = vrcp.f32 %v1672_v33 }
 0x6e2   : > { %v2188_v49 = vsub.f32 %v5892_v45, %v2187_v47  ;;  %v2191_v61 = vsub.f32 %v2186_v34, %v2187_v47  ;;  %v6014_v10 = vpop.eup %3745  ;;  %v1752_v54 = vadd.f32 %v5940_v53, %v1751_v23  ;;  %v1941_v58 = vmul.f32 %v6009_v48, %v1897_v50 }
 0x6e3   : > { %v6020_v59 = vadd.f32 %v5892_v45, %v5787_v17  ;;  %v1984_v0 = vrot.slane %v1977_v29, %v5791_v22  ;;  %v2035_v63 = vmul.f32 %v6014_v10, %v2005_v13  ;;  %v1832_v3 = vadd.f32 %v5992_v11, %v1831_v4 }
 0x6e4   : > { %v2189_v28 = vmul.f32 1.442695, %v2188_v49  ;;  %v2192_v1 = vmul.f32 1.442695, %v2191_v61  ;;  %v6024_v2 = vpop.eup %3747  ;;  %v2101_v5 = vadd.f32 %v2099_v40, %v2082_v42  ;;  %v2180_v7 = vrot.slane %v2173_v16, %v5791_v22 }
 0x6e5   : > { %v2212_v50 = vmax.f32 %v6020_v59, %v2184_v6  ;;  %v6029_v37 = vpop.eup %3749  ;;  %v2146_v17 = vcombine.high %v2144_v44, %v2144_v44  ;;  %v6031_v45 = vadd.f32 %v1984_v0, %v1967_v31  ;;  %v2072_v9 = vcombine.high %v2071_v51, %v2071_v51 }
 0x6e6   : > { %3761 = vpow2.f32 %v2189_v28  ;;  %v3752_v15 = vpop.eup %3751  ;;  %v1660_v14 = vrot.slane %v5959_v62, %v5791_v22  ;;  %v1923_v19 = vcombine.high %v5894_v46, %v5894_v46  ;;  %v1942_v13 = vadd.f32 %v6024_v2, %v1941_v58 }
 0x6e7   : > { %3763 = vrcp.f32 %v1752_v54  ;;  %2274 = vst.msk [vmem:[%s5723_s5 + $0x2] sm:$0x1] %vm2271_vm6, %v2212_v50  ;;  %v3754_v6 = vpop.eup %3753  ;;  %v1667_v20 = vrot.slane %v1653_v36, %v5791_v22  ;;  %v2036_v21 = vadd.f32 %v6029_v37, %v2035_v63  ;;  %v2220_v25 = vrot.slane %v2212_v50, %v5757_v38 }
 0x6e8   : > { %3765 = vpow2.f32 %v2192_v1  ;;  %v3756_v34 = vpop.eup %3755  ;;  %v2117_v33 = vmul.f32 %v3754_v6, %v2101_v5  ;;  %v2164_v62 = vmul.f32 %v3752_v15, %v2101_v5  ;;  %v2181_v23 = vcombine.high %v2180_v7, %v2180_v7 }
 0x6e9   : > { %3767 = vrcp.f32 %v1832_v3  ;;  %v3758_v29 = vpop.eup %3757  ;;  %v2061_v4 = vmul.f32 %v3742_v43, %v6031_v45  ;;  %v2079_v47 = vrot.slane %v2072_v9, %v5791_v22  ;;  %v2153_v44 = vrot.slane %v2146_v17, %v5791_v22 }
 0x6ea   : > { %v2222_v42 = vsub.f32 %v5794_v24, %v2220_v25  ;;  %v1587_v36 = vmul.f32 %v5916_v12, %v5899_v52  ;;  %v3209_v40 = vmul.f32 -1.442695, %v5808_v39  ;;  %3769 = vrcp.f32 %v1942_v13 }
 0x6eb   : > { %v2118_v16 = vadd.f32 %v3758_v29, %v2117_v33  ;;  %v1588_v31 = vmul.f32 %v5933_v41, %v5894_v46  ;;  %v1930_v51 = vrot.slane %v1923_v19, %v5791_v22  ;;  %3771 = vrcp.f32 %v2036_v21  ;;  %v3760_v49 = vpop.eup %3759 }
 0x6ec   : > { %v2223_v43 = vmul.f32 1.442695, %v2222_v42  ;;  %v1644_v61 = vmul.f32 %v5945_v60, %v5923_v27  ;;  %v1669_v24 = vmul.f32 %v5969_v30, %v1667_v20  ;;  %v6056_v54 = vadd.f32 %v2181_v23, %v2164_v62 }
 0x6ed   : > { %3773 = vrcp.f32 %v2118_v16  ;;  %v2081_v52 = vadd.f32 %v2079_v47, %v2061_v4  ;;  %v2160_v39 = vrot.slane %v2153_v44, %v5791_v22  ;;  %v2213_v12 = vsub.f32 %v6020_v59, %v2212_v50 }
 0x6ee   : > { %3775 = vpow2.f32 %v2223_v43  ;;  %v1747_v41 = vcombine.high %v1660_v14, %v1660_v14  ;;  %v1746_v58 = vmul.f32 %v5986_v56, %v5954_v8  ;;  %v1589_v63 = vadd.f32 %v1588_v31, %v1587_v36 }
 0x6ef   : > { %3777 = vpow2.f32 %v3209_v40  ;;  %v1827_v28 = vcombine.high %v1667_v20, %v1667_v20  ;;  %v2024_v27 = vcombine.high %v1930_v51, %v1930_v51  ;;  %v1670_v30 = vadd.f32 %v1669_v24, %v1644_v61 }
 0x6f0   : > { %v3762_v0 = vpop.eup %3761  ;;  %v1749_v1 = vmul.f32 %v5940_v53, %v1747_v41  ;;  %v1937_v3 = vrot.slane %v1930_v51, %v5791_v22  ;;  %v1826_v59 = vmul.f32 %v5989_v55, %v5979_v35  ;;  %v2143_v50 = vmul.f32 %v3752_v15, %v2081_v52 }
 0x6f1   : > { %v3764_v60 = vpop.eup %3763  ;;  %v2199_v5 = vmul.f32 %v3762_v0, %v6056_v54  ;;  %v2161_v17 = vcombine.high %v2160_v39, %v2160_v39  ;;  %v2214_v8 = vmul.f32 1.442695, %v2213_v12  ;;  %v1593_v9 = vmul.f32 %v3756_v34, %v1589_v63 }
 0x6f2   : > { %v3766_v7 = vpop.eup %3765  ;;  %v1750_v14 = vadd.f32 %v1749_v1, %v1746_v58  ;;  %v1922_v19 = vmul.f32 %v6009_v48, %v5994_v57  ;;  %v1674_v20 = vmul.f32 %v3760_v49, %v1670_v30  ;;  %v1829_v53 = vmul.f32 %v5992_v11, %v1827_v28 }
 0x6f3   : > { %v3768_v56 = vpop.eup %3767  ;;  %v2200_v13 = vadd.f32 %v3766_v7, %v2199_v5  ;;  %v2023_v21 = vmul.f32 %v6014_v10, %v6031_v45  ;;  %v2031_v25 = vrot.slane %v2024_v27, %v5791_v22  ;;  %v1939_v35 = vmul.f32 %v6024_v2, %v1937_v3 }
 0x6f4   : > { %v3770_v33 = vpop.eup %3769  ;;  %v2112_v55 = vmul.f32 %v3754_v6, %v2081_v52  ;;  %v2113_v15 = vcombine.high %v1937_v3, %v1937_v3  ;;  %v1830_v62 = vadd.f32 %v1829_v53, %v1826_v59  ;;  %v2163_v57 = vadd.f32 %v2161_v17, %v2143_v50 }
 0x6f5   : > { %3779 = vrcp.f32 %v2200_v13  ;;  %v3772_v34 = vpop.eup %3771  ;;  %v2033_v23 = vmul.f32 %v6029_v37, %v2031_v25  ;;  %v1754_v11 = vmul.f32 %v3764_v60, %v1750_v14  ;;  %v1940_v4 = vadd.f32 %v1939_v35, %v1922_v19 }
 0x6f6   : > { %3781 = vpow2.f32 %v2214_v8  ;;  %v2115_v10 = vmul.f32 %v3758_v29, %v2113_v15  ;;  %v1597_v47 = vrot.slane %v1593_v9, %v5757_v38  ;;  %v1834_v2 = vmul.f32 %v3768_v56, %v1830_v62 }
 0x6f7   : > { %v3774_v48 = vpop.eup %3773  ;;  %v2034_v6 = vadd.f32 %v2033_v23, %v2023_v21  ;;  %v1944_v44 = vmul.f32 %v3770_v33, %v1940_v4  ;;  %v1680_v16 = vrot.slane %v1674_v20, %v5757_v38  ;;  %v2194_v51 = vmul.f32 %v3762_v0, %v2163_v57 }
 0x6f8   : > { %v3776_v45 = vpop.eup %3775  ;;  %v2116_v42 = vadd.f32 %v2115_v10, %v2112_v55  ;;  %v2195_v43 = vcombine.high %v2031_v25, %v2031_v25  ;;  %v1760_v29 = vrot.slane %v1754_v11, %v5757_v38  ;;  %v1840_v52 = vrot.slane %v1834_v2, %v5757_v38 }
 0x6f9   : > { %v2226_v36 = vmul.f32 %v3776_v45, %v5894_v46  ;;  %v2249_v37 = vcombine.high %v3776_v45, %v3776_v45  ;;  %v3778_v40 = vpop.eup %3777  ;;  %v2038_v31 = vmul.f32 %v3772_v34, %v2034_v6  ;;  %v1598_v39 = vsel %vm1322_vm5, %v1597_v47, 0.0 }
 0x6fa   : > { %v2120_v49 = vmul.f32 %v3774_v48, %v2116_v42  ;;  %v2197_v46 = vmul.f32 %v3766_v7, %v2195_v43  ;;  %v1950_v12 = vrot.slane %v1944_v44, %v5757_v38  ;;  %v1682_v0 = vsel %vm1675_vm7, %v1680_v16, %v1598_v39  ;;  %v3683_v44 = vld [vmem:[#allocation38] sm:$0xff]   ;;  %v3684_v42 = vld [vmem:[#allocation38 + $0x8] sm:$0xff]  }
 0x6fb   : > { %v2228_v61 = vcombine.high %v2226_v36, %v2226_v36  ;;  %v2256_v24 = vrot.slane %v2249_v37, %v5791_v22  ;;  %v2044_v63 = vrot.slane %v2038_v31, %v5757_v38  ;;  %v1762_v60 = vsel %vm1755_vm8, %v1760_v29, %v1682_v0  ;;  %3300 = vmatpush3.bf16.msra.mxu0 %v3683_v44  ;;  %v3688_v36 = vld [vmem:[#allocation41 + $0x8] sm:$0xff]   ;;  %v3689_v37 = vld [vmem:[#allocation41 + $0x10] sm:$0xff]   ;;  %v3691_v16 = vld [vmem:[#allocation41 + $0x20] sm:$0xff]  }
 0x6fc   : > { %v2198_v28 = vadd.f32 %v2197_v46, %v2194_v51  ;;  %v2126_v30 = vrot.slane %v2120_v49, %v5757_v38  ;;  %v1842_v7 = vsel %vm1835_vm9, %v1840_v52, %v1762_v60  ;;  %v1566_v9 = vadd.f32 1.0, %v3778_v40  ;;  %3301 = vmatprep.subr.bf16.mxu0 %v4765_v26  ;;  %v3690_v40 = vld [vmem:[#allocation41 + $0x18] sm:$0xff]   ;;  %v3692_v31 = vld [vmem:[#allocation41 + $0x28] sm:$0xff]   ;;  %v3214_v46 = vld [vmem:[#allocation20] ss:$0 sm:$0xff] }
 0x6fd   : > { %v2235_v41 = vrot.slane %v2228_v61, %v5791_v22  ;;  %v2257_v58 = vcombine.high %v2256_v24, %v2256_v24  ;;  %v1952_v50 = vsel %vm1945_vm10, %v1950_v12, %v1842_v7  ;;  %v2379_v49 = vld [vmem:[#allocation35] sm:$0x1]  ;;  %v3213_v24 = vld [vmem:[#allocation19] ss:$0 sm:$0xff] }
 0x6fe   : > { %v2046_v14 = vsel %vm2039_vm11, %v2044_v63, %v1952_v50  ;;  %3783 = vrcp.f32 %v1566_v9  ;;  %v2388_v39 = vsub.f32 1.0, %v2379_v49  ;;  %v2385_v63 = vrot.slane %v2379_v49, %v5757_v38  ;;  %v3685_v50 = vld [vmem:[#allocation40] sm:$0xff]   ;;  %v3686_v9 = vld [vmem:[#allocation40 + $0x8] sm:$0xff]  }
 0x6ff   : > { %v3780_v27 = vpop.eup %3779  ;;  %v2236_v1 = vcombine.high %v2235_v41, %v2235_v41  ;;  %v2264_v3 = vrot.slane %v2257_v58, %v5791_v22  ;;  %v2128_v13 = vsel %vm2121_vm12, %v2126_v30, %v2046_v14  ;;  %3302 = vmatpush3.bf16.msra.mxu0 %v3684_v42  ;;  %v2380_v41 = vld [vmem:[#allocation37] sm:$0x1]  ;;  %v3215_v58 = vld [vmem:[%s5726_s4] ss:$0 sm:$0xff] }
 0x700   : > { %v3782_v5 = vpop.eup %3781  ;;  %v2202_v59 = vmul.f32 %v3780_v27, %v2198_v28  ;;  %3327 = vmatprep.subr.bf16.mxu0 %v4765_v26  ;;  %v2393_v28 = vrot.slane %v2388_v39, %v5757_v38  ;;  %v2404_v27 = vsub.f32 1.0, %v2380_v41 }
 0x701   : > { %v2243_v17 = vrot.slane %v2236_v1, %v5791_v22  ;;  %v2247_v8 = vmul.f32 %v3782_v5, %v6056_v54  ;;  %v2265_v56 = vcombine.high %v2264_v3, %v2264_v3  ;;  %v2225_v20 = vmul.f32 %v3782_v5, %v2163_v57 }
 0x702   : > { %v2208_v19 = vrot.slane %v2202_v59, %v5757_v38  ;;  %v2409_v5 = vrot.slane %v2404_v27, %v5757_v38  ;;  %v2401_v59 = vrot.slane %v2380_v41, %v5757_v38  ;;  %v3694_v38 = vld [vmem:[#allocation41 + $0x38] sm:$0xff]  }
 0x703   : > { %v2244_v53 = vcombine.high %v2243_v17, %v2243_v17  ;;  %v2267_v21 = vadd.f32 %v2265_v56, %v2247_v8 }
 0x704   : > { %v2210_v25 = vsel %vm2203_vm13, %v2208_v19, %v2128_v13  ;;  %v3693_v19 = vld [vmem:[#allocation41 + $0x30] sm:$0xff]  }
 0x705   : > { %v2268_v33 = vpack.c.bf16 %v2210_v25, %v2210_v25  ;;  %v2246_v35 = vadd.f32 %v2244_v53, %v2225_v20  ;;  %2273 = vst.msk [vmem:[%s5723_s5 + $0x1] sm:$0x1] %vm2271_vm6, %v2267_v21 }
 0x707   : > { %2270 = vst.msk [vmem:[#allocation4] sm:$0xf] %vm2269_vm14, %v2268_v33 }
 0x708   : > { %2272 = vst.msk [vmem:[%s5723_s5] sm:$0x1] %vm2271_vm6, %v2246_v35  ;;  %v3784_v55 = vpop.eup %3783 }
 0x70e   : > { %v2275_v22 = vld [vmem:[#allocation4] sm:$0xf] }
 0x70f   : > { %v2276_v54 = vunpack.c.l.bf16 %v2275_v22 }
 0x711   : > { %v2277_v15 = vmul.f32 %v3784_v55, %v2276_v54 }
 0x713   : > { %v2282_v34 = vpack.c.bf16 %v2277_v15, %v2277_v15 }
 0x715   : > { %3296 = vmatmul.mubr.msk.bf16.vlgmr.msra.gmra.mrb[0].mxu1 %vm1260_vm2, %v2282_v34 }
 0x716   : > { %3323 = vmatprep.mubr.msk.bf16.mxu1 %vm4766_vm3, %v4765_v26 }
 0x7e8   : > { %v2332_v62 = vpop.f32.mrb[0].mxu1 }
 0x7e9   : > { %v6116_v23 = vadd.f32 %v2332_v62, %v5740_v18  ;;  %v3297_v57 = vpop.f32.mrb[1].mxu1  ;;  %v3687_v18 = vld [vmem:[#allocation41] sm:$0xff]  }
 0x7ea   : > { %v2335_v48 = vpop.f32.mrb[2].mxu1  ;;  %3308 = vmatpush3.bf16.msra.mxu1 %v3687_v18 }
 0x7eb   : > { %v3298_v11 = vpop.f32.mrb[3].mxu1  ;;  %v2343_v4 = vsel %vm1260_vm2, %v6116_v23, 0.0  ;;  %3309 = vmatprep.subr.bf16.mxu1 %v4765_v26 }
 0x7ec   : > { %2344 = vadd.xlane.f32.xlu0 %v2343_v4 }
 0x7ee   : > { %3310 = vmatpush3.bf16.msra.mxu1 %v3688_v36 }
 0x7ef   : > { %3311 = vmatprep.subr.bf16.mxu1 %v4765_v26 }
 0x7f2   : > { %3312 = vmatpush3.bf16.msra.mxu1 %v3689_v37 }
 0x7f3   : > { %3313 = vmatprep.subr.bf16.mxu1 %v4765_v26 }
 0x7f6   : > { %3314 = vmatpush3.bf16.msra.mxu1 %v3690_v40 }
 0x7f7   : > { %3315 = vmatprep.subr.bf16.mxu1 %v4765_v26 }
 0x7fa   : > { %3316 = vmatpush3.bf16.msra.mxu1 %v3691_v16 }
 0x7fb   : > { %3317 = vmatprep.subr.bf16.mxu1 %v4765_v26 }
 0x7fe   : > { %3318 = vmatpush3.bf16.msra.mxu1 %v3692_v31 }
 0x7ff   : > { %3319 = vmatprep.subr.bf16.mxu1 %v4765_v26 }
 0x802   : > { %3320 = vmatpush3.bf16.msra.mxu1 %v3693_v19 }
 0x803   : > { %3321 = vmatprep.subr.bf16.mxu1 %v4765_v26 }
 0x806   : > { %3322 = vmatpush3.bf16.msra.mxu1 %v3694_v38 }
 0x879   : > { %v2345_v10 = vpop.xlane.xlu0 %2344 }
 0x87a   : > { %v2346_v45 = vmul.f32 0.03125, %v2345_v10 }
 0x87c   : > { %v2347_v47 = vsub.f32 %v6116_v23, %v2346_v45 }
 0x87e   : > { %v2348_v2 = vmul.f32 %v2347_v47, %v2347_v47 }
 0x880   : > { %v2349_v6 = vsel %vm1260_vm2, %v2348_v2, 0.0 }
 0x881   : > { %2350 = vadd.xlane.f32.xlu1 %v2349_v6 }
 0x90e   : > { %v2351_v51 = vpop.xlane.xlu1 %2350 }
 0x90f   : > { %v2352_v43 = vmul.f32 0.03125, %v2351_v51 }
 0x911   : > { %v2353_v29 = vadd.f32 1e-05, %v2352_v43 }
 0x913   : > { %3785 = vrsqrt.f32 %v2353_v29 }
 0x91d   : > { %v3786_v61 = vpop.eup %3785 }
 0x91e   : > { %v2355_v52 = vmul.f32 %v3786_v61, %v2347_v47 }
 0x920   : > { %v2362_v12 = vmul.f32 %v3213_v24, %v2355_v52 }
 0x922   : > { %v2369_v0 = vadd.f32 %v3214_v46, %v2362_v12 }
 0x924   : > { %v2371_v60 = vrot.slane %v2369_v0, 7  ;;  %2649 = vst.msk [vmem:[%s5726_s4 - $0x7] sm:$0x80] %vm2339_vm4, %v2369_v0  ;;  %v2387_v1 = vmul.f32 %v2385_v63, %v2369_v0  ;;  %v2403_v56 = vmul.f32 %v2401_v59, %v2369_v0 }
 0x926   : > { %v2378_v30 = vsel %vm1322_vm5, %v3215_v58, %v2371_v60 }
 0x927   : > { %v2395_v3 = vmul.f32 %v2393_v28, %v2378_v30  ;;  %v2411_v8 = vmul.f32 %v2409_v5, %v2378_v30 }
 0x929   : > { %v2396_v7 = vadd.f32 %v2395_v3, %v2387_v1  ;;  %v2412_v32 = vadd.f32 %v2411_v8, %v2403_v56 }
 0x92b   : > { %v2417_v17 = vpack.c.bf16 %v2396_v7, %v2396_v7  ;;  %v2584_v14 = vpack.c.bf16 %v2412_v32, %v2412_v32 }
 0x92d   : > { %3304 = vmatmul.mubr.msk.bf16.vlgmr.msra.gmra.mrb[12].mxu0 %vm1260_vm2, %v2417_v17 }
 0x92e   : > { %3328 = vmatpush3.bf16.msra.mxu0 %v3685_v50  ;;  %3331 = vmatprep.mubr.msk.bf16.mxu0 %vm4766_vm3, %v4765_v26 }
 0x92f   : > { %3329 = vmatprep.subr.bf16.mxu0 %v4765_v26 }
 0x932   : > { %3330 = vmatpush3.bf16.msra.mxu0 %v3686_v9 }
 0x935   : > { %3332 = vmatmul.mubr.msk.bf16.vlgmr.msra.gmra.mrb[16].mxu0 %vm1260_vm2, %v2584_v14 }
 0xa00   : > { %v2467_v13 = vpop.f32.mrb[12].mxu0 }
 0xa01   : > { %v2473_v20 = vmax.f32 %v2467_v13, 0.0  ;;  %v3305_v53 = vpop.f32.mrb[13].mxu0 }
 0xa02   : > { %v2470_v21 = vpop.f32.mrb[14].mxu0 }
 0xa03   : > { %v2474_v25 = vmul.f32 %v2473_v20, %v2473_v20  ;;  %v3306_v33 = vpop.f32.mrb[15].mxu0 }
 0xa05   : > { %v2491_v35 = vpack.c.bf16 %v2474_v25, %v2474_v25 }
 0xa07   : > { %3324 = vmatmul.mubr.bf16.vlgmr.msra.gmra.mrb[4].mxu1 %v2491_v35 }
 0xa08   : > { %v6145_v22 = vpop.f32.mrb[16].mxu0 }
 0xa09   : > { %v3333_v54 = vpop.f32.mrb[17].mxu0 }
 0xa0a   : > { %v2637_v55 = vpop.f32.mrb[18].mxu0 }
 0xa0b   : > { %v3334_v15 = vpop.f32.mrb[19].mxu0 }
 0xa0c   : > { %4484 = shalt.err (!%p4481_p8)
}
 0xa0d   : > { %s4485_s24 = scalar_lea.hbm %s6153_s18, 16  ;;  %s4489_s25 = scalar_lea.hbm %s6554_s19, 32 }
 0xa0e   : > { %p4486_p11 = scmp.ne.s32.totalorder %s6153_s18, %s4485_s24  ;;  %p4490_p1 = scmp.lt.u32.totalorder %s6153_s18, %s6554_s19 }
 0xa0f   : > { %p4491_p2 = scmp.lt.u32.totalorder %s4489_s25, %s4485_s24  ;;  %p4493_p6 = scmp.lt.u32.totalorder %s4485_s24, %s6153_s18 }
 0xa10   : > { %p4487_p10 = pnand %p4486_p11, %p6555_p12 }
 0xa11   : > { %p4492_p5 = por %p4491_p2, %p4490_p1 }
 0xa12   : > { %p4488_p4 = pneg %p4487_p10 }
 0xa13   : > { %p4494_p7 = por %p4493_p6, %p4492_p5 }
 0xa15   : > { %p4495_p13 = pnand %p4494_p7, %p4488_p4 }
 0xa17   : > { %4498 = shalt.err (!%p4495_p13)
}
 0xa18   : > { %3424 = dma.vmem_to_hbm [thread:$0]  (%p6555_p12), %s2693_s20, 16, %s6153_s18, %s6410_s7  }
 0xa19   : > { %s3236_s22 = sshll.u32 %s6552_s9, 6  ;;  %s6556_s21 = sld [smem:[#allocation108_spill]] }
 0xa1a   : > { %s2705_s24 = sshll.u32 %s5723_s5, 4  ;;  %s6557_s23 = sld [smem:[#allocation109_spill]]  ;;  %s2706_s24 = int_to_ptr.vmem [resolvable:$true] %s2705_s24 }
 0xa1b   : > { %s4499_s17 = scalar_lea.vmem %s2706_s24, 64  ;;  %s4769_s18 = smov [#allocation46]  }
 0xa1c   : > { %p4500_p3 = scmp.ne.s32.totalorder %s2706_s24, %s4499_s17  ;;  %s4503_s20 = sshll.u32 %s4769_s18, 4  ;;  %s4504_s20 = int_to_ptr.vmem [resolvable:$false] %s4503_s20 }
 0xa1d   : > { %s4505_s7 = scalar_lea.vmem %s4504_s20, 128  ;;  %p4506_p8 = scmp.lt.s32.totalorder %s2706_s24, %s4504_s20 }
 0xa1e   : > { %p4501_p9 = pnand %p4500_p3, %p6555_p12  ;;  %p4507_p11 = scmp.lt.s32.totalorder %s4505_s7, %s4499_s17 }
 0xa1f   : > { %s6180_s11 = scalar_lea.hbm %s6556_s21, %s3236_s22 }
 0xa20   : > { %s6188_s12 = scalar_lea.hbm %s6557_s23, %s3235_s0  ;;  %p4502_p0 = pneg %p4501_p9 }
 0xa21   : > { %p4508_p10 = por %p4507_p11, %p4506_p8 }
 0xa23   : > { %p4509_p4 = pnand %p4508_p10, %p4502_p0 }
 0xa25   : > { %4512 = shalt.err (!%p4509_p4)
}
 0xa26   : > { %s4513_s5 = scalar_lea.hbm %s6180_s11, 64  ;;  %s4517_s16 = scalar_lea.hbm %s6556_s21, 128 }
 0xa27   : > { %p4514_p1 = scmp.ne.s32.totalorder %s6180_s11, %s4513_s5  ;;  %p4518_p6 = scmp.lt.u32.totalorder %s6180_s11, %s6556_s21 }
 0xa28   : > { %p4519_p7 = scmp.lt.u32.totalorder %s4517_s16, %s4513_s5  ;;  %p4521_p3 = scmp.lt.u32.totalorder %s4513_s5, %s6180_s11 }
 0xa29   : > { %p4515_p2 = pnand %p4514_p1, %p6555_p12 }
 0xa2a   : > { %p4520_p13 = por %p4519_p7, %p4518_p6 }
 0xa2b   : > { %p4516_p5 = pneg %p4515_p2 }
 0xa2c   : > { %p4522_p9 = por %p4521_p3, %p4520_p13 }
 0xa2e   : > { %p4523_p0 = pnand %p4522_p9, %p4516_p5 }
 0xa30   : > { %4526 = shalt.err (!%p4523_p0)
}
 0xa31   : > { %s6558_s17 = scalar_lea.sflag [#allocation45], %s5648_s15  ;;  %s2718_s7 = sshll.u32 %s5726_s4, 4  ;;  %s2719_s7 = int_to_ptr.vmem [resolvable:$true] %s2718_s7 }
 0xa32   : > { %3425 = dma.vmem_to_hbm [thread:$0]  (%p6555_p12), %s2706_s24, 64, %s6180_s11, %s6558_s17  }
 0xa33   : > { %s2665_s14 = scalar_lea.sflag [#allocation48], %s5651_s26  ;;  %s4527_s18 = scalar_lea.vmem %s2719_s7, 16 }
 0xa34   : > { %p4528_p8 = scmp.ne.s32.totalorder %s2719_s7, %s4527_s18  ;;  %s4770_s20 = smov [#allocation47]  }
 0xa35   : > { %s4531_s5 = sshll.u32 %s4770_s20, 4  ;;  %s4532_s5 = int_to_ptr.vmem [resolvable:$false] %s4531_s5 }
 0xa36   : > { %p4529_p11 = pnand %p4528_p8, %p6555_p12  ;;  %s4533_s0 = scalar_lea.vmem %s4532_s5, 32 }
 0xa37   : > { %p4534_p4 = scmp.lt.s32.totalorder %s2719_s7, %s4532_s5  ;;  %p4535_p1 = scmp.lt.s32.totalorder %s4533_s0, %s4527_s18 }
 0xa38   : > { %p4530_p10 = pneg %p4529_p11 }
 0xa39   : > { %p4536_p2 = por %p4535_p1, %p4534_p4 }
 0xa3b   : > { %p4537_p5 = pnand %p4536_p2, %p4530_p10 }
 0xa3d   : > { %4540 = shalt.err (!%p4537_p5)
}
 0xa3e   : > { %s4541_s15 = scalar_lea.hbm %s6188_s12, 16  ;;  %s4545_s11 = scalar_lea.hbm %s6557_s23, 32 }
 0xa3f   : > { %p4542_p6 = scmp.ne.s32.totalorder %s6188_s12, %s4541_s15  ;;  %p4546_p3 = scmp.lt.u32.totalorder %s6188_s12, %s6557_s23 }
 0xa40   : > { %p4547_p9 = scmp.lt.u32.totalorder %s4545_s11, %s4541_s15  ;;  %p4549_p8 = scmp.lt.u32.totalorder %s4541_s15, %s6188_s12 }
 0xa41   : > { %p4543_p7 = pnand %p4542_p6, %p6555_p12 }
 0xa42   : > { %p4548_p0 = por %p4547_p9, %p4546_p3 }
 0xa43   : > { %p4544_p13 = pneg %p4543_p7 }
 0xa44   : > { %p4550_p11 = por %p4549_p8, %p4548_p0 }
 0xa46   : > { %p4551_p10 = pnand %p4550_p11, %p4544_p13 }
 0xa48   : > { %4554 = shalt.err (!%p4551_p10)
}
 0xa49   : > { %s6559_s16 = sld [smem:[#allocation71_spill]]  ;;  %v3230_v26 = vmul.f32 -1.442695, %v6145_v22  ;;  %s3233_s30 = sshll.u32 %s6552_s9, 1 }
 0xa4a   : > { %3426 = dma.vmem_to_hbm [thread:$0]  (%p6555_p12), %s2719_s7, 16, %s6188_s12, %s2665_s14  }
 0xa4b   : > { %3787 = vpow2.f32 %v3230_v26  ;;  %s6560_s17 = sld [smem:[#allocation80_spill]]  ;;  %s2679_s6 = sshll.u32 %s5716_s10, 4  ;;  %s6238_s6 = int_to_ptr.vmem [resolvable:$true] %s2679_s6 }
 0xa4c   : > { %s6561_s14 = sld [smem:[#allocation106_spill]]  ;;  %s2651_s9 = scalar_lea.sflag [#allocation7], %s5635_s13 }
 0xa4d   : > { %s4555_s5 = scalar_lea.vmem %s6238_s6, 128  ;;  %s4771_s0 = smov [#allocation43]  }
 0xa4e   : > { %p4556_p12 = scmp.ne.s32.totalorder %s6238_s6, %s4555_s5  ;;  %s4559_s15 = sshll.u32 %s4771_s0, 4  ;;  %s4560_s15 = int_to_ptr.vmem [resolvable:$false] %s4559_s15 }
 0xa4f   : > { %s2675_s25 = sadd.s32 %s6559_s16, %s3233_s30  ;;  %s4561_s26 = scalar_lea.vmem %s4560_s15, 256 }
 0xa50   : > { %s3234_s18 = sshll.u32 %s2675_s25, 7  ;;  %p4562_p5 = scmp.lt.s32.totalorder %s6238_s6, %s4560_s15 }
 0xa51   : > { %p6562_p4 = scmp.ne.s32.totalorder %s6560_s17, 0  ;;  %p4563_p6 = scmp.lt.s32.totalorder %s4561_s26, %s4555_s5 }
 0xa52   : > { %s6236_s20 = scalar_lea.hbm %s6561_s14, %s3234_s18 }
 0xa53   : > { %p4557_p1 = pnand %p4556_p12, %p6562_p4  ;;  %p4564_p7 = por %p4563_p6, %p4562_p5 }
 0xa55   : > { %v3788_v34 = vpop.eup %3787  ;;  %p4558_p2 = pneg %p4557_p1 }
 0xa56   : > { %v2643_v62 = vadd.f32 1.0, %v3788_v34 }
 0xa57   : > { %p4565_p13 = pnand %p4564_p7, %p4558_p2 }
 0xa58   : > { %3789 = vrcp.f32 %v2643_v62 }
 0xa62   : > { %v3790_v57 = vpop.eup %3789 }
 0xada   : > { %v2574_v48 = vpop.f32.mrb[4].mxu1 }
 0xadb   : > { %v2646_v11 = vmul.f32 %v3790_v57, %v2574_v48  ;;  %v3325_v4 = vpop.f32.mrb[5].mxu1 }
 0xadc   : > { %v2577_v10 = vpop.f32.mrb[6].mxu1 }
 0xadd   : > { %v2647_v45 = vadd.f32 %v2646_v11, %v6116_v23  ;;  %v3326_v47 = vpop.f32.mrb[7].mxu1 }
 0xadf   : > { %2648 = vst.msk [vmem:[%s5716_s10] sm:$0xff] %vm1260_vm2, %v2647_v45 }
 0xae0   : > { %4568 = shalt.err (!%p4565_p13)
}
 0xae1   : > { %s4569_s13 = scalar_lea.hbm %s6236_s20, 128  ;;  %s4573_s11 = scalar_lea.hbm %s6561_s14, 512 }
 0xae2   : > { %p4570_p3 = scmp.ne.s32.totalorder %s6236_s20, %s4569_s13  ;;  %p4574_p8 = scmp.lt.u32.totalorder %s6236_s20, %s6561_s14 }
 0xae3   : > { %p4575_p11 = scmp.lt.u32.totalorder %s4573_s11, %s4569_s13  ;;  %p4577_p12 = scmp.lt.u32.totalorder %s4569_s13, %s6236_s20 }
 0xae4   : > { %p4571_p9 = pnand %p4570_p3, %p6562_p4 }
 0xae5   : > { %p4576_p10 = por %p4575_p11, %p4574_p8 }
 0xae6   : > { %p4572_p0 = pneg %p4571_p9 }
 0xae7   : > { %p4578_p1 = por %p4577_p12, %p4576_p10 }
 0xae9   : > { %p4579_p2 = pnand %p4578_p1, %p4572_p0 }
 0xaeb   : > { %4582 = shalt.err (!%p4579_p2)
}
 0xaec   : > { %3423 = dma.vmem_to_hbm [thread:$0]  (%p6562_p4), %s6238_s6, 128, %s6236_s20, %s2651_s9  }
 0xaed PF: > { %s6563_s16 = sld [smem:[#allocation68_spill]]  ;;  %s6564_s30 = sld [smem:[#allocation81_spill]] }
 0xaee   : > { %p3559_p5 = scmp.ge.s32.totalorder %s4737_s1, 2 }
 0xaf3   : > { %s2730_s25 = sand.u32 1, %s6563_s16   ;;  %p6565_p6 = scmp.ne.s32.totalorder %s6564_s30, 0 }
 0xaf4   : > { %s2731_s18 = scalar_lea.sflag [#allocation7], %s2730_s25 }
 0xaf5   : > { %p3506_p7 = pnand %p3559_p5, %p6565_p6 }
 0xaf7   : > { %4684 = dma.done.wait (!%p3506_p7), %s2731_s18, 128  }
 0xaf8   : > { %4686 = vsyncadd (!%p3506_p7), %s2731_s18, 4294967168  ;;  %s6566_s12 = sadd.s32 4294967294, %s4737_s1   ;;  %s6567_s7 = sld [smem:[#allocation78_spill]] }
 0xaf9   : > { %s2739_s5 = sand.u32 1, %s6566_s12  }
 0xafa   : > { %s2740_s17 = scalar_lea.sflag [#allocation45], %s2739_s5 }
 0xafe   : > { %p6568_p13 = scmp.ne.s32.totalorder %s6567_s7, 0 }
 0xb00   : > { %p3509_p3 = pnand %p3559_p5, %p6568_p13 }
 0xb02   : > { %4688 = dma.done.wait (!%p3509_p3), %s2740_s17, 80  }
 0xb03   : > { %4690 = vsyncadd (!%p3509_p3), %s2740_s17, 4294967216  ;;  %s6569_s6 = sld [smem:[#allocation66_spill]] }
 0xb09   : > { %s2756_s20 = sand.u32 1, %s6569_s6  }
 0xb0a   : > { %s2757_s9 = scalar_lea.sflag [#allocation48], %s2756_s20 }
 0xb0b   : > { %4692 = dma.done.wait (!%p3509_p3), %s2757_s9, 16  }
 0xb0c   : > { %4694 = vsyncadd (!%p3509_p3), %s2757_s9, 4294967280  ;;  %s66_s1 = sadd.s32 1, %s4737_s1   ;;  %s6570_s7 = sld [smem:[#allocation67_spill]] }
 0xb0d   : > { %p63_p4 = scmp.ge.s32.totalorder %s66_s1, 6   ;;  %s6571_s30 = sld [smem:[#allocation69_spill]] }
 0xb0e   : > { %s6572_s9 = sld [smem:[#allocation70_spill]]  ;;  %s6573_s0 = sld [smem:[#allocation73_spill]] }
 0xb0f   : > { %s6574_s10 = sld [smem:[#allocation79_spill]]  ;;  %s6575_s15 = smov %s6587_s28 }
 0xb10   : > { %s6576_s4 = smov %s4705_s8  ;;  %s6577_s8 = smov %s5533_s3 }
 0xb11   : > { %s6578_s5 = smov %s6589_s2  ;;  %65 = sbr.rel (!%p63_p4) target bundleno = 56 (0x38), region = 331 }
 0xb14   : > { %s6579_s28 = smov %s6573_s0  ;;  %s6580_s0 = smov %s4733_s29 }
 0xb15   : > { %s6581_s29 = smov %s6575_s15 }
 0xb18   :  { %2761 = vsyncpa [#allocation6], 1 }
 0xb19   :  { %2763 = vsyncpa [#allocation6 + $0x1], 1 }
 0xb1a   :  { %2764 = vsyncpa [#allocation9], 1 }
 0xb1b   :  { %2766 = vsyncpa [#allocation9 + $0x1], 1 }
 0xb1c   :  { %2767 = vsyncpa [#allocation12], 1 }
 0xb1d   :  { %2769 = vsyncpa [#allocation12 + $0x1], 1 }
 0xb1e   :  { %2770 = vsyncpa [#allocation15], 1 }
 0xb1f   :  { %2771 = vsyncpa [#allocation18], 1 }
 0xb20   :  { %2772 = vsyncpa [#allocation21], 1 }
 0xb21   :  { %2773 = vsyncpa [#allocation24], 1 }
 0xb22   :  { %2774 = vsyncpa [#allocation27], 1 }
 0xb23   :  { %2775 = vsyncpa [#allocation30], 1 }
 0xb24   :  { %2776 = vsyncpa [#allocation33], 1 }
 0xb25   :  { %2777 = vsyncpa [#allocation36], 1 }
 0xb26   :  { %2778 = vsyncpa [#allocation39], 1 }
 0xb27   :  { %2779 = vsyncpa [#allocation42], 1 }
 0xb28   :  { %2780 = vsyncpa [#allocation7], 1 }
 0xb29   :  { %2782 = vsyncpa [#allocation7 + $0x1], 1 }
 0xb2a   :  { %2783 = vsyncpa [#allocation45], 1 }
 0xb2b   :  { %2785 = vsyncpa [#allocation45 + $0x1], 1 }
 0xb2c   :  { %2786 = vsyncpa [#allocation48], 1 }
 0xb2d   :  { %2788 = vsyncpa [#allocation48 + $0x1], 1 }

</bundles_post_ra>
